<compile_context>
chip_gen: v7x
topology: tpu7x:2x2x1
jax: 0.10.0
libtpu: 0.0.40
codegen_flags: <defaults>
</compile_context>

<pallas_src>
import jax
import jax.numpy as jnp
import numpy as np
from jax.experimental import pallas as pl
from jax.experimental.pallas import tpu as pltpu


def _ceil_to(x, m):
    return (x + m - 1) // m * m


def _vmem_limit_bytes():
    # 32 MiB on v7x (64 MiB physical), 64 MiB on v5e/v6e (128 MiB physical).
    try:
        cap = pltpu.get_tpu_info().vmem_capacity_bytes
        return int(min(64 << 20, max(32 << 20, cap // 2)))
    except Exception:
        return 32 << 20


_VMEM_LIMIT = _vmem_limit_bytes()


# ----------------------------------------------------------------------------
# Fused conv1+conv2+conv3 kernel (one image per grid step).
#
# Layouts (per image):
#   y_ref   : [128, 256] bf16   space-to-depth(8x8) input, row = a*11+b (a,b in
#                               [0,11), zero-padded to 128 rows), lane = rh*32+rw*4+c.
#   a1_scr  : [4, 112, 128]     conv1 output parity planes p=(r1h*2+r1w);
#                               row = a1*11+b1 (width-11 "wide" layout), lanes 0..31 valid.
#   a2_scr  : [104, 128]        conv2 output, row = h2*11+w2, lanes 0..63 valid.
#   o_ref   : [80, 128]         conv3 output, row = h3*11+w3, lanes 0..63 valid.
# Every tap of every conv is a contiguous row-slice + one MXU matmul accumulated
# in f32; bias+ReLU applied once per layer.
# ----------------------------------------------------------------------------
def _fused_conv_kernel(y_ref, w1_ref, b1_ref, w2_ref, b2_ref, w3_ref, b3_ref,
                       o_ref, a1_scr, a2_scr):
    f32 = jnp.float32

    # ---- conv1: 2x2-tap stride-1 conv on the 8x8 space-to-depth input, one
    # output-parity plane (r1h, r1w) at a time. ----
    for r1h in range(2):
        for r1w in range(2):
            acc = jnp.zeros((110, 128), f32)
            for q1h in range(2):
                if r1h == 0 and q1h == 1:      # all-zero packed tap
                    continue
                for q1w in range(2):
                    if r1w == 0 and q1w == 1:  # all-zero packed tap
                        continue
                    idx = ((r1h * 2 + r1w) * 2 + q1h) * 2 + q1w
                    off = q1h * 11 + q1w
                    acc = acc + jnp.dot(y_ref[off:off + 110, :], w1_ref[idx],
                                        preferred_element_type=f32)
            plane = r1h * 2 + r1w
            a1_scr[plane, 0:110, :] = jnp.maximum(
                acc + b1_ref[...], 0.0).astype(a1_scr.dtype)

    # ---- conv2: stride 2 folded into the parity planes -> 2x2 offsets per
    # plane, all contiguous row-slices. ----
    acc2 = jnp.zeros((97, 128), f32)
    for r2h in range(2):
        for r2w in range(2):
            plane = r2h * 2 + r2w
            for q2h in range(2):
                for q2w in range(2):
                    idx = (plane * 2 + q2h) * 2 + q2w
                    off = q2h * 11 + q2w
                    acc2 = acc2 + jnp.dot(a1_scr[plane, off:off + 97, :],
                                          w2_ref[idx],
                                          preferred_element_type=f32)
    a2_scr[0:97, :] = jnp.maximum(acc2 + b2_ref[...], 0.0).astype(a2_scr.dtype)

    # ---- conv3: 3x3 taps, stride 1. ----
    acc3 = jnp.zeros((80, 128), f32)
    for kh in range(3):
        for kw in range(3):
            off = kh * 11 + kw
            acc3 = acc3 + jnp.dot(a2_scr[off:off + 80, :], w3_ref[kh * 3 + kw],
                                  preferred_element_type=f32)
    o_ref[...] = jnp.maximum(acc3 + b3_ref[...], 0.0).astype(o_ref.dtype)


def fused_convs(y, packed, n_images):
    """y: [N*128, 256] bf16 (s2d input) -> conv3 output [N*80, 128] bf16."""
    return pl.pallas_call(
        _fused_conv_kernel,
        out_shape=jax.ShapeDtypeStruct((n_images * 80, 128), jnp.bfloat16),
        grid=(n_images,),
        in_specs=[
            pl.BlockSpec((128, 256), lambda i: (i, 0)),
            pl.BlockSpec((16, 256, 128), lambda i: (0, 0, 0)),
            pl.BlockSpec((1, 128), lambda i: (0, 0)),
            pl.BlockSpec((16, 128, 128), lambda i: (0, 0, 0)),
            pl.BlockSpec((1, 128), lambda i: (0, 0)),
            pl.BlockSpec((9, 128, 128), lambda i: (0, 0, 0)),
            pl.BlockSpec((1, 128), lambda i: (0, 0)),
        ],
        out_specs=pl.BlockSpec((80, 128), lambda i: (i, 0)),
        scratch_shapes=[
            pltpu.VMEM((4, 112, 128), jnp.bfloat16),   # conv1 parity planes
            pltpu.VMEM((104, 128), jnp.bfloat16),      # conv2 output
        ],
        compiler_params=pltpu.CompilerParams(
            dimension_semantics=("parallel",),
            vmem_limit_bytes=_VMEM_LIMIT),
    )(y, packed["W1"], packed["b1"], packed["W2"], packed["b2"],
      packed["W3"], packed["b3"])


# ----------------------------------------------------------------------------
# Fused fc4(+ReLU)+fc5 kernel: pipelined M grid, weights resident (constant
# index_map), hidden 512-vector never leaves VMEM.
# ----------------------------------------------------------------------------
def _fc_tail_kernel(x_ref, w4_ref, b4_ref, w5_ref, b5_ref, o_ref):
    h = jnp.dot(x_ref[...], w4_ref[...], preferred_element_type=jnp.float32)
    h = jnp.maximum(h + b4_ref[...], 0.0)
    q = jnp.dot(h.astype(jnp.bfloat16), w5_ref[...],
                preferred_element_type=jnp.float32)
    o_ref[...] = q + b5_ref[...]


def fc_tail(flat, w4, b4, w5, b5, *, n_actions):
    """flat: [M, 3136] bf16 -> q: [M, n_actions] f32."""
    M, K = flat.shape
    H = w4.shape[1]
    Np = w5.shape[1]                      # lane-padded action dim (128)
    block_m = min(512, _ceil_to(M, 16))   # 16-row aligned bf16 tiles
    Mp = _ceil_to(M, block_m)
    if Mp != M:
        flat = jnp.pad(flat, ((0, Mp - M), (0, 0)))

    q = pl.pallas_call(
        _fc_tail_kernel,
        out_shape=jax.ShapeDtypeStruct((Mp, Np), jnp.float32),
        grid=(Mp // block_m,),
        in_specs=[
            pl.BlockSpec((block_m, K), lambda i: (i, 0)),
            pl.BlockSpec((K, H), lambda i: (0, 0)),
            pl.BlockSpec((1, H), lambda i: (0, 0)),
            pl.BlockSpec((H, Np), lambda i: (0, 0)),
            pl.BlockSpec((1, Np), lambda i: (0, 0)),
        ],
        out_specs=pl.BlockSpec((block_m, Np), lambda i: (i, 0)),
        compiler_params=pltpu.CompilerParams(
            dimension_semantics=("parallel",),
            vmem_limit_bytes=_VMEM_LIMIT),
    )(flat, w4, b4, w5, b5)
    return q[:M, :n_actions]


# ----------------------------------------------------------------------------
# Parameters: PyTorch-layout init + one-time packing (outside jit).
# ----------------------------------------------------------------------------
def init_params(key):
    ks = jax.random.split(key, 10)
    scale = 0.05
    return {
        "conv1_w": scale * jax.random.normal(ks[0], (32, 4, 8, 8), jnp.float32),
        "conv1_b": scale * jax.random.normal(ks[1], (32,), jnp.float32),
        "conv2_w": scale * jax.random.normal(ks[2], (64, 32, 4, 4), jnp.float32),
        "conv2_b": scale * jax.random.normal(ks[3], (64,), jnp.float32),
        "conv3_w": scale * jax.random.normal(ks[4], (64, 64, 3, 3), jnp.float32),
        "conv3_b": scale * jax.random.normal(ks[5], (64,), jnp.float32),
        "fc4_w": scale * jax.random.normal(ks[6], (512, 3136), jnp.float32),  # [out, in]
        "fc4_b": scale * jax.random.normal(ks[7], (512,), jnp.float32),
        "fc5_w": scale * jax.random.normal(ks[8], (2, 512), jnp.float32),
        "fc5_b": scale * jax.random.normal(ks[9], (2,), jnp.float32),
    }


def pack_params(p):
    """One-time weight packing (numpy, outside jit; no per-forward transposes)."""
    f32 = np.float32
    w1 = np.asarray(p["conv1_w"], f32)   # [32, 4, 8, 8]
    w2 = np.asarray(p["conv2_w"], f32)   # [64, 32, 4, 4]
    w3 = np.asarray(p["conv3_w"], f32)   # [64, 64, 3, 3]

    # conv1: per output-parity (r1h, r1w) and input-block offset (q1h, q1w) a
    # [256, 128] tap matrix; rows indexed by the s2d channel (s1h*32+s1w*4+c).
    wt1 = np.transpose(w1, (2, 3, 1, 0))             # [kh, kw, cin, cout]
    W1 = np.zeros((2, 2, 2, 2, 256, 128), f32)
    for r1h in range(2):
        for r1w in range(2):
            for kh in range(8):
                q1h, s1h = divmod(4 * r1h + kh, 8)
                for kw in range(8):
                    q1w, s1w = divmod(4 * r1w + kw, 8)
                    row = s1h * 32 + s1w * 4
                    W1[r1h, r1w, q1h, q1w, row:row + 4, :32] = wt1[kh, kw]
    W1 = W1.reshape(16, 256, 128)

    # conv2: tap (kh, kw) = (2*q2h + r2h, 2*q2w + r2w) over conv1 parity planes.
    W2 = np.zeros((2, 2, 2, 2, 128, 128), f32)
    for r2h in range(2):
        for r2w in range(2):
            for q2h in range(2):
                for q2w in range(2):
                    W2[r2h, r2w, q2h, q2w, :32, :64] = \
                        w2[:, :, 2 * q2h + r2h, 2 * q2w + r2w].T
    W2 = W2.reshape(16, 128, 128)

    # conv3: plain 3x3 stride-1 taps.
    W3 = np.zeros((3, 3, 128, 128), f32)
    for kh in range(3):
        for kw in range(3):
            W3[kh, kw, :64, :64] = w3[:, :, kh, kw].T
    W3 = W3.reshape(9, 128, 128)

    def pad_bias(b, n=128):
        out = np.zeros((1, n), f32)
        out[0, :b.shape[0]] = np.asarray(b, f32)
        return out

    # fc4: PyTorch columns are NCHW-flatten (c, h, w); permute rows to the NHWC
    # flatten order (h, w, c) produced by the conv kernel, then transpose.
    fc4 = np.asarray(p["fc4_w"], f32).reshape(512, 64, 7, 7)
    fc4 = np.transpose(fc4, (2, 3, 1, 0)).reshape(3136, 512)

    # fc5: [2, 512] -> [512, 2] -> lane-pad to [512, 128].
    fc5 = np.asarray(p["fc5_w"], f32)
    n_act = fc5.shape[0]
    fc5p = np.zeros((512, 128), f32)
    fc5p[:, :n_act] = fc5.T

    bf = jnp.bfloat16
    return {
        "W1": jnp.asarray(W1, bf), "b1": jnp.asarray(pad_bias(p["conv1_b"])),
        "W2": jnp.asarray(W2, bf), "b2": jnp.asarray(pad_bias(p["conv2_b"])),
        "W3": jnp.asarray(W3, bf), "b3": jnp.asarray(pad_bias(p["conv3_b"])),
        "W4": jnp.asarray(fc4, bf),
        "b4": jnp.asarray(np.asarray(p["fc4_b"], f32).reshape(1, 512)),
        "W5": jnp.asarray(fc5p, bf),
        "b5": jnp.asarray(pad_bias(p["fc5_b"])),
        "n_actions": n_act,
    }


# ----------------------------------------------------------------------------
# Full network forward (input in PyTorch NCHW layout).
# ----------------------------------------------------------------------------
@jax.jit
def neural_network_forward(packed, x_nchw):
    N = x_nchw.shape[0]

    # Single cheap space-to-depth(8x8) of the raw input (XLA glue, ~30 KB/image):
    # Y[n, a*11+b, rh*32+rw*4+c] = x[n, 8a+rh, 8b+rw, c]  (zero padded 84->88, 121->128 rows).
    x = jnp.transpose(x_nchw, (0, 2, 3, 1)).astype(jnp.bfloat16)      # NHWC
    x = jnp.pad(x, ((0, 0), (0, 4), (0, 4), (0, 0)))                  # [N,88,88,4]
    x = x.reshape(N, 11, 8, 11, 8, 4).transpose(0, 1, 3, 2, 4, 5)     # [N,11,11,8,8,4]
    y = x.reshape(N, 121, 256)
    y = jnp.pad(y, ((0, 0), (0, 7), (0, 0))).reshape(N * 128, 256)    # [N*128,256]

    conv_out = fused_convs(y, packed, N)                              # [N*80, 128]

    # NHWC flatten of the valid 7x7x64 conv3 output (tiny glue, ~6 KB/image).
    flat = (conv_out.reshape(N, 80, 128)[:, :77, :]
            .reshape(N, 7, 11, 128)[:, :, :7, :64]
            .reshape(N, 3136))

    q = fc_tail(flat, packed["W4"], packed["b4"], packed["W5"], packed["b5"],
                n_actions=2)                                          # [N, 2] f32
    return q


# ----------------------------------------------------------------------------
# Pure-JAX fp32 reference (PyTorch semantics) for a sanity check.
# ----------------------------------------------------------------------------
def reference_forward(params, x):
    def conv(z, w, b, s):
        z = jax.lax.conv_general_dilated(
            z, w, window_strides=(s, s), padding="VALID",
            dimension_numbers=("NCHW", "OIHW", "NCHW"))
        return jax.nn.relu(z + b.reshape(1, -1, 1, 1))

    out = conv(x, params["conv1_w"], params["conv1_b"], 4)
    out = conv(out, params["conv2_w"], params["conv2_b"], 2)
    out = conv(out, params["conv3_w"], params["conv3_b"], 1)
    flat = out.reshape(out.shape[0], -1)
    h = jax.nn.relu(flat @ params["fc4_w"].T + params["fc4_b"])
    return h @ params["fc5_w"].T + params["fc5_b"]


if __name__ == "__main__":
    key = jax.random.PRNGKey(0)
    pkey, xkey = jax.random.split(key)
    params = init_params(pkey)
    packed = pack_params(params)

    # fc4's fixed 3136 (= 64*7*7) input dimension forces an 84x84 spatial input.
    x = jax.random.normal(xkey, (2, 4, 84, 84), jnp.float32)

    q_values = neural_network_forward(packed, x)
    jax.block_until_ready(q_values)

    assert q_values.shape == (2, 2), q_values.shape
    assert q_values.dtype == jnp.float32

    # Loose-tolerance check vs. fp32 reference (bf16 operands, f32 accumulation).
    q_ref = reference_forward(params, x)
    assert np.allclose(np.asarray(q_values), np.asarray(q_ref),
                       atol=0.12, rtol=0.12), (q_values, q_ref)

    print("KERNEL_OK")
</pallas_src>

<mosaic_0001>
module attributes {stable_mosaic.version = 11 : i64} {
  func.func @_fused_conv_kernel(%arg0: i32, %arg1: memref<128x256xbf16, #tpu.memory_space<vmem>>, %arg2: memref<16x256x128xbf16, #tpu.memory_space<vmem>>, %arg3: memref<1x128xf32, #tpu.memory_space<vmem>>, %arg4: memref<16x128x128xbf16, #tpu.memory_space<vmem>>, %arg5: memref<1x128xf32, #tpu.memory_space<vmem>>, %arg6: memref<9x128x128xbf16, #tpu.memory_space<vmem>>, %arg7: memref<1x128xf32, #tpu.memory_space<vmem>>, %arg8: memref<80x128xbf16, #tpu.memory_space<vmem>>, %arg9: memref<4x112x128xbf16, #tpu.memory_space<vmem>>, %arg10: memref<104x128xbf16, #tpu.memory_space<vmem>>) attributes {dimension_semantics = [#tpu.dimension_semantics<parallel>], iteration_bounds = array<i64: 2>, scalar_prefetch = 0 : i64, scratch_operands = 2 : i64, tpu.core_type = #tpu.core_type<tc>, window_params = [{transform_indices = @transform_0, window_bounds = array<i64: 128, 256>}, {pipeline_mode = #tpu.pipeline_mode<synchronous>, transform_indices = @transform_1, window_bounds = array<i64: 16, 256, 128>}, {pipeline_mode = #tpu.pipeline_mode<synchronous>, transform_indices = @transform_2, window_bounds = array<i64: 1, 128>}, {pipeline_mode = #tpu.pipeline_mode<synchronous>, transform_indices = @transform_3, window_bounds = array<i64: 16, 128, 128>}, {pipeline_mode = #tpu.pipeline_mode<synchronous>, transform_indices = @transform_4, window_bounds = array<i64: 1, 128>}, {pipeline_mode = #tpu.pipeline_mode<synchronous>, transform_indices = @transform_5, window_bounds = array<i64: 9, 128, 128>}, {pipeline_mode = #tpu.pipeline_mode<synchronous>, transform_indices = @transform_6, window_bounds = array<i64: 1, 128>}, {transform_indices = @transform_7, window_bounds = array<i64: 80, 128>}]} {
    %cst = arith.constant 0.000000e+00 : f32
    %0 = vector.broadcast %cst : f32 to vector<110x128xf32>
    %c0 = arith.constant 0 : index
    %c0_0 = arith.constant 0 : index
    %1 = vector.load %arg1[%c0, %c0_0] : memref<128x256xbf16, #tpu.memory_space<vmem>>, vector<110x256xbf16>
    %c0_1 = arith.constant 0 : index
    %c0_2 = arith.constant 0 : index
    %c0_3 = arith.constant 0 : index
    %2 = vector.load %arg2[%c0_1, %c0_2, %c0_3] : memref<16x256x128xbf16, #tpu.memory_space<vmem>>, vector<1x256x128xbf16>
    %3 = vector.shape_cast %2 : vector<1x256x128xbf16> to vector<256x128xbf16>
    %cst_4 = arith.constant dense<0.000000e+00> : vector<110x128xf32>
    %4 = tpu.matmul %1, %3, %cst_4 {dimension_numbers = #tpu.dot_dimension_numbers<[1], [0], [0], [1], [0, 0, 1, 1], [], []>} : vector<110x256xbf16>, vector<256x128xbf16>, vector<110x128xf32> -> vector<110x128xf32>
    %5 = arith.addf %0, %4 : vector<110x128xf32>
    %c0_5 = arith.constant 0 : index
    %c0_6 = arith.constant 0 : index
    %6 = vector.load %arg3[%c0_5, %c0_6] : memref<1x128xf32, #tpu.memory_space<vmem>>, vector<1x128xf32>
    %7 = vector.broadcast %6 : vector<1x128xf32> to vector<110x128xf32>
    %8 = arith.addf %5, %7 : vector<110x128xf32>
    %cst_7 = arith.constant 0.000000e+00 : f32
    %9 = vector.broadcast %cst_7 : f32 to vector<110x128xf32>
    %10 = arith.maximumf %8, %9 : vector<110x128xf32>
    %11 = arith.truncf %10 : vector<110x128xf32> to vector<110x128xbf16>
    %c0_8 = arith.constant 0 : index
    %c0_9 = arith.constant 0 : index
    %c0_10 = arith.constant 0 : index
    %12 = vector.load %arg9[%c0_8, %c0_9, %c0_10] : memref<4x112x128xbf16, #tpu.memory_space<vmem>>, vector<1x110x128xbf16>
    %13 = vector.shape_cast %12 : vector<1x110x128xbf16> to vector<110x128xbf16>
    %14 = vector.shape_cast %11 : vector<110x128xbf16> to vector<1x110x128xbf16>
    tpu.vector_store %arg9[%c0_8, %c0_9, %c0_10], %14 {strides = array<i32>} : memref<4x112x128xbf16, #tpu.memory_space<vmem>>, vector<1x110x128xbf16>,
    %cst_11 = arith.constant 0.000000e+00 : f32
    %15 = vector.broadcast %cst_11 : f32 to vector<110x128xf32>
    %c0_12 = arith.constant 0 : index
    %c0_13 = arith.constant 0 : index
    %16 = vector.load %arg1[%c0_12, %c0_13] : memref<128x256xbf16, #tpu.memory_space<vmem>>, vector<110x256xbf16>
    %c4 = arith.constant 4 : index
    %c0_14 = arith.constant 0 : index
    %c0_15 = arith.constant 0 : index
    %17 = vector.load %arg2[%c4, %c0_14, %c0_15] : memref<16x256x128xbf16, #tpu.memory_space<vmem>>, vector<1x256x128xbf16>
    %18 = vector.shape_cast %17 : vector<1x256x128xbf16> to vector<256x128xbf16>
    %cst_16 = arith.constant dense<0.000000e+00> : vector<110x128xf32>
    %19 = tpu.matmul %16, %18, %cst_16 {dimension_numbers = #tpu.dot_dimension_numbers<[1], [0], [0], [1], [0, 0, 1, 1], [], []>} : vector<110x256xbf16>, vector<256x128xbf16>, vector<110x128xf32> -> vector<110x128xf32>
    %20 = arith.addf %15, %19 : vector<110x128xf32>
    %c1 = arith.constant 1 : index
    %c0_17 = arith.constant 0 : index
    %21 = vector.load %arg1[%c1, %c0_17] : memref<128x256xbf16, #tpu.memory_space<vmem>>, vector<110x256xbf16>
    %c5 = arith.constant 5 : index
    %c0_18 = arith.constant 0 : index
    %c0_19 = arith.constant 0 : index
    %22 = vector.load %arg2[%c5, %c0_18, %c0_19] : memref<16x256x128xbf16, #tpu.memory_space<vmem>>, vector<1x256x128xbf16>
    %23 = vector.shape_cast %22 : vector<1x256x128xbf16> to vector<256x128xbf16>
    %cst_20 = arith.constant dense<0.000000e+00> : vector<110x128xf32>
    %24 = tpu.matmul %21, %23, %cst_20 {dimension_numbers = #tpu.dot_dimension_numbers<[1], [0], [0], [1], [0, 0, 1, 1], [], []>} : vector<110x256xbf16>, vector<256x128xbf16>, vector<110x128xf32> -> vector<110x128xf32>
    %25 = arith.addf %20, %24 : vector<110x128xf32>
    %c0_21 = arith.constant 0 : index
    %c0_22 = arith.constant 0 : index
    %26 = vector.load %arg3[%c0_21, %c0_22] : memref<1x128xf32, #tpu.memory_space<vmem>>, vector<1x128xf32>
    %27 = vector.broadcast %26 : vector<1x128xf32> to vector<110x128xf32>
    %28 = arith.addf %25, %27 : vector<110x128xf32>
    %cst_23 = arith.constant 0.000000e+00 : f32
    %29 = vector.broadcast %cst_23 : f32 to vector<110x128xf32>
    %30 = arith.maximumf %28, %29 : vector<110x128xf32>
    %31 = arith.truncf %30 : vector<110x128xf32> to vector<110x128xbf16>
    %c1_24 = arith.constant 1 : index
    %c0_25 = arith.constant 0 : index
    %c0_26 = arith.constant 0 : index
    %32 = vector.load %arg9[%c1_24, %c0_25, %c0_26] : memref<4x112x128xbf16, #tpu.memory_space<vmem>>, vector<1x110x128xbf16>
    %33 = vector.shape_cast %32 : vector<1x110x128xbf16> to vector<110x128xbf16>
    %34 = vector.shape_cast %31 : vector<110x128xbf16> to vector<1x110x128xbf16>
    tpu.vector_store %arg9[%c1_24, %c0_25, %c0_26], %34 {strides = array<i32>} : memref<4x112x128xbf16, #tpu.memory_space<vmem>>, vector<1x110x128xbf16>,
    %cst_27 = arith.constant 0.000000e+00 : f32
    %35 = vector.broadcast %cst_27 : f32 to vector<110x128xf32>
    %c0_28 = arith.constant 0 : index
    %c0_29 = arith.constant 0 : index
    %36 = vector.load %arg1[%c0_28, %c0_29] : memref<128x256xbf16, #tpu.memory_space<vmem>>, vector<110x256xbf16>
    %c8 = arith.constant 8 : index
    %c0_30 = arith.constant 0 : index
    %c0_31 = arith.constant 0 : index
    %37 = vector.load %arg2[%c8, %c0_30, %c0_31] : memref<16x256x128xbf16, #tpu.memory_space<vmem>>, vector<1x256x128xbf16>
    %38 = vector.shape_cast %37 : vector<1x256x128xbf16> to vector<256x128xbf16>
    %cst_32 = arith.constant dense<0.000000e+00> : vector<110x128xf32>
    %39 = tpu.matmul %36, %38, %cst_32 {dimension_numbers = #tpu.dot_dimension_numbers<[1], [0], [0], [1], [0, 0, 1, 1], [], []>} : vector<110x256xbf16>, vector<256x128xbf16>, vector<110x128xf32> -> vector<110x128xf32>
    %40 = arith.addf %35, %39 : vector<110x128xf32>
    %c11 = arith.constant 11 : index
    %c0_33 = arith.constant 0 : index
    %41 = vector.load %arg1[%c11, %c0_33] : memref<128x256xbf16, #tpu.memory_space<vmem>>, vector<110x256xbf16>
    %c10 = arith.constant 10 : index
    %c0_34 = arith.constant 0 : index
    %c0_35 = arith.constant 0 : index
    %42 = vector.load %arg2[%c10, %c0_34, %c0_35] : memref<16x256x128xbf16, #tpu.memory_space<vmem>>, vector<1x256x128xbf16>
    %43 = vector.shape_cast %42 : vector<1x256x128xbf16> to vector<256x128xbf16>
    %cst_36 = arith.constant dense<0.000000e+00> : vector<110x128xf32>
    %44 = tpu.matmul %41, %43, %cst_36 {dimension_numbers = #tpu.dot_dimension_numbers<[1], [0], [0], [1], [0, 0, 1, 1], [], []>} : vector<110x256xbf16>, vector<256x128xbf16>, vector<110x128xf32> -> vector<110x128xf32>
    %45 = arith.addf %40, %44 : vector<110x128xf32>
    %c0_37 = arith.constant 0 : index
    %c0_38 = arith.constant 0 : index
    %46 = vector.load %arg3[%c0_37, %c0_38] : memref<1x128xf32, #tpu.memory_space<vmem>>, vector<1x128xf32>
    %47 = vector.broadcast %46 : vector<1x128xf32> to vector<110x128xf32>
    %48 = arith.addf %45, %47 : vector<110x128xf32>
    %cst_39 = arith.constant 0.000000e+00 : f32
    %49 = vector.broadcast %cst_39 : f32 to vector<110x128xf32>
    %50 = arith.maximumf %48, %49 : vector<110x128xf32>
    %51 = arith.truncf %50 : vector<110x128xf32> to vector<110x128xbf16>
    %c2 = arith.constant 2 : index
    %c0_40 = arith.constant 0 : index
    %c0_41 = arith.constant 0 : index
    %52 = vector.load %arg9[%c2, %c0_40, %c0_41] : memref<4x112x128xbf16, #tpu.memory_space<vmem>>, vector<1x110x128xbf16>
    %53 = vector.shape_cast %52 : vector<1x110x128xbf16> to vector<110x128xbf16>
    %54 = vector.shape_cast %51 : vector<110x128xbf16> to vector<1x110x128xbf16>
    tpu.vector_store %arg9[%c2, %c0_40, %c0_41], %54 {strides = array<i32>} : memref<4x112x128xbf16, #tpu.memory_space<vmem>>, vector<1x110x128xbf16>,
    %cst_42 = arith.constant 0.000000e+00 : f32
    %55 = vector.broadcast %cst_42 : f32 to vector<110x128xf32>
    %c0_43 = arith.constant 0 : index
    %c0_44 = arith.constant 0 : index
    %56 = vector.load %arg1[%c0_43, %c0_44] : memref<128x256xbf16, #tpu.memory_space<vmem>>, vector<110x256xbf16>
    %c12 = arith.constant 12 : index
    %c0_45 = arith.constant 0 : index
    %c0_46 = arith.constant 0 : index
    %57 = vector.load %arg2[%c12, %c0_45, %c0_46] : memref<16x256x128xbf16, #tpu.memory_space<vmem>>, vector<1x256x128xbf16>
    %58 = vector.shape_cast %57 : vector<1x256x128xbf16> to vector<256x128xbf16>
    %cst_47 = arith.constant dense<0.000000e+00> : vector<110x128xf32>
    %59 = tpu.matmul %56, %58, %cst_47 {dimension_numbers = #tpu.dot_dimension_numbers<[1], [0], [0], [1], [0, 0, 1, 1], [], []>} : vector<110x256xbf16>, vector<256x128xbf16>, vector<110x128xf32> -> vector<110x128xf32>
    %60 = arith.addf %55, %59 : vector<110x128xf32>
    %c1_48 = arith.constant 1 : index
    %c0_49 = arith.constant 0 : index
    %61 = vector.load %arg1[%c1_48, %c0_49] : memref<128x256xbf16, #tpu.memory_space<vmem>>, vector<110x256xbf16>
    %c13 = arith.constant 13 : index
    %c0_50 = arith.constant 0 : index
    %c0_51 = arith.constant 0 : index
    %62 = vector.load %arg2[%c13, %c0_50, %c0_51] : memref<16x256x128xbf16, #tpu.memory_space<vmem>>, vector<1x256x128xbf16>
    %63 = vector.shape_cast %62 : vector<1x256x128xbf16> to vector<256x128xbf16>
    %cst_52 = arith.constant dense<0.000000e+00> : vector<110x128xf32>
    %64 = tpu.matmul %61, %63, %cst_52 {dimension_numbers = #tpu.dot_dimension_numbers<[1], [0], [0], [1], [0, 0, 1, 1], [], []>} : vector<110x256xbf16>, vector<256x128xbf16>, vector<110x128xf32> -> vector<110x128xf32>
    %65 = arith.addf %60, %64 : vector<110x128xf32>
    %c11_53 = arith.constant 11 : index
    %c0_54 = arith.constant 0 : index
    %66 = vector.load %arg1[%c11_53, %c0_54] : memref<128x256xbf16, #tpu.memory_space<vmem>>, vector<110x256xbf16>
    %c14 = arith.constant 14 : index
    %c0_55 = arith.constant 0 : index
    %c0_56 = arith.constant 0 : index
    %67 = vector.load %arg2[%c14, %c0_55, %c0_56] : memref<16x256x128xbf16, #tpu.memory_space<vmem>>, vector<1x256x128xbf16>
    %68 = vector.shape_cast %67 : vector<1x256x128xbf16> to vector<256x128xbf16>
    %cst_57 = arith.constant dense<0.000000e+00> : vector<110x128xf32>
    %69 = tpu.matmul %66, %68, %cst_57 {dimension_numbers = #tpu.dot_dimension_numbers<[1], [0], [0], [1], [0, 0, 1, 1], [], []>} : vector<110x256xbf16>, vector<256x128xbf16>, vector<110x128xf32> -> vector<110x128xf32>
    %70 = arith.addf %65, %69 : vector<110x128xf32>
    %c12_58 = arith.constant 12 : index
    %c0_59 = arith.constant 0 : index
    %71 = vector.load %arg1[%c12_58, %c0_59] : memref<128x256xbf16, #tpu.memory_space<vmem>>, vector<110x256xbf16>
    %c15 = arith.constant 15 : index
    %c0_60 = arith.constant 0 : index
    %c0_61 = arith.constant 0 : index
    %72 = vector.load %arg2[%c15, %c0_60, %c0_61] : memref<16x256x128xbf16, #tpu.memory_space<vmem>>, vector<1x256x128xbf16>
    %73 = vector.shape_cast %72 : vector<1x256x128xbf16> to vector<256x128xbf16>
    %cst_62 = arith.constant dense<0.000000e+00> : vector<110x128xf32>
    %74 = tpu.matmul %71, %73, %cst_62 {dimension_numbers = #tpu.dot_dimension_numbers<[1], [0], [0], [1], [0, 0, 1, 1], [], []>} : vector<110x256xbf16>, vector<256x128xbf16>, vector<110x128xf32> -> vector<110x128xf32>
    %75 = arith.addf %70, %74 : vector<110x128xf32>
    %c0_63 = arith.constant 0 : index
    %c0_64 = arith.constant 0 : index
    %76 = vector.load %arg3[%c0_63, %c0_64] : memref<1x128xf32, #tpu.memory_space<vmem>>, vector<1x128xf32>
    %77 = vector.broadcast %76 : vector<1x128xf32> to vector<110x128xf32>
    %78 = arith.addf %75, %77 : vector<110x128xf32>
    %cst_65 = arith.constant 0.000000e+00 : f32
    %79 = vector.broadcast %cst_65 : f32 to vector<110x128xf32>
    %80 = arith.maximumf %78, %79 : vector<110x128xf32>
    %81 = arith.truncf %80 : vector<110x128xf32> to vector<110x128xbf16>
    %c3 = arith.constant 3 : index
    %c0_66 = arith.constant 0 : index
    %c0_67 = arith.constant 0 : index
    %82 = vector.load %arg9[%c3, %c0_66, %c0_67] : memref<4x112x128xbf16, #tpu.memory_space<vmem>>, vector<1x110x128xbf16>
    %83 = vector.shape_cast %82 : vector<1x110x128xbf16> to vector<110x128xbf16>
    %84 = vector.shape_cast %81 : vector<110x128xbf16> to vector<1x110x128xbf16>
    tpu.vector_store %arg9[%c3, %c0_66, %c0_67], %84 {strides = array<i32>} : memref<4x112x128xbf16, #tpu.memory_space<vmem>>, vector<1x110x128xbf16>,
    %cst_68 = arith.constant 0.000000e+00 : f32
    %85 = vector.broadcast %cst_68 : f32 to vector<97x128xf32>
    %c0_69 = arith.constant 0 : index
    %c0_70 = arith.constant 0 : index
    %c0_71 = arith.constant 0 : index
    %86 = vector.load %arg9[%c0_69, %c0_70, %c0_71] : memref<4x112x128xbf16, #tpu.memory_space<vmem>>, vector<1x97x128xbf16>
    %87 = vector.shape_cast %86 : vector<1x97x128xbf16> to vector<97x128xbf16>
    %c0_72 = arith.constant 0 : index
    %c0_73 = arith.constant 0 : index
    %c0_74 = arith.constant 0 : index
    %88 = vector.load %arg4[%c0_72, %c0_73, %c0_74] : memref<16x128x128xbf16, #tpu.memory_space<vmem>>, vector<1x128x128xbf16>
    %89 = vector.shape_cast %88 : vector<1x128x128xbf16> to vector<128x128xbf16>
    %cst_75 = arith.constant dense<0.000000e+00> : vector<97x128xf32>
    %90 = tpu.matmul %87, %89, %cst_75 {dimension_numbers = #tpu.dot_dimension_numbers<[1], [0], [0], [1], [0, 0, 1, 1], [], []>} : vector<97x128xbf16>, vector<128x128xbf16>, vector<97x128xf32> -> vector<97x128xf32>
    %91 = arith.addf %85, %90 : vector<97x128xf32>
    %c0_76 = arith.constant 0 : index
    %c1_77 = arith.constant 1 : index
    %c0_78 = arith.constant 0 : index
    %92 = vector.load %arg9[%c0_76, %c1_77, %c0_78] : memref<4x112x128xbf16, #tpu.memory_space<vmem>>, vector<1x97x128xbf16>
    %93 = vector.shape_cast %92 : vector<1x97x128xbf16> to vector<97x128xbf16>
    %c1_79 = arith.constant 1 : index
    %c0_80 = arith.constant 0 : index
    %c0_81 = arith.constant 0 : index
    %94 = vector.load %arg4[%c1_79, %c0_80, %c0_81] : memref<16x128x128xbf16, #tpu.memory_space<vmem>>, vector<1x128x128xbf16>
    %95 = vector.shape_cast %94 : vector<1x128x128xbf16> to vector<128x128xbf16>
    %cst_82 = arith.constant dense<0.000000e+00> : vector<97x128xf32>
    %96 = tpu.matmul %93, %95, %cst_82 {dimension_numbers = #tpu.dot_dimension_numbers<[1], [0], [0], [1], [0, 0, 1, 1], [], []>} : vector<97x128xbf16>, vector<128x128xbf16>, vector<97x128xf32> -> vector<97x128xf32>
    %97 = arith.addf %91, %96 : vector<97x128xf32>
    %c0_83 = arith.constant 0 : index
    %c11_84 = arith.constant 11 : index
    %c0_85 = arith.constant 0 : index
    %98 = vector.load %arg9[%c0_83, %c11_84, %c0_85] : memref<4x112x128xbf16, #tpu.memory_space<vmem>>, vector<1x97x128xbf16>
    %99 = vector.shape_cast %98 : vector<1x97x128xbf16> to vector<97x128xbf16>
    %c2_86 = arith.constant 2 : index
    %c0_87 = arith.constant 0 : index
    %c0_88 = arith.constant 0 : index
    %100 = vector.load %arg4[%c2_86, %c0_87, %c0_88] : memref<16x128x128xbf16, #tpu.memory_space<vmem>>, vector<1x128x128xbf16>
    %101 = vector.shape_cast %100 : vector<1x128x128xbf16> to vector<128x128xbf16>
    %cst_89 = arith.constant dense<0.000000e+00> : vector<97x128xf32>
    %102 = tpu.matmul %99, %101, %cst_89 {dimension_numbers = #tpu.dot_dimension_numbers<[1], [0], [0], [1], [0, 0, 1, 1], [], []>} : vector<97x128xbf16>, vector<128x128xbf16>, vector<97x128xf32> -> vector<97x128xf32>
    %103 = arith.addf %97, %102 : vector<97x128xf32>
    %c0_90 = arith.constant 0 : index
    %c12_91 = arith.constant 12 : index
    %c0_92 = arith.constant 0 : index
    %104 = vector.load %arg9[%c0_90, %c12_91, %c0_92] : memref<4x112x128xbf16, #tpu.memory_space<vmem>>, vector<1x97x128xbf16>
    %105 = vector.shape_cast %104 : vector<1x97x128xbf16> to vector<97x128xbf16>
    %c3_93 = arith.constant 3 : index
    %c0_94 = arith.constant 0 : index
    %c0_95 = arith.constant 0 : index
    %106 = vector.load %arg4[%c3_93, %c0_94, %c0_95] : memref<16x128x128xbf16, #tpu.memory_space<vmem>>, vector<1x128x128xbf16>
    %107 = vector.shape_cast %106 : vector<1x128x128xbf16> to vector<128x128xbf16>
    %cst_96 = arith.constant dense<0.000000e+00> : vector<97x128xf32>
    %108 = tpu.matmul %105, %107, %cst_96 {dimension_numbers = #tpu.dot_dimension_numbers<[1], [0], [0], [1], [0, 0, 1, 1], [], []>} : vector<97x128xbf16>, vector<128x128xbf16>, vector<97x128xf32> -> vector<97x128xf32>
    %109 = arith.addf %103, %108 : vector<97x128xf32>
    %c1_97 = arith.constant 1 : index
    %c0_98 = arith.constant 0 : index
    %c0_99 = arith.constant 0 : index
    %110 = vector.load %arg9[%c1_97, %c0_98, %c0_99] : memref<4x112x128xbf16, #tpu.memory_space<vmem>>, vector<1x97x128xbf16>
    %111 = vector.shape_cast %110 : vector<1x97x128xbf16> to vector<97x128xbf16>
    %c4_100 = arith.constant 4 : index
    %c0_101 = arith.constant 0 : index
    %c0_102 = arith.constant 0 : index
    %112 = vector.load %arg4[%c4_100, %c0_101, %c0_102] : memref<16x128x128xbf16, #tpu.memory_space<vmem>>, vector<1x128x128xbf16>
    %113 = vector.shape_cast %112 : vector<1x128x128xbf16> to vector<128x128xbf16>
    %cst_103 = arith.constant dense<0.000000e+00> : vector<97x128xf32>
    %114 = tpu.matmul %111, %113, %cst_103 {dimension_numbers = #tpu.dot_dimension_numbers<[1], [0], [0], [1], [0, 0, 1, 1], [], []>} : vector<97x128xbf16>, vector<128x128xbf16>, vector<97x128xf32> -> vector<97x128xf32>
    %115 = arith.addf %109, %114 : vector<97x128xf32>
    %c1_104 = arith.constant 1 : index
    %c1_105 = arith.constant 1 : index
    %c0_106 = arith.constant 0 : index
    %116 = vector.load %arg9[%c1_104, %c1_105, %c0_106] : memref<4x112x128xbf16, #tpu.memory_space<vmem>>, vector<1x97x128xbf16>
    %117 = vector.shape_cast %116 : vector<1x97x128xbf16> to vector<97x128xbf16>
    %c5_107 = arith.constant 5 : index
    %c0_108 = arith.constant 0 : index
    %c0_109 = arith.constant 0 : index
    %118 = vector.load %arg4[%c5_107, %c0_108, %c0_109] : memref<16x128x128xbf16, #tpu.memory_space<vmem>>, vector<1x128x128xbf16>
    %119 = vector.shape_cast %118 : vector<1x128x128xbf16> to vector<128x128xbf16>
    %cst_110 = arith.constant dense<0.000000e+00> : vector<97x128xf32>
    %120 = tpu.matmul %117, %119, %cst_110 {dimension_numbers = #tpu.dot_dimension_numbers<[1], [0], [0], [1], [0, 0, 1, 1], [], []>} : vector<97x128xbf16>, vector<128x128xbf16>, vector<97x128xf32> -> vector<97x128xf32>
    %121 = arith.addf %115, %120 : vector<97x128xf32>
    %c1_111 = arith.constant 1 : index
    %c11_112 = arith.constant 11 : index
    %c0_113 = arith.constant 0 : index
    %122 = vector.load %arg9[%c1_111, %c11_112, %c0_113] : memref<4x112x128xbf16, #tpu.memory_space<vmem>>, vector<1x97x128xbf16>
    %123 = vector.shape_cast %122 : vector<1x97x128xbf16> to vector<97x128xbf16>
    %c6 = arith.constant 6 : index
    %c0_114 = arith.constant 0 : index
    %c0_115 = arith.constant 0 : index
    %124 = vector.load %arg4[%c6, %c0_114, %c0_115] : memref<16x128x128xbf16, #tpu.memory_space<vmem>>, vector<1x128x128xbf16>
    %125 = vector.shape_cast %124 : vector<1x128x128xbf16> to vector<128x128xbf16>
    %cst_116 = arith.constant dense<0.000000e+00> : vector<97x128xf32>
    %126 = tpu.matmul %123, %125, %cst_116 {dimension_numbers = #tpu.dot_dimension_numbers<[1], [0], [0], [1], [0, 0, 1, 1], [], []>} : vector<97x128xbf16>, vector<128x128xbf16>, vector<97x128xf32> -> vector<97x128xf32>
    %127 = arith.addf %121, %126 : vector<97x128xf32>
    %c1_117 = arith.constant 1 : index
    %c12_118 = arith.constant 12 : index
    %c0_119 = arith.constant 0 : index
    %128 = vector.load %arg9[%c1_117, %c12_118, %c0_119] : memref<4x112x128xbf16, #tpu.memory_space<vmem>>, vector<1x97x128xbf16>
    %129 = vector.shape_cast %128 : vector<1x97x128xbf16> to vector<97x128xbf16>
    %c7 = arith.constant 7 : index
    %c0_120 = arith.constant 0 : index
    %c0_121 = arith.constant 0 : index
    %130 = vector.load %arg4[%c7, %c0_120, %c0_121] : memref<16x128x128xbf16, #tpu.memory_space<vmem>>, vector<1x128x128xbf16>
    %131 = vector.shape_cast %130 : vector<1x128x128xbf16> to vector<128x128xbf16>
    %cst_122 = arith.constant dense<0.000000e+00> : vector<97x128xf32>
    %132 = tpu.matmul %129, %131, %cst_122 {dimension_numbers = #tpu.dot_dimension_numbers<[1], [0], [0], [1], [0, 0, 1, 1], [], []>} : vector<97x128xbf16>, vector<128x128xbf16>, vector<97x128xf32> -> vector<97x128xf32>
    %133 = arith.addf %127, %132 : vector<97x128xf32>
    %c2_123 = arith.constant 2 : index
    %c0_124 = arith.constant 0 : index
    %c0_125 = arith.constant 0 : index
    %134 = vector.load %arg9[%c2_123, %c0_124, %c0_125] : memref<4x112x128xbf16, #tpu.memory_space<vmem>>, vector<1x97x128xbf16>
    %135 = vector.shape_cast %134 : vector<1x97x128xbf16> to vector<97x128xbf16>
    %c8_126 = arith.constant 8 : index
    %c0_127 = arith.constant 0 : index
    %c0_128 = arith.constant 0 : index
    %136 = vector.load %arg4[%c8_126, %c0_127, %c0_128] : memref<16x128x128xbf16, #tpu.memory_space<vmem>>, vector<1x128x128xbf16>
    %137 = vector.shape_cast %136 : vector<1x128x128xbf16> to vector<128x128xbf16>
    %cst_129 = arith.constant dense<0.000000e+00> : vector<97x128xf32>
    %138 = tpu.matmul %135, %137, %cst_129 {dimension_numbers = #tpu.dot_dimension_numbers<[1], [0], [0], [1], [0, 0, 1, 1], [], []>} : vector<97x128xbf16>, vector<128x128xbf16>, vector<97x128xf32> -> vector<97x128xf32>
    %139 = arith.addf %133, %138 : vector<97x128xf32>
    %c2_130 = arith.constant 2 : index
    %c1_131 = arith.constant 1 : index
    %c0_132 = arith.constant 0 : index
    %140 = vector.load %arg9[%c2_130, %c1_131, %c0_132] : memref<4x112x128xbf16, #tpu.memory_space<vmem>>, vector<1x97x128xbf16>
    %141 = vector.shape_cast %140 : vector<1x97x128xbf16> to vector<97x128xbf16>
    %c9 = arith.constant 9 : index
    %c0_133 = arith.constant 0 : index
    %c0_134 = arith.constant 0 : index
    %142 = vector.load %arg4[%c9, %c0_133, %c0_134] : memref<16x128x128xbf16, #tpu.memory_space<vmem>>, vector<1x128x128xbf16>
    %143 = vector.shape_cast %142 : vector<1x128x128xbf16> to vector<128x128xbf16>
    %cst_135 = arith.constant dense<0.000000e+00> : vector<97x128xf32>
    %144 = tpu.matmul %141, %143, %cst_135 {dimension_numbers = #tpu.dot_dimension_numbers<[1], [0], [0], [1], [0, 0, 1, 1], [], []>} : vector<97x128xbf16>, vector<128x128xbf16>, vector<97x128xf32> -> vector<97x128xf32>
    %145 = arith.addf %139, %144 : vector<97x128xf32>
    %c2_136 = arith.constant 2 : index
    %c11_137 = arith.constant 11 : index
    %c0_138 = arith.constant 0 : index
    %146 = vector.load %arg9[%c2_136, %c11_137, %c0_138] : memref<4x112x128xbf16, #tpu.memory_space<vmem>>, vector<1x97x128xbf16>
    %147 = vector.shape_cast %146 : vector<1x97x128xbf16> to vector<97x128xbf16>
    %c10_139 = arith.constant 10 : index
    %c0_140 = arith.constant 0 : index
    %c0_141 = arith.constant 0 : index
    %148 = vector.load %arg4[%c10_139, %c0_140, %c0_141] : memref<16x128x128xbf16, #tpu.memory_space<vmem>>, vector<1x128x128xbf16>
    %149 = vector.shape_cast %148 : vector<1x128x128xbf16> to vector<128x128xbf16>
    %cst_142 = arith.constant dense<0.000000e+00> : vector<97x128xf32>
    %150 = tpu.matmul %147, %149, %cst_142 {dimension_numbers = #tpu.dot_dimension_numbers<[1], [0], [0], [1], [0, 0, 1, 1], [], []>} : vector<97x128xbf16>, vector<128x128xbf16>, vector<97x128xf32> -> vector<97x128xf32>
    %151 = arith.addf %145, %150 : vector<97x128xf32>
    %c2_143 = arith.constant 2 : index
    %c12_144 = arith.constant 12 : index
    %c0_145 = arith.constant 0 : index
    %152 = vector.load %arg9[%c2_143, %c12_144, %c0_145] : memref<4x112x128xbf16, #tpu.memory_space<vmem>>, vector<1x97x128xbf16>
    %153 = vector.shape_cast %152 : vector<1x97x128xbf16> to vector<97x128xbf16>
    %c11_146 = arith.constant 11 : index
    %c0_147 = arith.constant 0 : index
    %c0_148 = arith.constant 0 : index
    %154 = vector.load %arg4[%c11_146, %c0_147, %c0_148] : memref<16x128x128xbf16, #tpu.memory_space<vmem>>, vector<1x128x128xbf16>
    %155 = vector.shape_cast %154 : vector<1x128x128xbf16> to vector<128x128xbf16>
    %cst_149 = arith.constant dense<0.000000e+00> : vector<97x128xf32>
    %156 = tpu.matmul %153, %155, %cst_149 {dimension_numbers = #tpu.dot_dimension_numbers<[1], [0], [0], [1], [0, 0, 1, 1], [], []>} : vector<97x128xbf16>, vector<128x128xbf16>, vector<97x128xf32> -> vector<97x128xf32>
    %157 = arith.addf %151, %156 : vector<97x128xf32>
    %c3_150 = arith.constant 3 : index
    %c0_151 = arith.constant 0 : index
    %c0_152 = arith.constant 0 : index
    %158 = vector.load %arg9[%c3_150, %c0_151, %c0_152] : memref<4x112x128xbf16, #tpu.memory_space<vmem>>, vector<1x97x128xbf16>
    %159 = vector.shape_cast %158 : vector<1x97x128xbf16> to vector<97x128xbf16>
    %c12_153 = arith.constant 12 : index
    %c0_154 = arith.constant 0 : index
    %c0_155 = arith.constant 0 : index
    %160 = vector.load %arg4[%c12_153, %c0_154, %c0_155] : memref<16x128x128xbf16, #tpu.memory_space<vmem>>, vector<1x128x128xbf16>
    %161 = vector.shape_cast %160 : vector<1x128x128xbf16> to vector<128x128xbf16>
    %cst_156 = arith.constant dense<0.000000e+00> : vector<97x128xf32>
    %162 = tpu.matmul %159, %161, %cst_156 {dimension_numbers = #tpu.dot_dimension_numbers<[1], [0], [0], [1], [0, 0, 1, 1], [], []>} : vector<97x128xbf16>, vector<128x128xbf16>, vector<97x128xf32> -> vector<97x128xf32>
    %163 = arith.addf %157, %162 : vector<97x128xf32>
    %c3_157 = arith.constant 3 : index
    %c1_158 = arith.constant 1 : index
    %c0_159 = arith.constant 0 : index
    %164 = vector.load %arg9[%c3_157, %c1_158, %c0_159] : memref<4x112x128xbf16, #tpu.memory_space<vmem>>, vector<1x97x128xbf16>
    %165 = vector.shape_cast %164 : vector<1x97x128xbf16> to vector<97x128xbf16>
    %c13_160 = arith.constant 13 : index
    %c0_161 = arith.constant 0 : index
    %c0_162 = arith.constant 0 : index
    %166 = vector.load %arg4[%c13_160, %c0_161, %c0_162] : memref<16x128x128xbf16, #tpu.memory_space<vmem>>, vector<1x128x128xbf16>
    %167 = vector.shape_cast %166 : vector<1x128x128xbf16> to vector<128x128xbf16>
    %cst_163 = arith.constant dense<0.000000e+00> : vector<97x128xf32>
    %168 = tpu.matmul %165, %167, %cst_163 {dimension_numbers = #tpu.dot_dimension_numbers<[1], [0], [0], [1], [0, 0, 1, 1], [], []>} : vector<97x128xbf16>, vector<128x128xbf16>, vector<97x128xf32> -> vector<97x128xf32>
    %169 = arith.addf %163, %168 : vector<97x128xf32>
    %c3_164 = arith.constant 3 : index
    %c11_165 = arith.constant 11 : index
    %c0_166 = arith.constant 0 : index
    %170 = vector.load %arg9[%c3_164, %c11_165, %c0_166] : memref<4x112x128xbf16, #tpu.memory_space<vmem>>, vector<1x97x128xbf16>
    %171 = vector.shape_cast %170 : vector<1x97x128xbf16> to vector<97x128xbf16>
    %c14_167 = arith.constant 14 : index
    %c0_168 = arith.constant 0 : index
    %c0_169 = arith.constant 0 : index
    %172 = vector.load %arg4[%c14_167, %c0_168, %c0_169] : memref<16x128x128xbf16, #tpu.memory_space<vmem>>, vector<1x128x128xbf16>
    %173 = vector.shape_cast %172 : vector<1x128x128xbf16> to vector<128x128xbf16>
    %cst_170 = arith.constant dense<0.000000e+00> : vector<97x128xf32>
    %174 = tpu.matmul %171, %173, %cst_170 {dimension_numbers = #tpu.dot_dimension_numbers<[1], [0], [0], [1], [0, 0, 1, 1], [], []>} : vector<97x128xbf16>, vector<128x128xbf16>, vector<97x128xf32> -> vector<97x128xf32>
    %175 = arith.addf %169, %174 : vector<97x128xf32>
    %c3_171 = arith.constant 3 : index
    %c12_172 = arith.constant 12 : index
    %c0_173 = arith.constant 0 : index
    %176 = vector.load %arg9[%c3_171, %c12_172, %c0_173] : memref<4x112x128xbf16, #tpu.memory_space<vmem>>, vector<1x97x128xbf16>
    %177 = vector.shape_cast %176 : vector<1x97x128xbf16> to vector<97x128xbf16>
    %c15_174 = arith.constant 15 : index
    %c0_175 = arith.constant 0 : index
    %c0_176 = arith.constant 0 : index
    %178 = vector.load %arg4[%c15_174, %c0_175, %c0_176] : memref<16x128x128xbf16, #tpu.memory_space<vmem>>, vector<1x128x128xbf16>
    %179 = vector.shape_cast %178 : vector<1x128x128xbf16> to vector<128x128xbf16>
    %cst_177 = arith.constant dense<0.000000e+00> : vector<97x128xf32>
    %180 = tpu.matmul %177, %179, %cst_177 {dimension_numbers = #tpu.dot_dimension_numbers<[1], [0], [0], [1], [0, 0, 1, 1], [], []>} : vector<97x128xbf16>, vector<128x128xbf16>, vector<97x128xf32> -> vector<97x128xf32>
    %181 = arith.addf %175, %180 : vector<97x128xf32>
    %c0_178 = arith.constant 0 : index
    %c0_179 = arith.constant 0 : index
    %182 = vector.load %arg5[%c0_178, %c0_179] : memref<1x128xf32, #tpu.memory_space<vmem>>, vector<1x128xf32>
    %183 = vector.broadcast %182 : vector<1x128xf32> to vector<97x128xf32>
    %184 = arith.addf %181, %183 : vector<97x128xf32>
    %cst_180 = arith.constant 0.000000e+00 : f32
    %185 = vector.broadcast %cst_180 : f32 to vector<97x128xf32>
    %186 = arith.maximumf %184, %185 : vector<97x128xf32>
    %187 = arith.truncf %186 : vector<97x128xf32> to vector<97x128xbf16>
    %c0_181 = arith.constant 0 : index
    %c0_182 = arith.constant 0 : index
    %188 = vector.load %arg10[%c0_181, %c0_182] : memref<104x128xbf16, #tpu.memory_space<vmem>>, vector<97x128xbf16>
    tpu.vector_store %arg10[%c0_181, %c0_182], %187 {strides = array<i32>} : memref<104x128xbf16, #tpu.memory_space<vmem>>, vector<97x128xbf16>,
    %cst_183 = arith.constant 0.000000e+00 : f32
    %189 = vector.broadcast %cst_183 : f32 to vector<80x128xf32>
    %c0_184 = arith.constant 0 : index
    %c0_185 = arith.constant 0 : index
    %190 = vector.load %arg10[%c0_184, %c0_185] : memref<104x128xbf16, #tpu.memory_space<vmem>>, vector<80x128xbf16>
    %c0_186 = arith.constant 0 : index
    %c0_187 = arith.constant 0 : index
    %c0_188 = arith.constant 0 : index
    %191 = vector.load %arg6[%c0_186, %c0_187, %c0_188] : memref<9x128x128xbf16, #tpu.memory_space<vmem>>, vector<1x128x128xbf16>
    %192 = vector.shape_cast %191 : vector<1x128x128xbf16> to vector<128x128xbf16>
    %cst_189 = arith.constant dense<0.000000e+00> : vector<80x128xf32>
    %193 = tpu.matmul %190, %192, %cst_189 {dimension_numbers = #tpu.dot_dimension_numbers<[1], [0], [0], [1], [0, 0, 1, 1], [], []>} : vector<80x128xbf16>, vector<128x128xbf16>, vector<80x128xf32> -> vector<80x128xf32>
    %194 = arith.addf %189, %193 : vector<80x128xf32>
    %c1_190 = arith.constant 1 : index
    %c0_191 = arith.constant 0 : index
    %195 = vector.load %arg10[%c1_190, %c0_191] : memref<104x128xbf16, #tpu.memory_space<vmem>>, vector<80x128xbf16>
    %c1_192 = arith.constant 1 : index
    %c0_193 = arith.constant 0 : index
    %c0_194 = arith.constant 0 : index
    %196 = vector.load %arg6[%c1_192, %c0_193, %c0_194] : memref<9x128x128xbf16, #tpu.memory_space<vmem>>, vector<1x128x128xbf16>
    %197 = vector.shape_cast %196 : vector<1x128x128xbf16> to vector<128x128xbf16>
    %cst_195 = arith.constant dense<0.000000e+00> : vector<80x128xf32>
    %198 = tpu.matmul %195, %197, %cst_195 {dimension_numbers = #tpu.dot_dimension_numbers<[1], [0], [0], [1], [0, 0, 1, 1], [], []>} : vector<80x128xbf16>, vector<128x128xbf16>, vector<80x128xf32> -> vector<80x128xf32>
    %199 = arith.addf %194, %198 : vector<80x128xf32>
    %c2_196 = arith.constant 2 : index
    %c0_197 = arith.constant 0 : index
    %200 = vector.load %arg10[%c2_196, %c0_197] : memref<104x128xbf16, #tpu.memory_space<vmem>>, vector<80x128xbf16>
    %c2_198 = arith.constant 2 : index
    %c0_199 = arith.constant 0 : index
    %c0_200 = arith.constant 0 : index
    %201 = vector.load %arg6[%c2_198, %c0_199, %c0_200] : memref<9x128x128xbf16, #tpu.memory_space<vmem>>, vector<1x128x128xbf16>
    %202 = vector.shape_cast %201 : vector<1x128x128xbf16> to vector<128x128xbf16>
    %cst_201 = arith.constant dense<0.000000e+00> : vector<80x128xf32>
    %203 = tpu.matmul %200, %202, %cst_201 {dimension_numbers = #tpu.dot_dimension_numbers<[1], [0], [0], [1], [0, 0, 1, 1], [], []>} : vector<80x128xbf16>, vector<128x128xbf16>, vector<80x128xf32> -> vector<80x128xf32>
    %204 = arith.addf %199, %203 : vector<80x128xf32>
    %c11_202 = arith.constant 11 : index
    %c0_203 = arith.constant 0 : index
    %205 = vector.load %arg10[%c11_202, %c0_203] : memref<104x128xbf16, #tpu.memory_space<vmem>>, vector<80x128xbf16>
    %c3_204 = arith.constant 3 : index
    %c0_205 = arith.constant 0 : index
    %c0_206 = arith.constant 0 : index
    %206 = vector.load %arg6[%c3_204, %c0_205, %c0_206] : memref<9x128x128xbf16, #tpu.memory_space<vmem>>, vector<1x128x128xbf16>
    %207 = vector.shape_cast %206 : vector<1x128x128xbf16> to vector<128x128xbf16>
    %cst_207 = arith.constant dense<0.000000e+00> : vector<80x128xf32>
    %208 = tpu.matmul %205, %207, %cst_207 {dimension_numbers = #tpu.dot_dimension_numbers<[1], [0], [0], [1], [0, 0, 1, 1], [], []>} : vector<80x128xbf16>, vector<128x128xbf16>, vector<80x128xf32> -> vector<80x128xf32>
    %209 = arith.addf %204, %208 : vector<80x128xf32>
    %c12_208 = arith.constant 12 : index
    %c0_209 = arith.constant 0 : index
    %210 = vector.load %arg10[%c12_208, %c0_209] : memref<104x128xbf16, #tpu.memory_space<vmem>>, vector<80x128xbf16>
    %c4_210 = arith.constant 4 : index
    %c0_211 = arith.constant 0 : index
    %c0_212 = arith.constant 0 : index
    %211 = vector.load %arg6[%c4_210, %c0_211, %c0_212] : memref<9x128x128xbf16, #tpu.memory_space<vmem>>, vector<1x128x128xbf16>
    %212 = vector.shape_cast %211 : vector<1x128x128xbf16> to vector<128x128xbf16>
    %cst_213 = arith.constant dense<0.000000e+00> : vector<80x128xf32>
    %213 = tpu.matmul %210, %212, %cst_213 {dimension_numbers = #tpu.dot_dimension_numbers<[1], [0], [0], [1], [0, 0, 1, 1], [], []>} : vector<80x128xbf16>, vector<128x128xbf16>, vector<80x128xf32> -> vector<80x128xf32>
    %214 = arith.addf %209, %213 : vector<80x128xf32>
    %c13_214 = arith.constant 13 : index
    %c0_215 = arith.constant 0 : index
    %215 = vector.load %arg10[%c13_214, %c0_215] : memref<104x128xbf16, #tpu.memory_space<vmem>>, vector<80x128xbf16>
    %c5_216 = arith.constant 5 : index
    %c0_217 = arith.constant 0 : index
    %c0_218 = arith.constant 0 : index
    %216 = vector.load %arg6[%c5_216, %c0_217, %c0_218] : memref<9x128x128xbf16, #tpu.memory_space<vmem>>, vector<1x128x128xbf16>
    %217 = vector.shape_cast %216 : vector<1x128x128xbf16> to vector<128x128xbf16>
    %cst_219 = arith.constant dense<0.000000e+00> : vector<80x128xf32>
    %218 = tpu.matmul %215, %217, %cst_219 {dimension_numbers = #tpu.dot_dimension_numbers<[1], [0], [0], [1], [0, 0, 1, 1], [], []>} : vector<80x128xbf16>, vector<128x128xbf16>, vector<80x128xf32> -> vector<80x128xf32>
    %219 = arith.addf %214, %218 : vector<80x128xf32>
    %c22 = arith.constant 22 : index
    %c0_220 = arith.constant 0 : index
    %220 = vector.load %arg10[%c22, %c0_220] : memref<104x128xbf16, #tpu.memory_space<vmem>>, vector<80x128xbf16>
    %c6_221 = arith.constant 6 : index
    %c0_222 = arith.constant 0 : index
    %c0_223 = arith.constant 0 : index
    %221 = vector.load %arg6[%c6_221, %c0_222, %c0_223] : memref<9x128x128xbf16, #tpu.memory_space<vmem>>, vector<1x128x128xbf16>
    %222 = vector.shape_cast %221 : vector<1x128x128xbf16> to vector<128x128xbf16>
    %cst_224 = arith.constant dense<0.000000e+00> : vector<80x128xf32>
    %223 = tpu.matmul %220, %222, %cst_224 {dimension_numbers = #tpu.dot_dimension_numbers<[1], [0], [0], [1], [0, 0, 1, 1], [], []>} : vector<80x128xbf16>, vector<128x128xbf16>, vector<80x128xf32> -> vector<80x128xf32>
    %224 = arith.addf %219, %223 : vector<80x128xf32>
    %c23 = arith.constant 23 : index
    %c0_225 = arith.constant 0 : index
    %225 = vector.load %arg10[%c23, %c0_225] : memref<104x128xbf16, #tpu.memory_space<vmem>>, vector<80x128xbf16>
    %c7_226 = arith.constant 7 : index
    %c0_227 = arith.constant 0 : index
    %c0_228 = arith.constant 0 : index
    %226 = vector.load %arg6[%c7_226, %c0_227, %c0_228] : memref<9x128x128xbf16, #tpu.memory_space<vmem>>, vector<1x128x128xbf16>
    %227 = vector.shape_cast %226 : vector<1x128x128xbf16> to vector<128x128xbf16>
    %cst_229 = arith.constant dense<0.000000e+00> : vector<80x128xf32>
    %228 = tpu.matmul %225, %227, %cst_229 {dimension_numbers = #tpu.dot_dimension_numbers<[1], [0], [0], [1], [0, 0, 1, 1], [], []>} : vector<80x128xbf16>, vector<128x128xbf16>, vector<80x128xf32> -> vector<80x128xf32>
    %229 = arith.addf %224, %228 : vector<80x128xf32>
    %c24 = arith.constant 24 : index
    %c0_230 = arith.constant 0 : index
    %230 = vector.load %arg10[%c24, %c0_230] : memref<104x128xbf16, #tpu.memory_space<vmem>>, vector<80x128xbf16>
    %c8_231 = arith.constant 8 : index
    %c0_232 = arith.constant 0 : index
    %c0_233 = arith.constant 0 : index
    %231 = vector.load %arg6[%c8_231, %c0_232, %c0_233] : memref<9x128x128xbf16, #tpu.memory_space<vmem>>, vector<1x128x128xbf16>
    %232 = vector.shape_cast %231 : vector<1x128x128xbf16> to vector<128x128xbf16>
    %cst_234 = arith.constant dense<0.000000e+00> : vector<80x128xf32>
    %233 = tpu.matmul %230, %232, %cst_234 {dimension_numbers = #tpu.dot_dimension_numbers<[1], [0], [0], [1], [0, 0, 1, 1], [], []>} : vector<80x128xbf16>, vector<128x128xbf16>, vector<80x128xf32> -> vector<80x128xf32>
    %234 = arith.addf %229, %233 : vector<80x128xf32>
    %c0_235 = arith.constant 0 : index
    %c0_236 = arith.constant 0 : index
    %235 = vector.load %arg7[%c0_235, %c0_236] : memref<1x128xf32, #tpu.memory_space<vmem>>, vector<1x128xf32>
    %236 = vector.broadcast %235 : vector<1x128xf32> to vector<80x128xf32>
    %237 = arith.addf %234, %236 : vector<80x128xf32>
    %cst_237 = arith.constant 0.000000e+00 : f32
    %238 = vector.broadcast %cst_237 : f32 to vector<80x128xf32>
    %239 = arith.maximumf %237, %238 : vector<80x128xf32>
    %240 = arith.truncf %239 : vector<80x128xf32> to vector<80x128xbf16>
    %c0_238 = arith.constant 0 : index
    %c0_239 = arith.constant 0 : index
    %241 = vector.load %arg8[%c0_238, %c0_239] : memref<80x128xbf16, #tpu.memory_space<vmem>>, vector<80x128xbf16>
    tpu.vector_store %arg8[%c0_238, %c0_239], %240 {strides = array<i32>} : memref<80x128xbf16, #tpu.memory_space<vmem>>, vector<80x128xbf16>,
    return
  }
  func.func @transform_0(%arg0: i32) -> (i32, i32) {
    %c0_i32 = arith.constant 0 : i32
    %c0_i32_0 = arith.constant 0 : i32
    return %arg0, %c0_i32 : i32, i32
  }
  func.func @transform_1(%arg0: i32) -> (i32, i32, i32) {
    %c0_i32 = arith.constant 0 : i32
    %c0_i32_0 = arith.constant 0 : i32
    %c0_i32_1 = arith.constant 0 : i32
    %c0_i32_2 = arith.constant 0 : i32
    return %c0_i32, %c0_i32_0, %c0_i32_1 : i32, i32, i32
  }
  func.func @transform_2(%arg0: i32) -> (i32, i32) {
    %c0_i32 = arith.constant 0 : i32
    %c0_i32_0 = arith.constant 0 : i32
    %c0_i32_1 = arith.constant 0 : i32
    return %c0_i32, %c0_i32_0 : i32, i32
  }
  func.func @transform_3(%arg0: i32) -> (i32, i32, i32) {
    %c0_i32 = arith.constant 0 : i32
    %c0_i32_0 = arith.constant 0 : i32
    %c0_i32_1 = arith.constant 0 : i32
    %c0_i32_2 = arith.constant 0 : i32
    return %c0_i32, %c0_i32_0, %c0_i32_1 : i32, i32, i32
  }
  func.func @transform_4(%arg0: i32) -> (i32, i32) {
    %c0_i32 = arith.constant 0 : i32
    %c0_i32_0 = arith.constant 0 : i32
    %c0_i32_1 = arith.constant 0 : i32
    return %c0_i32, %c0_i32_0 : i32, i32
  }
  func.func @transform_5(%arg0: i32) -> (i32, i32, i32) {
    %c0_i32 = arith.constant 0 : i32
    %c0_i32_0 = arith.constant 0 : i32
    %c0_i32_1 = arith.constant 0 : i32
    %c0_i32_2 = arith.constant 0 : i32
    return %c0_i32, %c0_i32_0, %c0_i32_1 : i32, i32, i32
  }
  func.func @transform_6(%arg0: i32) -> (i32, i32) {
    %c0_i32 = arith.constant 0 : i32
    %c0_i32_0 = arith.constant 0 : i32
    %c0_i32_1 = arith.constant 0 : i32
    return %c0_i32, %c0_i32_0 : i32, i32
  }
  func.func @transform_7(%arg0: i32) -> (i32, i32) {
    %c0_i32 = arith.constant 0 : i32
    %c0_i32_0 = arith.constant 0 : i32
    return %arg0, %c0_i32 : i32, i32
  }
}

module attributes {stable_mosaic.version = 11 : i64} {
  func.func @_fc_tail_kernel(%arg0: i32, %arg1: memref<16x3136xbf16, #tpu.memory_space<vmem>>, %arg2: memref<3136x512xbf16, #tpu.memory_space<vmem>>, %arg3: memref<1x512xf32, #tpu.memory_space<vmem>>, %arg4: memref<512x128xbf16, #tpu.memory_space<vmem>>, %arg5: memref<1x128xf32, #tpu.memory_space<vmem>>, %arg6: memref<16x128xf32, #tpu.memory_space<vmem>>) attributes {dimension_semantics = [#tpu.dimension_semantics<parallel>], iteration_bounds = array<i64: 1>, scalar_prefetch = 0 : i64, scratch_operands = 0 : i64, tpu.core_type = #tpu.core_type<tc>, window_params = [{transform_indices = @transform_0, window_bounds = array<i64: 16, 3136>}, {pipeline_mode = #tpu.pipeline_mode<synchronous>, transform_indices = @transform_1, window_bounds = array<i64: 3136, 512>}, {pipeline_mode = #tpu.pipeline_mode<synchronous>, transform_indices = @transform_2, window_bounds = array<i64: 1, 512>}, {pipeline_mode = #tpu.pipeline_mode<synchronous>, transform_indices = @transform_3, window_bounds = array<i64: 512, 128>}, {pipeline_mode = #tpu.pipeline_mode<synchronous>, transform_indices = @transform_4, window_bounds = array<i64: 1, 128>}, {transform_indices = @transform_5, window_bounds = array<i64: 16, 128>}]} {
    %c0 = arith.constant 0 : index
    %c0_0 = arith.constant 0 : index
    %0 = vector.load %arg1[%c0, %c0_0] : memref<16x3136xbf16, #tpu.memory_space<vmem>>, vector<16x3136xbf16>
    %c0_1 = arith.constant 0 : index
    %c0_2 = arith.constant 0 : index
    %1 = vector.load %arg2[%c0_1, %c0_2] : memref<3136x512xbf16, #tpu.memory_space<vmem>>, vector<3136x512xbf16>
    %cst = arith.constant dense<0.000000e+00> : vector<16x512xf32>
    %2 = tpu.matmul %0, %1, %cst {dimension_numbers = #tpu.dot_dimension_numbers<[1], [0], [0], [1], [0, 0, 1, 1], [], []>} : vector<16x3136xbf16>, vector<3136x512xbf16>, vector<16x512xf32> -> vector<16x512xf32>
    %c0_3 = arith.constant 0 : index
    %c0_4 = arith.constant 0 : index
    %3 = vector.load %arg3[%c0_3, %c0_4] : memref<1x512xf32, #tpu.memory_space<vmem>>, vector<1x512xf32>
    %4 = vector.broadcast %3 : vector<1x512xf32> to vector<16x512xf32>
    %5 = arith.addf %2, %4 : vector<16x512xf32>
    %cst_5 = arith.constant 0.000000e+00 : f32
    %6 = vector.broadcast %cst_5 : f32 to vector<16x512xf32>
    %7 = arith.maximumf %5, %6 : vector<16x512xf32>
    %8 = arith.truncf %7 : vector<16x512xf32> to vector<16x512xbf16>
    %c0_6 = arith.constant 0 : index
    %c0_7 = arith.constant 0 : index
    %9 = vector.load %arg4[%c0_6, %c0_7] : memref<512x128xbf16, #tpu.memory_space<vmem>>, vector<512x128xbf16>
    %cst_8 = arith.constant dense<0.000000e+00> : vector<16x128xf32>
    %10 = tpu.matmul %8, %9, %cst_8 {dimension_numbers = #tpu.dot_dimension_numbers<[1], [0], [0], [1], [0, 0, 1, 1], [], []>} : vector<16x512xbf16>, vector<512x128xbf16>, vector<16x128xf32> -> vector<16x128xf32>
    %c0_9 = arith.constant 0 : index
    %c0_10 = arith.constant 0 : index
    %11 = vector.load %arg5[%c0_9, %c0_10] : memref<1x128xf32, #tpu.memory_space<vmem>>, vector<1x128xf32>
    %12 = vector.broadcast %11 : vector<1x128xf32> to vector<16x128xf32>
    %13 = arith.addf %10, %12 : vector<16x128xf32>
    %c0_11 = arith.constant 0 : index
    %c0_12 = arith.constant 0 : index
    %14 = vector.load %arg6[%c0_11, %c0_12] : memref<16x128xf32, #tpu.memory_space<vmem>>, vector<16x128xf32>
    tpu.vector_store %arg6[%c0_11, %c0_12], %13 {strides = array<i32>} : memref<16x128xf32, #tpu.memory_space<vmem>>, vector<16x128xf32>,
    return
  }
  func.func @transform_0(%arg0: i32) -> (i32, i32) {
    %c0_i32 = arith.constant 0 : i32
    %c0_i32_0 = arith.constant 0 : i32
    return %arg0, %c0_i32 : i32, i32
  }
  func.func @transform_1(%arg0: i32) -> (i32, i32) {
    %c0_i32 = arith.constant 0 : i32
    %c0_i32_0 = arith.constant 0 : i32
    %c0_i32_1 = arith.constant 0 : i32
    return %c0_i32, %c0_i32_0 : i32, i32
  }
  func.func @transform_2(%arg0: i32) -> (i32, i32) {
    %c0_i32 = arith.constant 0 : i32
    %c0_i32_0 = arith.constant 0 : i32
    %c0_i32_1 = arith.constant 0 : i32
    return %c0_i32, %c0_i32_0 : i32, i32
  }
  func.func @transform_3(%arg0: i32) -> (i32, i32) {
    %c0_i32 = arith.constant 0 : i32
    %c0_i32_0 = arith.constant 0 : i32
    %c0_i32_1 = arith.constant 0 : i32
    return %c0_i32, %c0_i32_0 : i32, i32
  }
  func.func @transform_4(%arg0: i32) -> (i32, i32) {
    %c0_i32 = arith.constant 0 : i32
    %c0_i32_0 = arith.constant 0 : i32
    %c0_i32_1 = arith.constant 0 : i32
    return %c0_i32, %c0_i32_0 : i32, i32
  }
  func.func @transform_5(%arg0: i32) -> (i32, i32) {
    %c0_i32 = arith.constant 0 : i32
    %c0_i32_0 = arith.constant 0 : i32
    return %arg0, %c0_i32 : i32, i32
  }
}

</mosaic_0001>

<bundles_post_ra>
// kernel: neural_network_forward.2
= control target key start
LH: loop header
LB: loop body
LE: loop exit
PB: predicated region body
PF: predicated region fallthrough
CT: control target
= control target key end

     0   :  { %s12362_s24 = smov 0   ;;  %s15882_s0 = inlined_call_operand.vmem [shape: bf16[256,256], index: 0, kind: input, shape index: {}]   ;;  %s15883_s1 = inlined_call_operand.vmem [shape: bf16[16,256,128], index: 1, kind: input, shape index: {}]   ;;  %s15884_s2 = inlined_call_operand.vmem [shape: f32[1,128], index: 2, kind: input, shape index: {}]   ;;  %s15885_s3 = inlined_call_operand.vmem [shape: bf16[16,128,128], index: 3, kind: input, shape index: {}]   ;;  %s15886_s4 = inlined_call_operand.vmem [shape: f32[1,128], index: 4, kind: input, shape index: {}]   ;;  %s15887_s5 = inlined_call_operand.vmem [shape: bf16[9,128,128], index: 5, kind: input, shape index: {}]   ;;  %s15888_s6 = inlined_call_operand.vmem [shape: f32[1,128], index: 6, kind: input, shape index: {}]   ;;  %s15889_s7 = inlined_call_operand.vmem [shape: bf16[160,128], index: 7, kind: output, shape index: {}]  }
   0x1 LB: > { %s8711_s25 = sadd.s32 4294967295, %s12318_s24   ;;  %p8715_p0 = scmp.ge.s32.totalorder %s12318_s24, 1  ;;  %s12318_s24 = sphi %s12362_s24, %s17_s24  }
   0x2   : > { %p239_p1 = scmp.lt.s32.totalorder %s12318_s24, 3 }
   0x4   : > { %p240_p2 = pnand %p8715_p0, %p239_p1 }
   0x5   : > { %v11861_v0 = vld [vmem:[%s15883_s1 + $0x40] sm:$0xff] (!%p240_p2)   ;;  %v11865_v4 = vld [vmem:[%s15883_s1 + $0x48] sm:$0xff] (!%p240_p2)   ;;  %v11869_v8 = vld [vmem:[%s15883_s1 + $0x50] sm:$0xff] (!%p240_p2)   ;;  %s8716_s12 = sshll.u32 (!%p240_p2), %s8711_s25, 4  ;;  %vm759_vm0 = vsmask.f32 (!%p240_p2), 7424 }
   0x6   : > { %243 = sbr.rel (%p240_p2) target bundleno = 1376 (0x560), region = 48  ;;  %v11862_v1 = vld [vmem:[%s15883_s1] sm:$0xff] (!%p240_p2)   ;;  %9928 = vmatprep.subr.bf16.mxu0 (!%p240_p2), %v11861_v0  ;;  %v11866_v5 = vld [vmem:[%s15883_s1 + $0x8] sm:$0xff] (!%p240_p2)   ;;  %v11870_v9 = vld [vmem:[%s15883_s1 + $0x10] sm:$0xff] (!%p240_p2)   ;;  %p273_p3 = scmp.lt.s32.totalorder (!%p240_p2), %s8716_s12, 31  ;;  %vm3263_vm2 = vcmask (!%p240_p2), 1045504  }
   0x7   : > { %v11863_v2 = vld [vmem:[%s15883_s1 + $0x2c0] sm:$0xff] (!%p240_p2)   ;;  %9929 = vmatpush3.bf16.msra.mxu0 (!%p240_p2), %v11862_v1  ;;  %v11867_v6 = vld [vmem:[%s15883_s1 + $0x2c8] sm:$0xff] (!%p240_p2)   ;;  %v11871_v10 = vld [vmem:[%s15883_s1 + $0x2d0] sm:$0xff] (!%p240_p2)   ;;  %vm1479_vm1 = vsmask.f32 (!%p240_p2), 6400  ;;  %vm12321_vm3 = vmmov (!%p240_p2), 0  }
   0x8   : > { %v11864_v3 = vld [vmem:[%s15883_s1 + $0x280] sm:$0xff] (!%p240_p2)   ;;  %9986 = vmatprep.subr.bf16.mxu1 (!%p240_p2), %v11863_v2  ;;  %9930 = vmatprep.subr.bf16.mxu0 (!%p240_p2), %v11865_v4  ;;  %v11868_v7 = vld [vmem:[%s15883_s1 + $0x288] sm:$0xff] (!%p240_p2)   ;;  %v11872_v11 = vld [vmem:[%s15883_s1 + $0x290] sm:$0xff] (!%p240_p2)   ;;  %vm4169_vm4 = vcmask (!%p240_p2), 1041408   ;;  %vm3949_vm5 = vsmask.f32 (!%p240_p2), 2304 }
   0x9   : > { %9987 = vmatpush3.bf16.msra.mxu1 (!%p240_p2), %v11864_v3  ;;  %v11873_v12 = vld [vmem:[%s15883_s1 + $0x58] sm:$0xff] (!%p240_p2)   ;;  %v11877_v16 = vld [vmem:[%s15883_s1 + $0x60] sm:$0xff] (!%p240_p2)   ;;  %v11881_v20 = vld [vmem:[%s15883_s1 + $0x68] sm:$0xff] (!%p240_p2)   ;;  %vm7253_vm6 = vcmask (!%p240_p2), 1046528   ;;  %vm6859_vm7 = vsmask.f32 (!%p240_p2), 256 }
   0xa   : > { %9988 = vmatprep.subr.bf16.mxu1 (!%p240_p2), %v11867_v6  ;;  %v11874_v13 = vld [vmem:[%s15883_s1 + $0x18] sm:$0xff] (!%p240_p2)   ;;  %v11878_v17 = vld [vmem:[%s15883_s1 + $0x20] sm:$0xff] (!%p240_p2)   ;;  %v11882_v21 = vld [vmem:[%s15883_s1 + $0x28] sm:$0xff] (!%p240_p2)   ;;  %vm6858_vm8 = vcmask (!%p240_p2), 1040384   ;;  %vm8230_vm10 = vsmask.f32 (!%p240_p2), 4352 }
   0xb   : > { %9931 = vmatpush3.bf16.msra.mxu0 (!%p240_p2), %v11866_v5  ;;  %v11875_v14 = vld [vmem:[%s15883_s1 + $0x2d8] sm:$0xff] (!%p240_p2)   ;;  %v11879_v18 = vld [vmem:[%s15883_s1 + $0x2e0] sm:$0xff] (!%p240_p2)   ;;  %v11883_v22 = vld [vmem:[%s15883_s1 + $0x2e8] sm:$0xff] (!%p240_p2)   ;;  %vm8061_vm11 = vcmask (!%p240_p2), 1044480   ;;  %vm7835_vm12 = vsmask.f32 (!%p240_p2), 5376 }
   0xc   : > { %9932 = vmatprep.subr.bf16.mxu0 (!%p240_p2), %v11869_v8  ;;  %v11876_v15 = vld [vmem:[%s15883_s1 + $0x298] sm:$0xff] (!%p240_p2)   ;;  %v11880_v19 = vld [vmem:[%s15883_s1 + $0x2a0] sm:$0xff] (!%p240_p2)   ;;  %v11884_v23 = vld [vmem:[%s15883_s1 + $0x2a8] sm:$0xff] (!%p240_p2)   ;;  %s279_s27 = smul.u32 (!%p240_p2), 10, %s8711_s25 }
   0xd   : > { %9989 = vmatpush3.bf16.msra.mxu1 %v11868_v7  ;;  %s15893_s12 = smov (!%p273_p3, %s8716_s12), 31  ;;  %v11885_v24 = vld [vmem:[%s15883_s1 + $0x70] sm:$0xff]   ;;  %v11889_v28 = vld [vmem:[%s15883_s1 + $0x78] sm:$0xff]   ;;  %v11896_v35 = vld [vmem:[%s15883_s1 + $0x240] sm:$0xff]  }
   0xe   : > { %9990 = vmatprep.subr.bf16.mxu1 %v11871_v10  ;;  %v11886_v25 = vld [vmem:[%s15883_s1 + $0x30] sm:$0xff]   ;;  %s9840_s15 = sshll.u32 %s15893_s12, 3  ;;  %v11890_v29 = vld [vmem:[%s15883_s1 + $0x38] sm:$0xff]   ;;  %v11898_v42 = vld [vmem:[%s15883_s1 + $0x200] sm:$0xff]   ;;  %p280_p4 = scmp.lt.s32.totalorder %s279_s27, 19 }
   0xf   : > { %9933 = vmatpush3.bf16.msra.mxu0 %v11870_v9  ;;  %v11887_v26 = vld [vmem:[%s15883_s1 + $0x2f0] sm:$0xff]   ;;  %s12462_s26 = scalar_lea.vmem %s15882_s0, %s9840_s15  ;;  %v11891_v30 = vld [vmem:[%s15883_s1 + $0x2f8] sm:$0xff]   ;;  %v11900_v48 = vld [vmem:[%s15883_s1 + $0x248] sm:$0xff]  }
  0x10   : > { %9934 = vmatprep.subr.bf16.mxu0 %v11873_v12  ;;  %v11888_v27 = vld [vmem:[%s15883_s1 + $0x2b0] sm:$0xff]   ;;  %v12471_v31 = vld [vmem:[%s12462_s26] ss:$8 sps:$4 sm:$0xff]   ;;  %v12474_v32 = vld [vmem:[%s12462_s26 + $0x4] ss:$8 sps:$4 sm:$0xff]   ;;  %s15895_s27 = smov (!%p280_p4, %s279_s27), 19 }
  0x11   : > { %9991 = vmatpush3.bf16.msra.mxu1 %v11872_v11  ;;  %v11895_v33 = vld [vmem:[%s15883_s1 + $0x2b8] sm:$0xff]   ;;  %v761_v34 = vshrl.u32 %v12471_v31, 16  ;;  %537 = vmatprep.mubr.bf16.mxu0 %v12474_v32  ;;  %v12485_v36 = vld [vmem:[%s12462_s26 + $0x10] sm:$0xff]  ;;  %v773_v38 = vshrl.u32 %v12474_v32, 16  ;;  %v775_v39 = vshll.u32 %v12474_v32, 16  ;;  %v763_v40 = vshll.u32 %v12471_v31, 16  ;;  %vm15289_vm9 = vmand %vm6858_vm8, %vm6859_vm7 }
  0x12   : > { %9992 = vmatprep.subr.bf16.mxu1 %v11875_v14  ;;  %v12488_v37 = vld [vmem:[%s12462_s26 + $0x18] sm:$0xff]  ;;  %v11901_v49 = vld [vmem:[%s15883_s1 + $0x208] sm:$0xff]   ;;  %v12515_v52 = vld [vmem:[%s12462_s26 + $0x20] sm:$0xff]  ;;  %s8719_s25 = sshll.u32 %s15895_s27, 2 }
  0x13   : > { %9935 = vmatpush3.bf16.msra.mxu0 %v11874_v13  ;;  %v12496_v41 = vcombine.high %v12485_v36, %v12488_v37  ;;  %v12503_v43 = vcombine.low %v12485_v36, %v12488_v37  ;;  %v777_v44 = vrot.slane %v775_v39, 1  ;;  %v765_v45 = vrot.slane %v763_v40, 1  ;;  %v12518_v53 = vld [vmem:[%s12462_s26 + $0x28] sm:$0xff]  ;;  %v11904_v60 = vld [vmem:[%s15883_s1 + $0x250] sm:$0xff]   ;;  %v12543_v3 = vld [vmem:[%s12462_s26 + $0x38] sm:$0xff]  ;;  %s15857_s9 = scalar_lea.vmem %s15889_s7, %s8719_s25 }
  0x14   : > { %9936 = vmatprep.subr.bf16.mxu0 %v11877_v16  ;;  %v12523_v57 = vcombine.high %v12515_v52, %v12518_v53  ;;  %v12527_v58 = vcombine.low %v12515_v52, %v12518_v53  ;;  %v11905_v1 = vld [vmem:[%s15883_s1 + $0x210] sm:$0xff]   ;;  %v11908_v8 = vld [vmem:[%s15883_s1 + $0x258] sm:$0xff]   ;;  %v12565_v14 = vld [vmem:[%s12462_s26 + $0x40] sm:$0xff] }
  0x15   : > { %9993 = vmatpush3.bf16.msra.mxu1 %v11876_v15  ;;  %v780_v46 = vshll.u32 %v12496_v41, 16  ;;  %v768_v47 = vshll.u32 %v12503_v43, 16  ;;  %v778_v50 = vor.u32 %v777_v44, %v773_v38  ;;  %v766_v51 = vor.u32 %v765_v45, %v761_v34  ;;  %v12540_v2 = vld [vmem:[%s12462_s26 + $0x30] sm:$0xff]  ;;  %v11909_v9 = vld [vmem:[%s15883_s1 + $0x218] sm:$0xff]   ;;  %v12568_v15 = vld [vmem:[%s12462_s26 + $0x48] sm:$0xff] }
  0x16   : > { %9994 = vmatprep.subr.bf16.mxu1 %v11879_v18  ;;  %v792_v54 = vshrl.u32 %v12496_v41, 16  ;;  %v784_v59 = vshrl.u32 %v12503_v43, 16  ;;  %v796_v0 = vshll.u32 %v12523_v57, 16  ;;  %v788_v4 = vshll.u32 %v12527_v58, 16  ;;  %v11917_v34 = vld [vmem:[%s15883_s1 + $0x508] sm:$0xff]   ;;  %v12609_v40 = vld [vmem:[%s12462_s26 + $0x58] sm:$0xff] }
  0x17   : > { %9937 = vmatpush3.bf16.msra.mxu0 %v11878_v17  ;;  %v782_v55 = vrot.slane %v780_v46, 1  ;;  %v770_v56 = vrot.slane %v768_v47, 1  ;;  %v12548_v5 = vcombine.high %v12540_v2, %v12543_v3  ;;  %v808_v6 = vshrl.u32 %v12523_v57, 16  ;;  %v11920_v46 = vld [vmem:[%s15883_s1 + $0x550] sm:$0xff]   ;;  %v11921_v47 = vld [vmem:[%s15883_s1 + $0x268] sm:$0xff]  }
  0x18   : > { %9938 = vmatprep.subr.bf16.mxu0 %v11881_v20  ;;  %v798_v7 = vrot.slane %v796_v0, 1  ;;  %v790_v11 = vrot.slane %v788_v4, 1  ;;  %v12562_v13 = vcombine.low %v12540_v2, %v12543_v3  ;;  %v12573_v18 = vcombine.high %v12565_v14, %v12568_v15  ;;  %v12647_v0 = vld [vmem:[%s12462_s26 + $0x68] sm:$0xff] }
  0x19   : > { %9995 = vmatpush3.bf16.msra.mxu1 %v11880_v19  ;;  %v783_v61 = vsel %vm759_vm0, %v778_v50, %v782_v55  ;;  %v771_v62 = vsel %vm759_vm0, %v766_v51, %v770_v56  ;;  %v794_v63 = vor.u32 %v792_v54, %v782_v55  ;;  %v786_v10 = vor.u32 %v784_v59, %v770_v56  ;;  %v11912_v19 = vld [vmem:[%s15883_s1 + $0x540] sm:$0xff]   ;;  %v11922_v50 = vld [vmem:[%s15883_s1 + $0x510] sm:$0xff]   ;;  %v11923_v51 = vld [vmem:[%s15883_s1 + $0x228] sm:$0xff]  }
  0x1a   : > { %9996 = vmatprep.subr.bf16.mxu1 %v11883_v22  ;;  %1012 = vmatprep.mubr.bf16.mxu1 %v783_v61  ;;  %v812_v12 = vshll.u32 %v12548_v5, 16  ;;  %v810_v17 = vor.u32 %v808_v6, %v798_v7  ;;  %v11913_v22 = vld [vmem:[%s15883_s1 + $0x500] sm:$0xff]   ;;  %v840_v56 = vshrl.u32 %v12573_v18, 16  ;;  %v11925_v61 = vld [vmem:[%s15883_s1 + $0x518] sm:$0xff]  }
  0x1b   : > { %9939 = vmatpush3.bf16.msra.mxu0 %v11882_v21  ;;  %v799_v16 = vsel %vm759_vm0, %v794_v63, %v798_v7  ;;  %v800_v21 = vshrl.u32 %v12527_v58, 16  ;;  %v12644_v63 = vld [vmem:[%s12462_s26 + $0x60] sm:$0xff] }
  0x1c   : > { %9940 = vmatprep.subr.bf16.mxu0 %v11885_v24  ;;  %v814_v20 = vrot.slane %v812_v12, 1  ;;  %v804_v24 = vshll.u32 %v12562_v13, 16  ;;  %v12656_v7 = vcombine.high %v12644_v63, %v12647_v0 }
  0x1d   : > { %9997 = vmatpush3.bf16.msra.mxu1 %v11884_v23  ;;  %v791_v23 = vsel %vm759_vm0, %v786_v10, %v790_v11  ;;  %v802_v38 = vor.u32 %v800_v21, %v790_v11  ;;  %v11930_v11 = vld [vmem:[%s15883_s1 + $0x230] sm:$0xff]   ;;  %v11932_v21 = vld [vmem:[%s15883_s1 + $0x568] sm:$0xff]  }
  0x1e   : > { %9998 = vmatprep.subr.bf16.mxu1 %v11887_v26  ;;  %v815_v26 = vsel %vm759_vm0, %v810_v17, %v814_v20  ;;  %v806_v39 = vrot.slane %v804_v24, 1 }
  0x1f   : > { %9941 = vmatpush3.bf16.msra.mxu0 %v11886_v25  ;;  %v11914_v25 = vld [vmem:[%s15883_s1 + $0x260] sm:$0xff]  }
  0x20   : > { %9942 = vmatprep.subr.bf16.mxu0 %v11889_v28  ;;  %v828_v28 = vshll.u32 %v12573_v18, 16  ;;  %v807_v54 = vsel %vm759_vm0, %v802_v38, %v806_v39 }
  0x21   : > { %9999 = vmatpush3.bf16.msra.mxu1 %v11888_v27  ;;  %v824_v27 = vshrl.u32 %v12548_v5, 16 }
  0x22   : > { %10000 = vmatprep.subr.bf16.mxu1 %v11891_v30  ;;  %v11916_v30 = vld [vmem:[%s15883_s1 + $0x548] sm:$0xff]   ;;  %v830_v44 = vrot.slane %v828_v28, 1 }
  0x23   : > { %9943 = vmatpush3.bf16.msra.mxu0 %v11890_v29  ;;  %v11915_v29 = vld [vmem:[%s15883_s1 + $0x220] sm:$0xff]  }
  0x24   : > { %10044 = vmatprep.subr.bf16.mxu0 %v11896_v35  ;;  %v12605_v35 = vld [vmem:[%s12462_s26 + $0x50] sm:$0xff] }
  0x25   : > { %10001 = vmatpush3.bf16.msra.mxu1 %v11895_v33  ;;  %v12599_v33 = vcombine.low %v12565_v14, %v12568_v15  ;;  %v12613_v45 = vcombine.high %v12605_v35, %v12609_v40 }
  0x26   : > { %538 = vmatmul.mubr.bf16.vlgmr.msra.gmra.mrb[0].mxu0 %v12471_v31  ;;  %10102 = vmatprep.subr.bf16.mxu1 %v11912_v19 }
  0x27   : > { %10045 = vmatpush3.bf16.msra.mxu0 %v11898_v42  ;;  %545 = vmatprep.mubr.bf16.mxu0 %v12496_v41  ;;  %v826_v42 = vor.u32 %v824_v27, %v814_v20  ;;  %v844_v59 = vshll.u32 %v12613_v45, 16  ;;  %v832_v19 = vshrl.u32 %v12599_v33, 16  ;;  %v860_v20 = vshll.u32 %v12656_v7, 16  ;;  %v11937_v27 = vld [vmem:[%s15883_s1 + $0x238] sm:$0xff]  }
  0x28   : > { %10046 = vmatprep.subr.bf16.mxu0 %v11900_v48  ;;  %1013 = vmatmul.mubr.bf16.vlgmr.msra.gmra.mrb[0].mxu1 %v771_v62  ;;  %v816_v48 = vshrl.u32 %v12562_v13, 16  ;;  %v12641_v62 = vcombine.low %v12605_v35, %v12609_v40  ;;  %v856_v24 = vshrl.u32 %v12613_v45, 16 }
  0x29   : > { %1020 = vmatprep.mubr.bf16.mxu1 %v799_v16  ;;  %10103 = vmatpush3.bf16.msra.mxu1 %v11913_v22  ;;  %v831_v55 = vsel %vm759_vm0, %v826_v42, %v830_v44  ;;  %v846_v10 = vrot.slane %v844_v59, 1  ;;  %v11931_v16 = vld [vmem:[%s15883_s1 + $0x520] sm:$0xff]   ;;  %v11934_v22 = vld [vmem:[%s15883_s1 + $0x528] sm:$0xff]   ;;  %v11939_v42 = vld [vmem:[%s15883_s1 + $0x530] sm:$0xff]  }
  0x2a   : > { %10104 = vmatprep.subr.bf16.mxu1 %v11916_v30  ;;  %v818_v4 = vor.u32 %v816_v48, %v806_v39  ;;  %v836_v12 = vshll.u32 %v12641_v62, 16  ;;  %v12689_v30 = vcombine.low %v12644_v63, %v12647_v0  ;;  %v299_v39 = vld [vmem:[%s12462_s26 + $0x68] sm:$0x77]  ;;  %v11941_v59 = vld [vmem:[%s15883_s1 + $0x538] sm:$0xff]  }
  0x2b   : > { %10047 = vmatpush3.bf16.msra.mxu0 %v11901_v49  ;;  %v820_v49 = vshll.u32 %v12599_v33, 16  ;;  %v858_v38 = vor.u32 %v856_v24, %v846_v10 }
  0x2c   : > { %10048 = vmatprep.subr.bf16.mxu0 %v11904_v60  ;;  %v11924_v60 = vld [vmem:[%s15883_s1 + $0x558] sm:$0xff]   ;;  %v852_v48 = vshll.u32 %v12689_v30, 16  ;;  %v864_v24 = vshrl.u32 %v12689_v30, 16  ;;  %v8932_v30 = vcombine.low %v12518_v53, %v12540_v2 }
  0x2d   : > { %10105 = vmatpush3.bf16.msra.mxu1 %v11917_v34  ;;  %v822_v6 = vrot.slane %v820_v49, 1  ;;  %v11938_v34 = vld [vmem:[%s15883_s1 + $0x570] sm:$0xff]   ;;  %v8734_v49 = vcombine.high %v12644_v63, %v299_v39 }
  0x2e   : > { %546 = vmatmul.mubr.bf16.gmra.mrb[4].mxu0 %v12503_v43  ;;  %10106 = vmatprep.subr.bf16.mxu1 %v11920_v46 }
  0x2f   : > { %553 = vmatprep.mubr.bf16.mxu0 %v12523_v57  ;;  %10049 = vmatpush3.bf16.msra.mxu0 %v11905_v1  ;;  %v11928_v1 = vld [vmem:[%s15883_s1 + $0x270] sm:$0xff]   ;;  %v823_v17 = vsel %vm759_vm0, %v818_v4, %v822_v6  ;;  %v834_v28 = vor.u32 %v832_v19, %v822_v6  ;;  %v854_v4 = vrot.slane %v852_v48, 1  ;;  %v867_v6 = vshrl.u32 %v12656_v7, 16  ;;  %v11948_v48 = vld [vmem:[%s15883_s1 + $0x448] sm:$0xff]  }
  0x30   : > { %10050 = vmatprep.subr.bf16.mxu0 %v11908_v8  ;;  %1021 = vmatmul.mubr.bf16.gmra.mrb[4].mxu1 %v791_v23  ;;  %v11929_v8 = vld [vmem:[%s15883_s1 + $0x560] sm:$0xff]   ;;  %v8933_v7 = vcombine.high %v12518_v53, %v12540_v2  ;;  %v11949_v53 = vld [vmem:[%s15883_s1 + $0x408] sm:$0xff]   ;;  %v1515_v2 = vshrl.u32 %v8932_v30, 16 }
  0x31   : > { %1028 = vmatprep.mubr.bf16.mxu1 %v815_v26  ;;  %10107 = vmatpush3.bf16.msra.mxu1 %v11922_v50  ;;  %v838_v26 = vrot.slane %v836_v12, 1  ;;  %v11940_v50 = vld [vmem:[%s15883_s1 + $0x578] sm:$0xff]  }
  0x32   : > { %10108 = vmatprep.subr.bf16.mxu1 %v11924_v60  ;;  %v8930_v60 = vcombine.low %v12488_v37, %v12515_v52 }
  0x33   : > { %10051 = vmatpush3.bf16.msra.mxu0 %v11909_v9  ;;  %v842_v9 = vor.u32 %v840_v56, %v830_v44  ;;  %v8931_v44 = vcombine.high %v12488_v37, %v12515_v52  ;;  %v839_v46 = vsel %vm759_vm0, %v834_v28, %v838_v26 }
  0x34   : > { %10052 = vmatprep.subr.bf16.mxu0 %v11914_v25  ;;  %v11936_v25 = vld [vmem:[%s15883_s1 + $0x278] sm:$0xff]  }
  0x35   : > { %10109 = vmatpush3.bf16.msra.mxu1 %v11925_v61  ;;  %v847_v23 = vsel %vm759_vm0, %v842_v9, %v846_v10  ;;  %v1506_v61 = vshrl.u32 %v8931_v44, 16 }
  0x36   : > { %554 = vmatmul.mubr.bf16.gmra.mrb[8].mxu0 %v12527_v58  ;;  %10110 = vmatprep.subr.bf16.mxu1 %v11929_v8  ;;  %v1509_v8 = vshll.u32 %v8931_v44, 16 }
  0x37   : > { %561 = vmatprep.mubr.bf16.mxu0 %v12548_v5  ;;  %10053 = vmatpush3.bf16.msra.mxu0 %v11915_v29  ;;  %v862_v29 = vrot.slane %v860_v20, 1  ;;  %v1508_v12 = vrot.slane %v1506_v61, 1  ;;  %v1517_v61 = vrot.slane %v1515_v2, 1 }
  0x38   : > { %10054 = vmatprep.subr.bf16.mxu0 %v11921_v47  ;;  %1029 = vmatmul.mubr.bf16.gmra.mrb[8].mxu1 %v807_v54  ;;  %v848_v47 = vshrl.u32 %v12641_v62, 16  ;;  %v1370_v54 = vld [vmem:[%s12462_s26 + $0x8] sm:$0xee]  ;;  %v1511_v52 = vrot.slane %v1509_v8, 2  ;;  %v11953_v8 = vld [vmem:[%s15883_s1 + $0x410] sm:$0xff]  }
  0x39   : > { %1036 = vmatprep.mubr.bf16.mxu1 %v831_v55  ;;  %10111 = vmatpush3.bf16.msra.mxu1 %v11931_v16  ;;  %v863_v55 = vsel %vm759_vm0, %v858_v38, %v862_v29  ;;  %v8929_v56 = vcombine.high %v1370_v54, %v12485_v36  ;;  %v1489_v16 = vshrl.u32 %v8930_v60, 16  ;;  %v869_v19 = vor.u32 %v867_v6, %v862_v29  ;;  %v11947_v38 = vld [vmem:[%s15883_s1 + $0x400] sm:$0xff]  }
  0x3a   : > { %10112 = vmatprep.subr.bf16.mxu1 %v11932_v21  ;;  %v8928_v37 = vcombine.low %v1370_v54, %v12485_v36  ;;  %v1512_v36 = vor.u32 %v1511_v52, %v1508_v12  ;;  %v1524_v29 = vshrl.u32 %v8933_v7, 16  ;;  %v11961_v12 = vld [vmem:[%s15883_s1 + $0x680] sm:$0xff]  }
  0x3b   : > { %10055 = vmatpush3.bf16.msra.mxu0 %v11923_v51  ;;  %v11942_v51 = vld [vmem:[%s15883_s1 + $0x440] sm:$0xff]   ;;  %v1498_v9 = vshrl.u32 %v8929_v56, 16  ;;  %v1501_v10 = vshll.u32 %v8929_v56, 16 }
  0x3c   : > { %10056 = vmatprep.subr.bf16.mxu0 %v11928_v1  ;;  %v850_v1 = vor.u32 %v848_v47, %v838_v26  ;;  %v1481_v26 = vshrl.u32 %v8928_v37, 16 }
  0x3d   : > { %10113 = vmatpush3.bf16.msra.mxu1 %v11934_v22  ;;  %v1500_v20 = vrot.slane %v1498_v9, 1  ;;  %v1503_v21 = vrot.slane %v1501_v10, 2  ;;  %v1492_v22 = vshll.u32 %v8930_v60, 16  ;;  %v11952_v60 = vld [vmem:[%s15883_s1 + $0x450] sm:$0xff]   ;;  %v8937_v9 = vcombine.high %v12568_v15, %v12605_v35 }
  0x3e   : > { %562 = vmatmul.mubr.bf16.gmra.mrb[12].mxu0 %v12562_v13  ;;  %10114 = vmatprep.subr.bf16.mxu1 %v11938_v34  ;;  %v1527_v34 = vshll.u32 %v8933_v7, 16  ;;  %v1483_v44 = vrot.slane %v1481_v26, 1  ;;  %v11965_v7 = vld [vmem:[%s15883_s1 + $0x688] sm:$0xff]  }
  0x3f   : > { %569 = vmatprep.mubr.bf16.mxu0 %v12573_v18  ;;  %10057 = vmatpush3.bf16.msra.mxu0 %v11930_v11  ;;  %v8733_v11 = vcombine.low %v12644_v63, %v299_v39  ;;  %v1504_v28 = vor.u32 %v1503_v21, %v1500_v20  ;;  %v1494_v39 = vrot.slane %v1492_v22, 2  ;;  %v1560_v52 = vshrl.u32 %v8937_v9, 16 }
  0x40   : > { %1037 = vmatmul.mubr.bf16.gmra.mrb[12].mxu1 %v823_v17  ;;  %10058 = vmatprep.subr.bf16.mxu0 %v11936_v25  ;;  %v855_v17 = vsel %vm759_vm0, %v850_v1, %v854_v4  ;;  %v1491_v25 = vrot.slane %v1489_v16, 1  ;;  %v1563_v21 = vshll.u32 %v8937_v9, 16 }
  0x41   : > { %1044 = vmatprep.mubr.bf16.mxu1 %v847_v23  ;;  %10115 = vmatpush3.bf16.msra.mxu1 %v11939_v42  ;;  %v11960_v23 = vld [vmem:[%s15883_s1 + $0x6c0] sm:$0xff]   ;;  %v866_v42 = vor.u32 %v864_v24, %v854_v4  ;;  %v1513_v47 = vsel %vm1479_vm1, %v1504_v28, %v1512_v36  ;;  %v8934_v4 = vcombine.low %v12543_v3, %v12565_v14  ;;  %v1562_v26 = vrot.slane %v1560_v52, 1  ;;  %v11969_v28 = vld [vmem:[%s15883_s1 + $0x468] sm:$0xff]   ;;  %v1384_v52 = vld [vmem:[%s12462_s26 + $0x78] sm:$0x11] }
  0x42   : > { %10116 = vmatprep.subr.bf16.mxu1 %v11940_v50  ;;  %v1529_v50 = vrot.slane %v1527_v34, 2  ;;  %v1495_v56 = vor.u32 %v1494_v39, %v1491_v25  ;;  %v8936_v24 = vcombine.low %v12568_v15, %v12605_v35  ;;  %v11963_v25 = vld [vmem:[%s15883_s1 + $0x420] sm:$0xff]   ;;  %v1565_v34 = vrot.slane %v1563_v21, 2  ;;  %v11970_v15 = vld [vmem:[%s15883_s1 + $0x690] sm:$0xff]   ;;  %v11972_v35 = vld [vmem:[%s15883_s1 + $0x6d8] sm:$0xff]  }
  0x43   : > { %10059 = vmatpush3.bf16.msra.mxu0 %v11937_v27  ;;  %v1484_v27 = vshll.u32 %v8928_v37, 16  ;;  %v1533_v16 = vshrl.u32 %v8934_v4, 16  ;;  %v11957_v37 = vld [vmem:[%s15883_s1 + $0x418] sm:$0xff]   ;;  %v11971_v39 = vld [vmem:[%s15883_s1 + $0x428] sm:$0xff]  }
  0x44   : > { %10160 = vmatprep.subr.bf16.mxu0 %v11942_v51  ;;  %v1518_v51 = vshll.u32 %v8932_v30, 16  ;;  %v1554_v30 = vshll.u32 %v8936_v24, 16 }
  0x45   : > { %10117 = vmatpush3.bf16.msra.mxu1 %v11941_v59  ;;  %v1535_v22 = vrot.slane %v1533_v16, 1 }
  0x46   : > { %570 = vmatmul.mubr.bf16.gmra.mrb[16].mxu0 %v12599_v33  ;;  %10218 = vmatprep.subr.bf16.mxu1 %v11960_v23  ;;  %v1520_v1 = vrot.slane %v1518_v51, 2  ;;  %v1556_v2 = vrot.slane %v1554_v30, 2 }
  0x47   : > { %577 = vmatprep.mubr.bf16.mxu0 %v12613_v45 }
  0x48   : > { %1045 = vmatmul.mubr.bf16.gmra.mrb[16].mxu1 %v839_v46  ;;  %v1486_v46 = vrot.slane %v1484_v27, 2  ;;  %v8939_v27 = vcombine.high %v12609_v40, %v12644_v63 }
  0x49   : > { %1052 = vmatprep.mubr.bf16.mxu1 %v863_v55 }
  0x4a   : > { %v1487_v55 = vor.u32 %v1486_v46, %v1483_v44  ;;  %v11973_v44 = vld [vmem:[%s15883_s1 + $0x698] sm:$0xff]   ;;  %v1383_v46 = vld [vmem:[%s12462_s26 + $0x70] sm:$0xff] }
  0x4c   : > { %v1496_v6 = vsel %vm1479_vm1, %v1487_v55, %v1495_v56  ;;  %v11978_v55 = vld [vmem:[%s15883_s1 + $0x430] sm:$0xff]  }
  0x4e   : > { %578 = vmatmul.mubr.bf16.gmra.mrb[20].mxu0 %v12641_v62 }
  0x4f   : > { %585 = vmatprep.mubr.bf16.mxu0 %v8734_v49  ;;  %v1526_v49 = vrot.slane %v1524_v29, 1 }
  0x50   : > { %1053 = vmatmul.mubr.bf16.gmra.mrb[20].mxu1 %v855_v17  ;;  %v1536_v17 = vshll.u32 %v8934_v4, 16 }
  0x51   : > { %1060 = vmatprep.mubr.bf16.mxu1 %v869_v19  ;;  %v1530_v59 = vor.u32 %v1529_v50, %v1526_v49  ;;  %v1521_v19 = vor.u32 %v1520_v1, %v1517_v61  ;;  %v8938_v50 = vcombine.low %v12609_v40, %v12644_v63  ;;  %v11980_v40 = vld [vmem:[%s15883_s1 + $0x6e8] sm:$0xff]  }
  0x52   : > { %v1538_v23 = vrot.slane %v1536_v17, 2 }
  0x53   : > { %v1531_v10 = vsel %vm1479_vm1, %v1512_v36, %v1530_v59  ;;  %v1522_v36 = vsel %vm1479_vm1, %v1495_v56, %v1521_v19  ;;  %v1569_v1 = vshrl.u32 %v8938_v50, 16  ;;  %v1572_v4 = vshll.u32 %v8938_v50, 16 }
  0x56   : > { %586 = vmatmul.mubr.bf16.gmra.mrb[24].mxu0 %v8733_v11 }
  0x57   : > { %1216 = vmatprep.mubr.bf16.mxu0 %v12474_v32  ;;  %v8935_v32 = vcombine.high %v12543_v3, %v12565_v14  ;;  %v11956_v3 = vld [vmem:[%s15883_s1 + $0x458] sm:$0xff]   ;;  %v11964_v14 = vld [vmem:[%s15883_s1 + $0x6c8] sm:$0xff]  }
  0x58   : > { %1061 = vmatmul.mubr.bf16.gmra.mrb[24].mxu1 %v866_v42  ;;  %v1539_v42 = vor.u32 %v1538_v23, %v1535_v22  ;;  %v8943_v22 = vcombine.high %v1384_v52, %v1384_v52  ;;  %v11994_v23 = vld [vmem:[%s15883_s1 + $0x6b8] sm:$0xff]  }
  0x59   : > { %v1542_v54 = vshrl.u32 %v8935_v32, 16  ;;  %1756 = vmatprep.mubr.bf16.mxu1 %v1513_v47  ;;  %v1566_v47 = vor.u32 %v1565_v34, %v1562_v26  ;;  %v12867_v26 = vld [vmem:[%s12462_s26 + $0x4] ss:$8 sps:$4 sm:$0xff]   ;;  %v12874_v34 = vld [vmem:[%s12462_s26 + $0x18] sm:$0xff] }
  0x5e   : > { %1217 = vmatmul.mubr.bf16.vlgmr.msra.gmra.mrb[28].mxu0 %v12471_v31  ;;  %v1545_v31 = vshll.u32 %v8935_v32, 16  ;;  %v1578_v32 = vshrl.u32 %v8939_v27, 16 }
  0x5f   : > { %10161 = vmatpush3.bf16.msra.mxu0 %v11947_v38  ;;  %1224 = vmatprep.mubr.bf16.mxu0 %v12496_v41  ;;  %v1544_v41 = vrot.slane %v1542_v54, 1  ;;  %v1551_v38 = vshrl.u32 %v8936_v24, 16  ;;  %v8941_v54 = vcombine.high %v12647_v0, %v1383_v46 }
  0x60   : > { %10162 = vmatprep.subr.bf16.mxu0 %v11948_v48  ;;  %v1547_v11 = vrot.slane %v1545_v31, 2  ;;  %1757 = vmatmul.mubr.bf16.vlgmr.msra.gmra.mrb[28].mxu1 %v1496_v6  ;;  %v1581_v48 = vshll.u32 %v8939_v27, 16  ;;  %v1580_v51 = vrot.slane %v1578_v32, 1  ;;  %v11985_v31 = vld [vmem:[%s15883_s1 + $0x478] sm:$0xff]   ;;  %v12884_v32 = vld [vmem:[%s12462_s26] ss:$8 sps:$4 sm:$0xff]  }
  0x61   : > { %1764 = vmatprep.mubr.bf16.mxu1 %v1531_v10  ;;  %10219 = vmatpush3.bf16.msra.mxu1 %v11961_v12  ;;  %v1553_v49 = vrot.slane %v1551_v38, 1  ;;  %v1596_v6 = vshrl.u32 %v8941_v54, 16  ;;  %v1599_v9 = vshll.u32 %v8941_v54, 16  ;;  %v11995_v10 = vld [vmem:[%s15883_s1 + $0x640] sm:$0xff]   ;;  %v2270_v38 = vshll.u32 %v12867_v26, 16 }
  0x62   : > { %v1548_v20 = vor.u32 %v1547_v11, %v1544_v41  ;;  %10220 = vmatprep.subr.bf16.mxu1 %v11964_v14  ;;  %v8940_v11 = vcombine.low %v12647_v0, %v1383_v46  ;;  %v1574_v14 = vrot.slane %v1572_v4, 2  ;;  %v11990_v0 = vld [vmem:[%s15883_s1 + $0x6f8] sm:$0xff]   ;;  %v2268_v46 = vshrl.u32 %v12867_v26, 16 }
  0x63   : > { %10163 = vmatpush3.bf16.msra.mxu0 %v11949_v53  ;;  %v1540_v53 = vsel %vm1479_vm1, %v1521_v19, %v1539_v42  ;;  %v1557_v61 = vor.u32 %v1556_v2, %v1553_v49  ;;  %v1598_v17 = vrot.slane %v1596_v6, 1  ;;  %v1601_v19 = vrot.slane %v1599_v9, 2  ;;  %v12894_v49 = vld [vmem:[%s12462_s26 + $0x28] sm:$0xff]  ;;  %v12919_v6 = vld [vmem:[%s12462_s26 + $0x30] sm:$0xff] }
  0x64   : > { %10164 = vmatprep.subr.bf16.mxu0 %v11952_v60  ;;  %v1549_v29 = vsel %vm1479_vm1, %v1530_v59, %v1548_v20  ;;  %v1567_v56 = vsel %vm1479_vm1, %v1548_v20, %v1566_v47  ;;  %v1583_v59 = vrot.slane %v1581_v48, 2  ;;  %v11979_v60 = vld [vmem:[%s15883_s1 + $0x6a0] sm:$0xff]   ;;  %v1587_v20 = vshrl.u32 %v8940_v11, 16 }
  0x65   : > { %10221 = vmatpush3.bf16.msra.mxu1 %v11965_v7  ;;  %v1558_v12 = vsel %vm1479_vm1, %v1539_v42, %v1557_v61  ;;  %v1590_v21 = vshll.u32 %v8940_v11, 16 }
  0x66   : > { %1225 = vmatmul.mubr.bf16.gmra.mrb[32].mxu0 %v12503_v43  ;;  %v11962_v43 = vld [vmem:[%s15883_s1 + $0x460] sm:$0xff]   ;;  %v1584_v41 = vor.u32 %v1583_v59, %v1580_v51  ;;  %v1589_v24 = vrot.slane %v1587_v20, 1 }
  0x67   : > { %1232 = vmatprep.mubr.bf16.mxu0 %v12523_v57  ;;  %10165 = vmatpush3.bf16.msra.mxu0 %v11953_v8  ;;  %v11968_v57 = vld [vmem:[%s15883_s1 + $0x6d0] sm:$0xff]   ;;  %v11982_v8 = vld [vmem:[%s15883_s1 + $0x6a8] sm:$0xff]  }
  0x68   : > { %10166 = vmatprep.subr.bf16.mxu0 %v11956_v3  ;;  %10222 = vmatprep.subr.bf16.mxu1 %v11968_v57  ;;  %v1571_v3 = vrot.slane %v1569_v1, 1  ;;  %v1585_v16 = vsel %vm1479_vm1, %v1566_v47, %v1584_v41  ;;  %v635_v57 = vld [vmem:[%s12462_s26 + $0x68] sm:$0x77]  ;;  %v2272_v47 = vrot.slane %v2270_v38, 1  ;;  %v12019_v38 = vld [vmem:[%s15883_s1 + $0x750] sm:$0xff]  }
  0x69   : > { %1765 = vmatmul.mubr.bf16.gmra.mrb[32].mxu1 %v1522_v36  ;;  %v8845_v30 = vcombine.low %v12644_v63, %v635_v57 }
  0x6a   : > { %1772 = vmatprep.mubr.bf16.mxu1 %v1549_v29  ;;  %10223 = vmatpush3.bf16.msra.mxu1 %v11970_v15  ;;  %v1575_v7 = vor.u32 %v1574_v14, %v1571_v3  ;;  %v12871_v29 = vld [vmem:[%s12462_s26 + $0x10] sm:$0xff]  ;;  %v2273_v2 = vor.u32 %v2272_v47, %v2268_v46 }
  0x6b   : > { %10167 = vmatpush3.bf16.msra.mxu0 %v11957_v37  ;;  %10224 = vmatprep.subr.bf16.mxu1 %v11972_v35  ;;  %v11989_v37 = vld [vmem:[%s15883_s1 + $0x6b0] sm:$0xff]   ;;  %v8942_v35 = vcombine.low %v1384_v52, %v1384_v52  ;;  %v12880_v42 = vcombine.high %v12871_v29, %v12874_v34 }
  0x6c   : > { %10168 = vmatprep.subr.bf16.mxu0 %v11962_v43  ;;  %v1602_v43 = vor.u32 %v1601_v19, %v1598_v17  ;;  %v1576_v36 = vsel %vm1479_vm1, %v1557_v61, %v1575_v7 }
  0x6d   : > { %v2287_v61 = vshrl.u32 %v12880_v42, 16 }
  0x6e   : > { %1233 = vmatmul.mubr.bf16.gmra.mrb[36].mxu0 %v12527_v58  ;;  %v11976_v58 = vld [vmem:[%s15883_s1 + $0x470] sm:$0xff]   ;;  %10225 = vmatpush3.bf16.msra.mxu1 %v11973_v44  ;;  %v1603_v27 = vsel %vm1479_vm1, %v1584_v41, %v1602_v43 }
  0x6f   : > { %1240 = vmatprep.mubr.bf16.mxu0 %v12548_v5  ;;  %10169 = vmatpush3.bf16.msra.mxu0 %v11963_v25  ;;  %v11977_v5 = vld [vmem:[%s15883_s1 + $0x6e0] sm:$0xff]   ;;  %v1592_v25 = vrot.slane %v1590_v21, 2  ;;  %v12953_v21 = vld [vmem:[%s12462_s26 + $0x48] sm:$0xff] }
  0x70   : > { %10170 = vmatprep.subr.bf16.mxu0 %v11969_v28  ;;  %10226 = vmatprep.subr.bf16.mxu1 %v11977_v5  ;;  %v1610_v28 = vshll.u32 %v8943_v22, 16  ;;  %v12891_v5 = vld [vmem:[%s12462_s26 + $0x20] sm:$0xff] }
  0x71   : > { %1773 = vmatmul.mubr.bf16.gmra.mrb[36].mxu1 %v1540_v53  ;;  %v1593_v15 = vor.u32 %v1592_v25, %v1589_v24  ;;  %v12900_v53 = vcombine.low %v12871_v29, %v12874_v34  ;;  %v12904_v54 = vcombine.high %v12891_v5, %v12894_v49 }
  0x72   : > { %1780 = vmatprep.mubr.bf16.mxu1 %v1567_v56  ;;  %10227 = vmatpush3.bf16.msra.mxu1 %v11979_v60  ;;  %v2256_v56 = vshrl.u32 %v12884_v32, 16  ;;  %v11999_v60 = vld [vmem:[%s15883_s1 + $0x648] sm:$0xff]  }
  0x73   : > { %10171 = vmatpush3.bf16.msra.mxu0 %v11971_v39  ;;  %10228 = vmatprep.subr.bf16.mxu1 %v11980_v40  ;;  %v1612_v39 = vrot.slane %v1610_v28, 2  ;;  %v1594_v44 = vsel %vm1479_vm1, %v1575_v7, %v1593_v15  ;;  %v2291_v4 = vshll.u32 %v12904_v54, 16  ;;  %v2279_v14 = vshrl.u32 %v12900_v53, 16  ;;  %v12012_v7 = vld [vmem:[%s15883_s1 + $0x700] sm:$0xff]  }
  0x74   : > { %10172 = vmatprep.subr.bf16.mxu0 %v11976_v58  ;;  %v2275_v58 = vshll.u32 %v12880_v42, 16 }
  0x75   : > { %v1613_v48 = vsel %vm1479_vm1, %v1602_v43, %v1612_v39  ;;  %v2293_v11 = vrot.slane %v2291_v4, 1  ;;  %v12007_v43 = vld [vmem:[%s15883_s1 + $0x658] sm:$0xff]  }
  0x76   : > { %1241 = vmatmul.mubr.bf16.gmra.mrb[40].mxu0 %v12562_v13  ;;  %v11987_v13 = vld [vmem:[%s15883_s1 + $0x438] sm:$0xff]   ;;  %10229 = vmatpush3.bf16.msra.mxu1 %v11982_v8  ;;  %v2277_v51 = vrot.slane %v2275_v58, 1 }
  0x77   : > { %1248 = vmatprep.mubr.bf16.mxu0 %v12573_v18  ;;  %10173 = vmatpush3.bf16.msra.mxu0 %v11978_v55  ;;  %v11988_v18 = vld [vmem:[%s15883_s1 + $0x6f0] sm:$0xff]   ;;  %v11998_v55 = vld [vmem:[%s15883_s1 + $0x600] sm:$0xff]   ;;  %v12922_v8 = vld [vmem:[%s12462_s26 + $0x38] sm:$0xff] }
  0x78   : > { %10174 = vmatprep.subr.bf16.mxu0 %v11985_v31  ;;  %10230 = vmatprep.subr.bf16.mxu1 %v11988_v18  ;;  %v2263_v31 = vshll.u32 %v12900_v53, 16  ;;  %v2278_v1 = vsel %vm759_vm0, %v2273_v2, %v2277_v51  ;;  %v12930_v18 = vcombine.low %v12891_v5, %v12894_v49  ;;  %v12938_v3 = vcombine.high %v12919_v6, %v12922_v8  ;;  %v12020_v2 = vld [vmem:[%s15883_s1 + $0x668] sm:$0xff]  }
  0x79   : > { %1781 = vmatmul.mubr.bf16.gmra.mrb[40].mxu1 %v1558_v12  ;;  %v12003_v12 = vld [vmem:[%s15883_s1 + $0x650] sm:$0xff]   ;;  %v12967_v22 = vcombine.low %v12919_v6, %v12922_v8 }
  0x7a   : > { %1788 = vmatprep.mubr.bf16.mxu1 %v1585_v16  ;;  %10231 = vmatpush3.bf16.msra.mxu1 %v11989_v37  ;;  %v2265_v9 = vrot.slane %v2263_v31, 1  ;;  %v12004_v16 = vld [vmem:[%s15883_s1 + $0x610] sm:$0xff]   ;;  %v2283_v19 = vshll.u32 %v12930_v18, 16  ;;  %v12947_v37 = vld [vmem:[%s12462_s26 + $0x40] sm:$0xff]  ;;  %v2307_v20 = vshll.u32 %v12938_v3, 16  ;;  %v2295_v39 = vshrl.u32 %v12930_v18, 16 }
  0x7b   : > { %10175 = vmatpush3.bf16.msra.mxu0 %v11987_v13  ;;  %10232 = vmatprep.subr.bf16.mxu1 %v11990_v0  ;;  %v12000_v13 = vld [vmem:[%s15883_s1 + $0x608] sm:$0xff]   ;;  %v2303_v0 = vshrl.u32 %v12904_v54, 16  ;;  %v12975_v25 = vcombine.high %v12947_v37, %v12953_v21  ;;  %v13002_v47 = vcombine.low %v12947_v37, %v12953_v21  ;;  %v12024_v31 = vld [vmem:[%s15883_s1 + $0x718] sm:$0xff]  }
  0x7c   : > { %10276 = vmatprep.subr.bf16.mxu0 %v11995_v10  ;;  %v2289_v10 = vor.u32 %v2287_v61, %v2277_v51  ;;  %v2285_v24 = vrot.slane %v2283_v19, 1  ;;  %v2309_v28 = vrot.slane %v2307_v20, 1  ;;  %v12021_v51 = vld [vmem:[%s15883_s1 + $0x710] sm:$0xff]   ;;  %v2311_v19 = vshrl.u32 %v12967_v22, 16 }
  0x7d   : > { %v2323_v46 = vshll.u32 %v12975_v25, 16  ;;  %v2315_v4 = vshll.u32 %v13002_v47, 16 }
  0x7e   : > { %1249 = vmatmul.mubr.bf16.gmra.mrb[44].mxu0 %v12599_v33  ;;  %v12011_v33 = vld [vmem:[%s15883_s1 + $0x740] sm:$0xff]   ;;  %10233 = vmatpush3.bf16.msra.mxu1 %v11994_v23  ;;  %v2294_v52 = vsel %vm759_vm0, %v2289_v10, %v2293_v11  ;;  %v12008_v23 = vld [vmem:[%s15883_s1 + $0x618] sm:$0xff]  }
  0x7f   : > { %1256 = vmatprep.mubr.bf16.mxu0 %v12613_v45  ;;  %v8846_v45 = vcombine.high %v12644_v63, %v635_v57  ;;  %10334 = vmatprep.subr.bf16.mxu1 %v12011_v33  ;;  %v2258_v63 = vshll.u32 %v12884_v32, 16  ;;  %v12015_v57 = vld [vmem:[%s15883_s1 + $0x748] sm:$0xff]   ;;  %v2281_v33 = vor.u32 %v2279_v14, %v2265_v9  ;;  %v12028_v14 = vld [vmem:[%s15883_s1 + $0x760] sm:$0xff]   ;;  %v13064_v20 = vrot.slane %v2315_v4, 1 }
  0x81   : > { %1789 = vmatmul.mubr.bf16.gmra.mrb[44].mxu1 %v1576_v36  ;;  %v2260_v59 = vrot.slane %v2258_v63, 1  ;;  %v12013_v36 = vld [vmem:[%s15883_s1 + $0x660] sm:$0xff]   ;;  %v2319_v63 = vshrl.u32 %v12938_v3, 16 }
  0x82   : > { %1796 = vmatprep.mubr.bf16.mxu1 %v1603_v27  ;;  %v2305_v27 = vor.u32 %v2303_v0, %v2293_v11  ;;  %v12027_v11 = vld [vmem:[%s15883_s1 + $0x670] sm:$0xff]  }
  0x83   : > { %v2261_v41 = vor.u32 %v2260_v59, %v2256_v56  ;;  %v12023_v56 = vld [vmem:[%s15883_s1 + $0x758] sm:$0xff]   ;;  %v2297_v59 = vor.u32 %v2295_v39, %v2285_v24 }
  0x84   : > { %v2310_v58 = vsel %vm759_vm0, %v2305_v27, %v2309_v28 }
  0x85   : > { %v2266_v17 = vsel %vm759_vm0, %v2261_v41, %v2265_v9  ;;  %v13037_v41 = vld [vmem:[%s12462_s26 + $0x60] sm:$0xff]  ;;  %v13040_v9 = vld [vmem:[%s12462_s26 + $0x68] sm:$0xff] }
  0x86   : > { %1257 = vmatmul.mubr.bf16.gmra.mrb[48].mxu0 %v12641_v62  ;;  %v1605_v62 = vshll.u32 %v8942_v35, 16  ;;  %v12987_v35 = vld [vmem:[%s12462_s26 + $0x58] sm:$0xff]  ;;  %v13062_v0 = vcombine.low %v13037_v41, %v13040_v9 }
  0x87   : > { %1264 = vmatprep.mubr.bf16.mxu0 %v8846_v45  ;;  %v12016_v45 = vld [vmem:[%s15883_s1 + $0x708] sm:$0xff]  }
  0x88   : > { %v1607_v50 = vrot.slane %v1605_v62, 2  ;;  %v2286_v62 = vsel %vm759_vm0, %v2281_v33, %v2285_v24  ;;  %v13080_v24 = vcombine.high %v12894_v49, %v12919_v6 }
  0x89   : > { %1797 = vmatmul.mubr.bf16.gmra.mrb[48].mxu1 %v1594_v44  ;;  %v12996_v44 = vcombine.high %v12874_v34, %v12891_v5 }
  0x8a   : > { %1804 = vmatprep.mubr.bf16.mxu1 %v1613_v48  ;;  %v1608_v40 = vsel %vm1479_vm1, %v1593_v15, %v1607_v50  ;;  %v12984_v15 = vld [vmem:[%s12462_s26 + $0x50] sm:$0xff]  ;;  %v12014_v48 = vld [vmem:[%s15883_s1 + $0x620] sm:$0xff]   ;;  %v2924_v4 = vshll.u32 %v13080_v24, 16 }
  0x8b   : > { %v13011_v50 = vcombine.high %v12984_v15, %v12987_v35  ;;  %v2903_v61 = vshrl.u32 %v12996_v44, 16  ;;  %v2906_v33 = vshll.u32 %v12996_v44, 16 }
  0x8d   : > { %v2339_v10 = vshll.u32 %v13011_v50, 16  ;;  %v2351_v27 = vshrl.u32 %v13011_v50, 16 }
  0x8e   : > { %1265 = vmatmul.mubr.bf16.gmra.mrb[52].mxu0 %v8845_v30  ;;  %v2299_v30 = vshll.u32 %v12967_v22, 16 }
  0x8f   : > { %2011 = vmatprep.mubr.bf16.mxu0 %v12867_v26 }
  0x91   : > { %1805 = vmatmul.mubr.bf16.gmra.mrb[52].mxu1 %v1608_v40  ;;  %v12022_v40 = vld [vmem:[%s15883_s1 + $0x628] sm:$0xff]  }
  0x92   : > { %2507 = vmatprep.mubr.bf16.mxu1 %v2278_v1  ;;  %v2325_v1 = vrot.slane %v2323_v46, 1  ;;  %v12033_v46 = vld [vmem:[%s15883_s1 + $0x728] sm:$0xff]  }
  0x96   : > { %2012 = vmatmul.mubr.bf16.vlgmr.msra.gmra.mrb[56].mxu0 %v12884_v32 }
  0x97   : > { %10277 = vmatpush3.bf16.msra.mxu0 %v11998_v55  ;;  %2019 = vmatprep.mubr.bf16.mxu0 %v12880_v42  ;;  %v13021_v55 = vcombine.low %v12984_v15, %v12987_v35 }
  0x98   : > { %10278 = vmatprep.subr.bf16.mxu0 %v11999_v60  ;;  %v2301_v60 = vrot.slane %v2299_v30, 1 }
  0x99   : > { %2508 = vmatmul.mubr.bf16.vlgmr.msra.gmra.mrb[56].mxu1 %v2266_v17 }
  0x9a   : > { %2515 = vmatprep.mubr.bf16.mxu1 %v2294_v52  ;;  %10335 = vmatpush3.bf16.msra.mxu1 %v12012_v7  ;;  %v2302_v17 = vsel %vm759_vm0, %v2297_v59, %v2301_v60  ;;  %v13058_v52 = vcombine.high %v13037_v41, %v13040_v9  ;;  %v2335_v7 = vshrl.u32 %v12975_v25, 16  ;;  %v2768_v59 = vld [vmem:[%s12462_s26 + $0x8] sm:$0xee] }
  0x9b   : > { %10279 = vmatpush3.bf16.msra.mxu0 %v12000_v13  ;;  %10336 = vmatprep.subr.bf16.mxu1 %v12015_v57  ;;  %v2321_v13 = vor.u32 %v2319_v63, %v2309_v28  ;;  %v12031_v28 = vld [vmem:[%s15883_s1 + $0x768] sm:$0xff]  }
  0x9c   : > { %10280 = vmatprep.subr.bf16.mxu0 %v12003_v12  ;;  %v2331_v12 = vshll.u32 %v13021_v55, 16  ;;  %v2355_v30 = vshll.u32 %v13058_v52, 16  ;;  %v2337_v63 = vor.u32 %v2335_v7, %v2325_v1 }
  0x9d   : > { %v2326_v57 = vsel %vm759_vm0, %v2321_v13, %v2325_v1  ;;  %v13117_v1 = vrot.slane %v2906_v33, 2  ;;  %v12040_v33 = vld [vmem:[%s15883_s1 + $0x738] sm:$0xff]  }
  0x9e   : > { %2020 = vmatmul.mubr.bf16.gmra.mrb[60].mxu0 %v12900_v53  ;;  %10337 = vmatpush3.bf16.msra.mxu1 %v12016_v45  ;;  %v13082_v45 = vrot.slane %v2331_v12, 1 }
  0x9f   : > { %2027 = vmatprep.mubr.bf16.mxu0 %v12904_v54  ;;  %10281 = vmatpush3.bf16.msra.mxu0 %v12004_v16  ;;  %v13052_v16 = vcombine.low %v12874_v34, %v12891_v5  ;;  %v12029_v34 = vld [vmem:[%s15883_s1 + $0x630] sm:$0xff]   ;;  %v13071_v5 = vrot.slane %v2903_v61, 1  ;;  %v2362_v61 = vshrl.u32 %v13058_v52, 16 }
  0xa0   : > { %10282 = vmatprep.subr.bf16.mxu0 %v12007_v43  ;;  %10338 = vmatprep.subr.bf16.mxu1 %v12019_v38  ;;  %v2327_v43 = vshrl.u32 %v13002_v47, 16  ;;  %v12035_v38 = vld [vmem:[%s15883_s1 + $0x678] sm:$0xff]  }
  0xa1   : > { %2516 = vmatmul.mubr.bf16.gmra.mrb[60].mxu1 %v2286_v62  ;;  %v2886_v39 = vshrl.u32 %v13052_v16, 16  ;;  %v2347_v62 = vshll.u32 %v13062_v0, 16 }
  0xa2   : > { %2523 = vmatprep.mubr.bf16.mxu1 %v2310_v58  ;;  %10339 = vmatpush3.bf16.msra.mxu1 %v12021_v51  ;;  %v2313_v58 = vor.u32 %v2311_v19, %v2301_v60  ;;  %v2889_v51 = vshll.u32 %v13052_v16, 16  ;;  %v2921_v60 = vshrl.u32 %v13080_v24, 16  ;;  %v9135_v19 = vcombine.low %v2768_v59, %v12871_v29 }
  0xa3   : > { %10283 = vmatpush3.bf16.msra.mxu0 %v12008_v23  ;;  %10340 = vmatprep.subr.bf16.mxu1 %v12023_v56  ;;  %v12030_v23 = vld [vmem:[%s15883_s1 + $0x720] sm:$0xff]   ;;  %v13136_v7 = vrot.slane %v2886_v39, 1  ;;  %v13156_v39 = vcombine.high %v12922_v8, %v12947_v37 }
  0xa4   : > { %10284 = vmatprep.subr.bf16.mxu0 %v12013_v36  ;;  %v2341_v36 = vrot.slane %v2339_v10, 1  ;;  %v12041_v56 = vld [vmem:[%s15883_s1 + $0x7c0] sm:$0xff]   ;;  %v2318_v13 = vsel %vm759_vm0, %v2313_v58, %v13064_v20  ;;  %v13122_v10 = vrot.slane %v2355_v30, 1  ;;  %v2881_v58 = vshll.u32 %v9135_v19, 16 }
  0xa6   : > { %2028 = vmatmul.mubr.bf16.gmra.mrb[64].mxu0 %v12930_v18  ;;  %10341 = vmatpush3.bf16.msra.mxu1 %v12024_v31  ;;  %v2343_v31 = vshrl.u32 %v13021_v55, 16  ;;  %v2342_v12 = vsel %vm759_vm0, %v2337_v63, %v2341_v36  ;;  %v2353_v30 = vor.u32 %v2351_v27, %v2341_v36  ;;  %v13160_v63 = vcombine.low %v12922_v8, %v12947_v37 }
  0xa7   : > { %2035 = vmatprep.mubr.bf16.mxu0 %v12938_v3  ;;  %10285 = vmatpush3.bf16.msra.mxu0 %v12014_v48  ;;  %v12036_v48 = vld [vmem:[%s15883_s1 + $0x638] sm:$0xff]  }
  0xa8   : > { %10286 = vmatprep.subr.bf16.mxu0 %v12020_v2  ;;  %10342 = vmatprep.subr.bf16.mxu1 %v12028_v14  ;;  %v12037_v2 = vld [vmem:[%s15883_s1 + $0x770] sm:$0xff]   ;;  %v9136_v14 = vcombine.high %v2768_v59, %v12871_v29  ;;  %v2329_v29 = vor.u32 %v2327_v43, %v13064_v20  ;;  %v13165_v20 = vcombine.high %v12953_v21, %v12984_v15 }
  0xa9   : > { %2524 = vmatmul.mubr.bf16.gmra.mrb[64].mxu1 %v2302_v17  ;;  %v12039_v17 = vld [vmem:[%s15883_s1 + $0x778] sm:$0xff]   ;;  %v13177_v59 = vcombine.low %v12953_v21, %v12984_v15  ;;  %v2345_v21 = vor.u32 %v2343_v31, %v13082_v45  ;;  %v13208_v31 = vcombine.low %v12987_v35, %v13037_v41 }
  0xaa   : > { %2531 = vmatprep.mubr.bf16.mxu1 %v2326_v57  ;;  %10343 = vmatpush3.bf16.msra.mxu1 %v12030_v23  ;;  %v13140_v57 = vrot.slane %v2921_v60, 1  ;;  %v1336_v23 = vld [vmem:[%s12462_s26 + $0x68] sm:$0x77]  ;;  %v2334_v43 = vsel %vm759_vm0, %v2329_v29, %v13082_v45 }
  0xab   : > { %10287 = vmatpush3.bf16.msra.mxu0 %v12022_v40  ;;  %10344 = vmatprep.subr.bf16.mxu1 %v12031_v28  ;;  %v13113_v40 = vcombine.low %v12894_v49, %v12919_v6  ;;  %v2359_v49 = vshrl.u32 %v13062_v0, 16  ;;  %v12038_v6 = vld [vmem:[%s15883_s1 + $0x730] sm:$0xff]   ;;  %v13147_v28 = vrot.slane %v2924_v4, 2  ;;  %v8973_v36 = vcombine.high %v13037_v41, %v1336_v23 }
  0xac   : > { %10288 = vmatprep.subr.bf16.mxu0 %v12027_v11  ;;  %v13124_v11 = vrot.slane %v2347_v62, 1  ;;  %v2895_v62 = vshrl.u32 %v9136_v14, 16  ;;  %v13181_v4 = vrot.slane %v2881_v58, 2  ;;  %v2948_v29 = vshrl.u32 %v13177_v59, 16 }
  0xad   : > { %v2951_v45 = vshll.u32 %v13177_v59, 16 }
  0xae   : > { %2036 = vmatmul.mubr.bf16.gmra.mrb[68].mxu0 %v12967_v22  ;;  %10345 = vmatpush3.bf16.msra.mxu1 %v12033_v46  ;;  %v2898_v46 = vshll.u32 %v9136_v14, 16  ;;  %v2897_v8 = vrot.slane %v2895_v62, 1  ;;  %v2350_v58 = vsel %vm759_vm0, %v2345_v21, %v13124_v11  ;;  %v2969_v21 = vshll.u32 %v13208_v31, 16 }
  0xaf   : > { %2043 = vmatprep.mubr.bf16.mxu0 %v12975_v25  ;;  %10289 = vmatpush3.bf16.msra.mxu0 %v12029_v34  ;;  %v13138_v34 = vrot.slane %v2889_v51, 2  ;;  %v2939_v51 = vshrl.u32 %v13156_v39, 16 }
  0xb0   : > { %10290 = vmatprep.subr.bf16.mxu0 %v12035_v38  ;;  %10346 = vmatprep.subr.bf16.mxu1 %v12037_v2  ;;  %v2912_v38 = vshrl.u32 %v13113_v40, 16  ;;  %v2915_v2 = vshll.u32 %v13113_v40, 16  ;;  %v2900_v37 = vrot.slane %v2898_v46, 2  ;;  %v8972_v46 = vcombine.low %v13037_v41, %v1336_v23 }
  0xb1   : > { %2532 = vmatmul.mubr.bf16.gmra.mrb[68].mxu1 %v2318_v13  ;;  %v2942_v13 = vshll.u32 %v13156_v39, 16  ;;  %v13191_v15 = vrot.slane %v2939_v51, 1  ;;  %v13220_v51 = vrot.slane %v2948_v29, 1 }
  0xb2   : > { %2539 = vmatprep.mubr.bf16.mxu1 %v2342_v12  ;;  %10347 = vmatpush3.bf16.msra.mxu1 %v12038_v6  ;;  %v13170_v27 = vrot.slane %v2912_v38, 1  ;;  %v2930_v12 = vshrl.u32 %v13160_v63, 16  ;;  %v12320_v6 = vmov 0.0   ;;  %v13187_v14 = vrot.slane %v2915_v2, 2 }
  0xb3   : > { %10291 = vmatpush3.bf16.msra.mxu0 %v12036_v48  ;;  %10348 = vmatprep.subr.bf16.mxu1 %v12039_v17  ;;  %v2878_v48 = vshrl.u32 %v9135_v19, 16  ;;  %v2933_v17 = vshll.u32 %v13160_v63, 16  ;;  %v2957_v19 = vshrl.u32 %v13165_v20, 16  ;;  %v2960_v38 = vshll.u32 %v13165_v20, 16 }
  0xb4   : > { %10392 = vmatprep.subr.bf16.mxu0 %v12041_v56  ;;  %v2358_v56 = vsel %vm759_vm0, %v2353_v30, %v13122_v10  ;;  %v2944_v30 = vrot.slane %v2942_v13, 2  ;;  %v13200_v62 = vrot.slane %v2930_v12, 1  ;;  %v2364_v2 = vor.u32 %v2362_v61, %v13122_v10  ;;  %v12046_v12 = vld [vmem:[%s15883_s1 + $0x780] sm:$0xff]  }
  0xb5   : > { %v13179_v60 = vrot.slane %v2878_v48, 1  ;;  %v13203_v48 = vrot.slane %v2933_v17, 2  ;;  %v13218_v23 = vrot.slane %v2960_v38, 2  ;;  %v2966_v61 = vshrl.u32 %v13208_v31, 16  ;;  %v12047_v17 = vld [vmem:[%s15883_s1 + $0x7c8] sm:$0xff]  }
  0xb6   : > { %2044 = vmatmul.mubr.bf16.gmra.mrb[72].mxu0 %v13002_v47  ;;  %10349 = vmatpush3.bf16.msra.mxu1 %v12040_v33  ;;  %v13196_v33 = vcombine.high %v12987_v35, %v13037_v41  ;;  %v13223_v35 = vrot.slane %v2951_v45, 2  ;;  %v2901_v10 = vor.u32 %v2900_v37, %v2897_v8  ;;  %v2909_v13 = vor.u32 %v13117_v1, %v13071_v5  ;;  %v12048_v5 = vld [vmem:[%s15883_s1 + $0x788] sm:$0xff]   ;;  %v12059_v45 = vld [vmem:[%s15883_s1 + $0x7e0] sm:$0xff]  }
  0xb7   : > { %2051 = vmatprep.mubr.bf16.mxu0 %v13011_v50  ;;  %10807 = vmatprep.subr.bf16.mxu1 %v12320_v6  ;;  %v2884_v0 = vor.u32 %v13181_v4, %v13179_v60  ;;  %v2892_v1 = vor.u32 %v13138_v34, %v13136_v7  ;;  %v13256_v37 = vrot.slane %v2966_v61, 1  ;;  %v13258_v38 = vrot.slane %v2969_v21, 2  ;;  %v12052_v34 = vld [vmem:[%s15883_s1 + $0x790] sm:$0xff]   ;;  %v12055_v4 = vld [vmem:[%s15883_s1 + $0x7d8] sm:$0xff]   ;;  %v12084_v21 = vld [vmem:[%s15885_s3 + $0x68] sm:$0xff]  }
  0xb8   : > { %v2978_v52 = vshll.u32 %v13196_v33, 16  ;;  %v2910_v8 = vsel %vm1479_vm1, %v2901_v10, %v2909_v13  ;;  %v2927_v7 = vor.u32 %v13147_v28, %v13140_v57  ;;  %v12056_v57 = vld [vmem:[%s15883_s1 + $0x798] sm:$0xff]   ;;  %v2918_v28 = vor.u32 %v13187_v14, %v13170_v27  ;;  %v12077_v27 = vld [vmem:[%s15885_s3 + $0x50] sm:$0xff]  }
  0xb9   : > { %2540 = vmatmul.mubr.bf16.gmra.mrb[72].mxu1 %v2334_v43  ;;  %v13215_v43 = vrot.slane %v2957_v19, 1  ;;  %v2781_v19 = vld [vmem:[%s12462_s26 + $0x70] sm:$0xff]  ;;  %v2893_v60 = vsel %vm1479_vm1, %v2884_v0, %v2892_v1  ;;  %v2936_v61 = vor.u32 %v13203_v48, %v13200_v62  ;;  %v12082_v48 = vld [vmem:[%s15885_s3 + $0x60] sm:$0xff]   ;;  %v2782_v0 = vld [vmem:[%s12462_s26 + $0x78] sm:$0x11] }
  0xba   : > { %2547 = vmatprep.mubr.bf16.mxu1 %v2358_v56  ;;  %v2919_v14 = vsel %vm1479_vm1, %v2892_v1, %v2918_v28  ;;  %v12067_v10 = vld [vmem:[%s15883_s1 + $0x7f0] sm:$0xff]  }
  0xbb   : > { %v12085_v1 = vld [vmem:[%s15885_s3 + $0x70] sm:$0xff]  }
  0xbe   : > { %2052 = vmatmul.mubr.bf16.gmra.mrb[76].mxu0 %v13021_v55 }
  0xbf   : > { %2059 = vmatprep.mubr.bf16.mxu0 %v8973_v36  ;;  %v2975_v36 = vshrl.u32 %v13196_v33, 16 }
  0xc1   : > { %2548 = vmatmul.mubr.bf16.gmra.mrb[76].mxu1 %v2350_v58  ;;  %v13225_v56 = vrot.slane %v2975_v36, 1  ;;  %v12063_v36 = vld [vmem:[%s15883_s1 + $0x7e8] sm:$0xff]  }
  0xc2   : > { %2555 = vmatprep.mubr.bf16.mxu1 %v2364_v2  ;;  %v2945_v2 = vor.u32 %v2944_v30, %v13191_v15  ;;  %v13305_v15 = vcombine.low %v13040_v9, %v2781_v19 }
  0xc4   : > { %v2946_v30 = vsel %vm1479_vm1, %v2927_v7, %v2945_v2  ;;  %v2987_v62 = vshll.u32 %v13305_v15, 16 }
  0xc6   : > { %2060 = vmatmul.mubr.bf16.gmra.mrb[80].mxu0 %v8972_v46  ;;  %v2928_v46 = vsel %vm1479_vm1, %v2909_v13, %v2927_v7  ;;  %v2963_v13 = vor.u32 %v13218_v23, %v13215_v43  ;;  %v12073_v43 = vld [vmem:[%s15883_s1 + $0x7f8] sm:$0xff]   ;;  %v3224_v7 = vld [vmem:[%s12462_s26 + $0x8] sm:$0xcc] }
  0xc7   : > { %2711 = vmatprep.mubr.bf16.mxu0 %v12867_v26  ;;  %v2361_v26 = vor.u32 %v2359_v49, %v13124_v11  ;;  %v12051_v11 = vld [vmem:[%s15883_s1 + $0x7d0] sm:$0xff]   ;;  %v13254_v49 = vrot.slane %v2978_v52, 2  ;;  %v12064_v52 = vld [vmem:[%s15883_s1 + $0x7a8] sm:$0xff]  }
  0xc8   : > { %v2964_v23 = vsel %vm1479_vm1, %v2945_v2, %v2963_v13 }
  0xc9   : > { %2556 = vmatmul.mubr.bf16.gmra.mrb[80].mxu1 %v2361_v26  ;;  %v2937_v26 = vsel %vm1479_vm1, %v2918_v28, %v2936_v61 }
  0xca   : > { %3153 = vmatprep.mubr.bf16.mxu1 %v2910_v8  ;;  %v2981_v8 = vor.u32 %v13254_v49, %v13225_v56  ;;  %v2989_v56 = vrot.slane %v2987_v62, 2  ;;  %v13365_v49 = vcombine.high %v2782_v0, %v2782_v0  ;;  %v3272_v62 = vrot.slane %v13080_v24, 2 }
  0xce   : > { %2712 = vmatmul.mubr.bf16.vlgmr.msra.gmra.mrb[84].mxu0 %v12884_v32  ;;  %v13261_v32 = vcombine.high %v13040_v9, %v2781_v19  ;;  %v2984_v9 = vshrl.u32 %v13305_v15, 16  ;;  %v2954_v19 = vor.u32 %v13223_v35, %v13220_v51  ;;  %v2972_v35 = vor.u32 %v13258_v38, %v13256_v37 }
  0xcf   : > { %10393 = vmatpush3.bf16.msra.mxu0 %v12046_v12  ;;  %2719 = vmatprep.mubr.bf16.mxu0 %v12880_v42  ;;  %v12069_v42 = vld [vmem:[%s15885_s3 + $0x40] sm:$0xff]   ;;  %v3007_v38 = vshll.u32 %v13365_v49, 16 }
  0xd0   : > { %10394 = vmatprep.subr.bf16.mxu0 %v12047_v17  ;;  %v2993_v29 = vshrl.u32 %v13261_v32, 16  ;;  %v2996_v58 = vshll.u32 %v13261_v32, 16  ;;  %v12076_v17 = vld [vmem:[%s15883_s1 + $0x7b8] sm:$0xff]   ;;  %v2955_v51 = vsel %vm1479_vm1, %v2936_v61, %v2954_v19 }
  0xd1   : > { %3154 = vmatmul.mubr.bf16.vlgmr.msra.gmra.mrb[84].mxu1 %v2893_v60 }
  0xd2   : > { %3161 = vmatprep.mubr.bf16.mxu1 %v2928_v46  ;;  %10808 = vmatpush3.bf16.msra.mxu1 %v12069_v42  ;;  %v2995_v12 = vrot.slane %v2993_v29, 1 }
  0xd3   : > { %10395 = vmatpush3.bf16.msra.mxu0 %v12048_v5  ;;  %10809 = vmatprep.subr.bf16.mxu1 %v12320_v6  ;;  %v2986_v5 = vrot.slane %v2984_v9, 1 }
  0xd4   : > { %10396 = vmatprep.subr.bf16.mxu0 %v12051_v11  ;;  %v2131_v11 = vld [vmem:[%s12462_s26 + $0x68] sm:$0x77] }
  0xd5   : > { %v9086_v37 = vcombine.high %v13037_v41, %v2131_v11  ;;  %v2990_v46 = vor.u32 %v2989_v56, %v2986_v5 }
  0xd6   : > { %2720 = vmatmul.mubr.bf16.gmra.mrb[88].mxu0 %v12900_v53  ;;  %v12074_v53 = vld [vmem:[%s15885_s3 + $0x48] sm:$0xff]  }
  0xd7   : > { %2727 = vmatprep.mubr.bf16.mxu0 %v12904_v54  ;;  %10397 = vmatpush3.bf16.msra.mxu0 %v12052_v34  ;;  %v12060_v54 = vld [vmem:[%s15883_s1 + $0x7a0] sm:$0xff]   ;;  %v12087_v34 = vld [vmem:[%s15885_s3 + $0x78] sm:$0xff]  }
  0xd8   : > { %10398 = vmatprep.subr.bf16.mxu0 %v12055_v4  ;;  %10810 = vmatpush3.bf16.msra.mxu1 %v12074_v53  ;;  %v12304_v4 = vld [vmem:[%s12462_s26 + $0x10] sm:$0xff]  ;;  %v13386_v53 = vld [vmem:[%s15884_s2] ss:$0 sm:$0xff] }
  0xd9   : > { %10811 = vmatprep.subr.bf16.mxu1 %v12320_v6  ;;  %3162 = vmatmul.mubr.bf16.gmra.mrb[88].mxu1 %v2919_v14  ;;  %v9200_v29 = vcombine.high %v3224_v7, %v12304_v4 }
  0xda   : > { %3169 = vmatprep.mubr.bf16.mxu1 %v2946_v30  ;;  %v9199_v30 = vcombine.low %v3224_v7, %v12304_v4 }
  0xdb   : > { %10399 = vmatpush3.bf16.msra.mxu0 %v12056_v57  ;;  %v3009_v57 = vrot.slane %v3007_v38, 2 }
  0xdc   : > { %10400 = vmatprep.subr.bf16.mxu0 %v12059_v45  ;;  %10812 = vmatpush3.bf16.msra.mxu1 %v12077_v27  ;;  %v3267_v45 = vrot.slane %v9200_v29, 2  ;;  %v9085_v27 = vcombine.low %v13037_v41, %v2131_v11  ;;  %v3264_v41 = vrot.slane %v9199_v30, 2  ;;  %v3270_v11 = vrot.slane %v13113_v40, 2 }
  0xdd   : > { %10813 = vmatprep.subr.bf16.mxu1 %v12320_v6 }
  0xde   : > { %2728 = vmatmul.mubr.bf16.gmra.mrb[92].mxu0 %v12930_v18  ;;  %v12080_v18 = vld [vmem:[%s15885_s3 + $0x58] sm:$0xff]  }
  0xdf   : > { %2735 = vmatprep.mubr.bf16.mxu0 %v12938_v3  ;;  %10401 = vmatpush3.bf16.msra.mxu0 %v12060_v54  ;;  %v12068_v3 = vld [vmem:[%s15883_s1 + $0x7b0] sm:$0xff]  }
  0xe0   : > { %10402 = vmatprep.subr.bf16.mxu0 %v12063_v36  ;;  %10814 = vmatpush3.bf16.msra.mxu1 %v12080_v18 }
  0xe1   : > { %10815 = vmatprep.subr.bf16.mxu1 %v12320_v6  ;;  %3170 = vmatmul.mubr.bf16.gmra.mrb[92].mxu1 %v2937_v26 }
  0xe2   : > { %3177 = vmatprep.mubr.bf16.mxu1 %v2964_v23 }
  0xe3   : > { %10403 = vmatpush3.bf16.msra.mxu0 %v12064_v52 }
  0xe4   : > { %10404 = vmatprep.subr.bf16.mxu0 %v12067_v10  ;;  %10816 = vmatpush3.bf16.msra.mxu1 %v12082_v48 }
  0xe5   : > { %10817 = vmatprep.subr.bf16.mxu1 %v12320_v6 }
  0xe6   : > { %2736 = vmatmul.mubr.bf16.gmra.mrb[96].mxu0 %v12967_v22  ;;  %v2998_v22 = vrot.slane %v2996_v58, 2  ;;  %v3268_v58 = vrot.slane %v12996_v44, 2 }
  0xe7   : > { %2743 = vmatprep.mubr.bf16.mxu0 %v12975_v25  ;;  %10405 = vmatpush3.bf16.msra.mxu0 %v12068_v3  ;;  %v2982_v25 = vsel %vm1479_vm1, %v2963_v13, %v2981_v8 }
  0xe8   : > { %10406 = vmatprep.subr.bf16.mxu0 %v12073_v43  ;;  %10818 = vmatpush3.bf16.msra.mxu1 %v12084_v21  ;;  %v2999_v60 = vor.u32 %v2998_v22, %v2995_v12  ;;  %v3269_v44 = vsel %vm3263_vm2, %v3267_v45, %v3268_v58  ;;  %v3265_v12 = vrot.slane %v13052_v16, 2  ;;  %v12081_v16 = vld [vmem:[%s15885_s3] sm:$0xff]  }
  0xe9   : > { %10819 = vmatprep.subr.bf16.mxu1 %v12320_v6  ;;  %3178 = vmatmul.mubr.bf16.gmra.mrb[96].mxu1 %v2955_v51  ;;  %v3273_v51 = vsel %vm3263_vm2, %v3268_v58, %v3272_v62 }
  0xea   : > { %3185 = vmatprep.mubr.bf16.mxu1 %v2982_v25  ;;  %v3000_v42 = vsel %vm1479_vm1, %v2981_v8, %v2999_v60  ;;  %v3010_v61 = vsel %vm1479_vm1, %v2999_v60, %v3009_v57  ;;  %v3266_v5 = vsel %vm3263_vm2, %v3264_v41, %v3265_v12  ;;  %v12083_v60 = vld [vmem:[%s15885_s3 + $0x8] sm:$0xff]   ;;  %v3271_v57 = vsel %vm3263_vm2, %v3265_v12, %v3270_v11 }
  0xeb   : > { %10407 = vmatpush3.bf16.msra.mxu0 %v12076_v17  ;;  %v3278_v12 = vrot.slane %v13177_v59, 2 }
  0xec   : > { %10851 = vmatprep.subr.bf16.mxu0 %v12320_v6  ;;  %10820 = vmatpush3.bf16.msra.mxu1 %v12085_v1 }
  0xed   : > { %10821 = vmatprep.subr.bf16.mxu1 %v12320_v6 }
  0xee   : > { %2744 = vmatmul.mubr.bf16.gmra.mrb[100].mxu0 %v13002_v47  ;;  %v2973_v47 = vsel %vm1479_vm1, %v2954_v19, %v2972_v35 }
  0xef   : > { %2751 = vmatprep.mubr.bf16.mxu0 %v13011_v50  ;;  %v13375_v50 = vcombine.low %v2782_v0, %v2782_v0 }
  0xf0   : > { %10822 = vmatpush3.bf16.msra.mxu1 %v12087_v34 }
  0xf1   : > { %10895 = vmatprep.subr.bf16.mxu1 %v12320_v6  ;;  %3186 = vmatmul.mubr.bf16.gmra.mrb[100].mxu1 %v2973_v47  ;;  %v3002_v28 = vshll.u32 %v13375_v50, 16  ;;  %v3276_v47 = vrot.slane %v13156_v39, 2 }
  0xf2   : > { %3193 = vmatprep.mubr.bf16.mxu1 %v3000_v42 }
  0xf3   : > { %v3004_v9 = vrot.slane %v3002_v28, 2  ;;  %v3277_v30 = vsel %vm3263_vm2, %v3272_v62, %v3276_v47  ;;  %v3282_v62 = vrot.slane %v13208_v31, 2 }
  0xf5   : > { %v3005_v23 = vsel %vm1479_vm1, %v2990_v46, %v3004_v9  ;;  %v3280_v9 = vrot.slane %v13165_v20, 2  ;;  %v3286_v20 = vrot.slane %v13305_v15, 2 }
  0xf6   : > { %2752 = vmatmul.mubr.bf16.gmra.mrb[104].mxu0 %v13021_v55  ;;  %v2991_v55 = vsel %vm1479_vm1, %v2972_v35, %v2990_v46 }
  0xf7   : > { %2759 = vmatprep.mubr.bf16.mxu0 %v9086_v37 }
  0xf9   : > { %v9944_v2 = vpop.f32.mrb[0].mxu0  ;;  %3194 = vmatmul.mubr.bf16.gmra.mrb[104].mxu1 %v2991_v55 }
  0xfa   : > { %v9945_v54 = vpop.f32.mrb[1].mxu0  ;;  %3201 = vmatprep.mubr.bf16.mxu1 %v3010_v61 }
  0xfb   : > { %v9946_v14 = vadd.f32 %v9945_v54, %v9944_v2  ;;  %v9947_v36 = vpop.f32.mrb[2].mxu0  ;;  %v10002_v43 = vpop.f32.mrb[0].mxu1  ;;  %v12086_v54 = vld [vmem:[%s15885_s3 + $0x10] sm:$0xff]  }
  0xfc   : > { %v9948_v52 = vpop.f32.mrb[3].mxu0  ;;  %v10003_v21 = vpop.f32.mrb[1].mxu1 }
  0xfd   : > { %v540_v10 = vadd.f32 %v9946_v14, %v13386_v53  ;;  %v9949_v18 = vadd.f32 %v9948_v52, %v9947_v36  ;;  %v13403_v0 = vadd.f32 %v10003_v21, %v10002_v43  ;;  %v10005_v24 = vpop.f32.mrb[2].mxu1  ;;  %v3274_v52 = vrot.slane %v13160_v63, 2 }
  0xfe   : > { %2760 = vmatmul.mubr.bf16.gmra.mrb[108].mxu0 %v9085_v27  ;;  %v10006_v25 = vpop.f32.mrb[3].mxu1  ;;  %v3288_v21 = vrot.slane %v13261_v32, 2 }
  0xff   : > { %v543_v13 = vadd.f32 %v9949_v18, %v13386_v53  ;;  %3436 = vmatprep.mubr.bf16.mxu0 %v3269_v44  ;;  %v594_v3 = vmax.f32 %v540_v10, 0.0  ;;  %v13409_v7 = vadd.f32 %v10006_v25, %v10005_v24 }
 0x101   : > { %v595_v48 = vmax.f32 %v543_v13, 0.0  ;;  %v9950_v26 = vpop.f32.mrb[4].mxu0  ;;  %3202 = vmatmul.mubr.bf16.gmra.mrb[108].mxu1 %v3005_v23 }
 0x102   : > { %v9951_v17 = vpop.f32.mrb[5].mxu0  ;;  %10823 = vmatprep.mubr.msk.bf16.mxu1 %vm12321_vm3, %v12320_v6 }
 0x103   : > { %v13397_v19 = vpack.c.bf16 %v595_v48, %v594_v3  ;;  %v9952_v8 = vadd.f32 %v9951_v17, %v9950_v26  ;;  %v9953_v22 = vpop.f32.mrb[6].mxu0  ;;  %v10008_v42 = vpop.f32.mrb[4].mxu1  ;;  %v3284_v3 = vrot.slane %v13196_v33, 2  ;;  %v12088_v17 = vld [vmem:[%s15885_s3 + $0x18] sm:$0xff]   ;;  %v3292_v33 = vrot.slane %v13365_v49, 2 }
 0x104   : > { %v9954_v1 = vpop.f32.mrb[7].mxu0  ;;  %v10009_v28 = vpop.f32.mrb[5].mxu1 }
 0x105   : > { %615 = vst [vmem:[#allocation2] sm:$0xff] %v13397_v19  ;;  %v548_v35 = vadd.f32 %v9952_v8, %v13386_v53  ;;  %v9955_v56 = vadd.f32 %v9954_v1, %v9953_v22  ;;  %v3600_v37 = vshll.u32 %v13397_v19, 16  ;;  %v13428_v55 = vadd.f32 %v10009_v28, %v10008_v42  ;;  %v10011_v14 = vpop.f32.mrb[6].mxu1 }
 0x106   : > { %3437 = vmatmul.mubr.bf16.vlgmr.msra.gmra.mrb[112].mxu0 %v3266_v5  ;;  %v3598_v61 = vshrl.u32 %v13397_v19, 16  ;;  %v10012_v44 = vpop.f32.mrb[7].mxu1  ;;  %v12092_v5 = vld [vmem:[%s15885_s3 + $0x80] sm:$0xff]  }
 0x107   : > { %v551_v34 = vadd.f32 %v9955_v56, %v13386_v53  ;;  %10852 = vmatpush3.bf16.msra.mxu0 %v12081_v16  ;;  %3444 = vmatprep.mubr.bf16.mxu0 %v3273_v51  ;;  %v596_v38 = vmax.f32 %v548_v35, 0.0  ;;  %v3602_v27 = vrot.slane %v3600_v37, 1  ;;  %v13443_v48 = vadd.f32 %v10012_v44, %v10011_v14  ;;  %v12089_v51 = vld [vmem:[%s15885_s3 + $0x20] sm:$0xff]  }
 0x108   : > { %10853 = vmatprep.subr.bf16.mxu0 %v12320_v6 }
 0x109   : > { %v597_v4 = vmax.f32 %v551_v34, 0.0  ;;  %v9956_v29 = vpop.f32.mrb[8].mxu0  ;;  %v3603_v43 = vor.u32 %v3602_v27, %v3598_v61  ;;  %v3275_v34 = vsel %vm3263_vm2, %v3270_v11, %v3274_v52  ;;  %v3281_v11 = vsel %vm3263_vm2, %v3276_v47, %v3280_v9  ;;  %v12090_v61 = vld [vmem:[%s15885_s3 + $0x28] sm:$0xff]  }
 0x10a   : > { %v9957_v46 = vpop.f32.mrb[9].mxu0 }
 0x10b   : > { %v13423_v45 = vpack.c.bf16 %v597_v4, %v596_v38  ;;  %v9958_v58 = vadd.f32 %v9957_v46, %v9956_v29  ;;  %v9959_v2 = vpop.f32.mrb[10].mxu0  ;;  %10854 = vmatpush3.bf16.msra.mxu0 %v12083_v60  ;;  %v10014_v25 = vpop.f32.mrb[8].mxu1  ;;  %v12093_v60 = vld [vmem:[%s15885_s3 + $0x88] sm:$0xff]  }
 0x10c   : > { %v9960_v36 = vpop.f32.mrb[11].mxu0  ;;  %10855 = vmatprep.subr.bf16.mxu0 %v12320_v6  ;;  %v10015_v37 = vpop.f32.mrb[9].mxu1 }
 0x10d   : > { %v556_v10 = vadd.f32 %v9958_v58, %v13386_v53  ;;  %v9961_v18 = vadd.f32 %v9960_v36, %v9959_v2  ;;  %v3605_v13 = vshll.u32 %v13423_v45, 16  ;;  %v3609_v41 = vshrl.u32 %v13423_v45, 16  ;;  %v10017_v46 = vpop.f32.mrb[10].mxu1 }
 0x10e   : > { %3445 = vmatmul.mubr.bf16.gmra.mrb[116].mxu0 %v3271_v57  ;;  %v13470_v42 = vadd.f32 %v10015_v37, %v10014_v25  ;;  %v10018_v57 = vpop.f32.mrb[11].mxu1  ;;  %v4171_v39 = vrot.slane %v13423_v45, 6 }
 0x10f   : > { %v559_v26 = vadd.f32 %v9961_v18, %v13386_v53  ;;  %3452 = vmatprep.mubr.bf16.mxu0 %v3277_v30  ;;  %10856 = vmatpush3.bf16.msra.mxu0 %v12086_v54  ;;  %v3607_v23 = vrot.slane %v3605_v13, 1  ;;  %v598_v8 = vmax.f32 %v556_v10, 0.0  ;;  %v3958_v22 = vrot.slane %v3609_v41, 5  ;;  %v12095_v10 = vld [vmem:[%s15885_s3 + $0x90] sm:$0xff]  }
 0x110   : > { %10857 = vmatprep.subr.bf16.mxu0 %v12320_v6  ;;  %v3959_v35 = vrot.slane %v3605_v13, 6  ;;  %v13482_v27 = vadd.f32 %v10018_v57, %v10017_v46 }
 0x111   : > { %v599_v16 = vmax.f32 %v559_v26, 0.0  ;;  %v9962_v24 = vpop.f32.mrb[12].mxu0  ;;  %v3608_v1 = vsel %vm759_vm0, %v3603_v43, %v3607_v23  ;;  %v3611_v36 = vor.u32 %v3609_v41, %v3607_v23 }
 0x112   : > { %v9963_v56 = vpop.f32.mrb[13].mxu0  ;;  %10824 = vmatmul.mubr.bf16.vlgmr.msra.gmra.mrb[112].mxu1 %v3608_v1 }
 0x113   : > { %v13466_v38 = vpack.c.bf16 %v599_v16, %v598_v8  ;;  %v9964_v4 = vadd.f32 %v9963_v56, %v9962_v24  ;;  %v9965_v29 = vpop.f32.mrb[14].mxu0  ;;  %10858 = vmatpush3.bf16.msra.mxu0 %v12088_v17  ;;  %10827 = vmatprep.mubr.msk.bf16.mxu1 %vm12321_vm3, %v12320_v6  ;;  %v12091_v17 = vld [vmem:[%s15885_s3 + $0x30] sm:$0xff]   ;;  %v10020_v8 = vpop.f32.mrb[12].mxu1  ;;  %v3279_v16 = vsel %vm3263_vm2, %v3274_v52, %v3278_v12  ;;  %v12096_v24 = vld [vmem:[%s15885_s3 + $0x98] sm:$0xff]  }
 0x114   : > { %v9966_v40 = vpop.f32.mrb[15].mxu0  ;;  %10859 = vmatprep.subr.bf16.mxu0 %v12320_v6  ;;  %10896 = vmatpush3.bf16.msra.mxu1 %v12092_v5  ;;  %v10021_v1 = vpop.f32.mrb[13].mxu1 }
 0x115   : > { %v564_v28 = vadd.f32 %v9964_v4, %v13386_v53  ;;  %v9967_v58 = vadd.f32 %v9966_v40, %v9965_v29  ;;  %v3613_v2 = vshll.u32 %v13466_v38, 16  ;;  %v3617_v54 = vshrl.u32 %v13466_v38, 16  ;;  %10897 = vmatprep.subr.bf16.mxu1 %v12320_v6  ;;  %v10023_v52 = vpop.f32.mrb[14].mxu1 }
 0x116   : > { %3453 = vmatmul.mubr.bf16.gmra.mrb[120].mxu0 %v3275_v34  ;;  %v4173_v47 = vrot.slane %v13466_v38, 6  ;;  %v13518_v63 = vadd.f32 %v10021_v1, %v10020_v8 }
 0x117   : > { %v567_v14 = vadd.f32 %v9967_v58, %v13386_v53  ;;  %3460 = vmatprep.mubr.bf16.mxu0 %v3281_v11  ;;  %v3615_v30 = vrot.slane %v3613_v2, 1  ;;  %10860 = vmatpush3.bf16.msra.mxu0 %v12089_v51  ;;  %v3962_v44 = vrot.slane %v3617_v54, 5  ;;  %v3963_v18 = vrot.slane %v3613_v2, 6 }
 0x118   : > { %10861 = vmatprep.subr.bf16.mxu0 %v12320_v6  ;;  %10898 = vmatpush3.bf16.msra.mxu1 %v12093_v60  ;;  %v13497_v13 = vsel %vm4169_vm4, %v4171_v39, %v4173_v47  ;;  %v600_v41 = vmax.f32 %v564_v28, 0.0  ;;  %v13512_v51 = vor.u32 %v3959_v35, %v3958_v22  ;;  %v3285_v22 = vsel %vm3263_vm2, %v3280_v9, %v3284_v3  ;;  %v10024_v35 = vpop.f32.mrb[15].mxu1 }
 0x119   : > { %v601_v26 = vmax.f32 %v567_v14, 0.0  ;;  %v9968_v43 = vpop.f32.mrb[16].mxu0  ;;  %v3616_v23 = vsel %vm759_vm0, %v3611_v36, %v3615_v30  ;;  %10899 = vmatprep.subr.bf16.mxu1 %v12320_v6  ;;  %v3964_v25 = vor.u32 %v3963_v18, %v3962_v44  ;;  %v13535_v9 = vadd.f32 %v10024_v35, %v10023_v52  ;;  %v12094_v14 = vld [vmem:[%s15885_s3 + $0x38] sm:$0xff]  }
 0x11a   : > { %v9969_v5 = vpop.f32.mrb[17].mxu0  ;;  %10828 = vmatmul.mubr.bf16.gmra.mrb[116].mxu1 %v3616_v23  ;;  %v3619_v58 = vor.u32 %v3617_v54, %v3615_v30  ;;  %v3283_v23 = vsel %vm3263_vm2, %v3278_v12, %v3282_v62  ;;  %v3289_v12 = vsel %vm3263_vm2, %v3284_v3, %v3288_v21 }
 0x11b   : > { %v13514_v56 = vpack.c.bf16 %v601_v26, %v600_v41  ;;  %v9970_v34 = vadd.f32 %v9969_v5, %v9968_v43  ;;  %v9971_v60 = vpop.f32.mrb[18].mxu0  ;;  %10831 = vmatprep.mubr.msk.bf16.mxu1 %vm12321_vm3, %v12320_v6  ;;  %10862 = vmatpush3.bf16.msra.mxu0 %v12090_v61  ;;  %v13528_v4 = vsel %vm3949_vm5, %v13512_v51, %v3964_v25  ;;  %v12098_v61 = vld [vmem:[%s15885_s3 + $0xa0] sm:$0xff]   ;;  %v10026_v26 = vpop.f32.mrb[16].mxu1 }
 0x11c   : > { %v9972_v37 = vpop.f32.mrb[19].mxu0  ;;  %10863 = vmatprep.subr.bf16.mxu0 %v12320_v6  ;;  %10900 = vmatpush3.bf16.msra.mxu1 %v12095_v10 }
 0x11d   : > { %v572_v29 = vadd.f32 %v9970_v34, %v13386_v53  ;;  %v9973_v46 = vadd.f32 %v9972_v37, %v9971_v60  ;;  %v3621_v40 = vshll.u32 %v13514_v56, 16  ;;  %v3625_v11 = vshrl.u32 %v13514_v56, 16  ;;  %10901 = vmatprep.subr.bf16.mxu1 %v12320_v6 }
 0x11e   : > { %3461 = vmatmul.mubr.bf16.gmra.mrb[124].mxu0 %v3279_v16  ;;  %v4175_v57 = vrot.slane %v13514_v56, 6 }
 0x11f   : > { %v575_v28 = vadd.f32 %v9973_v46, %v13386_v53  ;;  %3468 = vmatprep.mubr.bf16.mxu0 %v3285_v22  ;;  %v3623_v2 = vrot.slane %v3621_v40, 1  ;;  %10864 = vmatpush3.bf16.msra.mxu0 %v12091_v17  ;;  %v3966_v36 = vrot.slane %v3625_v11, 5  ;;  %v3967_v44 = vrot.slane %v3621_v40, 6  ;;  %v10027_v17 = vpop.f32.mrb[17].mxu1 }
 0x120   : > { %10865 = vmatprep.subr.bf16.mxu0 %v12320_v6  ;;  %10902 = vmatpush3.bf16.msra.mxu1 %v12096_v24  ;;  %v13547_v10 = vsel %vm4169_vm4, %v4173_v47, %v4175_v57  ;;  %v602_v18 = vmax.f32 %v572_v29, 0.0  ;;  %v12100_v47 = vld [vmem:[%s15885_s3 + $0xa8] sm:$0xff]   ;;  %v13563_v1 = vadd.f32 %v10027_v17, %v10026_v26  ;;  %v10029_v59 = vpop.f32.mrb[18].mxu1 }
 0x121   : > { %v603_v54 = vmax.f32 %v575_v28, 0.0  ;;  %v9974_v30 = vpop.f32.mrb[20].mxu0  ;;  %v3624_v41 = vsel %vm759_vm0, %v3619_v58, %v3623_v2  ;;  %10903 = vmatprep.subr.bf16.mxu1 %v12320_v6  ;;  %v3968_v8 = vor.u32 %v3967_v44, %v3966_v36  ;;  %v10030_v60 = vpop.f32.mrb[19].mxu1 }
 0x122   : > { %v9975_v43 = vpop.f32.mrb[21].mxu0  ;;  %10832 = vmatmul.mubr.bf16.gmra.mrb[120].mxu1 %v3624_v41  ;;  %v13579_v3 = vadd.f32 %v10030_v60, %v10029_v59  ;;  %v3293_v59 = vsel %vm3263_vm2, %v3288_v21, %v3292_v33 }
 0x123   : > { %v13559_v5 = vpack.c.bf16 %v603_v54, %v602_v18  ;;  %v9976_v16 = vadd.f32 %v9975_v43, %v9974_v30  ;;  %v9977_v24 = vpop.f32.mrb[22].mxu0  ;;  %10835 = vmatprep.mubr.msk.bf16.mxu1 %vm12321_vm3, %v12320_v6  ;;  %10866 = vmatpush3.bf16.msra.mxu0 %v12094_v14  ;;  %v13572_v52 = vsel %vm3949_vm5, %v3964_v25, %v3968_v8  ;;  %v12101_v14 = vld [vmem:[%s15885_s3 + $0xb0] sm:$0xff]   ;;  %v10032_v30 = vpop.f32.mrb[20].mxu1 }
 0x124   : > { %v9978_v34 = vpop.f32.mrb[23].mxu0  ;;  %10939 = vmatprep.subr.bf16.mxu0 %v12320_v6  ;;  %10904 = vmatpush3.bf16.msra.mxu1 %v12098_v61  ;;  %v3627_v25 = vor.u32 %v3625_v11, %v3623_v2  ;;  %v10033_v2 = vpop.f32.mrb[21].mxu1 }
 0x125   : > { %v580_v37 = vadd.f32 %v9976_v16, %v13386_v53  ;;  %v9979_v22 = vadd.f32 %v9978_v34, %v9977_v24  ;;  %v3629_v35 = vshll.u32 %v13559_v5, 16  ;;  %v3633_v29 = vshrl.u32 %v13559_v5, 16  ;;  %10905 = vmatprep.subr.bf16.mxu1 %v12320_v6  ;;  %v10035_v16 = vpop.f32.mrb[22].mxu1 }
 0x126   : > { %3469 = vmatmul.mubr.bf16.gmra.mrb[128].mxu0 %v3283_v23  ;;  %v4177_v46 = vrot.slane %v13559_v5, 6  ;;  %v13603_v17 = vadd.f32 %v10033_v2, %v10032_v30  ;;  %v10036_v34 = vpop.f32.mrb[23].mxu1 }
 0x127   : > { %v583_v40 = vadd.f32 %v9979_v22, %v13386_v53  ;;  %3476 = vmatprep.mubr.bf16.mxu0 %v3289_v12  ;;  %v3631_v28 = vrot.slane %v3629_v35, 1  ;;  %v3970_v58 = vrot.slane %v3633_v29, 5  ;;  %v3971_v36 = vrot.slane %v3629_v35, 6 }
 0x128   : > { %10906 = vmatpush3.bf16.msra.mxu1 %v12100_v47  ;;  %v13587_v61 = vsel %vm4169_vm4, %v4175_v57, %v4177_v46  ;;  %v604_v49 = vmax.f32 %v580_v37, 0.0  ;;  %v3287_v57 = vsel %vm3263_vm2, %v3282_v62, %v3286_v20  ;;  %v12103_v47 = vld [vmem:[%s15885_s3 + $0xb8] sm:$0xff]   ;;  %v3290_v22 = vrot.slane %v13375_v50, 2 }
 0x129   : > { %v605_v44 = vmax.f32 %v583_v40, 0.0  ;;  %v9980_v18 = vpop.f32.mrb[24].mxu0  ;;  %v3632_v54 = vsel %vm759_vm0, %v3627_v25, %v3631_v28  ;;  %10907 = vmatprep.subr.bf16.mxu1 %v12320_v6  ;;  %v3972_v41 = vor.u32 %v3971_v36, %v3970_v58  ;;  %v13616_v32 = vadd.f32 %v10036_v34, %v10035_v16 }
 0x12a   : > { %v9981_v11 = vpop.f32.mrb[25].mxu0  ;;  %10836 = vmatmul.mubr.bf16.gmra.mrb[124].mxu1 %v3632_v54 }
 0x12b   : > { %v13591_v26 = vpack.c.bf16 %v605_v44, %v604_v49  ;;  %v9982_v43 = vadd.f32 %v9981_v11, %v9980_v18  ;;  %v9983_v23 = vpop.f32.mrb[26].mxu0  ;;  %10839 = vmatprep.mubr.msk.bf16.mxu1 %vm12321_vm3, %v12320_v6  ;;  %v13609_v31 = vsel %vm3949_vm5, %v3968_v8, %v3972_v41  ;;  %v3635_v8 = vor.u32 %v3633_v29, %v3631_v28  ;;  %v10038_v44 = vpop.f32.mrb[24].mxu1 }
 0x12c   : > { %v9984_v24 = vpop.f32.mrb[27].mxu0  ;;  %10908 = vmatpush3.bf16.msra.mxu1 %v12101_v14  ;;  %v10039_v28 = vpop.f32.mrb[25].mxu1 }
 0x12d   : > { %v588_v62 = vadd.f32 %v9982_v43, %v13386_v53  ;;  %v9985_v12 = vadd.f32 %v9984_v24, %v9983_v23  ;;  %v3637_v60 = vshll.u32 %v13591_v26, 16  ;;  %v3641_v37 = vshrl.u32 %v13591_v26, 16  ;;  %10909 = vmatprep.subr.bf16.mxu1 %v12320_v6  ;;  %v10041_v43 = vpop.f32.mrb[26].mxu1 }
 0x12e   : > { %3477 = vmatmul.mubr.bf16.gmra.mrb[132].mxu0 %v3287_v57  ;;  %v4179_v21 = vrot.slane %v13591_v26, 6  ;;  %v13636_v2 = vadd.f32 %v10039_v28, %v10038_v44  ;;  %v10042_v57 = vpop.f32.mrb[27].mxu1 }
 0x12f   : > { %v591_v35 = vadd.f32 %v9985_v12, %v13386_v53  ;;  %3484 = vmatprep.mubr.bf16.mxu0 %v3293_v59  ;;  %v3639_v33 = vrot.slane %v3637_v60, 1  ;;  %v3974_v40 = vrot.slane %v3641_v37, 5  ;;  %v3975_v25 = vrot.slane %v3637_v60, 6 }
 0x130   : > { %10910 = vmatpush3.bf16.msra.mxu1 %v12103_v47  ;;  %v13625_v58 = vsel %vm4169_vm4, %v4177_v46, %v4179_v21  ;;  %v606_v50 = vmax.f32 %v588_v62, 0.0  ;;  %v3291_v46 = vsel %vm3263_vm2, %v3286_v20, %v3290_v22  ;;  %v13643_v59 = vadd.f32 %v10042_v57, %v10041_v43 }
 0x131   : > { %v607_v14 = vmax.f32 %v591_v35, 0.0  ;;  %v10060_v36 = vpop.f32.mrb[28].mxu0  ;;  %v3640_v49 = vsel %vm759_vm0, %v3635_v8, %v3639_v33  ;;  %10983 = vmatprep.subr.bf16.mxu1 %v12320_v6  ;;  %v13629_v18 = vor.u32 %v3975_v25, %v3974_v40 }
 0x132   : > { %v10061_v29 = vpop.f32.mrb[29].mxu0  ;;  %10840 = vmatmul.mubr.bf16.gmra.mrb[128].mxu1 %v3640_v49 }
 0x133   : > { %v614_v54 = vpack.c.bf16 %v607_v14, %v606_v50  ;;  %v10062_v30 = vadd.f32 %v10061_v29, %v10060_v36  ;;  %v10063_v11 = vpop.f32.mrb[30].mxu0  ;;  %10843 = vmatprep.mubr.msk.bf16.mxu1 %vm12321_vm3, %v12320_v6  ;;  %v13640_v47 = vsel %vm3949_vm5, %v3972_v41, %v13629_v18  ;;  %v12097_v41 = vld [vmem:[%s15885_s3 + $0xc0] sm:$0xff]   ;;  %v10118_v12 = vpop.f32.mrb[28].mxu1 }
 0x134   : > { %v10064_v23 = vpop.f32.mrb[31].mxu0  ;;  %v10119_v60 = vpop.f32.mrb[29].mxu1 }
 0x135   : > { %621 = vst [vmem:[#allocation2 + $0x30] sm:$0x7f] %v614_v54  ;;  %v1219_v16 = vadd.f32 %v10062_v30, %v13403_v0  ;;  %v10065_v24 = vadd.f32 %v10064_v23, %v10063_v11  ;;  %v13653_v25 = vadd.f32 %v10119_v60, %v10118_v12 }
 0x136   : > { %3485 = vmatmul.mubr.bf16.gmra.mrb[136].mxu0 %v3291_v46  ;;  %v3643_v46 = vor.u32 %v3641_v37, %v3639_v33  ;;  %v12102_v37 = vld [vmem:[%s15885_s3 + $0xd0] sm:$0xff]  }
 0x137   : > { %v1280_v15 = vadd.f32 %v13386_v53, %v1219_v16  ;;  %v1222_v20 = vadd.f32 %v10065_v24, %v13409_v7  ;;  %10867 = vmatprep.mubr.msk.bf16.mxu0 %vm12321_vm3, %v12320_v6  ;;  %v10121_v7 = vpop.f32.mrb[30].mxu1 }
 0x138   : > { %v10122_v36 = vpop.f32.mrb[31].mxu1 }
 0x139   : > { %v1281_v34 = vadd.f32 %v13386_v53, %v1222_v20  ;;  %v10066_v62 = vpop.f32.mrb[32].mxu0  ;;  %v1294_v22 = vmax.f32 %v1280_v15, 0.0  ;;  %v13662_v54 = vadd.f32 %v10122_v36, %v10121_v7 }
 0x13a   : > { %v10067_v0 = vpop.f32.mrb[33].mxu0 }
 0x13b   : > { %v1295_v35 = vmax.f32 %v1281_v34, 0.0  ;;  %v10068_v8 = vadd.f32 %v10067_v0, %v10066_v62  ;;  %v10069_v40 = vpop.f32.mrb[34].mxu0 }
 0x13c   : > { %v10070_v50 = vpop.f32.mrb[35].mxu0  ;;  %v13655_v14 = vld [vmem:[#allocation2 + $0x30] sm:$0x1]  ;;  %v10124_v33 = vpop.f32.mrb[32].mxu1 }
 0x13d   : > { %v13657_v49 = vpack.c.bf16 %v1295_v35, %v1294_v22  ;;  %v1227_v44 = vadd.f32 %v10068_v8, %v13428_v55  ;;  %v10071_v29 = vadd.f32 %v10070_v50, %v10069_v40  ;;  %v3645_v28 = vshll.u32 %v13655_v14, 16  ;;  %v3930_v55 = vld [vmem:[#allocation2] sm:$0xe0]  ;;  %v10125_v20 = vpop.f32.mrb[33].mxu1 }
 0x13e   : > { %10868 = vmatmul.mubr.bf16.vlgmr.msra.gmra.mrb[140].mxu0 %v13397_v19  ;;  %v12099_v19 = vld [vmem:[%s15885_s3 + $0xc8] sm:$0xff]   ;;  %v3951_v24 = vshrl.u32 %v3930_v55, 16  ;;  %v3954_v15 = vshll.u32 %v3930_v55, 16  ;;  %v13682_v0 = vadd.f32 %v10125_v20, %v10124_v33  ;;  %v10127_v60 = vpop.f32.mrb[34].mxu1 }
 0x13f   : > { %1316 = vst [vmem:[#allocation2 + $0x38] sm:$0xff] %v13657_v49  ;;  %v1282_v30 = vadd.f32 %v13386_v53, %v1227_v44  ;;  %v1230_v11 = vadd.f32 %v10071_v29, %v13443_v48  ;;  %10940 = vmatpush3.bf16.msra.mxu0 %v12097_v41  ;;  %v3647_v43 = vrot.slane %v3645_v28, 1  ;;  %10871 = vmatprep.mubr.msk.bf16.mxu0 %vm12321_vm3, %v12320_v6  ;;  %v10128_v35 = vpop.f32.mrb[35].mxu1  ;;  %v12104_v29 = vld [vmem:[%s15885_s3 + $0xd8] sm:$0xff]  }
 0x140   : > { %10941 = vmatprep.subr.bf16.mxu0 %v12320_v6  ;;  %v13688_v50 = vadd.f32 %v10128_v35, %v10127_v60  ;;  %v3953_v28 = vrot.slane %v3951_v24, 5 }
 0x141   : > { %v1283_v23 = vadd.f32 %v13386_v53, %v1230_v11  ;;  %v10072_v57 = vpop.f32.mrb[36].mxu0  ;;  %v3648_v48 = vsel %vm759_vm0, %v3643_v46, %v3647_v43  ;;  %v1296_v34 = vmax.f32 %v1282_v30, 0.0  ;;  %v3956_v30 = vrot.slane %v3954_v15, 6 }
 0x142   : > { %v10073_v16 = vpop.f32.mrb[37].mxu0  ;;  %10844 = vmatmul.mubr.bf16.gmra.mrb[132].mxu1 %v3648_v48 }
 0x143   : > { %v1297_v62 = vmax.f32 %v1283_v23, 0.0  ;;  %v10074_v41 = vadd.f32 %v10073_v16, %v10072_v57  ;;  %v10075_v12 = vpop.f32.mrb[38].mxu0  ;;  %10942 = vmatpush3.bf16.msra.mxu0 %v12099_v19  ;;  %10847 = vmatprep.mubr.msk.bf16.mxu1 %vm12321_vm3, %v12320_v6  ;;  %v3957_v24 = vor.u32 %v3956_v30, %v3953_v28 }
 0x144   : > { %v10076_v22 = vpop.f32.mrb[39].mxu0  ;;  %10943 = vmatprep.subr.bf16.mxu0 %v12320_v6  ;;  %v10130_v43 = vpop.f32.mrb[36].mxu1 }
 0x145   : > { %v13685_v8 = vpack.c.bf16 %v1297_v62, %v1296_v34  ;;  %v1235_v40 = vadd.f32 %v10074_v41, %v13470_v42  ;;  %v10077_v7 = vadd.f32 %v10076_v22, %v10075_v12  ;;  %v3649_v42 = vshrl.u32 %v13655_v14, 16  ;;  %v10131_v55 = vpop.f32.mrb[37].mxu1  ;;  %v13720_v12 = vld [vmem:[%s15884_s2] ss:$0 sm:$0xff] }
 0x146   : > { %10872 = vmatmul.mubr.bf16.gmra.mrb[144].mxu0 %v13423_v45  ;;  %v13707_v33 = vadd.f32 %v10131_v55, %v10130_v43  ;;  %v12115_v45 = vld [vmem:[%s15885_s3 + $0x148] sm:$0xff]  }
 0x147   : > { %1317 = vst [vmem:[#allocation2 + $0x40] sm:$0xff] %v13685_v8  ;;  %v1284_v36 = vadd.f32 %v13386_v53, %v1235_v40  ;;  %v1238_v44 = vadd.f32 %v10077_v7, %v13482_v27  ;;  %10875 = vmatprep.mubr.msk.bf16.mxu0 %vm12321_vm3, %v12320_v6  ;;  %10944 = vmatpush3.bf16.msra.mxu0 %v12102_v37  ;;  %v12105_v27 = vld [vmem:[%s15885_s3 + $0xe0] sm:$0xff]  }
 0x148   : > { %10945 = vmatprep.subr.bf16.mxu0 %v12320_v6 }
 0x149   : > { %v1285_v11 = vadd.f32 %v13386_v53, %v1238_v44  ;;  %v10078_v46 = vpop.f32.mrb[40].mxu0  ;;  %v1298_v23 = vmax.f32 %v1284_v36, 0.0  ;;  %v10133_v53 = vpop.f32.mrb[38].mxu1  ;;  %v12107_v44 = vld [vmem:[%s15885_s3 + $0xf0] sm:$0xff]  }
 0x14a   : > { %v10079_v19 = vpop.f32.mrb[41].mxu0  ;;  %10848 = vmatmul.mubr.bf16.gmra.mrb[136].mxu1 %v3649_v42  ;;  %v10134_v15 = vpop.f32.mrb[39].mxu1 }
 0x14b   : > { %v1299_v57 = vmax.f32 %v1285_v11, 0.0  ;;  %v10080_v48 = vadd.f32 %v10079_v19, %v10078_v46  ;;  %v10081_v37 = vpop.f32.mrb[42].mxu0  ;;  %10911 = vmatprep.mubr.msk.bf16.mxu1 %vm12321_vm3, %v12320_v6  ;;  %10946 = vmatpush3.bf16.msra.mxu0 %v12104_v29  ;;  %v13713_v41 = vadd.f32 %v10134_v15, %v10133_v53  ;;  %v12109_v29 = vld [vmem:[%s15885_s3 + $0x108] sm:$0xff]  }
 0x14c   : > { %v10082_v16 = vpop.f32.mrb[43].mxu0  ;;  %10947 = vmatprep.subr.bf16.mxu0 %v12320_v6  ;;  %v10136_v7 = vpop.f32.mrb[40].mxu1 }
 0x14d   : > { %v13710_v20 = vpack.c.bf16 %v1299_v57, %v1298_v23  ;;  %v1243_v34 = vadd.f32 %v10080_v48, %v13518_v63  ;;  %v10083_v62 = vadd.f32 %v10082_v16, %v10081_v37  ;;  %v12106_v63 = vld [vmem:[%s15885_s3 + $0xe8] sm:$0xff]   ;;  %v10137_v42 = vpop.f32.mrb[41].mxu1 }
 0x14e   : > { %10876 = vmatmul.mubr.bf16.gmra.mrb[148].mxu0 %v13466_v38  ;;  %v12108_v38 = vld [vmem:[%s15885_s3 + $0x100] sm:$0xff]   ;;  %v10139_v43 = vpop.f32.mrb[42].mxu1 }
 0x14f   : > { %1318 = vst [vmem:[#allocation2 + $0x48] sm:$0xff] %v13710_v20  ;;  %v1286_v60 = vadd.f32 %v13720_v12, %v1243_v34  ;;  %v1246_v22 = vadd.f32 %v10083_v62, %v13535_v9  ;;  %10879 = vmatprep.mubr.msk.bf16.mxu0 %vm12321_vm3, %v12320_v6  ;;  %10948 = vmatpush3.bf16.msra.mxu0 %v12105_v27  ;;  %v10140_v27 = vpop.f32.mrb[43].mxu1  ;;  %v12112_v34 = vld [vmem:[%s15885_s3 + $0x118] sm:$0xff]  }
 0x150   : > { %10949 = vmatprep.subr.bf16.mxu0 %v12320_v6  ;;  %v3961_v9 = vsel %vm3949_vm5, %v3957_v24, %v13512_v51  ;;  %v13744_v51 = vadd.f32 %v10137_v42, %v10136_v7  ;;  %v13751_v48 = vadd.f32 %v10140_v27, %v10139_v43 }
 0x151   : > { %v1287_v35 = vadd.f32 %v13720_v12, %v1246_v22  ;;  %v10084_v40 = vpop.f32.mrb[44].mxu0  ;;  %v1300_v28 = vmax.f32 %v1286_v60, 0.0 }
 0x152   : > { %v10085_v36 = vpop.f32.mrb[45].mxu0  ;;  %10912 = vmatmul.mubr.bf16.vlgmr.msra.gmra.mrb[140].mxu1 %v3961_v9 }
 0x153   : > { %v1301_v30 = vmax.f32 %v1287_v35, 0.0  ;;  %v10086_v11 = vadd.f32 %v10085_v36, %v10084_v40  ;;  %v10087_v46 = vpop.f32.mrb[46].mxu0  ;;  %10915 = vmatprep.mubr.msk.bf16.mxu1 %vm12321_vm3, %v12320_v6  ;;  %10950 = vmatpush3.bf16.msra.mxu0 %v12106_v63 }
 0x154   : > { %v10088_v19 = vpop.f32.mrb[47].mxu0  ;;  %10951 = vmatprep.subr.bf16.mxu0 %v12320_v6  ;;  %10984 = vmatpush3.bf16.msra.mxu1 %v12108_v38 }
 0x155   : > { %v13747_v55 = vpack.c.bf16 %v1301_v30, %v1300_v28  ;;  %v1251_v23 = vadd.f32 %v10086_v11, %v13563_v1  ;;  %v10089_v57 = vadd.f32 %v10088_v19, %v10087_v46  ;;  %10985 = vmatprep.subr.bf16.mxu1 %v12320_v6  ;;  %v12110_v1 = vld [vmem:[%s15885_s3 + $0xf8] sm:$0xff]  }
 0x156   : > { %10880 = vmatmul.mubr.bf16.gmra.mrb[152].mxu0 %v13514_v56  ;;  %v12111_v56 = vld [vmem:[%s15885_s3 + $0x110] sm:$0xff]  }
 0x157   : > { %1319 = vst [vmem:[#allocation2 + $0x50] sm:$0xff] %v13747_v55  ;;  %v1288_v37 = vadd.f32 %v13720_v12, %v1251_v23  ;;  %v1254_v53 = vadd.f32 %v10089_v57, %v13579_v3  ;;  %10883 = vmatprep.mubr.msk.bf16.mxu0 %vm12321_vm3, %v12320_v6  ;;  %10952 = vmatpush3.bf16.msra.mxu0 %v12107_v44  ;;  %v10142_v3 = vpop.f32.mrb[44].mxu1 }
 0x158   : > { %10953 = vmatprep.subr.bf16.mxu0 %v12320_v6  ;;  %10986 = vmatpush3.bf16.msra.mxu1 %v12109_v29  ;;  %v10143_v62 = vpop.f32.mrb[45].mxu1 }
 0x159   : > { %v1289_v16 = vadd.f32 %v13720_v12, %v1254_v53  ;;  %v10090_v24 = vpop.f32.mrb[48].mxu0  ;;  %10987 = vmatprep.subr.bf16.mxu1 %v12320_v6  ;;  %v1302_v60 = vmax.f32 %v1288_v37, 0.0  ;;  %v13774_v35 = vadd.f32 %v10143_v62, %v10142_v3  ;;  %v10145_v40 = vpop.f32.mrb[46].mxu1 }
 0x15a   : > { %v10091_v15 = vpop.f32.mrb[49].mxu0  ;;  %10916 = vmatmul.mubr.bf16.gmra.mrb[144].mxu1 %v13528_v4  ;;  %v10146_v4 = vpop.f32.mrb[47].mxu1 }
 0x15b   : > { %v1303_v22 = vmax.f32 %v1289_v16, 0.0  ;;  %v10092_v63 = vadd.f32 %v10091_v15, %v10090_v24  ;;  %v10093_v38 = vpop.f32.mrb[50].mxu0  ;;  %10919 = vmatprep.mubr.msk.bf16.mxu1 %vm12321_vm3, %v12320_v6  ;;  %10954 = vmatpush3.bf16.msra.mxu0 %v12110_v1  ;;  %v13781_v29 = vadd.f32 %v10146_v4, %v10145_v40 }
 0x15c   : > { %v10094_v9 = vpop.f32.mrb[51].mxu0  ;;  %10988 = vmatpush3.bf16.msra.mxu1 %v12111_v56  ;;  %11027 = vmatprep.subr.bf16.mxu0 %v12320_v6  ;;  %v13802_v56 = vld [vmem:[#allocation2] sm:$0xc0] }
 0x15d   : > { %v13777_v7 = vpack.c.bf16 %v1303_v22, %v1302_v60  ;;  %v1259_v36 = vadd.f32 %v10092_v63, %v13603_v17  ;;  %v10095_v44 = vadd.f32 %v10094_v9, %v10093_v38  ;;  %10989 = vmatprep.subr.bf16.mxu1 %v12320_v6  ;;  %v12114_v17 = vld [vmem:[%s15885_s3 + $0x120] sm:$0xff]   ;;  %v3931_v60 = vld [vmem:[#allocation2 + $0x30] sm:$0x3f]  ;;  %v4170_v38 = vrot.slane %v13802_v56, 6 }
 0x15e   : > { %10884 = vmatmul.mubr.bf16.gmra.mrb[156].mxu0 %v13559_v5  ;;  %v10148_v5 = vpop.f32.mrb[48].mxu1  ;;  %v3979_v4 = vshrl.u32 %v3931_v60, 16 }
 0x15f   : > { %1320 = vst [vmem:[#allocation2 + $0x58] sm:$0xff] %v13777_v7  ;;  %v1290_v42 = vadd.f32 %v13720_v12, %v1259_v36  ;;  %v1262_v28 = vadd.f32 %v10095_v44, %v13616_v32  ;;  %10887 = vmatprep.mubr.msk.bf16.mxu0 %vm12321_vm3, %v12320_v6  ;;  %v12116_v32 = vld [vmem:[%s15885_s3 + $0x128] sm:$0xff]   ;;  %v10149_v43 = vpop.f32.mrb[49].mxu1  ;;  %v3982_v36 = vshll.u32 %v3931_v60, 16 }
 0x160   : > { %10990 = vmatpush3.bf16.msra.mxu1 %v12112_v34  ;;  %v13800_v37 = vadd.f32 %v10149_v43, %v10148_v5  ;;  %v10151_v53 = vpop.f32.mrb[50].mxu1 }
 0x161   : > { %v1291_v30 = vadd.f32 %v13720_v12, %v1262_v28  ;;  %v10096_v11 = vpop.f32.mrb[52].mxu0  ;;  %10991 = vmatprep.subr.bf16.mxu1 %v12320_v6  ;;  %v1304_v19 = vmax.f32 %v1290_v42, 0.0 }
 0x162   : > { %v10097_v46 = vpop.f32.mrb[53].mxu0  ;;  %10920 = vmatmul.mubr.bf16.gmra.mrb[148].mxu1 %v13572_v52  ;;  %v10152_v52 = vpop.f32.mrb[51].mxu1 }
 0x163   : > { %v1305_v27 = vmax.f32 %v1291_v30, 0.0  ;;  %v10098_v23 = vadd.f32 %v10097_v46, %v10096_v11  ;;  %v10099_v57 = vpop.f32.mrb[54].mxu0  ;;  %10923 = vmatprep.mubr.msk.bf16.mxu1 %vm12321_vm3, %v12320_v6  ;;  %v13808_v15 = vadd.f32 %v10152_v52, %v10151_v53  ;;  %v13844_v53 = vrot.slane %v3979_v4, 5  ;;  %v12113_v52 = vld [vmem:[%s15885_s3 + $0x140] sm:$0xff]  }
 0x164   : > { %v10100_v1 = vpop.f32.mrb[55].mxu0  ;;  %10992 = vmatpush3.bf16.msra.mxu1 %v12114_v17  ;;  %v10154_v40 = vpop.f32.mrb[52].mxu1 }
 0x165   : > { %v13804_v16 = vpack.c.bf16 %v1305_v27, %v1304_v19  ;;  %v1267_v24 = vadd.f32 %v10098_v23, %v13636_v2  ;;  %v10101_v3 = vadd.f32 %v10100_v1, %v10099_v57  ;;  %10993 = vmatprep.subr.bf16.mxu1 %v12320_v6  ;;  %v12117_v2 = vld [vmem:[%s15885_s3 + $0x130] sm:$0xff]   ;;  %v10155_v44 = vpop.f32.mrb[53].mxu1  ;;  %v3984_v1 = vrot.slane %v3982_v36, 6 }
 0x166   : > { %10888 = vmatmul.mubr.bf16.gmra.mrb[160].mxu0 %v13591_v26  ;;  %v13833_v11 = vadd.f32 %v10155_v44, %v10154_v40  ;;  %v10157_v5 = vpop.f32.mrb[54].mxu1  ;;  %v4172_v40 = vsel %vm4169_vm4, %v4170_v38, %v4171_v39 }
 0x167   : > { %1321 = vst [vmem:[#allocation2 + $0x60] sm:$0xff] %v13804_v16  ;;  %v1292_v34 = vadd.f32 %v13720_v12, %v1267_v24  ;;  %v1270_v62 = vadd.f32 %v10101_v3, %v13643_v59  ;;  %10891 = vmatprep.mubr.msk.bf16.mxu0 %vm12321_vm3, %v12320_v6  ;;  %v13825_v59 = vld [vmem:[%s15884_s2] ss:$0 sm:$0xff] }
 0x168   : > { %10994 = vmatpush3.bf16.msra.mxu1 %v12116_v32 }
 0x169   : > { %v1293_v22 = vadd.f32 %v13720_v12, %v1270_v62  ;;  %v10176_v63 = vpop.f32.mrb[56].mxu0  ;;  %10995 = vmatprep.subr.bf16.mxu1 %v12320_v6  ;;  %v12119_v12 = vld [vmem:[%s15885_s3 + $0x138] sm:$0xff]   ;;  %v1306_v42 = vmax.f32 %v1292_v34, 0.0 }
 0x16a   : > { %v10177_v9 = vpop.f32.mrb[57].mxu0  ;;  %10924 = vmatmul.mubr.bf16.gmra.mrb[152].mxu1 %v13609_v31  ;;  %v10158_v31 = vpop.f32.mrb[55].mxu1 }
 0x16b   : > { %v1307_v28 = vmax.f32 %v1293_v22, 0.0  ;;  %v10178_v17 = vadd.f32 %v10177_v9, %v10176_v63  ;;  %v10179_v30 = vpop.f32.mrb[58].mxu0  ;;  %10927 = vmatprep.mubr.msk.bf16.mxu1 %vm12321_vm3, %v12320_v6  ;;  %v13836_v27 = vadd.f32 %v10158_v31, %v10157_v5  ;;  %v3985_v9 = vor.u32 %v3984_v1, %v13844_v53 }
 0x16c   : > { %v10180_v46 = vpop.f32.mrb[59].mxu0  ;;  %10996 = vmatpush3.bf16.msra.mxu1 %v12117_v2 }
 0x16d   : > { %v1314_v32 = vpack.c.bf16 %v1307_v28, %v1306_v42  ;;  %v2014_v43 = vadd.f32 %v10178_v17, %v13653_v25  ;;  %v10181_v19 = vadd.f32 %v10180_v46, %v10179_v30  ;;  %10997 = vmatprep.subr.bf16.mxu1 %v12320_v6  ;;  %v3986_v38 = vsel %vm3949_vm5, %v13629_v18, %v3985_v9 }
 0x16e   : > { %10892 = vmatmul.mubr.bf16.gmra.mrb[164].mxu0 %v13655_v14  ;;  %v10234_v14 = vpop.f32.mrb[56].mxu1 }
 0x16f   : > { %1322 = vst [vmem:[#allocation2 + $0x68] sm:$0x7f] %v1314_v32  ;;  %v2075_v23 = vadd.f32 %v13825_v59, %v2014_v43  ;;  %v2017_v57 = vadd.f32 %v10181_v19, %v13662_v54  ;;  %10955 = vmatprep.mubr.msk.bf16.mxu0 %vm12321_vm3, %v12320_v6  ;;  %v10235_v54 = vpop.f32.mrb[57].mxu1 }
 0x170   : > { %10998 = vmatpush3.bf16.msra.mxu1 %v12119_v12  ;;  %v13854_v2 = vadd.f32 %v10235_v54, %v10234_v14  ;;  %v10237_v22 = vpop.f32.mrb[58].mxu1  ;;  %v12120_v54 = vld [vmem:[%s15885_s3 + $0x158] sm:$0xff]  }
 0x171   : > { %v2076_v25 = vadd.f32 %v13825_v59, %v2017_v57  ;;  %v10182_v56 = vpop.f32.mrb[60].mxu0  ;;  %11071 = vmatprep.subr.bf16.mxu1 %v12320_v6  ;;  %v2089_v3 = vmax.f32 %v2075_v23, 0.0  ;;  %v10238_v4 = vpop.f32.mrb[59].mxu1 }
 0x172   : > { %v10183_v24 = vpop.f32.mrb[61].mxu0  ;;  %10928 = vmatmul.mubr.bf16.gmra.mrb[156].mxu1 %v13640_v47  ;;  %v13861_v12 = vadd.f32 %v10238_v4, %v10237_v22 }
 0x173   : > { %v2090_v34 = vmax.f32 %v2076_v25, 0.0  ;;  %v10184_v62 = vadd.f32 %v10183_v24, %v10182_v56  ;;  %v10185_v60 = vpop.f32.mrb[62].mxu0  ;;  %10931 = vmatprep.mubr.msk.bf16.mxu1 %vm12321_vm3, %v12320_v6 }
 0x174   : > { %v10186_v63 = vpop.f32.mrb[63].mxu0  ;;  %v10240_v17 = vpop.f32.mrb[60].mxu1 }
 0x175   : > { %v2103_v47 = vpack.c.bf16 %v2090_v34, %v2089_v3  ;;  %v2022_v36 = vadd.f32 %v10184_v62, %v13682_v0  ;;  %v10187_v44 = vadd.f32 %v10186_v63, %v10185_v60  ;;  %v10241_v5 = vpop.f32.mrb[61].mxu1 }
 0x176   : > { %10956 = vmatmul.mubr.bf16.vlgmr.msra.gmra.mrb[168].mxu0 %v4172_v40  ;;  %v13879_v19 = vadd.f32 %v10241_v5, %v10240_v17  ;;  %v10243_v23 = vpop.f32.mrb[62].mxu1 }
 0x177   : > { %2111 = vst [vmem:[#allocation2 + $0x70] sm:$0xff] %v2103_v47  ;;  %v2077_v42 = vadd.f32 %v13825_v59, %v2022_v36  ;;  %v2025_v28 = vadd.f32 %v10187_v44, %v13688_v50  ;;  %11028 = vmatpush3.bf16.msra.mxu0 %v12113_v52  ;;  %10959 = vmatprep.mubr.msk.bf16.mxu0 %vm12321_vm3, %v12320_v6  ;;  %v12118_v50 = vld [vmem:[%s15885_s3 + $0x150] sm:$0xff]   ;;  %v10244_v57 = vpop.f32.mrb[63].mxu1 }
 0x178   : > { %11029 = vmatprep.subr.bf16.mxu0 %v12320_v6  ;;  %v13883_v52 = vadd.f32 %v10244_v57, %v10243_v23  ;;  %v12123_v23 = vld [vmem:[%s15885_s3 + $0x170] sm:$0xff]  }
 0x179   : > { %v2078_v39 = vadd.f32 %v13825_v59, %v2025_v28  ;;  %v10188_v0 = vpop.f32.mrb[64].mxu0  ;;  %v2091_v46 = vmax.f32 %v2077_v42, 0.0 }
 0x17a   : > { %v10189_v30 = vpop.f32.mrb[65].mxu0  ;;  %10932 = vmatmul.mubr.bf16.gmra.mrb[160].mxu1 %v3986_v38 }
 0x17b   : > { %v2092_v31 = vmax.f32 %v2078_v39, 0.0  ;;  %v10190_v32 = vadd.f32 %v10189_v30, %v10188_v0  ;;  %v10191_v43 = vpop.f32.mrb[66].mxu0  ;;  %11030 = vmatpush3.bf16.msra.mxu0 %v12115_v45  ;;  %10935 = vmatprep.mubr.msk.bf16.mxu1 %vm12321_vm3, %v12320_v6  ;;  %v12122_v0 = vld [vmem:[%s15885_s3 + $0x168] sm:$0xff]  }
 0x17c   : > { %v10192_v18 = vpop.f32.mrb[67].mxu0  ;;  %11031 = vmatprep.subr.bf16.mxu0 %v12320_v6  ;;  %v10246_v34 = vpop.f32.mrb[64].mxu1 }
 0x17d   : > { %v2104_v1 = vpack.c.bf16 %v2092_v31, %v2091_v46  ;;  %v2030_v25 = vadd.f32 %v10190_v32, %v13707_v33  ;;  %v10193_v56 = vadd.f32 %v10192_v18, %v10191_v43  ;;  %v10247_v62 = vpop.f32.mrb[65].mxu1 }
 0x17e   : > { %10960 = vmatmul.mubr.bf16.gmra.mrb[172].mxu0 %v13497_v13  ;;  %v13901_v9 = vadd.f32 %v10247_v62, %v10246_v34  ;;  %v10249_v4 = vpop.f32.mrb[66].mxu1 }
 0x17f   : > { %2112 = vst [vmem:[#allocation2 + $0x78] sm:$0xff] %v2104_v1  ;;  %v2079_v14 = vadd.f32 %v13825_v59, %v2030_v25  ;;  %v2033_v24 = vadd.f32 %v10193_v56, %v13713_v41  ;;  %10963 = vmatprep.mubr.msk.bf16.mxu0 %vm12321_vm3, %v12320_v6  ;;  %11032 = vmatpush3.bf16.msra.mxu0 %v12118_v50  ;;  %v12121_v41 = vld [vmem:[%s15885_s3 + $0x160] sm:$0xff]   ;;  %v10250_v36 = vpop.f32.mrb[67].mxu1 }
 0x180   : > { %11033 = vmatprep.subr.bf16.mxu0 %v12320_v6  ;;  %v13905_v28 = vadd.f32 %v10250_v36, %v10249_v4  ;;  %v12128_v36 = vld [vmem:[%s15885_s3 + $0x198] sm:$0xff]  }
 0x181   : > { %v2080_v33 = vadd.f32 %v13825_v59, %v2033_v24  ;;  %v10194_v3 = vpop.f32.mrb[68].mxu0  ;;  %v2093_v60 = vmax.f32 %v2079_v14, 0.0 }
 0x182   : > { %v10195_v13 = vpop.f32.mrb[69].mxu0  ;;  %10936 = vmatmul.mubr.bf16.gmra.mrb[164].mxu1 %v13844_v53 }
 0x183   : > { %v2094_v22 = vmax.f32 %v2080_v33, 0.0  ;;  %v10196_v63 = vadd.f32 %v10195_v13, %v10194_v3  ;;  %v10197_v40 = vpop.f32.mrb[70].mxu0  ;;  %10999 = vmatprep.mubr.msk.bf16.mxu1 %vm12321_vm3, %v12320_v6  ;;  %11034 = vmatpush3.bf16.msra.mxu0 %v12120_v54 }
 0x184   : > { %v10198_v47 = vpop.f32.mrb[71].mxu0  ;;  %11035 = vmatprep.subr.bf16.mxu0 %v12320_v6  ;;  %v10252_v17 = vpop.f32.mrb[68].mxu1 }
 0x185   : > { %v2105_v53 = vpack.c.bf16 %v2094_v22, %v2093_v60  ;;  %v2038_v44 = vadd.f32 %v10196_v63, %v13744_v51  ;;  %v10199_v42 = vadd.f32 %v10198_v47, %v10197_v40  ;;  %v12124_v51 = vld [vmem:[%s15885_s3 + $0x180] sm:$0xff]  }
 0x186   : > { %10964 = vmatmul.mubr.bf16.gmra.mrb[176].mxu0 %v13547_v10 }
 0x187   : > { %2113 = vst [vmem:[#allocation2 + $0x80] sm:$0xff] %v2105_v53  ;;  %v2081_v45 = vadd.f32 %v13825_v59, %v2038_v44  ;;  %v2041_v39 = vadd.f32 %v10199_v42, %v13751_v48  ;;  %10967 = vmatprep.mubr.msk.bf16.mxu0 %vm12321_vm3, %v12320_v6  ;;  %11036 = vmatpush3.bf16.msra.mxu0 %v12121_v41  ;;  %v10253_v48 = vpop.f32.mrb[69].mxu1 }
 0x188   : > { %11037 = vmatprep.subr.bf16.mxu0 %v12320_v6  ;;  %v13923_v32 = vadd.f32 %v10253_v48, %v10252_v17  ;;  %v10255_v43 = vpop.f32.mrb[70].mxu1 }
 0x189   : > { %v2082_v10 = vadd.f32 %v13825_v59, %v2041_v39  ;;  %v10200_v38 = vpop.f32.mrb[72].mxu0  ;;  %v2095_v50 = vmax.f32 %v2081_v45, 0.0  ;;  %v10256_v57 = vpop.f32.mrb[71].mxu1  ;;  %v13962_v39 = vld [vmem:[#allocation2 + $0x30] sm:$0x7f] }
 0x18a   : > { %v10201_v30 = vpop.f32.mrb[73].mxu0  ;;  %11000 = vmatmul.mubr.bf16.vlgmr.msra.gmra.mrb[168].mxu1 %v13657_v49  ;;  %v12125_v49 = vld [vmem:[%s15885_s3 + $0x188] sm:$0xff]   ;;  %v13933_v14 = vadd.f32 %v10256_v57, %v10255_v43 }
 0x18b   : > { %v2096_v5 = vmax.f32 %v2082_v10, 0.0  ;;  %v10202_v46 = vadd.f32 %v10201_v30, %v10200_v38  ;;  %v10203_v31 = vpop.f32.mrb[74].mxu0  ;;  %11003 = vmatprep.mubr.msk.bf16.mxu1 %vm12321_vm3, %v12320_v6  ;;  %11038 = vmatpush3.bf16.msra.mxu0 %v12122_v0  ;;  %v4181_v10 = vrot.slane %v13962_v39, 6 }
 0x18c   : > { %v10204_v18 = vpop.f32.mrb[75].mxu0  ;;  %11039 = vmatprep.subr.bf16.mxu0 %v12320_v6  ;;  %11072 = vmatpush3.bf16.msra.mxu1 %v12124_v51  ;;  %v10258_v34 = vpop.f32.mrb[72].mxu1 }
 0x18d   : > { %v2106_v1 = vpack.c.bf16 %v2096_v5, %v2095_v50  ;;  %v2046_v25 = vadd.f32 %v10202_v46, %v13774_v35  ;;  %v10205_v56 = vadd.f32 %v10204_v18, %v10203_v31  ;;  %11073 = vmatprep.subr.bf16.mxu1 %v12320_v6  ;;  %v12126_v35 = vld [vmem:[%s15885_s3 + $0x178] sm:$0xff]   ;;  %v10259_v13 = vpop.f32.mrb[73].mxu1  ;;  %v4182_v57 = vsel %vm4169_vm4, %v4179_v21, %v4181_v10  ;;  %v12133_v21 = vld [vmem:[%s15885_s3 + $0x1b0] sm:$0xff]  }
 0x18e   : > { %10968 = vmatmul.mubr.bf16.gmra.mrb[180].mxu0 %v13587_v61  ;;  %v12127_v61 = vld [vmem:[%s15885_s3 + $0x190] sm:$0xff]   ;;  %v13951_v63 = vadd.f32 %v10259_v13, %v10258_v34  ;;  %v10261_v40 = vpop.f32.mrb[74].mxu1 }
 0x18f   : > { %2114 = vst [vmem:[#allocation2 + $0x88] sm:$0xff] %v2106_v1  ;;  %v2083_v24 = vadd.f32 %v13825_v59, %v2046_v25  ;;  %v2049_v54 = vadd.f32 %v10205_v56, %v13781_v29  ;;  %10971 = vmatprep.mubr.msk.bf16.mxu0 %vm12321_vm3, %v12320_v6  ;;  %11040 = vmatpush3.bf16.msra.mxu0 %v12123_v23  ;;  %v10262_v47 = vpop.f32.mrb[75].mxu1 }
 0x190   : > { %11041 = vmatprep.subr.bf16.mxu0 %v12320_v6  ;;  %11074 = vmatpush3.bf16.msra.mxu1 %v12125_v49  ;;  %v13960_v45 = vadd.f32 %v10262_v47, %v10261_v40  ;;  %v12132_v49 = vld [vmem:[%s15885_s3 + $0x1a8] sm:$0xff]   ;;  %v12135_v47 = vld [vmem:[%s15885_s3 + $0x1b8] sm:$0xff]  }
 0x191   : > { %v2084_v33 = vadd.f32 %v13825_v59, %v2049_v54  ;;  %v10206_v3 = vpop.f32.mrb[76].mxu0  ;;  %11075 = vmatprep.subr.bf16.mxu1 %v12320_v6  ;;  %v2097_v62 = vmax.f32 %v2083_v24, 0.0 }
 0x192   : > { %v10207_v29 = vpop.f32.mrb[77].mxu0  ;;  %11004 = vmatmul.mubr.bf16.gmra.mrb[172].mxu1 %v13685_v8 }
 0x193   : > { %v2098_v41 = vmax.f32 %v2084_v33, 0.0  ;;  %v10208_v60 = vadd.f32 %v10207_v29, %v10206_v3  ;;  %v10209_v22 = vpop.f32.mrb[78].mxu0  ;;  %11007 = vmatprep.mubr.msk.bf16.mxu1 %vm12321_vm3, %v12320_v6  ;;  %11042 = vmatpush3.bf16.msra.mxu0 %v12126_v35  ;;  %v12306_v33 = vld [vmem:[#allocation2 + $0x38] sm:$0xff] }
 0x194   : > { %v10210_v4 = vpop.f32.mrb[79].mxu0  ;;  %11076 = vmatpush3.bf16.msra.mxu1 %v12127_v61  ;;  %11115 = vmatprep.subr.bf16.mxu0 %v12320_v6  ;;  %v10264_v30 = vpop.f32.mrb[76].mxu1  ;;  %v4532_v3 = vshll.u32 %v12306_v33, 16 }
 0x195   : > { %v2107_v53 = vpack.c.bf16 %v2098_v41, %v2097_v62  ;;  %v2054_v44 = vadd.f32 %v10208_v60, %v13800_v37  ;;  %v10211_v42 = vadd.f32 %v10210_v4, %v10209_v22  ;;  %11077 = vmatprep.subr.bf16.mxu1 %v12320_v6  ;;  %v12130_v37 = vld [vmem:[%s15885_s3 + $0x1a0] sm:$0xff]  }
 0x196   : > { %10972 = vmatmul.mubr.bf16.gmra.mrb[184].mxu0 %v13625_v58  ;;  %v4534_v39 = vrot.slane %v4532_v3, 1 }
 0x197   : > { %2115 = vst [vmem:[#allocation2 + $0x90] sm:$0xff] %v2107_v53  ;;  %v2085_v0 = vadd.f32 %v13825_v59, %v2054_v44  ;;  %v2057_v51 = vadd.f32 %v10211_v42, %v13808_v15  ;;  %10975 = vmatprep.mubr.msk.bf16.mxu0 %vm12321_vm3, %v12320_v6  ;;  %v10265_v15 = vpop.f32.mrb[77].mxu1 }
 0x198   : > { %11078 = vmatpush3.bf16.msra.mxu1 %v12128_v36  ;;  %v13977_v31 = vadd.f32 %v10265_v15, %v10264_v30  ;;  %v10267_v43 = vpop.f32.mrb[78].mxu1 }
 0x199   : > { %v2086_v38 = vadd.f32 %v13825_v59, %v2057_v51  ;;  %v10212_v17 = vpop.f32.mrb[80].mxu0  ;;  %11079 = vmatprep.subr.bf16.mxu1 %v12320_v6  ;;  %v2099_v48 = vmax.f32 %v2085_v0, 0.0  ;;  %v10268_v18 = vpop.f32.mrb[79].mxu1  ;;  %v4530_v51 = vshrl.u32 %v12306_v33, 16 }
 0x19a   : > { %v10213_v58 = vpop.f32.mrb[81].mxu0  ;;  %11008 = vmatmul.mubr.bf16.gmra.mrb[176].mxu1 %v13710_v20  ;;  %v13988_v24 = vadd.f32 %v10268_v18, %v10267_v43 }
 0x19b   : > { %v2100_v50 = vmax.f32 %v2086_v38, 0.0  ;;  %v10214_v5 = vadd.f32 %v10213_v58, %v10212_v17  ;;  %v10215_v46 = vpop.f32.mrb[82].mxu0  ;;  %11011 = vmatprep.mubr.msk.bf16.mxu1 %vm12321_vm3, %v12320_v6 }
 0x19c   : > { %v10216_v23 = vpop.f32.mrb[83].mxu0  ;;  %11080 = vmatpush3.bf16.msra.mxu1 %v12130_v37  ;;  %v10270_v35 = vpop.f32.mrb[80].mxu1 }
 0x19d   : > { %v2108_v1 = vpack.c.bf16 %v2100_v50, %v2099_v48  ;;  %v2062_v25 = vadd.f32 %v10214_v5, %v13833_v11  ;;  %v10217_v56 = vadd.f32 %v10216_v23, %v10215_v46  ;;  %11081 = vmatprep.subr.bf16.mxu1 %v12320_v6  ;;  %v10271_v34 = vpop.f32.mrb[81].mxu1  ;;  %v12129_v50 = vld [vmem:[%s15885_s3 + $0x1c0] sm:$0xff]   ;;  %v4545_v5 = vshll.u32 %v13710_v20, 16  ;;  %v12139_v20 = vld [vmem:[%s15885_s3 + $0x1f0] sm:$0xff]  }
 0x19e   : > { %10976 = vmatmul.mubr.bf16.gmra.mrb[188].mxu0 %v4182_v57  ;;  %v14001_v62 = vadd.f32 %v10271_v34, %v10270_v35  ;;  %v10273_v41 = vpop.f32.mrb[82].mxu1 }
 0x19f   : > { %2116 = vst [vmem:[#allocation2 + $0x98] sm:$0xff] %v2108_v1  ;;  %v2087_v54 = vadd.f32 %v13825_v59, %v2062_v25  ;;  %v2065_v26 = vadd.f32 %v10217_v56, %v13836_v27  ;;  %10979 = vmatprep.mubr.msk.bf16.mxu0 %vm12321_vm3, %v12320_v6  ;;  %v10274_v40 = vpop.f32.mrb[83].mxu1 }
 0x1a0   : > { %11082 = vmatpush3.bf16.msra.mxu1 %v12132_v49  ;;  %v14009_v53 = vadd.f32 %v10274_v40, %v10273_v41  ;;  %v12134_v41 = vld [vmem:[%s15885_s3 + $0x1d0] sm:$0xff]  }
 0x1a1   : > { %v2088_v11 = vadd.f32 %v13825_v59, %v2065_v26  ;;  %v10292_v61 = vpop.f32.mrb[84].mxu0  ;;  %11083 = vmatprep.subr.bf16.mxu1 %v12320_v6  ;;  %v2101_v27 = vmax.f32 %v2087_v54, 0.0  ;;  %v4537_v59 = vshll.u32 %v13685_v8, 16  ;;  %v12131_v54 = vld [vmem:[%s15885_s3 + $0x1c8] sm:$0xff]   ;;  %v14038_v26 = vld [vmem:[#allocation2 + $0x40] sm:$0xff] }
 0x1a2   : > { %v10293_v29 = vpop.f32.mrb[85].mxu0  ;;  %11012 = vmatmul.mubr.bf16.gmra.mrb[180].mxu1 %v13747_v55 }
 0x1a3   : > { %v2102_v13 = vmax.f32 %v2088_v11, 0.0  ;;  %v10294_v60 = vadd.f32 %v10293_v29, %v10292_v61  ;;  %v10295_v22 = vpop.f32.mrb[86].mxu0  ;;  %11015 = vmatprep.mubr.msk.bf16.mxu1 %vm12321_vm3, %v12320_v6  ;;  %v4539_v37 = vrot.slane %v4537_v59, 1 }
 0x1a4   : > { %v10296_v4 = vpop.f32.mrb[87].mxu0  ;;  %11084 = vmatpush3.bf16.msra.mxu1 %v12133_v21  ;;  %v10350_v38 = vpop.f32.mrb[84].mxu1  ;;  %v4541_v21 = vshrl.u32 %v14038_v26, 16 }
 0x1a5   : > { %v2109_v36 = vpack.c.bf16 %v2102_v13, %v2101_v27  ;;  %v2714_v44 = vadd.f32 %v10294_v60, %v13854_v2  ;;  %v10297_v42 = vadd.f32 %v10296_v4, %v10295_v22  ;;  %11085 = vmatprep.subr.bf16.mxu1 %v12320_v6  ;;  %v4535_v2 = vor.u32 %v4534_v39, %v4530_v51  ;;  %v10351_v30 = vpop.f32.mrb[85].mxu1 }
 0x1a6   : > { %10980 = vmatmul.mubr.bf16.gmra.mrb[192].mxu0 %v4181_v10  ;;  %v10352_v10 = vadd.f32 %v10351_v30, %v10350_v38  ;;  %v10353_v15 = vpop.f32.mrb[86].mxu1  ;;  %v4543_v3 = vor.u32 %v4541_v21, %v4539_v37  ;;  %v4553_v60 = vshll.u32 %v13747_v55, 16  ;;  %v4766_v51 = vrot.slane %v4541_v21, 5  ;;  %v14066_v30 = vld [vmem:[#allocation2 + $0x48] sm:$0xff] }
 0x1a7   : > { %2117 = vst [vmem:[#allocation2 + $0xa0] sm:$0x7f] %v2109_v36  ;;  %v2717_v0 = vadd.f32 %v10297_v42, %v13861_v12  ;;  %11043 = vmatprep.mubr.msk.bf16.mxu0 %vm12321_vm3, %v12320_v6  ;;  %v10354_v46 = vpop.f32.mrb[87].mxu1  ;;  %v4540_v23 = vsel %vm759_vm0, %v4535_v2, %v4539_v37  ;;  %v4767_v37 = vrot.slane %v4537_v59, 6  ;;  %v12136_v2 = vld [vmem:[%s15885_s3 + $0x1d8] sm:$0xff]  }
 0x1a8   : > { %11086 = vmatpush3.bf16.msra.mxu1 %v12135_v47  ;;  %v14027_v18 = vadd.f32 %v10352_v10, %v2714_v44  ;;  %v10355_v57 = vadd.f32 %v10354_v46, %v10353_v15  ;;  %v4555_v8 = vrot.slane %v4553_v60, 1  ;;  %v14072_v15 = vld [vmem:[#allocation2 + $0x68] sm:$0x1] }
 0x1a9   : > { %v10298_v17 = vpop.f32.mrb[88].mxu0  ;;  %11159 = vmatprep.subr.bf16.mxu1 %v12320_v6 }
 0x1aa   : > { %v10299_v58 = vpop.f32.mrb[89].mxu0  ;;  %11016 = vmatmul.mubr.bf16.gmra.mrb[184].mxu1 %v13777_v7  ;;  %v14030_v25 = vadd.f32 %v10355_v57, %v2717_v0 }
 0x1ab   : > { %v10300_v12 = vadd.f32 %v10299_v58, %v10298_v17  ;;  %v10301_v48 = vpop.f32.mrb[90].mxu0  ;;  %11019 = vmatprep.mubr.msk.bf16.mxu1 %vm12321_vm3, %v12320_v6 }
 0x1ac   : > { %v10302_v43 = vpop.f32.mrb[91].mxu0  ;;  %v10356_v11 = vpop.f32.mrb[88].mxu1 }
 0x1ad   : > { %v2722_v49 = vadd.f32 %v10300_v12, %v13879_v19  ;;  %v10303_v1 = vadd.f32 %v10302_v43, %v10301_v48  ;;  %v4547_v19 = vrot.slane %v4545_v5, 1  ;;  %v10357_v61 = vpop.f32.mrb[89].mxu1 }
 0x1ae   : > { %11044 = vmatmul.mubr.bf16.vlgmr.msra.gmra.mrb[196].mxu0 %v4540_v23  ;;  %v10358_v34 = vadd.f32 %v10357_v61, %v10356_v11  ;;  %v10359_v29 = vpop.f32.mrb[90].mxu1 }
 0x1af   : > { %v2725_v56 = vadd.f32 %v10303_v1, %v13883_v52  ;;  %11116 = vmatpush3.bf16.msra.mxu0 %v12129_v50  ;;  %11047 = vmatprep.mubr.msk.bf16.mxu0 %vm12321_vm3, %v12320_v6  ;;  %v4739_v52 = vld [vmem:[#allocation2 + $0x38] sm:$0xe0]  ;;  %v10360_v22 = vpop.f32.mrb[91].mxu1  ;;  %v4548_v4 = vsel %vm759_vm0, %v4543_v3, %v4547_v19  ;;  %v4561_v1 = vshll.u32 %v13777_v7, 16 }
 0x1b0   : > { %11117 = vmatprep.subr.bf16.mxu0 %v12320_v6  ;;  %v4759_v47 = vshrl.u32 %v4739_v52, 16  ;;  %v4762_v36 = vshll.u32 %v4739_v52, 16  ;;  %v14053_v44 = vadd.f32 %v10358_v34, %v2722_v49  ;;  %v10361_v42 = vadd.f32 %v10360_v22, %v10359_v29  ;;  %v12137_v49 = vld [vmem:[%s15885_s3 + $0x1e0] sm:$0xff]   ;;  %v12138_v29 = vld [vmem:[%s15885_s3 + $0x1e8] sm:$0xff]  }
 0x1b1   : > { %v10304_v35 = vpop.f32.mrb[92].mxu0 }
 0x1b2   : > { %v10305_v33 = vpop.f32.mrb[93].mxu0  ;;  %11020 = vmatmul.mubr.bf16.gmra.mrb[188].mxu1 %v13804_v16  ;;  %v14058_v38 = vadd.f32 %v10361_v42, %v2725_v56  ;;  %v4761_v59 = vrot.slane %v4759_v47, 5  ;;  %v4764_v58 = vrot.slane %v4762_v36, 6 }
 0x1b3   : > { %v10306_v27 = vadd.f32 %v10305_v33, %v10304_v35  ;;  %v10307_v13 = vpop.f32.mrb[94].mxu0  ;;  %11118 = vmatpush3.bf16.msra.mxu0 %v12131_v54  ;;  %11023 = vmatprep.mubr.msk.bf16.mxu1 %vm12321_vm3, %v12320_v6 }
 0x1b4   : > { %v10308_v40 = vpop.f32.mrb[95].mxu0  ;;  %11119 = vmatprep.subr.bf16.mxu0 %v12320_v6  ;;  %v4765_v11 = vor.u32 %v4764_v58, %v4761_v59 }
 0x1b5   : > { %v2730_v39 = vadd.f32 %v10306_v27, %v13901_v9  ;;  %v10309_v0 = vadd.f32 %v10308_v40, %v10307_v13  ;;  %v4549_v9 = vshrl.u32 %v14066_v30, 16  ;;  %v4557_v27 = vshrl.u32 %v13747_v55, 16 }
 0x1b6   : > { %11048 = vmatmul.mubr.bf16.gmra.mrb[200].mxu0 %v4548_v4  ;;  %v4563_v13 = vrot.slane %v4561_v1, 1 }
 0x1b7   : > { %v2733_v17 = vadd.f32 %v10309_v0, %v13905_v28  ;;  %11051 = vmatprep.mubr.msk.bf16.mxu0 %vm12321_vm3, %v12320_v6  ;;  %11120 = vmatpush3.bf16.msra.mxu0 %v12134_v41  ;;  %v10362_v28 = vpop.f32.mrb[92].mxu1  ;;  %v4551_v50 = vor.u32 %v4549_v9, %v4547_v19  ;;  %v4768_v19 = vor.u32 %v4767_v37, %v4766_v51  ;;  %v4771_v41 = vrot.slane %v4545_v5, 6 }
 0x1b8   : > { %11121 = vmatprep.subr.bf16.mxu0 %v12320_v6  ;;  %v10363_v12 = vpop.f32.mrb[93].mxu1  ;;  %v4559_v42 = vor.u32 %v4557_v27, %v4555_v8  ;;  %v4569_v5 = vshll.u32 %v13804_v16, 16 }
 0x1b9   : > { %v10310_v10 = vpop.f32.mrb[96].mxu0  ;;  %v10364_v46 = vadd.f32 %v10363_v12, %v10362_v28  ;;  %v10365_v43 = vpop.f32.mrb[94].mxu1  ;;  %v4556_v21 = vsel %vm759_vm0, %v4551_v50, %v4555_v8  ;;  %v4769_v4 = vsel %vm3949_vm5, %v4765_v11, %v4768_v19  ;;  %v12141_v8 = vld [vmem:[%s15885_s3 + $0x208] sm:$0xff]  }
 0x1ba   : > { %v10311_v48 = vpop.f32.mrb[97].mxu0  ;;  %11024 = vmatmul.mubr.bf16.gmra.mrb[192].mxu1 %v14072_v15  ;;  %v10366_v56 = vpop.f32.mrb[95].mxu1 }
 0x1bb   : > { %v10312_v23 = vadd.f32 %v10311_v48, %v10310_v10  ;;  %v10313_v57 = vpop.f32.mrb[98].mxu0  ;;  %11087 = vmatprep.mubr.msk.bf16.mxu1 %vm12321_vm3, %v12320_v6  ;;  %11122 = vmatpush3.bf16.msra.mxu0 %v12136_v2  ;;  %v14083_v35 = vadd.f32 %v10364_v46, %v2730_v39  ;;  %v10367_v52 = vadd.f32 %v10366_v56, %v10365_v43  ;;  %v12142_v46 = vld [vmem:[%s15885_s3 + $0x1f8] sm:$0xff]   ;;  %v4565_v43 = vshrl.u32 %v13777_v7, 16 }
 0x1bc   : > { %v10314_v54 = vpop.f32.mrb[99].mxu0  ;;  %11123 = vmatprep.subr.bf16.mxu0 %v12320_v6  ;;  %v10368_v22 = vpop.f32.mrb[96].mxu1 }
 0x1bd   : > { %v2738_v61 = vadd.f32 %v10312_v23, %v13923_v32  ;;  %v10315_v33 = vadd.f32 %v10314_v54, %v10313_v57  ;;  %v14086_v3 = vadd.f32 %v10367_v52, %v2733_v17  ;;  %v4770_v32 = vrot.slane %v4549_v9, 5  ;;  %v10369_v47 = vpop.f32.mrb[97].mxu1 }
 0x1be   : > { %11052 = vmatmul.mubr.bf16.gmra.mrb[204].mxu0 %v4556_v21  ;;  %v10370_v39 = vadd.f32 %v10369_v47, %v10368_v22  ;;  %v10371_v0 = vpop.f32.mrb[98].mxu1  ;;  %v4564_v9 = vsel %vm759_vm0, %v4559_v42, %v4563_v13  ;;  %v4774_v23 = vrot.slane %v4557_v27, 5  ;;  %v4775_v57 = vrot.slane %v4553_v60, 6 }
 0x1bf   : > { %v2741_v34 = vadd.f32 %v10315_v33, %v13933_v14  ;;  %11055 = vmatprep.mubr.msk.bf16.mxu0 %vm12321_vm3, %v12320_v6  ;;  %11124 = vmatpush3.bf16.msra.mxu0 %v12137_v49  ;;  %v12140_v14 = vld [vmem:[%s15885_s3 + $0x200] sm:$0xff]   ;;  %v10372_v17 = vpop.f32.mrb[99].mxu1  ;;  %v4772_v59 = vor.u32 %v4771_v41, %v4770_v32  ;;  %v4567_v52 = vor.u32 %v4565_v43, %v4563_v13  ;;  %v12144_v13 = vld [vmem:[%s15885_s3 + $0x218] sm:$0xff]  }
 0x1c0   : > { %11125 = vmatprep.subr.bf16.mxu0 %v12320_v6  ;;  %v14115_v58 = vadd.f32 %v10370_v39, %v2738_v61  ;;  %v10373_v28 = vadd.f32 %v10372_v17, %v10371_v0  ;;  %v4776_v32 = vor.u32 %v4775_v57, %v4774_v23  ;;  %v4778_v39 = vrot.slane %v4565_v43, 5 }
 0x1c1   : > { %v10316_v40 = vpop.f32.mrb[100].mxu0  ;;  %v4773_v54 = vsel %vm3949_vm5, %v4768_v19, %v4772_v59  ;;  %v4779_v0 = vrot.slane %v4561_v1, 6 }
 0x1c2   : > { %v10317_v36 = vpop.f32.mrb[101].mxu0  ;;  %11088 = vmatmul.mubr.bf16.vlgmr.msra.gmra.mrb[196].mxu1 %v4769_v4  ;;  %v14119_v48 = vadd.f32 %v10373_v28, %v2741_v34  ;;  %v4577_v34 = vshll.u32 %v14072_v15, 16 }
 0x1c3   : > { %v10318_v51 = vadd.f32 %v10317_v36, %v10316_v40  ;;  %v10319_v37 = vpop.f32.mrb[102].mxu0  ;;  %11091 = vmatprep.mubr.msk.bf16.mxu1 %vm12321_vm3, %v12320_v6  ;;  %11126 = vmatpush3.bf16.msra.mxu0 %v12138_v29  ;;  %v4573_v36 = vshrl.u32 %v13804_v16, 16  ;;  %v14188_v16 = vld [vmem:[%s15884_s2] ss:$0 sm:$0xff] }
 0x1c4   : > { %v10320_v2 = vpop.f32.mrb[103].mxu0  ;;  %11127 = vmatprep.subr.bf16.mxu0 %v12320_v6  ;;  %11160 = vmatpush3.bf16.msra.mxu1 %v12140_v14  ;;  %v10374_v49 = vpop.f32.mrb[100].mxu1  ;;  %v4579_v42 = vrot.slane %v4577_v34, 1 }
 0x1c5   : > { %v2746_v10 = vadd.f32 %v10318_v51, %v13951_v63  ;;  %v10321_v12 = vadd.f32 %v10320_v2, %v10319_v37  ;;  %11161 = vmatprep.subr.bf16.mxu1 %v12320_v6  ;;  %v4571_v63 = vrot.slane %v4569_v5, 1  ;;  %v10375_v21 = vpop.f32.mrb[101].mxu1 }
 0x1c6   : > { %11056 = vmatmul.mubr.bf16.gmra.mrb[208].mxu0 %v4564_v9  ;;  %v10376_v61 = vadd.f32 %v10375_v21, %v10374_v49  ;;  %v10377_v55 = vpop.f32.mrb[102].mxu1  ;;  %v4782_v49 = vrot.slane %v4573_v36, 5 }
 0x1c7   : > { %v2749_v50 = vadd.f32 %v10321_v12, %v13960_v45  ;;  %11059 = vmatprep.mubr.msk.bf16.mxu0 %vm12321_vm3, %v12320_v6  ;;  %11128 = vmatpush3.bf16.msra.mxu0 %v12139_v20  ;;  %v12143_v45 = vld [vmem:[%s15885_s3 + $0x210] sm:$0xff]   ;;  %v10378_v29 = vpop.f32.mrb[103].mxu1  ;;  %v4572_v19 = vsel %vm759_vm0, %v4567_v52, %v4571_v63  ;;  %v4777_v20 = vsel %vm3949_vm5, %v4772_v59, %v4776_v32  ;;  %v12148_v59 = vld [vmem:[%s15885_s3 + $0x228] sm:$0xff]  }
 0x1c8   : > { %11129 = vmatprep.subr.bf16.mxu0 %v12320_v6  ;;  %11162 = vmatpush3.bf16.msra.mxu1 %v12141_v8  ;;  %v14146_v41 = vadd.f32 %v10376_v61, %v2746_v10  ;;  %v10379_v14 = vadd.f32 %v10378_v29, %v10377_v55  ;;  %v4575_v2 = vor.u32 %v4573_v36, %v4571_v63  ;;  %v4740_v52 = vld [vmem:[#allocation2 + $0x68] sm:$0x3f] }
 0x1c9   : > { %v10322_v56 = vpop.f32.mrb[104].mxu0  ;;  %11163 = vmatprep.subr.bf16.mxu1 %v12320_v6 }
 0x1ca   : > { %v10323_v11 = vpop.f32.mrb[105].mxu0  ;;  %11092 = vmatmul.mubr.bf16.gmra.mrb[200].mxu1 %v4773_v54  ;;  %v14150_v4 = vadd.f32 %v10379_v14, %v2749_v50  ;;  %v4580_v12 = vsel %vm759_vm0, %v4575_v2, %v4579_v42  ;;  %v4780_v50 = vor.u32 %v4779_v0, %v4778_v39  ;;  %v12151_v14 = vld [vmem:[%s15885_s3 + $0x238] sm:$0xff]  }
 0x1cb   : > { %v10324_v60 = vadd.f32 %v10323_v11, %v10322_v56  ;;  %v10325_v33 = vpop.f32.mrb[106].mxu0  ;;  %11095 = vmatprep.mubr.msk.bf16.mxu1 %vm12321_vm3, %v12320_v6  ;;  %11130 = vmatpush3.bf16.msra.mxu0 %v12142_v46  ;;  %v4783_v56 = vrot.slane %v4569_v5, 6  ;;  %v4951_v42 = vld [vmem:[#allocation2 + $0x38] sm:$0xc0] }
 0x1cc   : > { %v10326_v27 = vpop.f32.mrb[107].mxu0  ;;  %11164 = vmatpush3.bf16.msra.mxu1 %v12143_v45  ;;  %11203 = vmatprep.subr.bf16.mxu0 %v12320_v6  ;;  %v10380_v51 = vpop.f32.mrb[104].mxu1  ;;  %v4781_v11 = vsel %vm3949_vm5, %v4776_v32, %v4780_v50  ;;  %v4787_v32 = vshrl.u32 %v4740_v52, 16 }
 0x1cd   : > { %v2754_v22 = vadd.f32 %v10324_v60, %v13977_v31  ;;  %v10327_v40 = vadd.f32 %v10326_v27, %v10325_v33  ;;  %11165 = vmatprep.subr.bf16.mxu1 %v12320_v6  ;;  %v12146_v31 = vld [vmem:[%s15885_s3 + $0x220] sm:$0xff]   ;;  %v4581_v27 = vshrl.u32 %v14072_v15, 16 }
 0x1ce   : > { %11060 = vmatmul.mubr.bf16.gmra.mrb[212].mxu0 %v4572_v19  ;;  %v4784_v19 = vor.u32 %v4783_v56, %v4782_v49 }
 0x1cf   : > { %v2757_v47 = vadd.f32 %v10327_v40, %v13988_v24  ;;  %11063 = vmatprep.mubr.msk.bf16.mxu0 %vm12321_vm3, %v12320_v6  ;;  %v10381_v24 = vpop.f32.mrb[105].mxu1 }
 0x1d0   : > { %11166 = vmatpush3.bf16.msra.mxu1 %v12144_v13  ;;  %v10382_v9 = vadd.f32 %v10381_v24, %v10380_v51  ;;  %v10383_v8 = vpop.f32.mrb[106].mxu1  ;;  %v4790_v13 = vshll.u32 %v4740_v52, 16  ;;  %v4977_v51 = vrot.slane %v4951_v42, 6  ;;  %v14209_v24 = vrot.slane %v4787_v32, 5  ;;  %v12309_v42 = vld [vmem:[#allocation2 + $0x50] sm:$0xff] }
 0x1d1   : > { %v10328_v37 = vpop.f32.mrb[108].mxu0  ;;  %11167 = vmatprep.subr.bf16.mxu1 %v12320_v6  ;;  %v10384_v1 = vpop.f32.mrb[107].mxu1 }
 0x1d2   : > { %v10329_v17 = vpop.f32.mrb[109].mxu0  ;;  %11096 = vmatmul.mubr.bf16.gmra.mrb[204].mxu1 %v4777_v20  ;;  %v14169_v46 = vadd.f32 %v10382_v9, %v2754_v22  ;;  %v10385_v43 = vadd.f32 %v10384_v1, %v10383_v8  ;;  %v4785_v20 = vsel %vm3949_vm5, %v4780_v50, %v4784_v19 }
 0x1d3   : > { %v10330_v28 = vadd.f32 %v10329_v17, %v10328_v37  ;;  %v10331_v7 = vpop.f32.mrb[110].mxu0  ;;  %11099 = vmatprep.mubr.msk.bf16.mxu1 %vm12321_vm3, %v12320_v6  ;;  %v4792_v17 = vrot.slane %v4790_v13, 6 }
 0x1d4   : > { %v10332_v10 = vpop.f32.mrb[111].mxu0  ;;  %11168 = vmatpush3.bf16.msra.mxu1 %v12146_v31  ;;  %v14173_v57 = vadd.f32 %v10385_v43, %v2757_v47  ;;  %v10386_v54 = vpop.f32.mrb[108].mxu1  ;;  %v4978_v31 = vrot.slane %v14038_v26, 6  ;;  %v12145_v26 = vld [vmem:[%s15885_s3 + $0x240] sm:$0xff]  }
 0x1d5   : > { %v2762_v63 = vadd.f32 %v10330_v28, %v14001_v62  ;;  %v10333_v23 = vadd.f32 %v10332_v10, %v10331_v7  ;;  %11169 = vmatprep.subr.bf16.mxu1 %v12320_v6  ;;  %v12149_v62 = vld [vmem:[%s15885_s3 + $0x230] sm:$0xff]  }
 0x1d6   : > { %11064 = vmatmul.mubr.bf16.gmra.mrb[216].mxu0 %v4580_v12  ;;  %v4979_v1 = vsel %vm4169_vm4, %v4977_v51, %v4978_v31 }
 0x1d7   : > { %v2765_v45 = vadd.f32 %v10333_v23, %v14009_v53  ;;  %11067 = vmatprep.mubr.msk.bf16.mxu0 %vm12321_vm3, %v12320_v6  ;;  %v10387_v53 = vpop.f32.mrb[109].mxu1 }
 0x1d8   : > { %11170 = vmatpush3.bf16.msra.mxu1 %v12148_v59  ;;  %v10388_v55 = vadd.f32 %v10387_v53, %v10386_v54  ;;  %v10389_v60 = vpop.f32.mrb[110].mxu1  ;;  %v4793_v59 = vor.u32 %v4792_v17, %v14209_v24 }
 0x1d9   : > { %v10408_v21 = vpop.f32.mrb[112].mxu0  ;;  %11171 = vmatprep.subr.bf16.mxu1 %v12320_v6  ;;  %v10390_v34 = vpop.f32.mrb[111].mxu1 }
 0x1da   : > { %v10409_v61 = vpop.f32.mrb[113].mxu0  ;;  %11100 = vmatmul.mubr.bf16.gmra.mrb[208].mxu1 %v4781_v11  ;;  %v14196_v22 = vadd.f32 %v10388_v55, %v2762_v63  ;;  %v10391_v40 = vadd.f32 %v10390_v34, %v10389_v60  ;;  %v12150_v60 = vld [vmem:[%s15885_s3 + $0x250] sm:$0xff]  }
 0x1db   : > { %v10410_v33 = vadd.f32 %v10409_v61, %v10408_v21  ;;  %v10411_v5 = vpop.f32.mrb[114].mxu0  ;;  %11103 = vmatprep.mubr.msk.bf16.mxu1 %vm12321_vm3, %v12320_v6  ;;  %v4794_v21 = vsel %vm3949_vm5, %v4784_v19, %v4793_v59  ;;  %v12310_v59 = vld [vmem:[#allocation2 + $0x58] sm:$0xff] }
 0x1dc   : > { %v10412_v29 = vpop.f32.mrb[115].mxu0  ;;  %11172 = vmatpush3.bf16.msra.mxu1 %v12149_v62  ;;  %v14200_v39 = vadd.f32 %v10391_v40, %v2765_v45 }
 0x1dd   : > { %v3493_v47 = vadd.f32 %v10410_v33, %v14027_v18  ;;  %v10413_v36 = vadd.f32 %v10412_v29, %v10411_v5  ;;  %11173 = vmatprep.subr.bf16.mxu1 %v12320_v6 }
 0x1de   : > { %11068 = vmatmul.mubr.bf16.gmra.mrb[220].mxu0 %v4581_v27 }
 0x1df   : > { %v3514_v15 = vadd.f32 %v14188_v16, %v3493_v47  ;;  %v3494_v0 = vadd.f32 %v10413_v36, %v14030_v25  ;;  %11131 = vmatprep.mubr.msk.bf16.mxu0 %vm12321_vm3, %v12320_v6 }
 0x1e0   : > { %11174 = vmatpush3.bf16.msra.mxu1 %v12151_v14 }
 0x1e1   : > { %v3515_v18 = vadd.f32 %v14188_v16, %v3494_v0  ;;  %v10414_v37 = vpop.f32.mrb[116].mxu0  ;;  %11247 = vmatprep.subr.bf16.mxu1 %v12320_v6  ;;  %v3528_v25 = vmax.f32 %v3514_v15, 0.0  ;;  %v4982_v15 = vrot.slane %v12309_v42, 6 }
 0x1e2   : > { %v10415_v2 = vpop.f32.mrb[117].mxu0  ;;  %11104 = vmatmul.mubr.bf16.gmra.mrb[212].mxu1 %v4785_v20 }
 0x1e3   : > { %v3529_v9 = vmax.f32 %v3515_v18, 0.0  ;;  %v10416_v8 = vadd.f32 %v10415_v2, %v10414_v37  ;;  %v10417_v28 = vpop.f32.mrb[118].mxu0  ;;  %11107 = vmatprep.mubr.msk.bf16.mxu1 %vm12321_vm3, %v12320_v6  ;;  %v12153_v37 = vld [vmem:[%s15885_s3 + $0x260] sm:$0xff]  }
 0x1e4   : > { %v10418_v7 = vpop.f32.mrb[119].mxu0 }
 0x1e5   : > { %v3542_v10 = vpack.c.bf16 %v3529_v9, %v3528_v25  ;;  %v3495_v12 = vadd.f32 %v10416_v8, %v14053_v44  ;;  %v10419_v50 = vadd.f32 %v10418_v7, %v10417_v28  ;;  %v14220_v43 = vpop.f32.mrb[112].mxu1  ;;  %v12147_v44 = vld [vmem:[%s15885_s3 + $0x248] sm:$0xff]  }
 0x1e6   : > { %11132 = vmatmul.mubr.bf16.vlgmr.msra.gmra.mrb[224].mxu0 %v4979_v1  ;;  %v10825_v63 = vpop.f32.mrb[113].mxu1 }
 0x1e7   : > { %3550 = vst [vmem:[#allocation2 + $0xa8] sm:$0xff] %v3542_v10  ;;  %v3516_v23 = vadd.f32 %v14188_v16, %v3495_v12  ;;  %v3496_v45 = vadd.f32 %v10419_v50, %v14058_v38  ;;  %11204 = vmatpush3.bf16.msra.mxu0 %v12145_v26  ;;  %11135 = vmatprep.mubr.msk.bf16.mxu0 %vm12321_vm3, %v12320_v6  ;;  %v14229_v49 = vpop.f32.mrb[114].mxu1  ;;  %v4980_v38 = vrot.slane %v14066_v30, 6  ;;  %v12156_v10 = vld [vmem:[%s15885_s3 + $0x280] sm:$0xff]   ;;  %v14281_v50 = vld [vmem:[#allocation2 + $0x70] sm:$0xff]  ;;  %v4984_v63 = vrot.slane %v12310_v59, 6 }
 0x1e8   : > { %11205 = vmatprep.subr.bf16.mxu0 %v12320_v6  ;;  %v10826_v56 = vpop.f32.mrb[115].mxu1 }
 0x1e9   : > { %v3517_v62 = vadd.f32 %v14188_v16, %v3496_v45  ;;  %v10420_v54 = vpop.f32.mrb[120].mxu0  ;;  %v3530_v52 = vmax.f32 %v3516_v23, 0.0  ;;  %v4981_v29 = vsel %vm4169_vm4, %v4978_v31, %v4980_v38 }
 0x1ea   : > { %v10421_v11 = vpop.f32.mrb[121].mxu0  ;;  %11108 = vmatmul.mubr.bf16.gmra.mrb[216].mxu1 %v4794_v21 }
 0x1eb   : > { %v3531_v53 = vmax.f32 %v3517_v62, 0.0  ;;  %v10422_v61 = vadd.f32 %v10421_v11, %v10420_v54  ;;  %v10423_v55 = vpop.f32.mrb[122].mxu0  ;;  %11206 = vmatpush3.bf16.msra.mxu0 %v12147_v44  ;;  %11111 = vmatprep.mubr.msk.bf16.mxu1 %vm12321_vm3, %v12320_v6  ;;  %v12155_v54 = vld [vmem:[%s15885_s3 + $0x270] sm:$0xff]  }
 0x1ec   : > { %v10424_v33 = vpop.f32.mrb[123].mxu0  ;;  %11207 = vmatprep.subr.bf16.mxu0 %v12320_v6 }
 0x1ed   : > { %v3543_v5 = vpack.c.bf16 %v3531_v53, %v3530_v52  ;;  %v3497_v30 = vadd.f32 %v10422_v61, %v14083_v35  ;;  %v10425_v34 = vadd.f32 %v10424_v33, %v10423_v55  ;;  %v14243_v27 = vpop.f32.mrb[116].mxu1  ;;  %v12152_v35 = vld [vmem:[%s15885_s3 + $0x258] sm:$0xff]   ;;  %v4985_v61 = vsel %vm4169_vm4, %v4982_v15, %v4984_v63 }
 0x1ee   : > { %11136 = vmatmul.mubr.bf16.gmra.mrb[228].mxu0 %v4981_v29  ;;  %v10829_v19 = vpop.f32.mrb[117].mxu1  ;;  %v12159_v29 = vld [vmem:[%s15885_s3 + $0x290] sm:$0xff]  }
 0x1ef   : > { %3551 = vst [vmem:[#allocation2 + $0xb0] sm:$0xff] %v3543_v5  ;;  %v3518_v32 = vadd.f32 %v14188_v16, %v3497_v30  ;;  %v3498_v13 = vadd.f32 %v10425_v34, %v14086_v3  ;;  %11139 = vmatprep.mubr.msk.bf16.mxu0 %vm12321_vm3, %v12320_v6  ;;  %11208 = vmatpush3.bf16.msra.mxu0 %v12150_v60  ;;  %v14249_v14 = vpop.f32.mrb[118].mxu1 }
 0x1f0   : > { %v10830_v40 = vpop.f32.mrb[119].mxu1  ;;  %11209 = vmatprep.subr.bf16.mxu0 %v12320_v6 }
 0x1f1   : > { %v3519_v47 = vadd.f32 %v14188_v16, %v3498_v13  ;;  %v10426_v36 = vpop.f32.mrb[124].mxu0  ;;  %v3532_v3 = vmax.f32 %v3518_v32, 0.0  ;;  %v14312_v32 = vld [vmem:[#allocation2 + $0x78] sm:$0xff]  ;;  %v12311_v13 = vld [vmem:[#allocation2 + $0x60] sm:$0xff] }
 0x1f2   : > { %v10427_v0 = vpop.f32.mrb[125].mxu0  ;;  %11112 = vmatmul.mubr.bf16.gmra.mrb[220].mxu1 %v14209_v24  ;;  %v4983_v24 = vsel %vm4169_vm4, %v4980_v38, %v4982_v15  ;;  %v12157_v38 = vld [vmem:[%s15885_s3 + $0x288] sm:$0xff]  }
 0x1f3   : > { %v3533_v31 = vmax.f32 %v3519_v47, 0.0  ;;  %v10428_v51 = vadd.f32 %v10427_v0, %v10426_v36  ;;  %v10429_v18 = vpop.f32.mrb[126].mxu0  ;;  %11175 = vmatprep.mubr.msk.bf16.mxu1 %vm12321_vm3, %v12320_v6  ;;  %11210 = vmatpush3.bf16.msra.mxu0 %v12152_v35  ;;  %v4986_v35 = vrot.slane %v12311_v13, 6 }
 0x1f4   : > { %v10430_v20 = vpop.f32.mrb[127].mxu0  ;;  %11211 = vmatprep.subr.bf16.mxu0 %v12320_v6 }
 0x1f5   : > { %v3544_v17 = vpack.c.bf16 %v3533_v31, %v3532_v3  ;;  %v3499_v2 = vadd.f32 %v10428_v51, %v14115_v58  ;;  %v10431_v25 = vadd.f32 %v10430_v20, %v10429_v18  ;;  %v14265_v9 = vpop.f32.mrb[120].mxu1  ;;  %v12154_v58 = vld [vmem:[%s15885_s3 + $0x268] sm:$0xff]   ;;  %v12160_v3 = vld [vmem:[%s15885_s3 + $0x298] sm:$0xff]  }
 0x1f6   : > { %11140 = vmatmul.mubr.bf16.gmra.mrb[232].mxu0 %v4983_v24  ;;  %v10833_v8 = vpop.f32.mrb[121].mxu1 }
 0x1f7   : > { %3552 = vst [vmem:[#allocation2 + $0xb8] sm:$0xff] %v3544_v17  ;;  %v3520_v28 = vadd.f32 %v14188_v16, %v3499_v2  ;;  %v3500_v26 = vadd.f32 %v10431_v25, %v14119_v48  ;;  %11143 = vmatprep.mubr.msk.bf16.mxu0 %vm12321_vm3, %v12320_v6  ;;  %v14271_v7 = vpop.f32.mrb[122].mxu1  ;;  %11212 = vmatpush3.bf16.msra.mxu0 %v12153_v37  ;;  %v4952_v2 = vld [vmem:[#allocation2 + $0x68] sm:$0x7f] }
 0x1f8   : > { %v10834_v1 = vpop.f32.mrb[123].mxu1  ;;  %11213 = vmatprep.subr.bf16.mxu0 %v12320_v6  ;;  %v4987_v37 = vsel %vm4169_vm4, %v4984_v63, %v4986_v35 }
 0x1f9   : > { %v3521_v12 = vadd.f32 %v14188_v16, %v3500_v26  ;;  %v10432_v48 = vpop.f32.mrb[128].mxu0  ;;  %v3534_v45 = vmax.f32 %v3520_v28, 0.0  ;;  %v12162_v28 = vld [vmem:[%s15885_s3 + $0x2a0] sm:$0xff]  }
 0x1fa   : > { %v10433_v23 = vpop.f32.mrb[129].mxu0  ;;  %11176 = vmatmul.mubr.bf16.vlgmr.msra.gmra.mrb[224].mxu1 %v14281_v50  ;;  %v14337_v1 = vld [vmem:[#allocation2 + $0x80] sm:$0xff] }
 0x1fb   : > { %v3535_v44 = vmax.f32 %v3521_v12, 0.0  ;;  %v10434_v56 = vadd.f32 %v10433_v23, %v10432_v48  ;;  %v10435_v62 = vpop.f32.mrb[130].mxu0  ;;  %11179 = vmatprep.mubr.msk.bf16.mxu1 %vm12321_vm3, %v12320_v6  ;;  %11214 = vmatpush3.bf16.msra.mxu0 %v12154_v58 }
 0x1fc   : > { %v10436_v21 = vpop.f32.mrb[131].mxu0  ;;  %11215 = vmatprep.subr.bf16.mxu0 %v12320_v6  ;;  %11248 = vmatpush3.bf16.msra.mxu1 %v12156_v10  ;;  %v4988_v10 = vrot.slane %v4952_v2, 6 }
 0x1fd   : > { %v3545_v11 = vpack.c.bf16 %v3535_v44, %v3534_v45  ;;  %v3501_v52 = vadd.f32 %v10434_v56, %v14146_v41  ;;  %v10437_v53 = vadd.f32 %v10436_v21, %v10435_v62  ;;  %v14295_v55 = vpop.f32.mrb[124].mxu1  ;;  %11249 = vmatprep.subr.bf16.mxu1 %v12320_v6  ;;  %v12158_v41 = vld [vmem:[%s15885_s3 + $0x278] sm:$0xff]   ;;  %v12164_v45 = vld [vmem:[%s15885_s3 + $0x2a8] sm:$0xff]  }
 0x1fe   : > { %11144 = vmatmul.mubr.bf16.gmra.mrb[236].mxu0 %v4985_v61  ;;  %v10837_v60 = vpop.f32.mrb[125].mxu1 }
 0x1ff   : > { %3553 = vst [vmem:[#allocation2 + $0xc0] sm:$0xff] %v3545_v11  ;;  %v3522_v33 = vadd.f32 %v14188_v16, %v3501_v52  ;;  %v3502_v5 = vadd.f32 %v10437_v53, %v14150_v4  ;;  %11147 = vmatprep.mubr.msk.bf16.mxu0 %vm12321_vm3, %v12320_v6  ;;  %v14302_v30 = vpop.f32.mrb[126].mxu1  ;;  %11216 = vmatpush3.bf16.msra.mxu0 %v12155_v54  ;;  %v12165_v11 = vld [vmem:[%s15885_s3 + $0x2b0] sm:$0xff]   ;;  %v14357_v53 = vld [vmem:[#allocation2 + $0x88] sm:$0xff] }
 0x200   : > { %v10838_v34 = vpop.f32.mrb[127].mxu1  ;;  %11217 = vmatprep.subr.bf16.mxu0 %v12320_v6  ;;  %11250 = vmatpush3.bf16.msra.mxu1 %v12157_v38  ;;  %v4989_v54 = vsel %vm4169_vm4, %v4986_v35, %v4988_v10 }
 0x201   : > { %v3523_v4 = vadd.f32 %v14188_v16, %v3502_v5  ;;  %v10438_v19 = vpop.f32.mrb[132].mxu0  ;;  %11251 = vmatprep.subr.bf16.mxu1 %v12320_v6  ;;  %v3536_v47 = vmax.f32 %v3522_v33, 0.0 }
 0x202   : > { %v10439_v40 = vpop.f32.mrb[133].mxu0  ;;  %11180 = vmatmul.mubr.bf16.gmra.mrb[228].mxu1 %v14312_v32 }
 0x203   : > { %v3537_v36 = vmax.f32 %v3523_v4, 0.0  ;;  %v10440_v42 = vadd.f32 %v10439_v40, %v10438_v19  ;;  %v10441_v15 = vpop.f32.mrb[134].mxu0  ;;  %11183 = vmatprep.mubr.msk.bf16.mxu1 %vm12321_vm3, %v12320_v6  ;;  %11218 = vmatpush3.bf16.msra.mxu0 %v12158_v41 }
 0x204   : > { %v10442_v0 = vpop.f32.mrb[135].mxu0  ;;  %11252 = vmatpush3.bf16.msra.mxu1 %v12159_v29  ;;  %11291 = vmatprep.subr.bf16.mxu0 %v12320_v6  ;;  %v5344_v29 = vshll.u32 %v14312_v32, 16 }
 0x205   : > { %v3546_v31 = vpack.c.bf16 %v3537_v36, %v3536_v47  ;;  %v3503_v51 = vadd.f32 %v10440_v42, %v14169_v46  ;;  %v10443_v18 = vadd.f32 %v10442_v0, %v10441_v15  ;;  %v14324_v20 = vpop.f32.mrb[128].mxu1  ;;  %11253 = vmatprep.subr.bf16.mxu1 %v12320_v6  ;;  %v5337_v47 = vshrl.u32 %v14281_v50, 16  ;;  %v14384_v15 = vld [vmem:[#allocation2 + $0x90] sm:$0xff] }
 0x206   : > { %11148 = vmatmul.mubr.bf16.gmra.mrb[240].mxu0 %v4987_v37  ;;  %v10841_v17 = vpop.f32.mrb[129].mxu1  ;;  %v5346_v36 = vrot.slane %v5344_v29, 1 }
 0x207   : > { %3554 = vst [vmem:[#allocation2 + $0xc8] sm:$0xff] %v3546_v31  ;;  %v3524_v25 = vadd.f32 %v14188_v16, %v3503_v51  ;;  %v3504_v24 = vadd.f32 %v10443_v18, %v14173_v57  ;;  %11151 = vmatprep.mubr.msk.bf16.mxu0 %vm12321_vm3, %v12320_v6  ;;  %v14331_v8 = vpop.f32.mrb[130].mxu1  ;;  %v5352_v17 = vshll.u32 %v14337_v1, 16 }
 0x208   : > { %v10842_v46 = vpop.f32.mrb[131].mxu1  ;;  %11254 = vmatpush3.bf16.msra.mxu1 %v12160_v3 }
 0x209   : > { %v3525_v26 = vadd.f32 %v14188_v16, %v3504_v24  ;;  %v10444_v58 = vpop.f32.mrb[136].mxu0  ;;  %11255 = vmatprep.subr.bf16.mxu1 %v12320_v6  ;;  %v3538_v12 = vmax.f32 %v3524_v25, 0.0  ;;  %v12163_v46 = vld [vmem:[%s15885_s3 + $0x2c8] sm:$0xff]  }
 0x20a   : > { %v10445_v57 = vpop.f32.mrb[137].mxu0  ;;  %11184 = vmatmul.mubr.bf16.gmra.mrb[232].mxu1 %v14337_v1 }
 0x20b   : > { %v3539_v48 = vmax.f32 %v3525_v26, 0.0  ;;  %v10446_v59 = vadd.f32 %v10445_v57, %v10444_v58  ;;  %v10447_v63 = vpop.f32.mrb[138].mxu0  ;;  %11187 = vmatprep.mubr.msk.bf16.mxu1 %vm12321_vm3, %v12320_v6  ;;  %v5354_v26 = vrot.slane %v5352_v17, 1 }
 0x20c   : > { %v10448_v23 = vpop.f32.mrb[139].mxu0  ;;  %11256 = vmatpush3.bf16.msra.mxu1 %v12162_v28  ;;  %v5348_v28 = vshrl.u32 %v14312_v32, 16 }
 0x20d   : > { %v3547_v44 = vpack.c.bf16 %v3539_v48, %v3538_v12  ;;  %v3505_v56 = vadd.f32 %v10446_v59, %v14196_v22  ;;  %v10449_v62 = vadd.f32 %v10448_v23, %v10447_v63  ;;  %11257 = vmatprep.subr.bf16.mxu1 %v12320_v6  ;;  %v12166_v63 = vld [vmem:[%s15885_s3 + $0x2d0] sm:$0xff]  }
 0x20e   : > { %11152 = vmatmul.mubr.bf16.gmra.mrb[244].mxu0 %v4989_v54  ;;  %v5350_v48 = vor.u32 %v5348_v28, %v5346_v36  ;;  %v5546_v23 = vld [vmem:[#allocation2 + $0x70] sm:$0xe0] }
 0x20f   : > { %3555 = vst [vmem:[#allocation2 + $0xd0] sm:$0xff] %v3547_v44  ;;  %v3526_v21 = vadd.f32 %v14188_v16, %v3505_v56  ;;  %v3506_v38 = vadd.f32 %v10449_v62, %v14200_v39  ;;  %11155 = vmatprep.mubr.msk.bf16.mxu0 %vm12321_vm3, %v12320_v6  ;;  %v5339_v39 = vshll.u32 %v14281_v50, 16  ;;  %v12161_v50 = vld [vmem:[%s15885_s3 + $0x2c0] sm:$0xff]  }
 0x210   : > { %11258 = vmatpush3.bf16.msra.mxu1 %v12164_v45  ;;  %v5355_v62 = vsel %vm759_vm0, %v5350_v48, %v5354_v26 }
 0x211   : > { %v3527_v22 = vadd.f32 %v14188_v16, %v3506_v38  ;;  %v3876_v52 = vpop.f32.mrb[140].mxu0  ;;  %11259 = vmatprep.subr.bf16.mxu1 %v12320_v6  ;;  %v3540_v33 = vmax.f32 %v3526_v21, 0.0  ;;  %v5341_v35 = vrot.slane %v5339_v39, 1  ;;  %v5566_v38 = vshrl.u32 %v5546_v23, 16 }
 0x212   : > { %v14361_v61 = vadd.f32 %v3876_v52, %v14220_v43  ;;  %v10869_v60 = vpop.f32.mrb[141].mxu0  ;;  %11188 = vmatmul.mubr.bf16.gmra.mrb[236].mxu1 %v14357_v53  ;;  %v12167_v43 = vld [vmem:[%s15885_s3 + $0x2b8] sm:$0xff]   ;;  %v5573_v52 = vrot.slane %v5348_v28, 5  ;;  %v5578_v28 = vrot.slane %v5352_v17, 6  ;;  %v12171_v17 = vld [vmem:[%s15885_s3 + $0x2f0] sm:$0xff]  }
 0x213   : > { %v3541_v5 = vmax.f32 %v3527_v22, 0.0  ;;  %v3879_v41 = vpop.f32.mrb[142].mxu0  ;;  %11191 = vmatprep.mubr.msk.bf16.mxu1 %vm12321_vm3, %v12320_v6  ;;  %v5342_v31 = vor.u32 %v5341_v35, %v5337_v47  ;;  %v5574_v60 = vrot.slane %v5344_v29, 6  ;;  %v5568_v29 = vrot.slane %v5566_v38, 5 }
 0x214   : > { %v14368_v16 = vadd.f32 %v3879_v41, %v14229_v49  ;;  %v10870_v34 = vpop.f32.mrb[143].mxu0  ;;  %11260 = vmatpush3.bf16.msra.mxu1 %v12165_v11  ;;  %v5569_v11 = vshll.u32 %v5546_v23, 16 }
 0x215   : > { %v3548_v4 = vpack.c.bf16 %v3541_v5, %v3540_v33  ;;  %v14374_v19 = vpop.f32.mrb[132].mxu1  ;;  %11261 = vmatprep.subr.bf16.mxu1 %v12320_v6  ;;  %v5347_v2 = vsel %vm759_vm0, %v5342_v31, %v5346_v36  ;;  %v5356_v33 = vshrl.u32 %v14337_v1, 16  ;;  %v14446_v34 = vld [vmem:[#allocation2 + $0xa0] sm:$0x1]  ;;  %v5575_v36 = vor.u32 %v5574_v60, %v5573_v52 }
 0x216   : > { %v10845_v13 = vpop.f32.mrb[133].mxu1  ;;  %11156 = vmatmul.mubr.bf16.gmra.mrb[248].mxu0 %v4988_v10  ;;  %v14412_v10 = vld [vmem:[#allocation2 + $0x98] sm:$0xff] }
 0x217   : > { %3556 = vst [vmem:[#allocation2 + $0xd8] sm:$0x7f] %v3548_v4  ;;  %v14377_v40 = vpop.f32.mrb[134].mxu1  ;;  %11219 = vmatprep.mubr.msk.bf16.mxu0 %vm12321_vm3, %v12320_v6  ;;  %v5358_v13 = vor.u32 %v5356_v33, %v5354_v26  ;;  %v5364_v26 = vshrl.u32 %v14357_v53, 16 }
 0x218   : > { %v10846_v49 = vpop.f32.mrb[135].mxu1  ;;  %11262 = vmatpush3.bf16.msra.mxu1 %v12167_v43 }
 0x219   : > { %v3884_v42 = vpop.f32.mrb[144].mxu0  ;;  %11335 = vmatprep.subr.bf16.mxu1 %v12320_v6  ;;  %v12169_v49 = vld [vmem:[%s15885_s3 + $0x2e0] sm:$0xff]   ;;  %v5581_v52 = vrot.slane %v5364_v26, 5 }
 0x21a   : > { %v14388_v0 = vadd.f32 %v3884_v42, %v14243_v27  ;;  %v10873_v3 = vpop.f32.mrb[145].mxu0  ;;  %11192 = vmatmul.mubr.bf16.gmra.mrb[240].mxu1 %v14384_v15  ;;  %v5368_v42 = vshll.u32 %v14384_v15, 16 }
 0x21b   : > { %v3887_v51 = vpop.f32.mrb[146].mxu0  ;;  %11195 = vmatprep.mubr.msk.bf16.mxu1 %vm12321_vm3, %v12320_v6 }
 0x21c   : > { %v14397_v18 = vadd.f32 %v3887_v51, %v14249_v14  ;;  %v10874_v37 = vpop.f32.mrb[147].mxu0 }
 0x21d   : > { %v14400_v27 = vpop.f32.mrb[136].mxu1 }
 0x21e   : > { %v10849_v25 = vpop.f32.mrb[137].mxu1  ;;  %11220 = vmatmul.mubr.bf16.vlgmr.msra.gmra.mrb[252].mxu0 %v5347_v2 }
 0x21f   : > { %v3791_v24 = vpop.f32.mrb[138].mxu1  ;;  %11292 = vmatpush3.bf16.msra.mxu0 %v12161_v50  ;;  %11223 = vmatprep.mubr.msk.bf16.mxu0 %vm12321_vm3, %v12320_v6 }
 0x220   : > { %v10850_v14 = vpop.f32.mrb[139].mxu1  ;;  %11293 = vmatprep.subr.bf16.mxu0 %v12320_v6 }
 0x221   : > { %v3892_v58 = vpop.f32.mrb[148].mxu0  ;;  %v5577_v14 = vrot.slane %v5356_v33, 5  ;;  %v12175_v33 = vld [vmem:[%s15885_s3 + $0x310] sm:$0xff]  }
 0x222   : > { %v14415_v57 = vadd.f32 %v3892_v58, %v14265_v9  ;;  %v10877_v12 = vpop.f32.mrb[149].mxu0  ;;  %11196 = vmatmul.mubr.bf16.gmra.mrb[244].mxu1 %v14412_v10  ;;  %v5360_v9 = vshll.u32 %v14357_v53, 16  ;;  %v5370_v58 = vrot.slane %v5368_v42, 1 }
 0x223   : > { %v3895_v59 = vpop.f32.mrb[150].mxu0  ;;  %11294 = vmatpush3.bf16.msra.mxu0 %v12163_v46  ;;  %11199 = vmatprep.mubr.msk.bf16.mxu1 %vm12321_vm3, %v12320_v6 }
 0x224   : > { %v14424_v45 = vadd.f32 %v3895_v59, %v14271_v7  ;;  %v10878_v44 = vpop.f32.mrb[151].mxu0  ;;  %11295 = vmatprep.subr.bf16.mxu0 %v12320_v6  ;;  %v12168_v7 = vld [vmem:[%s15885_s3 + $0x2d8] sm:$0xff]   ;;  %v5362_v5 = vrot.slane %v5360_v9, 1  ;;  %v5582_v60 = vrot.slane %v5360_v9, 6 }
 0x225   : > { %v4076_v56 = vpop.f32.mrb[140].mxu1 }
 0x226   : > { %v14430_v54 = vadd.f32 %v4076_v56, %v14361_v61  ;;  %v10913_v21 = vpop.f32.mrb[141].mxu1  ;;  %11224 = vmatmul.mubr.bf16.gmra.mrb[0].mxu0 %v5355_v62  ;;  %v5363_v31 = vsel %vm759_vm0, %v5358_v13, %v5362_v5  ;;  %v5366_v59 = vor.u32 %v5364_v26, %v5362_v5  ;;  %v5579_v56 = vor.u32 %v5578_v28, %v5577_v14 }
 0x227   : > { %v4079_v22 = vpop.f32.mrb[142].mxu1  ;;  %11227 = vmatprep.mubr.msk.bf16.mxu0 %vm12321_vm3, %v12320_v6  ;;  %11296 = vmatpush3.bf16.msra.mxu0 %v12166_v63  ;;  %v5376_v62 = vshll.u32 %v14412_v10, 16  ;;  %v5372_v5 = vshrl.u32 %v14384_v15, 16  ;;  %v5380_v14 = vshrl.u32 %v14412_v10, 16 }
 0x228   : > { %v14440_v61 = vadd.f32 %v4079_v22, %v14368_v16  ;;  %v10914_v39 = vpop.f32.mrb[143].mxu1  ;;  %11297 = vmatprep.subr.bf16.mxu0 %v12320_v6  ;;  %v5571_v16 = vrot.slane %v5569_v11, 6  ;;  %v5371_v38 = vsel %vm759_vm0, %v5366_v59, %v5370_v58 }
 0x229   : > { %v3900_v41 = vpop.f32.mrb[152].mxu0 }
 0x22a   : > { %v14449_v43 = vadd.f32 %v3900_v41, %v14295_v55  ;;  %v10881_v4 = vpop.f32.mrb[153].mxu0  ;;  %11200 = vmatmul.mubr.bf16.gmra.mrb[248].mxu1 %v14446_v34  ;;  %v5572_v37 = vor.u32 %v5571_v16, %v5568_v29  ;;  %v5378_v41 = vrot.slane %v5376_v62, 1  ;;  %v5580_v29 = vsel %vm3949_vm5, %v5575_v36, %v5579_v56 }
 0x22b   : > { %v3903_v35 = vpop.f32.mrb[154].mxu0  ;;  %11263 = vmatprep.mubr.msk.bf16.mxu1 %vm12321_vm3, %v12320_v6  ;;  %11298 = vmatpush3.bf16.msra.mxu0 %v12168_v7  ;;  %v12174_v7 = vld [vmem:[%s15885_s3 + $0x2f8] sm:$0xff]   ;;  %v5374_v16 = vor.u32 %v5372_v5, %v5370_v58 }
 0x22c   : > { %v14458_v47 = vadd.f32 %v3903_v35, %v14302_v30  ;;  %v10882_v55 = vpop.f32.mrb[155].mxu0  ;;  %11299 = vmatprep.subr.bf16.mxu0 %v12320_v6  ;;  %v12170_v30 = vld [vmem:[%s15885_s3 + $0x2e8] sm:$0xff]   ;;  %v5576_v46 = vsel %vm3949_vm5, %v5572_v37, %v5575_v36  ;;  %v5583_v35 = vor.u32 %v5582_v60, %v5581_v52  ;;  %v5384_v36 = vshll.u32 %v14446_v34, 16 }
 0x22d   : > { %v4084_v3 = vpop.f32.mrb[144].mxu1 }
 0x22e   : > { %v14464_v51 = vadd.f32 %v4084_v3, %v14388_v0  ;;  %v10917_v50 = vpop.f32.mrb[145].mxu1  ;;  %11228 = vmatmul.mubr.bf16.gmra.mrb[4].mxu0 %v5363_v31  ;;  %v12172_v0 = vld [vmem:[%s15885_s3 + $0x300] sm:$0xff]   ;;  %v5379_v31 = vsel %vm759_vm0, %v5374_v16, %v5378_v41  ;;  %v5386_v28 = vrot.slane %v5384_v36, 1  ;;  %v5785_v36 = vrot.slane %v14312_v32, 6 }
 0x22f   : > { %v4087_v2 = vpop.f32.mrb[146].mxu1  ;;  %11231 = vmatprep.mubr.msk.bf16.mxu0 %vm12321_vm3, %v12320_v6  ;;  %11300 = vmatpush3.bf16.msra.mxu0 %v12169_v49 }
 0x230   : > { %v14472_v25 = vadd.f32 %v4087_v2, %v14397_v18  ;;  %v10918_v24 = vpop.f32.mrb[147].mxu1  ;;  %11301 = vmatprep.subr.bf16.mxu0 %v12320_v6 }
 0x231   : > { %v3908_v18 = vpop.f32.mrb[156].mxu0  ;;  %v5584_v24 = vsel %vm3949_vm5, %v5579_v56, %v5583_v35 }
 0x232   : > { %v14485_v12 = vadd.f32 %v3908_v18, %v14324_v20  ;;  %v10885_v48 = vpop.f32.mrb[157].mxu0  ;;  %11264 = vmatmul.mubr.bf16.vlgmr.msra.gmra.mrb[252].mxu1 %v5576_v46  ;;  %v12173_v20 = vld [vmem:[%s15885_s3 + $0x308] sm:$0xff]   ;;  %v12178_v46 = vld [vmem:[%s15885_s3 + $0x320] sm:$0xff]   ;;  %v5382_v18 = vor.u32 %v5380_v14, %v5378_v41 }
 0x233   : > { %v3911_v63 = vpop.f32.mrb[158].mxu0  ;;  %11267 = vmatprep.mubr.msk.bf16.mxu1 %vm12321_vm3, %v12320_v6  ;;  %11302 = vmatpush3.bf16.msra.mxu0 %v12170_v30 }
 0x234   : > { %v14493_v23 = vadd.f32 %v3911_v63, %v14331_v8  ;;  %v10886_v44 = vpop.f32.mrb[159].mxu0  ;;  %11303 = vmatprep.subr.bf16.mxu0 %v12320_v6  ;;  %11336 = vmatpush3.bf16.msra.mxu1 %v12172_v0  ;;  %v5585_v0 = vrot.slane %v5372_v5, 5 }
 0x235   : > { %v4092_v21 = vpop.f32.mrb[148].mxu1  ;;  %11337 = vmatprep.subr.bf16.mxu1 %v12320_v6 }
 0x236   : > { %v14503_v11 = vadd.f32 %v4092_v21, %v14415_v57  ;;  %v10921_v8 = vpop.f32.mrb[149].mxu1  ;;  %11232 = vmatmul.mubr.bf16.gmra.mrb[8].mxu0 %v5371_v38  ;;  %v12181_v38 = vld [vmem:[%s15885_s3 + $0x330] sm:$0xff]  }
 0x237   : > { %v4095_v22 = vpop.f32.mrb[150].mxu1  ;;  %11235 = vmatprep.mubr.msk.bf16.mxu0 %vm12321_vm3, %v12320_v6  ;;  %11304 = vmatpush3.bf16.msra.mxu0 %v12171_v17  ;;  %v5387_v17 = vsel %vm759_vm0, %v5382_v18, %v5386_v28 }
 0x238   : > { %v14513_v39 = vadd.f32 %v4095_v22, %v14424_v45  ;;  %v10922_v57 = vpop.f32.mrb[151].mxu1  ;;  %11305 = vmatprep.subr.bf16.mxu0 %v12320_v6  ;;  %11338 = vmatpush3.bf16.msra.mxu1 %v12173_v20  ;;  %v5589_v22 = vrot.slane %v5380_v14, 5 }
 0x239   : > { %v3916_v4 = vpop.f32.mrb[160].mxu0  ;;  %11339 = vmatprep.subr.bf16.mxu1 %v12320_v6 }
 0x23a   : > { %v14525_v45 = vadd.f32 %v3916_v4, %v14374_v19  ;;  %v10889_v9 = vpop.f32.mrb[161].mxu0  ;;  %11268 = vmatmul.mubr.bf16.gmra.mrb[0].mxu1 %v5580_v29  ;;  %v12176_v19 = vld [vmem:[%s15885_s3 + $0x318] sm:$0xff]  }
 0x23b   : > { %v3919_v13 = vpop.f32.mrb[162].mxu0  ;;  %11271 = vmatprep.mubr.msk.bf16.mxu1 %vm12321_vm3, %v12320_v6  ;;  %11306 = vmatpush3.bf16.msra.mxu0 %v12174_v7  ;;  %v5590_v7 = vrot.slane %v5376_v62, 6  ;;  %v12183_v4 = vld [vmem:[%s15885_s3 + $0x338] sm:$0xff]  }
 0x23c   : > { %v14530_v49 = vadd.f32 %v3919_v13, %v14377_v40  ;;  %v10890_v55 = vpop.f32.mrb[163].mxu0  ;;  %11340 = vmatpush3.bf16.msra.mxu1 %v12175_v33  ;;  %11379 = vmatprep.subr.bf16.mxu0 %v12320_v6  ;;  %v5547_v33 = vld [vmem:[#allocation2 + $0xa0] sm:$0x3f] }
 0x23d   : > { %v4100_v3 = vpop.f32.mrb[152].mxu1  ;;  %11341 = vmatprep.subr.bf16.mxu1 %v12320_v6  ;;  %v5594_v9 = vshrl.u32 %v5547_v33, 16  ;;  %v5597_v16 = vshll.u32 %v5547_v33, 16 }
 0x23e   : > { %v14540_v50 = vadd.f32 %v4100_v3, %v14449_v43  ;;  %v10925_v40 = vpop.f32.mrb[153].mxu1  ;;  %11236 = vmatmul.mubr.bf16.gmra.mrb[12].mxu0 %v5379_v31  ;;  %v5586_v43 = vrot.slane %v5368_v42, 6  ;;  %v12180_v42 = vld [vmem:[%s15885_s3 + $0x328] sm:$0xff]  }
 0x23f   : > { %v4103_v37 = vpop.f32.mrb[154].mxu1  ;;  %11239 = vmatprep.mubr.msk.bf16.mxu0 %vm12321_vm3, %v12320_v6  ;;  %v5596_v40 = vrot.slane %v5594_v9, 5 }
 0x240   : > { %v14545_v2 = vadd.f32 %v4103_v37, %v14458_v47  ;;  %v10926_v30 = vpop.f32.mrb[155].mxu1  ;;  %11342 = vmatpush3.bf16.msra.mxu1 %v12176_v19  ;;  %v5587_v63 = vor.u32 %v5586_v43, %v5585_v0  ;;  %v5599_v37 = vrot.slane %v5597_v16, 6  ;;  %v12188_v16 = vld [vmem:[%s15885_s3 + $0x380] sm:$0xff]  }
 0x241   : > { %v3924_v26 = vpop.f32.mrb[164].mxu0  ;;  %11343 = vmatprep.subr.bf16.mxu1 %v12320_v6 }
 0x242   : > { %v14556_v47 = vadd.f32 %v3924_v26, %v14400_v27  ;;  %v10893_v58 = vpop.f32.mrb[165].mxu0  ;;  %11272 = vmatmul.mubr.bf16.gmra.mrb[4].mxu1 %v5584_v24  ;;  %v5600_v28 = vor.u32 %v5599_v37, %v5596_v40 }
 0x243   : > { %v3927_v48 = vpop.f32.mrb[166].mxu0  ;;  %11275 = vmatprep.mubr.msk.bf16.mxu1 %vm12321_vm3, %v12320_v6 }
 0x244   : > { %v10894_v59 = vpop.f32.mrb[167].mxu0  ;;  %11344 = vmatpush3.bf16.msra.mxu1 %v12178_v46  ;;  %v5787_v48 = vrot.slane %v14337_v1, 6 }
 0x245   : > { %v4108_v44 = vpop.f32.mrb[156].mxu1  ;;  %11345 = vmatprep.subr.bf16.mxu1 %v12320_v6 }
 0x246   : > { %v10929_v27 = vpop.f32.mrb[157].mxu1  ;;  %11240 = vmatmul.mubr.bf16.gmra.mrb[16].mxu0 %v5387_v17  ;;  %v14566_v20 = vadd.f32 %v4108_v44, %v14485_v12  ;;  %v5588_v12 = vsel %vm3949_vm5, %v5583_v35, %v5587_v63  ;;  %v12182_v44 = vld [vmem:[%s15885_s3 + $0x350] sm:$0xff]  }
 0x247   : > { %v4111_v56 = vpop.f32.mrb[158].mxu1  ;;  %11243 = vmatprep.mubr.msk.bf16.mxu0 %vm12321_vm3, %v12320_v6 }
 0x248   : > { %v10930_v21 = vpop.f32.mrb[159].mxu1  ;;  %11346 = vmatpush3.bf16.msra.mxu1 %v12180_v42  ;;  %v14574_v8 = vadd.f32 %v4111_v56, %v14493_v23  ;;  %v5388_v23 = vshrl.u32 %v14446_v34, 16 }
 0x249   : > { %v4272_v52 = vpop.f32.mrb[168].mxu0  ;;  %11347 = vmatprep.subr.bf16.mxu1 %v12320_v6 }
 0x24a   : > { %v14581_v60 = vadd.f32 %v4272_v52, %v14430_v54  ;;  %v10957_v57 = vpop.f32.mrb[169].mxu0  ;;  %11276 = vmatmul.mubr.bf16.gmra.mrb[8].mxu1 %v5588_v12  ;;  %v5591_v54 = vor.u32 %v5590_v7, %v5589_v22  ;;  %v5789_v12 = vrot.slane %v14357_v53, 6 }
 0x24b   : > { %v4275_v5 = vpop.f32.mrb[170].mxu0  ;;  %11279 = vmatprep.mubr.msk.bf16.mxu1 %vm12321_vm3, %v12320_v6 }
 0x24c   : > { %v14587_v41 = vadd.f32 %v4275_v5, %v14440_v61  ;;  %v10958_v62 = vpop.f32.mrb[171].mxu0  ;;  %11348 = vmatpush3.bf16.msra.mxu1 %v12181_v38  ;;  %v5758_v61 = vld [vmem:[#allocation2 + $0x70] sm:$0xc0]  ;;  %v5592_v31 = vsel %vm3949_vm5, %v5587_v63, %v5591_v54  ;;  %v5601_v42 = vsel %vm3949_vm5, %v5591_v54, %v5600_v28 }
 0x24d   : > { %v4116_v29 = vpop.f32.mrb[160].mxu1  ;;  %11349 = vmatprep.subr.bf16.mxu1 %v12320_v6  ;;  %v5784_v24 = vrot.slane %v5758_v61, 6 }
 0x24e   : > { %v10933_v13 = vpop.f32.mrb[161].mxu1  ;;  %11244 = vmatmul.mubr.bf16.gmra.mrb[20].mxu0 %v5388_v23  ;;  %v14594_v35 = vadd.f32 %v4116_v29, %v14525_v45  ;;  %v12185_v23 = vld [vmem:[%s15885_s3 + $0x360] sm:$0xff]  }
 0x24f   : > { %v4119_v34 = vpop.f32.mrb[162].mxu1  ;;  %11307 = vmatprep.mubr.msk.bf16.mxu0 %vm12321_vm3, %v12320_v6  ;;  %v5786_v43 = vsel %vm4169_vm4, %v5784_v24, %v5785_v36 }
 0x250   : > { %v10934_v55 = vpop.f32.mrb[163].mxu1  ;;  %11350 = vmatpush3.bf16.msra.mxu1 %v12183_v4  ;;  %v14599_v19 = vadd.f32 %v4119_v34, %v14530_v49  ;;  %v12177_v49 = vld [vmem:[%s15885_s3 + $0x340] sm:$0xff]   ;;  %v5791_v34 = vrot.slane %v14384_v15, 6 }
 0x251   : > { %v4280_v3 = vpop.f32.mrb[172].mxu0  ;;  %11423 = vmatprep.subr.bf16.mxu1 %v12320_v6  ;;  %v14679_v55 = vld [vmem:[#allocation2 + $0xa8] sm:$0xff] }
 0x252   : > { %v4328_v45 = vadd.f32 %v4280_v3, %v14464_v51  ;;  %v10961_v30 = vpop.f32.mrb[173].mxu0  ;;  %11280 = vmatmul.mubr.bf16.gmra.mrb[12].mxu1 %v5592_v31 }
 0x253   : > { %v4283_v46 = vpop.f32.mrb[174].mxu0  ;;  %11283 = vmatprep.mubr.msk.bf16.mxu1 %vm12321_vm3, %v12320_v6  ;;  %v5792_v30 = vsel %vm4169_vm4, %v5789_v12, %v5791_v34 }
 0x254   : > { %v14611_v32 = vadd.f32 %v4283_v46, %v14472_v25  ;;  %v10962_v0 = vpop.f32.mrb[175].mxu0  ;;  %v12179_v25 = vld [vmem:[%s15885_s3 + $0x348] sm:$0xff]  }
 0x255   : > { %v4124_v14 = vpop.f32.mrb[164].mxu1  ;;  %v12191_v0 = vld [vmem:[%s15885_s3 + $0x390] sm:$0xff]  }
 0x256   : > { %v10937_v51 = vpop.f32.mrb[165].mxu1  ;;  %11308 = vmatmul.mubr.bf16.vlgmr.msra.gmra.mrb[24].mxu0 %v5786_v43  ;;  %v14615_v26 = vadd.f32 %v4124_v14, %v14556_v47  ;;  %v5793_v14 = vrot.slane %v14412_v10, 6 }
 0x257   : > { %v4127_v58 = vpop.f32.mrb[166].mxu1  ;;  %11380 = vmatpush3.bf16.msra.mxu0 %v12177_v49  ;;  %11311 = vmatprep.mubr.msk.bf16.mxu0 %vm12321_vm3, %v12320_v6  ;;  %v12190_v49 = vld [vmem:[%s15885_s3 + $0x378] sm:$0xff]   ;;  %v14715_v51 = vld [vmem:[#allocation2 + $0xb0] sm:$0xff] }
 0x258   : > { %v10938_v18 = vpop.f32.mrb[167].mxu1  ;;  %11381 = vmatprep.subr.bf16.mxu0 %v12320_v6 }
 0x259   : > { %v4288_v59 = vpop.f32.mrb[176].mxu0 }
 0x25a   : > { %v14626_v47 = vadd.f32 %v4288_v59, %v14503_v11  ;;  %v10965_v63 = vpop.f32.mrb[177].mxu0  ;;  %11284 = vmatmul.mubr.bf16.gmra.mrb[16].mxu1 %v5601_v42  ;;  %v5788_v11 = vsel %vm4169_vm4, %v5785_v36, %v5787_v48  ;;  %v5794_v42 = vsel %vm4169_vm4, %v5791_v34, %v5793_v14 }
 0x25b   : > { %v4291_v17 = vpop.f32.mrb[178].mxu0  ;;  %11382 = vmatpush3.bf16.msra.mxu0 %v12179_v25  ;;  %11287 = vmatprep.mubr.msk.bf16.mxu1 %vm12321_vm3, %v12320_v6  ;;  %v5759_v63 = vld [vmem:[#allocation2 + $0xa0] sm:$0x7f] }
 0x25c   : > { %v14634_v27 = vadd.f32 %v4291_v17, %v14513_v39  ;;  %v10966_v1 = vpop.f32.mrb[179].mxu0  ;;  %11383 = vmatprep.subr.bf16.mxu0 %v12320_v6  ;;  %v12184_v39 = vld [vmem:[%s15885_s3 + $0x358] sm:$0xff]  }
 0x25d   : > { %v4445_v56 = vpop.f32.mrb[168].mxu1 }
 0x25e   : > { %v11001_v21 = vpop.f32.mrb[169].mxu1  ;;  %11312 = vmatmul.mubr.bf16.gmra.mrb[28].mxu0 %v5788_v11  ;;  %v14639_v38 = vadd.f32 %v4445_v56, %v14581_v60  ;;  %v14744_v11 = vld [vmem:[#allocation2 + $0xb8] sm:$0xff] }
 0x25f   : > { %v4448_v22 = vpop.f32.mrb[170].mxu1  ;;  %11315 = vmatprep.mubr.msk.bf16.mxu0 %vm12321_vm3, %v12320_v6  ;;  %11384 = vmatpush3.bf16.msra.mxu0 %v12182_v44  ;;  %v5795_v21 = vrot.slane %v5759_v63, 6  ;;  %v14825_v63 = vld [vmem:[#allocation2 + $0xd0] sm:$0xff] }
 0x260   : > { %v11002_v7 = vpop.f32.mrb[171].mxu1  ;;  %11385 = vmatprep.subr.bf16.mxu0 %v12320_v6  ;;  %v14648_v52 = vadd.f32 %v4448_v22, %v14587_v41 }
 0x261   : > { %v4296_v57 = vpop.f32.mrb[180].mxu0 }
 0x262   : > { %v14652_v60 = vadd.f32 %v4296_v57, %v14540_v50  ;;  %v10969_v33 = vpop.f32.mrb[181].mxu0  ;;  %11288 = vmatmul.mubr.bf16.gmra.mrb[20].mxu1 %v5596_v40  ;;  %v5790_v50 = vsel %vm4169_vm4, %v5787_v48, %v5789_v12  ;;  %v12187_v40 = vld [vmem:[%s15885_s3 + $0x370] sm:$0xff]   ;;  %v12196_v57 = vld [vmem:[%s15885_s3 + $0x3a8] sm:$0xff]  }
 0x263   : > { %v4299_v5 = vpop.f32.mrb[182].mxu0  ;;  %11351 = vmatprep.mubr.msk.bf16.mxu1 %vm12321_vm3, %v12320_v6  ;;  %11386 = vmatpush3.bf16.msra.mxu0 %v12184_v39  ;;  %v5796_v33 = vsel %vm4169_vm4, %v5793_v14, %v5795_v21 }
 0x264   : > { %v14660_v41 = vadd.f32 %v4299_v5, %v14545_v2  ;;  %v10970_v62 = vpop.f32.mrb[183].mxu0  ;;  %11387 = vmatprep.subr.bf16.mxu0 %v12320_v6  ;;  %v12186_v2 = vld [vmem:[%s15885_s3 + $0x368] sm:$0xff]  }
 0x265   : > { %v4453_v53 = vpop.f32.mrb[172].mxu1 }
 0x266   : > { %v11005_v4 = vpop.f32.mrb[173].mxu1  ;;  %11316 = vmatmul.mubr.bf16.gmra.mrb[32].mxu0 %v5790_v50  ;;  %v14664_v54 = vadd.f32 %v4453_v53, %v4328_v45  ;;  %v12197_v53 = vld [vmem:[%s15885_s3 + $0x3b0] sm:$0xff]  }
 0x267   : > { %v4456_v29 = vpop.f32.mrb[174].mxu1  ;;  %11319 = vmatprep.mubr.msk.bf16.mxu0 %vm12321_vm3, %v12320_v6  ;;  %11388 = vmatpush3.bf16.msra.mxu0 %v12185_v23  ;;  %v14769_v4 = vld [vmem:[#allocation2 + $0xc0] sm:$0xff] }
 0x268   : > { %v11006_v9 = vpop.f32.mrb[175].mxu1  ;;  %11389 = vmatprep.subr.bf16.mxu0 %v12320_v6  ;;  %v14676_v13 = vadd.f32 %v4456_v29, %v14611_v32 }
 0x269   : > { %v4304_v61 = vpop.f32.mrb[184].mxu0  ;;  %v6146_v9 = vshll.u32 %v14679_v55, 16 }
 0x26a   : > { %v14682_v36 = vadd.f32 %v4304_v61, %v14566_v20  ;;  %v10973_v3 = vpop.f32.mrb[185].mxu0  ;;  %11352 = vmatmul.mubr.bf16.vlgmr.msra.gmra.mrb[24].mxu1 %v14679_v55  ;;  %v12189_v20 = vld [vmem:[%s15885_s3 + $0x388] sm:$0xff]  }
 0x26b   : > { %v4307_v31 = vpop.f32.mrb[186].mxu0  ;;  %11355 = vmatprep.mubr.msk.bf16.mxu1 %vm12321_vm3, %v12320_v6  ;;  %11390 = vmatpush3.bf16.msra.mxu0 %v12186_v2 }
 0x26c   : > { %v14691_v15 = vadd.f32 %v4307_v31, %v14574_v8  ;;  %v10974_v37 = vpop.f32.mrb[187].mxu0  ;;  %11391 = vmatprep.subr.bf16.mxu0 %v12320_v6  ;;  %11424 = vmatpush3.bf16.msra.mxu1 %v12188_v16 }
 0x26d   : > { %v4461_v45 = vpop.f32.mrb[176].mxu1  ;;  %11425 = vmatprep.subr.bf16.mxu1 %v12320_v6 }
 0x26e   : > { %v11009_v24 = vpop.f32.mrb[177].mxu1  ;;  %11320 = vmatmul.mubr.bf16.gmra.mrb[36].mxu0 %v5792_v30  ;;  %v14700_v46 = vadd.f32 %v4461_v45, %v14626_v47  ;;  %v6144_v45 = vshrl.u32 %v14679_v55, 16  ;;  %v12193_v55 = vld [vmem:[%s15885_s3 + $0x3c0] sm:$0xff]  }
 0x26f   : > { %v4464_v8 = vpop.f32.mrb[178].mxu1  ;;  %11323 = vmatprep.mubr.msk.bf16.mxu0 %vm12321_vm3, %v12320_v6  ;;  %11392 = vmatpush3.bf16.msra.mxu0 %v12187_v40 }
 0x270   : > { %v11010_v32 = vpop.f32.mrb[179].mxu1  ;;  %11393 = vmatprep.subr.bf16.mxu0 %v12320_v6  ;;  %11426 = vmatpush3.bf16.msra.mxu1 %v12189_v20  ;;  %v14712_v43 = vadd.f32 %v4464_v8, %v14634_v27  ;;  %v12194_v27 = vld [vmem:[%s15885_s3 + $0x3a0] sm:$0xff]   ;;  %v14798_v8 = vld [vmem:[#allocation2 + $0xc8] sm:$0xff] }
 0x271   : > { %v4312_v28 = vpop.f32.mrb[188].mxu0  ;;  %11427 = vmatprep.subr.bf16.mxu1 %v12320_v6 }
 0x272   : > { %v14719_v58 = vadd.f32 %v4312_v28, %v14594_v35  ;;  %v10977_v25 = vpop.f32.mrb[189].mxu0  ;;  %11356 = vmatmul.mubr.bf16.gmra.mrb[28].mxu1 %v14715_v51  ;;  %v12192_v35 = vld [vmem:[%s15885_s3 + $0x398] sm:$0xff]  }
 0x273   : > { %v4315_v18 = vpop.f32.mrb[190].mxu0  ;;  %11359 = vmatprep.mubr.msk.bf16.mxu1 %vm12321_vm3, %v12320_v6  ;;  %11394 = vmatpush3.bf16.msra.mxu0 %v12190_v49  ;;  %v6159_v25 = vshll.u32 %v14744_v11, 16 }
 0x274   : > { %v14725_v48 = vadd.f32 %v4315_v18, %v14599_v19  ;;  %v10978_v10 = vpop.f32.mrb[191].mxu0  ;;  %11428 = vmatpush3.bf16.msra.mxu1 %v12191_v0  ;;  %11467 = vmatprep.subr.bf16.mxu0 %v12320_v6 }
 0x275   : > { %v4469_v59 = vpop.f32.mrb[180].mxu1  ;;  %11429 = vmatprep.subr.bf16.mxu1 %v12320_v6 }
 0x276   : > { %v11013_v47 = vpop.f32.mrb[181].mxu1  ;;  %11324 = vmatmul.mubr.bf16.gmra.mrb[40].mxu0 %v5794_v42  ;;  %v14734_v17 = vadd.f32 %v4469_v59, %v14652_v60  ;;  %v6155_v42 = vshrl.u32 %v14715_v51, 16 }
 0x277   : > { %v4472_v19 = vpop.f32.mrb[182].mxu1  ;;  %11327 = vmatprep.mubr.msk.bf16.mxu0 %vm12321_vm3, %v12320_v6 }
 0x278   : > { %v11014_v44 = vpop.f32.mrb[183].mxu1  ;;  %11430 = vmatpush3.bf16.msra.mxu1 %v12192_v35  ;;  %v14742_v1 = vadd.f32 %v4472_v19, %v14660_v41  ;;  %v6161_v19 = vrot.slane %v6159_v25, 1 }
 0x279   : > { %v4320_v56 = vpop.f32.mrb[192].mxu0  ;;  %11431 = vmatprep.subr.bf16.mxu1 %v12320_v6 }
 0x27a   : > { %v14748_v22 = vadd.f32 %v4320_v56, %v14615_v26  ;;  %v10981_v39 = vpop.f32.mrb[193].mxu0  ;;  %11360 = vmatmul.mubr.bf16.gmra.mrb[32].mxu1 %v14744_v11 }
 0x27b   : > { %v4323_v7 = vpop.f32.mrb[194].mxu0  ;;  %11363 = vmatprep.mubr.msk.bf16.mxu1 %vm12321_vm3, %v12320_v6  ;;  %v6353_v39 = vld [vmem:[#allocation2 + $0xa8] sm:$0xe0] }
 0x27c   : > { %v10982_v12 = vpop.f32.mrb[195].mxu0  ;;  %11432 = vmatpush3.bf16.msra.mxu1 %v12194_v27 }
 0x27d   : > { %v4477_v60 = vpop.f32.mrb[184].mxu1  ;;  %11433 = vmatprep.subr.bf16.mxu1 %v12320_v6 }
 0x27e   : > { %v14759_v26 = vadd.f32 %v4477_v60, %v14682_v36  ;;  %v11017_v5 = vpop.f32.mrb[185].mxu1  ;;  %11328 = vmatmul.mubr.bf16.gmra.mrb[44].mxu0 %v5796_v33  ;;  %v12199_v36 = vld [vmem:[%s15885_s3 + $0x3b8] sm:$0xff]  }
 0x27f   : > { %v4480_v23 = vpop.f32.mrb[186].mxu1  ;;  %11331 = vmatprep.mubr.msk.bf16.mxu0 %vm12321_vm3, %v12320_v6 }
 0x280   : > { %v14764_v41 = vadd.f32 %v4480_v23, %v14691_v15  ;;  %v11018_v62 = vpop.f32.mrb[187].mxu1  ;;  %11434 = vmatpush3.bf16.msra.mxu1 %v12196_v57  ;;  %v6148_v15 = vrot.slane %v6146_v9, 1  ;;  %v6373_v23 = vshrl.u32 %v6353_v39, 16 }
 0x281   : > { %v4672_v50 = vpop.f32.mrb[196].mxu0  ;;  %11435 = vmatprep.subr.bf16.mxu1 %v12320_v6  ;;  %v6376_v62 = vshll.u32 %v6353_v39, 16 }
 0x282   : > { %v14773_v29 = vadd.f32 %v4672_v50, %v14639_v38  ;;  %v11045_v2 = vpop.f32.mrb[197].mxu0  ;;  %11364 = vmatmul.mubr.bf16.gmra.mrb[36].mxu1 %v14769_v4  ;;  %v6151_v38 = vshll.u32 %v14715_v51, 16  ;;  %v6149_v0 = vor.u32 %v6148_v15, %v6144_v45  ;;  %v6380_v50 = vrot.slane %v6155_v42, 5  ;;  %v12201_v45 = vld [vmem:[%s15885_s3 + $0x3e0] sm:$0xff]  }
 0x283   : > { %v4675_v16 = vpop.f32.mrb[198].mxu0  ;;  %11367 = vmatprep.mubr.msk.bf16.mxu1 %vm12321_vm3, %v12320_v6 }
 0x284   : > { %v14780_v34 = vadd.f32 %v4675_v16, %v14648_v52  ;;  %v11046_v61 = vpop.f32.mrb[199].mxu0  ;;  %11436 = vmatpush3.bf16.msra.mxu1 %v12197_v53  ;;  %v6153_v30 = vrot.slane %v6151_v38, 1  ;;  %v6381_v2 = vrot.slane %v6151_v38, 6  ;;  %v6163_v16 = vshrl.u32 %v14744_v11, 16 }
 0x285   : > { %v4485_v3 = vpop.f32.mrb[188].mxu1  ;;  %11437 = vmatprep.subr.bf16.mxu1 %v12320_v6  ;;  %v6375_v38 = vrot.slane %v6373_v23, 5 }
 0x286   : > { %v14788_v31 = vadd.f32 %v4485_v3, %v14719_v58  ;;  %v11021_v40 = vpop.f32.mrb[189].mxu1  ;;  %11332 = vmatmul.mubr.bf16.gmra.mrb[48].mxu0 %v5795_v21  ;;  %v6154_v18 = vsel %vm759_vm0, %v6149_v0, %v6153_v30  ;;  %v6157_v21 = vor.u32 %v6155_v42, %v6153_v30  ;;  %v6382_v30 = vor.u32 %v6381_v2, %v6380_v50 }
 0x287   : > { %v4488_v37 = vpop.f32.mrb[190].mxu1  ;;  %11395 = vmatprep.mubr.msk.bf16.mxu0 %vm12321_vm3, %v12320_v6  ;;  %v6171_v42 = vshrl.u32 %v14769_v4, 16  ;;  %v6179_v2 = vshrl.u32 %v14798_v8, 16 }
 0x288   : > { %v14793_v52 = vadd.f32 %v4488_v37, %v14725_v48  ;;  %v11022_v20 = vpop.f32.mrb[191].mxu1  ;;  %11438 = vmatpush3.bf16.msra.mxu1 %v12199_v36  ;;  %v6162_v60 = vsel %vm759_vm0, %v6157_v21, %v6161_v19  ;;  %v14859_v36 = vld [vmem:[#allocation2 + $0xd8] sm:$0x1] }
 0x289   : > { %v4680_v24 = vpop.f32.mrb[200].mxu0  ;;  %11511 = vmatprep.subr.bf16.mxu1 %v12320_v6  ;;  %v6165_v20 = vor.u32 %v6163_v16, %v6161_v19 }
 0x28a   : > { %v14802_v49 = vadd.f32 %v4680_v24, %v14664_v54  ;;  %v11049_v32 = vpop.f32.mrb[201].mxu0  ;;  %11368 = vmatmul.mubr.bf16.gmra.mrb[40].mxu1 %v14798_v8 }
 0x28b   : > { %v4683_v14 = vpop.f32.mrb[202].mxu0  ;;  %11371 = vmatprep.mubr.msk.bf16.mxu1 %vm12321_vm3, %v12320_v6  ;;  %v6175_v32 = vshll.u32 %v14798_v8, 16 }
 0x28c   : > { %v14811_v28 = vadd.f32 %v4683_v14, %v14676_v13  ;;  %v11050_v58 = vpop.f32.mrb[203].mxu0  ;;  %v12195_v13 = vld [vmem:[%s15885_s3 + $0x3c8] sm:$0xff]  }
 0x28d   : > { %v4493_v54 = vpop.f32.mrb[192].mxu1  ;;  %v6177_v19 = vrot.slane %v6175_v32, 1 }
 0x28e   : > { %v14816_v48 = vadd.f32 %v4493_v54, %v14748_v22  ;;  %v11025_v10 = vpop.f32.mrb[193].mxu1  ;;  %11396 = vmatmul.mubr.bf16.vlgmr.msra.gmra.mrb[52].mxu0 %v6154_v18  ;;  %v12198_v22 = vld [vmem:[%s15885_s3 + $0x3d0] sm:$0xff]  }
 0x28f   : > { %v4496_v35 = vpop.f32.mrb[194].mxu1  ;;  %11468 = vmatpush3.bf16.msra.mxu0 %v12193_v55  ;;  %11399 = vmatprep.mubr.msk.bf16.mxu0 %vm12321_vm3, %v12320_v6 }
 0x290   : > { %v11026_v59 = vpop.f32.mrb[195].mxu1  ;;  %11469 = vmatprep.subr.bf16.mxu0 %v12320_v6 }
 0x291   : > { %v4688_v47 = vpop.f32.mrb[204].mxu0  ;;  %v6385_v59 = vrot.slane %v6159_v25, 6  ;;  %v12203_v25 = vld [vmem:[%s15885_s3 + $0x3f0] sm:$0xff]  }
 0x292   : > { %v14830_v44 = vadd.f32 %v4688_v47, %v14700_v46  ;;  %v11053_v27 = vpop.f32.mrb[205].mxu0  ;;  %11372 = vmatmul.mubr.bf16.gmra.mrb[44].mxu1 %v14825_v63  ;;  %v6167_v46 = vshll.u32 %v14769_v4, 16 }
 0x293   : > { %v4691_v56 = vpop.f32.mrb[206].mxu0  ;;  %11470 = vmatpush3.bf16.msra.mxu0 %v12195_v13  ;;  %11375 = vmatprep.mubr.msk.bf16.mxu1 %vm12321_vm3, %v12320_v6 }
 0x294   : > { %v14839_v7 = vadd.f32 %v4691_v56, %v14712_v43  ;;  %v11054_v12 = vpop.f32.mrb[207].mxu0  ;;  %11471 = vmatprep.subr.bf16.mxu0 %v12320_v6  ;;  %v12200_v43 = vld [vmem:[%s15885_s3 + $0x3d8] sm:$0xff]   ;;  %v6169_v3 = vrot.slane %v6167_v46, 1 }
 0x295   : > { %v4884_v57 = vpop.f32.mrb[196].mxu1 }
 0x296   : > { %v14845_v33 = vadd.f32 %v4884_v57, %v14773_v29  ;;  %v11089_v5 = vpop.f32.mrb[197].mxu1  ;;  %11400 = vmatmul.mubr.bf16.gmra.mrb[56].mxu0 %v6162_v60  ;;  %v6170_v14 = vsel %vm759_vm0, %v6165_v20, %v6169_v3  ;;  %v6173_v21 = vor.u32 %v6171_v42, %v6169_v3  ;;  %v6191_v20 = vshll.u32 %v14859_v36, 16 }
 0x297   : > { %v4887_v53 = vpop.f32.mrb[198].mxu1  ;;  %11403 = vmatprep.mubr.msk.bf16.mxu0 %vm12321_vm3, %v12320_v6  ;;  %11472 = vmatpush3.bf16.msra.mxu0 %v12198_v22 }
 0x298   : > { %v14855_v29 = vadd.f32 %v4887_v53, %v14780_v34  ;;  %v11090_v9 = vpop.f32.mrb[199].mxu1  ;;  %11473 = vmatprep.subr.bf16.mxu0 %v12320_v6  ;;  %v6378_v34 = vrot.slane %v6376_v62, 6  ;;  %v6178_v57 = vsel %vm759_vm0, %v6173_v21, %v6177_v19  ;;  %v6388_v53 = vrot.slane %v6171_v42, 5 }
 0x299   : > { %v4696_v61 = vpop.f32.mrb[208].mxu0 }
 0x29a   : > { %v14864_v40 = vadd.f32 %v4696_v61, %v14734_v17  ;;  %v11057_v15 = vpop.f32.mrb[209].mxu0  ;;  %11376 = vmatmul.mubr.bf16.gmra.mrb[48].mxu1 %v14859_v36  ;;  %v6379_v54 = vor.u32 %v6378_v34, %v6375_v38 }
 0x29b   : > { %v4699_v37 = vpop.f32.mrb[210].mxu0  ;;  %11439 = vmatprep.mubr.msk.bf16.mxu1 %vm12321_vm3, %v12320_v6  ;;  %11474 = vmatpush3.bf16.msra.mxu0 %v12200_v43  ;;  %v6389_v43 = vrot.slane %v6167_v46, 6  ;;  %v6181_v46 = vor.u32 %v6179_v2, %v6177_v19 }
 0x29c   : > { %v14873_v24 = vadd.f32 %v4699_v37, %v14742_v1  ;;  %v11058_v17 = vpop.f32.mrb[211].mxu0  ;;  %11475 = vmatprep.subr.bf16.mxu0 %v12320_v6  ;;  %v12202_v1 = vld [vmem:[%s15885_s3 + $0x3e8] sm:$0xff]   ;;  %v6383_v13 = vsel %vm3949_vm5, %v6379_v54, %v6382_v30  ;;  %v6392_v54 = vrot.slane %v6179_v2, 5 }
 0x29d   : > { %v4892_v0 = vpop.f32.mrb[200].mxu1  ;;  %v6390_v37 = vor.u32 %v6389_v43, %v6388_v53 }
 0x29e   : > { %v14879_v55 = vadd.f32 %v4892_v0, %v14802_v49  ;;  %v11093_v58 = vpop.f32.mrb[201].mxu1  ;;  %11404 = vmatmul.mubr.bf16.gmra.mrb[60].mxu0 %v6170_v14  ;;  %v6384_v49 = vrot.slane %v6163_v16, 5 }
 0x29f   : > { %v4895_v18 = vpop.f32.mrb[202].mxu1  ;;  %11407 = vmatprep.mubr.msk.bf16.mxu0 %vm12321_vm3, %v12320_v6  ;;  %11476 = vmatpush3.bf16.msra.mxu0 %v12201_v45 }
 0x2a0   : > { %v14887_v10 = vadd.f32 %v4895_v18, %v14811_v28  ;;  %v11094_v35 = vpop.f32.mrb[203].mxu1  ;;  %11477 = vmatprep.subr.bf16.mxu0 %v12320_v6  ;;  %v6386_v60 = vor.u32 %v6385_v59, %v6384_v49  ;;  %v6393_v18 = vrot.slane %v6175_v32, 6 }
 0x2a1   : > { %v4704_v47 = vpop.f32.mrb[212].mxu0 }
 0x2a2   : > { %v14897_v27 = vadd.f32 %v4704_v47, %v14759_v26  ;;  %v11061_v28 = vpop.f32.mrb[213].mxu0  ;;  %11440 = vmatmul.mubr.bf16.vlgmr.msra.gmra.mrb[52].mxu1 %v6383_v13  ;;  %v6183_v26 = vshll.u32 %v14825_v63, 16  ;;  %v6387_v16 = vsel %vm3949_vm5, %v6382_v30, %v6386_v60  ;;  %v6391_v58 = vsel %vm3949_vm5, %v6386_v60, %v6390_v37 }
 0x2a3   : > { %v4707_v56 = vpop.f32.mrb[214].mxu0  ;;  %11443 = vmatprep.mubr.msk.bf16.mxu1 %vm12321_vm3, %v12320_v6  ;;  %11478 = vmatpush3.bf16.msra.mxu0 %v12202_v1  ;;  %v6187_v1 = vshrl.u32 %v14825_v63, 16  ;;  %v6394_v28 = vor.u32 %v6393_v18, %v6392_v54 }
 0x2a4   : > { %v14905_v22 = vadd.f32 %v4707_v56, %v14764_v41  ;;  %v11062_v39 = vpop.f32.mrb[215].mxu0  ;;  %11479 = vmatprep.subr.bf16.mxu0 %v12320_v6  ;;  %v12204_v41 = vld [vmem:[%s15885_s3 + $0x3f8] sm:$0xff]   ;;  %v6185_v61 = vrot.slane %v6183_v26, 1 }
 0x2a5   : > { %v4900_v12 = vpop.f32.mrb[204].mxu1  ;;  %v6396_v39 = vrot.slane %v6187_v1, 5  ;;  %v6395_v60 = vsel %vm3949_vm5, %v6390_v37, %v6394_v28 }
 0x2a6   : > { %v14911_v5 = vadd.f32 %v4900_v12, %v14830_v44  ;;  %v11097_v23 = vpop.f32.mrb[205].mxu1  ;;  %11408 = vmatmul.mubr.bf16.gmra.mrb[64].mxu0 %v6178_v57  ;;  %v6186_v30 = vsel %vm759_vm0, %v6181_v46, %v6185_v61  ;;  %v6189_v42 = vor.u32 %v6187_v1, %v6185_v61  ;;  %v6397_v12 = vrot.slane %v6183_v26, 6  ;;  %v6565_v46 = vld [vmem:[#allocation2 + $0xa8] sm:$0xc0] }
 0x2a7   : > { %v4903_v62 = vpop.f32.mrb[206].mxu1  ;;  %11411 = vmatprep.mubr.msk.bf16.mxu0 %vm12321_vm3, %v12320_v6  ;;  %11480 = vmatpush3.bf16.msra.mxu0 %v12203_v25 }
 0x2a8   : > { %v14921_v50 = vadd.f32 %v4903_v62, %v14839_v7  ;;  %v11098_v44 = vpop.f32.mrb[207].mxu1  ;;  %11481 = vmatprep.subr.bf16.mxu0 %v12320_v6  ;;  %v6354_v62 = vld [vmem:[#allocation2 + $0xd8] sm:$0x3f]  ;;  %v6398_v2 = vor.u32 %v6397_v12, %v6396_v39 }
 0x2a9   : > { %v4712_v9 = vpop.f32.mrb[216].mxu0  ;;  %v6401_v26 = vshrl.u32 %v6354_v62, 16 }
 0x2aa   : > { %v4736_v3 = vadd.f32 %v4712_v9, %v14788_v31  ;;  %v11065_v15 = vpop.f32.mrb[217].mxu0  ;;  %11444 = vmatmul.mubr.bf16.gmra.mrb[56].mxu1 %v6387_v16  ;;  %v6404_v9 = vshll.u32 %v6354_v62, 16 }
 0x2ab   : > { %v4715_v38 = vpop.f32.mrb[218].mxu0  ;;  %11447 = vmatprep.mubr.msk.bf16.mxu1 %vm12321_vm3, %v12320_v6  ;;  %11482 = vmatpush3.bf16.msra.mxu0 %v12204_v41  ;;  %v6403_v37 = vrot.slane %v6401_v26, 5 }
 0x2ac   : > { %v4737_v7 = vadd.f32 %v4715_v38, %v14793_v52  ;;  %v11066_v34 = vpop.f32.mrb[219].mxu0  ;;  %11583 = vmatprep.subr.bf16.mxu0 %v12320_v6 }
 0x2ad   : > { %v4908_v45 = vpop.f32.mrb[208].mxu1  ;;  %v6399_v34 = vsel %vm3949_vm5, %v6394_v28, %v6398_v2 }
 0x2ae   : > { %v14936_v31 = vadd.f32 %v4908_v45, %v14864_v40  ;;  %v11101_v17 = vpop.f32.mrb[209].mxu1  ;;  %11412 = vmatmul.mubr.bf16.gmra.mrb[68].mxu0 %v6186_v30  ;;  %v6193_v40 = vrot.slane %v6191_v20, 1  ;;  %v6406_v20 = vrot.slane %v6404_v9, 6 }
 0x2af   : > { %v4911_v0 = vpop.f32.mrb[210].mxu1  ;;  %11415 = vmatprep.mubr.msk.bf16.mxu0 %vm12321_vm3, %v12320_v6  ;;  %v6591_v17 = vrot.slane %v6565_v46, 6 }
 0x2b0   : > { %v14941_v52 = vadd.f32 %v4911_v0, %v14873_v24  ;;  %v11102_v14 = vpop.f32.mrb[211].mxu1  ;;  %v6194_v19 = vsel %vm759_vm0, %v6189_v42, %v6193_v40  ;;  %v6594_v40 = vrot.slane %v14744_v11, 6 }
 0x2b1   : > { %v4720_v35 = vpop.f32.mrb[220].mxu0 }
 0x2b2   : > { %v4738_v13 = vadd.f32 %v4720_v35, %v14816_v48  ;;  %v11069_v49 = vpop.f32.mrb[221].mxu0  ;;  %11448 = vmatmul.mubr.bf16.gmra.mrb[60].mxu1 %v6391_v58  ;;  %v6407_v58 = vor.u32 %v6406_v20, %v6403_v37 }
 0x2b3   : > { %v4723_v59 = vpop.f32.mrb[222].mxu0  ;;  %11451 = vmatprep.mubr.msk.bf16.mxu1 %vm12321_vm3, %v12320_v6 }
 0x2b4   : > { %v11070_v24 = vpop.f32.mrb[223].mxu0  ;;  %v6408_v49 = vsel %vm3949_vm5, %v6398_v2, %v6407_v58 }
 0x2b5   : > { %v4916_v47 = vpop.f32.mrb[212].mxu1 }
 0x2b6   : > { %v14952_v32 = vadd.f32 %v4916_v47, %v14897_v27  ;;  %v11105_v56 = vpop.f32.mrb[213].mxu1  ;;  %11416 = vmatmul.mubr.bf16.gmra.mrb[72].mxu0 %v6194_v19 }
 0x2b7   : > { %v4919_v21 = vpop.f32.mrb[214].mxu1  ;;  %11419 = vmatprep.mubr.msk.bf16.mxu0 %vm12321_vm3, %v12320_v6 }
 0x2b8   : > { %v14957_v48 = vadd.f32 %v4919_v21, %v14905_v22  ;;  %v11106_v25 = vpop.f32.mrb[215].mxu1  ;;  %v6195_v22 = vshrl.u32 %v14859_v36, 16  ;;  %v6592_v36 = vrot.slane %v14715_v51, 6 }
 0x2b9   : > { %v5079_v57 = vpop.f32.mrb[224].mxu0  ;;  %v6596_v25 = vrot.slane %v14769_v4, 6 }
 0x2ba   : > { %v5133_v27 = vadd.f32 %v5079_v57, %v14845_v33  ;;  %v11133_v23 = vpop.f32.mrb[225].mxu0  ;;  %11452 = vmatmul.mubr.bf16.gmra.mrb[64].mxu1 %v6395_v60  ;;  %v6593_v51 = vsel %vm4169_vm4, %v6591_v17, %v6592_v36  ;;  %v6595_v19 = vsel %vm4169_vm4, %v6592_v36, %v6594_v40 }
 0x2bb   : > { %v5082_v41 = vpop.f32.mrb[226].mxu0  ;;  %11455 = vmatprep.mubr.msk.bf16.mxu1 %vm12321_vm3, %v12320_v6  ;;  %v6597_v62 = vsel %vm4169_vm4, %v6594_v40, %v6596_v25 }
 0x2bc   : > { %v5134_v53 = vadd.f32 %v5082_v41, %v14855_v29  ;;  %v11134_v43 = vpop.f32.mrb[227].mxu0 }
 0x2bd   : > { %v4924_v44 = vpop.f32.mrb[216].mxu1  ;;  %v6598_v43 = vrot.slane %v14798_v8, 6 }
 0x2be   : > { %v14967_v16 = vadd.f32 %v4924_v44, %v4736_v3  ;;  %v11109_v61 = vpop.f32.mrb[217].mxu1  ;;  %11420 = vmatmul.mubr.bf16.gmra.mrb[76].mxu0 %v6195_v22 }
 0x2bf   : > { %v4927_v33 = vpop.f32.mrb[218].mxu1  ;;  %11483 = vmatprep.mubr.msk.bf16.mxu0 %vm12321_vm3, %v12320_v6 }
 0x2c0   : > { %v14971_v15 = vadd.f32 %v4927_v33, %v4737_v7  ;;  %v11110_v38 = vpop.f32.mrb[219].mxu1 }
 0x2c1   : > { %v5087_v29 = vpop.f32.mrb[228].mxu0  ;;  %v6599_v38 = vsel %vm4169_vm4, %v6596_v25, %v6598_v43 }
 0x2c2   : > { %v5135_v3 = vadd.f32 %v5087_v29, %v14879_v55  ;;  %v11137_v45 = vpop.f32.mrb[229].mxu0  ;;  %11456 = vmatmul.mubr.bf16.gmra.mrb[68].mxu1 %v6399_v34 }
 0x2c3   : > { %v5090_v30 = vpop.f32.mrb[230].mxu0  ;;  %11459 = vmatprep.mubr.msk.bf16.mxu1 %vm12321_vm3, %v12320_v6 }
 0x2c4   : > { %v5136_v7 = vadd.f32 %v5090_v30, %v14887_v10  ;;  %v11138_v0 = vpop.f32.mrb[231].mxu0 }
 0x2c5   : > { %v4932_v14 = vpop.f32.mrb[220].mxu1 }
 0x2c6   : > { %v14980_v54 = vadd.f32 %v4932_v14, %v4738_v13  ;;  %v11113_v18 = vpop.f32.mrb[221].mxu1  ;;  %11484 = vmatmul.mubr.bf16.vlgmr.msra.gmra.mrb[80].mxu0 %v6593_v51  ;;  %v6566_v51 = vld [vmem:[#allocation2 + $0xd8] sm:$0x7f] }
 0x2c7   : > { %v4935_v1 = vpop.f32.mrb[222].mxu1  ;;  %11487 = vmatprep.mubr.msk.bf16.mxu0 %vm12321_vm3, %v12320_v6 }
 0x2c8   : > { %v11114_v55 = vpop.f32.mrb[223].mxu1  ;;  %v6602_v1 = vrot.slane %v6566_v51, 6 }
 0x2c9   : > { %v5095_v35 = vpop.f32.mrb[232].mxu0 }
 0x2ca   : > { %v5137_v10 = vadd.f32 %v5095_v35, %v14911_v5  ;;  %v11141_v59 = vpop.f32.mrb[233].mxu0  ;;  %11460 = vmatmul.mubr.bf16.gmra.mrb[72].mxu1 %v6408_v49 }
 0x2cb   : > { %v5098_v42 = vpop.f32.mrb[234].mxu0  ;;  %11463 = vmatprep.mubr.msk.bf16.mxu1 %vm12321_vm3, %v12320_v6 }
 0x2cc   : > { %v5138_v13 = vadd.f32 %v5098_v42, %v14921_v50  ;;  %v11142_v24 = vpop.f32.mrb[235].mxu0 }
 0x2cd   : > { %v5252_v47 = vpop.f32.mrb[224].mxu1 }
 0x2ce   : > { %v14991_v28 = vadd.f32 %v5252_v47, %v5133_v27  ;;  %v11177_v11 = vpop.f32.mrb[225].mxu1  ;;  %11488 = vmatmul.mubr.bf16.gmra.mrb[84].mxu0 %v6595_v19 }
 0x2cf   : > { %v5255_v56 = vpop.f32.mrb[226].mxu1  ;;  %11491 = vmatprep.mubr.msk.bf16.mxu0 %vm12321_vm3, %v12320_v6 }
 0x2d0   : > { %v14995_v5 = vadd.f32 %v5255_v56, %v5134_v53  ;;  %v11178_v21 = vpop.f32.mrb[227].mxu1 }
 0x2d1   : > { %v5103_v39 = vpop.f32.mrb[236].mxu0 }
 0x2d2   : > { %v5139_v50 = vadd.f32 %v5103_v39, %v14936_v31  ;;  %v11145_v12 = vpop.f32.mrb[237].mxu0  ;;  %11464 = vmatmul.mubr.bf16.gmra.mrb[76].mxu1 %v6403_v37 }
 0x2d3   : > { %v5106_v57 = vpop.f32.mrb[238].mxu0  ;;  %11527 = vmatprep.mubr.msk.bf16.mxu1 %vm12321_vm3, %v12320_v6 }
 0x2d4   : > { %v5140_v60 = vadd.f32 %v5106_v57, %v14941_v52  ;;  %v11146_v27 = vpop.f32.mrb[239].mxu0 }
 0x2d5   : > { %v5260_v23 = vpop.f32.mrb[228].mxu1 }
 0x2d6   : > { %v15003_v41 = vadd.f32 %v5260_v23, %v5135_v3  ;;  %v11181_v22 = vpop.f32.mrb[229].mxu1  ;;  %11492 = vmatmul.mubr.bf16.gmra.mrb[88].mxu0 %v6597_v62 }
 0x2d7   : > { %v5263_v4 = vpop.f32.mrb[230].mxu1  ;;  %11495 = vmatprep.mubr.msk.bf16.mxu0 %vm12321_vm3, %v12320_v6 }
 0x2d8   : > { %v15007_v31 = vadd.f32 %v5263_v4, %v5136_v7  ;;  %v11182_v53 = vpop.f32.mrb[231].mxu1 }
 0x2d9   : > { %v5111_v44 = vpop.f32.mrb[240].mxu0 }
 0x2da   : > { %v5141_v52 = vadd.f32 %v5111_v44, %v14952_v32  ;;  %v11149_v2 = vpop.f32.mrb[241].mxu0  ;;  %v6600_v32 = vrot.slane %v14825_v63, 6 }
 0x2db   : > { %v5114_v26 = vpop.f32.mrb[242].mxu0 }
 0x2dc   : > { %v5142_v9 = vadd.f32 %v5114_v26, %v14957_v48  ;;  %v11150_v61 = vpop.f32.mrb[243].mxu0  ;;  %v6601_v7 = vsel %vm4169_vm4, %v6598_v43, %v6600_v32 }
 0x2dd   : > { %v5268_v33 = vpop.f32.mrb[232].mxu1 }
 0x2de   : > { %v15013_v46 = vadd.f32 %v5268_v33, %v5137_v10  ;;  %v11185_v36 = vpop.f32.mrb[233].mxu1  ;;  %11496 = vmatmul.mubr.bf16.gmra.mrb[92].mxu0 %v6599_v38  ;;  %v6603_v10 = vsel %vm4169_vm4, %v6600_v32, %v6602_v1 }
 0x2df   : > { %v5271_v29 = vpop.f32.mrb[234].mxu1  ;;  %11499 = vmatprep.mubr.msk.bf16.mxu0 %vm12321_vm3, %v12320_v6 }
 0x2e0   : > { %v15017_v8 = vadd.f32 %v5271_v29, %v5138_v13  ;;  %v11186_v34 = vpop.f32.mrb[235].mxu1 }
 0x2e1   : > { %v5119_v37 = vpop.f32.mrb[244].mxu0 }
 0x2e2   : > { %v5143_v48 = vadd.f32 %v5119_v37, %v14967_v16  ;;  %v11153_v20 = vpop.f32.mrb[245].mxu0 }
 0x2e3   : > { %v5122_v3 = vpop.f32.mrb[246].mxu0 }
 0x2e4   : > { %v5144_v45 = vadd.f32 %v5122_v3, %v14971_v15  ;;  %v11154_v30 = vpop.f32.mrb[247].mxu0 }
 0x2e5   : > { %v5276_v17 = vpop.f32.mrb[236].mxu1 }
 0x2e6   : > { %v15023_v0 = vadd.f32 %v5276_v17, %v5139_v50  ;;  %v11189_v14 = vpop.f32.mrb[237].mxu1  ;;  %11500 = vmatmul.mubr.bf16.gmra.mrb[96].mxu0 %v6601_v7  ;;  %v12206_v17 = vld [vmem:[%s15887_s5 + $0x48] sm:$0xff]  }
 0x2e7   : > { %v5279_v58 = vpop.f32.mrb[238].mxu1  ;;  %11503 = vmatprep.mubr.msk.bf16.mxu0 %vm12321_vm3, %v12320_v6 }
 0x2e8   : > { %v5313_v63 = vadd.f32 %v5279_v58, %v5140_v60  ;;  %v11190_v18 = vpop.f32.mrb[239].mxu1 }
 0x2e9   : > { %v5127_v16 = vpop.f32.mrb[248].mxu0 }
 0x2ea   : > { %v5145_v55 = vadd.f32 %v5127_v16, %v14980_v54  ;;  %v11157_v15 = vpop.f32.mrb[249].mxu0 }
 0x2eb   : > { %v5130_v40 = vpop.f32.mrb[250].mxu0 }
 0x2ec   : > { %v11158_v35 = vpop.f32.mrb[251].mxu0 }
 0x2ed   : > { %v5284_v49 = vpop.f32.mrb[240].mxu1 }
 0x2ee   : > { %v15029_v59 = vadd.f32 %v5284_v49, %v5141_v52  ;;  %v11193_v42 = vpop.f32.mrb[241].mxu1  ;;  %11504 = vmatmul.mubr.bf16.gmra.mrb[100].mxu0 %v6603_v10 }
 0x2ef   : > { %v5287_v13 = vpop.f32.mrb[242].mxu1  ;;  %11507 = vmatprep.mubr.msk.bf16.mxu0 %vm12321_vm3, %v12320_v6 }
 0x2f0   : > { %v5315_v24 = vadd.f32 %v5287_v13, %v5142_v9  ;;  %v11194_v47 = vpop.f32.mrb[243].mxu1 }
 0x2f1   : > { %v5479_v19 = vpop.f32.mrb[252].mxu0 }
 0x2f2   : > { %v5533_v11 = vadd.f32 %v5479_v19, %v14991_v28  ;;  %v11221_v54 = vpop.f32.mrb[253].mxu0 }
 0x2f3   : > { %v5482_v56 = vpop.f32.mrb[254].mxu0 }
 0x2f4   : > { %v5534_v21 = vadd.f32 %v5482_v56, %v14995_v5  ;;  %v11222_v25 = vpop.f32.mrb[255].mxu0 }
 0x2f5   : > { %v5292_v39 = vpop.f32.mrb[244].mxu1 }
 0x2f6   : > { %v15035_v50 = vadd.f32 %v5292_v39, %v5143_v48  ;;  %v11197_v12 = vpop.f32.mrb[245].mxu1  ;;  %11508 = vmatmul.mubr.bf16.gmra.mrb[104].mxu0 %v6602_v1  ;;  %v12209_v39 = vld [vmem:[%s15887_s5 + $0x80] sm:$0xff]  }
 0x2f7   : > { %v5295_v57 = vpop.f32.mrb[246].mxu1  ;;  %11599 = vmatprep.mubr.msk.bf16.mxu0 %vm12321_vm3, %v12320_v6  ;;  %11584 = vmatpush3.bf16.msra.mxu0 %v12209_v39 }
 0x2f8   : > { %v5317_v60 = vadd.f32 %v5295_v57, %v5144_v45  ;;  %v11198_v27 = vpop.f32.mrb[247].mxu1  ;;  %11585 = vmatprep.subr.bf16.mxu0 %v12320_v6 }
 0x2f9   : > { %v5487_v23 = vpop.f32.mrb[0].mxu0  ;;  %v12208_v27 = vld [vmem:[%s15887_s5 + $0x58] sm:$0xff]  }
 0x2fa   : > { %v5535_v62 = vadd.f32 %v5487_v23, %v15003_v41  ;;  %v11225_v28 = vpop.f32.mrb[1].mxu0  ;;  %v12205_v41 = vld [vmem:[%s15887_s5 + $0x40] sm:$0xff]  }
 0x2fb   : > { %v5490_v22 = vpop.f32.mrb[2].mxu0  ;;  %11512 = vmatpush3.bf16.msra.mxu1 %v12205_v41  ;;  %v12210_v28 = vld [vmem:[%s15887_s5 + $0x88] sm:$0xff]  }
 0x2fc   : > { %v5536_v4 = vadd.f32 %v5490_v22, %v15007_v31  ;;  %v11226_v5 = vpop.f32.mrb[3].mxu0  ;;  %11513 = vmatprep.subr.bf16.mxu1 %v12320_v6  ;;  %11586 = vmatpush3.bf16.msra.mxu0 %v12210_v28 }
 0x2fd   : > { %v5300_v53 = vpop.f32.mrb[248].mxu1  ;;  %11587 = vmatprep.subr.bf16.mxu0 %v12320_v6 }
 0x2fe   : > { %v15041_v43 = vadd.f32 %v5300_v53, %v5145_v55  ;;  %v11201_v44 = vpop.f32.mrb[249].mxu1  ;;  %v12207_v55 = vld [vmem:[%s15887_s5 + $0x50] sm:$0xff]  }
 0x2ff   : > { %v5303_v52 = vpop.f32.mrb[250].mxu1  ;;  %11514 = vmatpush3.bf16.msra.mxu1 %v12206_v17  ;;  %v12211_v44 = vld [vmem:[%s15887_s5 + $0x60] sm:$0xff]  }
 0x300   : > { %v11202_v2 = vpop.f32.mrb[251].mxu1  ;;  %11515 = vmatprep.subr.bf16.mxu1 %v12320_v6 }
 0x301   : > { %v5495_v26 = vpop.f32.mrb[4].mxu0  ;;  %v12212_v2 = vld [vmem:[%s15887_s5 + $0x90] sm:$0xff]  }
 0x302   : > { %v5537_v9 = vadd.f32 %v5495_v26, %v15013_v46  ;;  %v11229_v61 = vpop.f32.mrb[5].mxu0  ;;  %11588 = vmatpush3.bf16.msra.mxu0 %v12212_v2 }
 0x303   : > { %v5498_v33 = vpop.f32.mrb[6].mxu0  ;;  %11516 = vmatpush3.bf16.msra.mxu1 %v12207_v55  ;;  %11589 = vmatprep.subr.bf16.mxu0 %v12320_v6 }
 0x304   : > { %v5538_v38 = vadd.f32 %v5498_v33, %v15017_v8  ;;  %v11230_v36 = vpop.f32.mrb[7].mxu0  ;;  %11517 = vmatprep.subr.bf16.mxu1 %v12320_v6 }
 0x305   : > { %v5691_v31 = vpop.f32.mrb[252].mxu1  ;;  %v12213_v36 = vld [vmem:[%s15887_s5 + $0x98] sm:$0xff]  }
 0x306   : > { %v15048_v29 = vadd.f32 %v5691_v31, %v5533_v11  ;;  %v11265_v34 = vpop.f32.mrb[253].mxu1  ;;  %11590 = vmatpush3.bf16.msra.mxu0 %v12213_v36 }
 0x307   : > { %v5694_v32 = vpop.f32.mrb[254].mxu1  ;;  %11518 = vmatpush3.bf16.msra.mxu1 %v12208_v27  ;;  %11591 = vmatprep.subr.bf16.mxu0 %v12320_v6 }
 0x308   : > { %v15051_v37 = vadd.f32 %v5694_v32, %v5534_v21  ;;  %v11266_v46 = vpop.f32.mrb[255].mxu1  ;;  %11519 = vmatprep.subr.bf16.mxu1 %v12320_v6 }
 0x309   : > { %v5503_v48 = vpop.f32.mrb[8].mxu0 }
 0x30a   : > { %v5539_v20 = vadd.f32 %v5503_v48, %v15023_v0  ;;  %v11233_v8 = vpop.f32.mrb[9].mxu0  ;;  %v12214_v48 = vld [vmem:[%s15887_s5 + $0x68] sm:$0xff]  }
 0x30b   : > { %v5506_v3 = vpop.f32.mrb[10].mxu0  ;;  %11520 = vmatpush3.bf16.msra.mxu1 %v12211_v44  ;;  %v12215_v8 = vld [vmem:[%s15887_s5 + $0xa0] sm:$0xff]  }
 0x30c   : > { %v5540_v45 = vadd.f32 %v5506_v3, %v5313_v63  ;;  %v11234_v30 = vpop.f32.mrb[11].mxu0  ;;  %11521 = vmatprep.subr.bf16.mxu1 %v12320_v6  ;;  %11592 = vmatpush3.bf16.msra.mxu0 %v12215_v8 }
 0x30d   : > { %v5699_v7 = vpop.f32.mrb[0].mxu1  ;;  %11593 = vmatprep.subr.bf16.mxu0 %v12320_v6 }
 0x30e   : > { %v15057_v14 = vadd.f32 %v5699_v7, %v5535_v62  ;;  %v11269_v51 = vpop.f32.mrb[1].mxu1  ;;  %v12217_v7 = vld [vmem:[%s15887_s5 + $0xa8] sm:$0xff]  }
 0x30f   : > { %v5702_v58 = vpop.f32.mrb[2].mxu1  ;;  %11522 = vmatpush3.bf16.msra.mxu1 %v12214_v48 }
 0x310   : > { %v15060_v18 = vadd.f32 %v5702_v58, %v5536_v4  ;;  %v11270_v16 = vpop.f32.mrb[3].mxu1  ;;  %11523 = vmatprep.subr.bf16.mxu1 %v12320_v6  ;;  %11594 = vmatpush3.bf16.msra.mxu0 %v12217_v7 }
 0x311   : > { %v5511_v0 = vpop.f32.mrb[12].mxu0  ;;  %11595 = vmatprep.subr.bf16.mxu0 %v12320_v6 }
 0x312   : > { %v5541_v1 = vadd.f32 %v5511_v0, %v15029_v59  ;;  %v11237_v63 = vpop.f32.mrb[13].mxu0 }
 0x313   : > { %v5514_v15 = vpop.f32.mrb[14].mxu0  ;;  %v12216_v63 = vld [vmem:[%s15887_s5 + $0x70] sm:$0xff]  }
 0x314   : > { %v5542_v40 = vadd.f32 %v5514_v15, %v5315_v24  ;;  %v11238_v35 = vpop.f32.mrb[15].mxu0  ;;  %v12218_v15 = vld [vmem:[%s15887_s5 + $0xb0] sm:$0xff]   ;;  %11524 = vmatpush3.bf16.msra.mxu1 %v12216_v63 }
 0x315   : > { %v5707_v49 = vpop.f32.mrb[4].mxu1  ;;  %11596 = vmatpush3.bf16.msra.mxu0 %v12218_v15  ;;  %11525 = vmatprep.subr.bf16.mxu1 %v12320_v6 }
 0x316   : > { %v15067_v10 = vadd.f32 %v5707_v49, %v5537_v9  ;;  %v11273_v42 = vpop.f32.mrb[5].mxu1  ;;  %11597 = vmatprep.subr.bf16.mxu0 %v12320_v6 }
 0x317   : > { %v5710_v13 = vpop.f32.mrb[6].mxu1  ;;  %v12220_v42 = vld [vmem:[%s15887_s5 + $0xb8] sm:$0xff]  }
 0x318   : > { %v15069_v47 = vadd.f32 %v5710_v13, %v5538_v38  ;;  %v11274_v19 = vpop.f32.mrb[7].mxu1 }
 0x319   : > { %v5519_v59 = vpop.f32.mrb[16].mxu0  ;;  %11598 = vmatpush3.bf16.msra.mxu0 %v12220_v42 }
 0x31a   : > { %v5543_v11 = vadd.f32 %v5519_v59, %v15035_v50  ;;  %v11241_v54 = vpop.f32.mrb[17].mxu0  ;;  %11655 = vmatprep.subr.bf16.mxu0 %v12320_v6 }
 0x31b   : > { %v5522_v56 = vpop.f32.mrb[18].mxu0 }
 0x31c   : > { %v5544_v21 = vadd.f32 %v5522_v56, %v5317_v60  ;;  %v11242_v25 = vpop.f32.mrb[19].mxu0 }
 0x31d   : > { %v5715_v24 = vpop.f32.mrb[8].mxu1 }
 0x31e   : > { %v15075_v12 = vadd.f32 %v5715_v24, %v5539_v20  ;;  %v11277_v57 = vpop.f32.mrb[9].mxu1 }
 0x31f   : > { %v5718_v23 = vpop.f32.mrb[10].mxu1 }
 0x320   : > { %v15080_v62 = vadd.f32 %v5718_v23, %v5540_v45  ;;  %v11278_v50 = vpop.f32.mrb[11].mxu1 }
 0x321   : > { %v5527_v60 = vpop.f32.mrb[20].mxu0 }
 0x322   : > { %v5545_v22 = vadd.f32 %v5527_v60, %v15041_v43  ;;  %v11245_v4 = vpop.f32.mrb[21].mxu0 }
 0x323   : > { %v5530_v5 = vpop.f32.mrb[22].mxu0 }
 0x324   : > { %v11246_v53 = vpop.f32.mrb[23].mxu0 }
 0x325   : > { %v5723_v52 = vpop.f32.mrb[12].mxu1 }
 0x326   : > { %v15095_v26 = vadd.f32 %v5723_v52, %v5541_v1  ;;  %v11281_v9 = vpop.f32.mrb[13].mxu1 }
 0x327   : > { %v5726_v43 = vpop.f32.mrb[14].mxu1 }
 0x328   : > { %v15098_v61 = vadd.f32 %v5726_v43, %v5542_v40  ;;  %v11282_v33 = vpop.f32.mrb[15].mxu1 }
 0x329   : > { %v5886_v38 = vpop.f32.mrb[24].mxu0 }
 0x32a   : > { %v5940_v41 = vadd.f32 %v5886_v38, %v15048_v29  ;;  %v11309_v31 = vpop.f32.mrb[25].mxu0 }
 0x32b   : > { %v5889_v34 = vpop.f32.mrb[26].mxu0 }
 0x32c   : > { %v5941_v32 = vadd.f32 %v5889_v34, %v15051_v37  ;;  %v11310_v46 = vpop.f32.mrb[27].mxu0 }
 0x32d   : > { %v5731_v20 = vpop.f32.mrb[16].mxu1 }
 0x32e   : > { %v15113_v3 = vadd.f32 %v5731_v20, %v5543_v11  ;;  %v11285_v29 = vpop.f32.mrb[17].mxu1  ;;  %v12219_v11 = vld [vmem:[%s15887_s5 + $0x78] sm:$0xff]  }
 0x32f   : > { %v5734_v45 = vpop.f32.mrb[18].mxu1  ;;  %11526 = vmatpush3.bf16.msra.mxu1 %v12219_v11 }
 0x330   : > { %v15116_v37 = vadd.f32 %v5734_v45, %v5544_v21  ;;  %v11286_v30 = vpop.f32.mrb[19].mxu1  ;;  %11547 = vmatprep.subr.bf16.mxu1 %v12320_v6 }
 0x331   : > { %v5894_v17 = vpop.f32.mrb[28].mxu0 }
 0x332   : > { %v5942_v51 = vadd.f32 %v5894_v17, %v15057_v14  ;;  %v11313_v58 = vpop.f32.mrb[29].mxu0 }
 0x333   : > { %v5897_v16 = vpop.f32.mrb[30].mxu0 }
 0x334   : > { %v5943_v0 = vadd.f32 %v5897_v16, %v15060_v18  ;;  %v11314_v1 = vpop.f32.mrb[31].mxu0 }
 0x335   : > { %v5739_v55 = vpop.f32.mrb[20].mxu1 }
 0x336   : > { %v15131_v40 = vadd.f32 %v5739_v55, %v5545_v22  ;;  %v11289_v14 = vpop.f32.mrb[21].mxu1 }
 0x337   : > { %v5742_v35 = vpop.f32.mrb[22].mxu1 }
 0x338   : > { %v11290_v18 = vpop.f32.mrb[23].mxu1 }
 0x339   : > { %v5902_v49 = vpop.f32.mrb[32].mxu0 }
 0x33a   : > { %v5944_v13 = vadd.f32 %v5902_v49, %v15067_v10  ;;  %v11317_v19 = vpop.f32.mrb[33].mxu0 }
 0x33b   : > { %v5905_v59 = vpop.f32.mrb[34].mxu0 }
 0x33c   : > { %v5945_v54 = vadd.f32 %v5905_v59, %v15069_v47  ;;  %v11318_v56 = vpop.f32.mrb[35].mxu0 }
 0x33d   : > { %v6059_v21 = vpop.f32.mrb[24].mxu1 }
 0x33e   : > { %v6113_v25 = vadd.f32 %v6059_v21, %v5940_v41  ;;  %v11353_v24 = vpop.f32.mrb[25].mxu1 }
 0x33f   : > { %v6062_v39 = vpop.f32.mrb[26].mxu1 }
 0x340   : > { %v6114_v10 = vadd.f32 %v6062_v39, %v5941_v32  ;;  %v11354_v57 = vpop.f32.mrb[27].mxu1 }
 0x341   : > { %v5910_v27 = vpop.f32.mrb[36].mxu0 }
 0x342   : > { %v5946_v23 = vadd.f32 %v5910_v27, %v15075_v12  ;;  %v11321_v50 = vpop.f32.mrb[37].mxu0 }
 0x343   : > { %v5913_v60 = vpop.f32.mrb[38].mxu0 }
 0x344   : > { %v5947_v28 = vadd.f32 %v5913_v60, %v15080_v62  ;;  %v11322_v47 = vpop.f32.mrb[39].mxu0 }
 0x345   : > { %v6067_v22 = vpop.f32.mrb[28].mxu1 }
 0x346   : > { %v6115_v4 = vadd.f32 %v6067_v22, %v5942_v51  ;;  %v11357_v5 = vpop.f32.mrb[29].mxu1 }
 0x347   : > { %v6070_v53 = vpop.f32.mrb[30].mxu1 }
 0x348   : > { %v6116_v44 = vadd.f32 %v6070_v53, %v5943_v0  ;;  %v11358_v52 = vpop.f32.mrb[31].mxu1 }
 0x349   : > { %v5918_v2 = vpop.f32.mrb[40].mxu0 }
 0x34a   : > { %v5948_v9 = vadd.f32 %v5918_v2, %v15095_v26  ;;  %v11325_v43 = vpop.f32.mrb[41].mxu0 }
 0x34b   : > { %v5921_v33 = vpop.f32.mrb[42].mxu0 }
 0x34c   : > { %v5949_v38 = vadd.f32 %v5921_v33, %v15098_v61  ;;  %v11326_v36 = vpop.f32.mrb[43].mxu0 }
 0x34d   : > { %v6075_v12 = vpop.f32.mrb[32].mxu1 }
 0x34e   : > { %v6117_v41 = vadd.f32 %v6075_v12, %v5944_v13  ;;  %v11361_v31 = vpop.f32.mrb[33].mxu1 }
 0x34f   : > { %v6078_v34 = vpop.f32.mrb[34].mxu1 }
 0x350   : > { %v6118_v62 = vadd.f32 %v6078_v34, %v5945_v54  ;;  %v11362_v32 = vpop.f32.mrb[35].mxu1 }
 0x351   : > { %v5926_v46 = vpop.f32.mrb[44].mxu0 }
 0x352   : > { %v5950_v48 = vadd.f32 %v5926_v46, %v15113_v3  ;;  %v11329_v20 = vpop.f32.mrb[45].mxu0 }
 0x353   : > { %v5929_v8 = vpop.f32.mrb[46].mxu0 }
 0x354   : > { %v5951_v29 = vadd.f32 %v5929_v8, %v15116_v37  ;;  %v11330_v45 = vpop.f32.mrb[47].mxu0 }
 0x355   : > { %v6083_v26 = vpop.f32.mrb[36].mxu1 }
 0x356   : > { %v6119_v30 = vadd.f32 %v6083_v26, %v5946_v23  ;;  %v11365_v17 = vpop.f32.mrb[37].mxu1 }
 0x357   : > { %v6086_v7 = vpop.f32.mrb[38].mxu1 }
 0x358   : > { %v6120_v61 = vadd.f32 %v6086_v7, %v5947_v28  ;;  %v11366_v51 = vpop.f32.mrb[39].mxu1 }
 0x359   : > { %v5934_v58 = vpop.f32.mrb[48].mxu0 }
 0x35a   : > { %v5952_v16 = vadd.f32 %v5934_v58, %v15131_v40  ;;  %v11333_v0 = vpop.f32.mrb[49].mxu0 }
 0x35b   : > { %v5937_v1 = vpop.f32.mrb[50].mxu0 }
 0x35c   : > { %v11334_v63 = vpop.f32.mrb[51].mxu0 }
 0x35d   : > { %v6091_v55 = vpop.f32.mrb[40].mxu1 }
 0x35e   : > { %v6121_v15 = vadd.f32 %v6091_v55, %v5948_v9  ;;  %v11369_v3 = vpop.f32.mrb[41].mxu1 }
 0x35f   : > { %v6094_v14 = vpop.f32.mrb[42].mxu1 }
 0x360   : > { %v6122_v35 = vadd.f32 %v6094_v14, %v5949_v38  ;;  %v11370_v18 = vpop.f32.mrb[43].mxu1 }
 0x361   : > { %v6286_v37 = vpop.f32.mrb[52].mxu0 }
 0x362   : > { %v6340_v49 = vadd.f32 %v6286_v37, %v6113_v25  ;;  %v11397_v42 = vpop.f32.mrb[53].mxu0 }
 0x363   : > { %v6289_v13 = vpop.f32.mrb[54].mxu0 }
 0x364   : > { %v6341_v19 = vadd.f32 %v6289_v13, %v6114_v10  ;;  %v11398_v59 = vpop.f32.mrb[55].mxu0 }
 0x365   : > { %v6099_v11 = vpop.f32.mrb[44].mxu1 }
 0x366   : > { %v6123_v54 = vadd.f32 %v6099_v11, %v5950_v48  ;;  %v11373_v56 = vpop.f32.mrb[45].mxu1 }
 0x367   : > { %v6102_v21 = vpop.f32.mrb[46].mxu1 }
 0x368   : > { %v6124_v40 = vadd.f32 %v6102_v21, %v5951_v29  ;;  %v11374_v24 = vpop.f32.mrb[47].mxu1 }
 0x369   : > { %v6294_v39 = vpop.f32.mrb[56].mxu0 }
 0x36a   : > { %v6342_v57 = vadd.f32 %v6294_v39, %v6115_v4  ;;  %v11401_v27 = vpop.f32.mrb[57].mxu0 }
 0x36b   : > { %v6297_v23 = vpop.f32.mrb[58].mxu0 }
 0x36c   : > { %v6343_v50 = vadd.f32 %v6297_v23, %v6116_v44  ;;  %v11402_v60 = vpop.f32.mrb[59].mxu0 }
 0x36d   : > { %v6107_v28 = vpop.f32.mrb[48].mxu1 }
 0x36e   : > { %v6125_v47 = vadd.f32 %v6107_v28, %v5952_v16  ;;  %v11377_v22 = vpop.f32.mrb[49].mxu1 }
 0x36f   : > { %v6110_v25 = vpop.f32.mrb[50].mxu1 }
 0x370   : > { %v11378_v5 = vpop.f32.mrb[51].mxu1  ;;  %v15167_v25 = vld [vmem:[%s15886_s4] ss:$0 sm:$0xff] }
 0x371   : > { %v6302_v53 = vpop.f32.mrb[60].mxu0 }
 0x372   : > { %v6344_v10 = vadd.f32 %v6302_v53, %v6117_v41  ;;  %v11405_v52 = vpop.f32.mrb[61].mxu0 }
 0x373   : > { %v6305_v2 = vpop.f32.mrb[62].mxu0 }
 0x374   : > { %v6345_v9 = vadd.f32 %v6305_v2, %v6118_v62  ;;  %v11406_v43 = vpop.f32.mrb[63].mxu0 }
 0x375   : > { %v6498_v33 = vpop.f32.mrb[52].mxu1 }
 0x376   : > { %v6552_v38 = vadd.f32 %v6498_v33, %v6340_v49  ;;  %v11441_v36 = vpop.f32.mrb[53].mxu1 }
 0x377   : > { %v6501_v12 = vpop.f32.mrb[54].mxu1 }
 0x378   : > { %v6553_v4 = vadd.f32 %v6501_v12, %v6341_v19  ;;  %v11442_v31 = vpop.f32.mrb[55].mxu1 }
 0x379   : > { %v6310_v34 = vpop.f32.mrb[64].mxu0 }
 0x37a   : > { %v6346_v44 = vadd.f32 %v6310_v34, %v6119_v30  ;;  %v11409_v32 = vpop.f32.mrb[65].mxu0 }
 0x37b   : > { %v6313_v46 = vpop.f32.mrb[66].mxu0 }
 0x37c   : > { %v6347_v48 = vadd.f32 %v6313_v46, %v6120_v61  ;;  %v11410_v20 = vpop.f32.mrb[67].mxu0 }
 0x37d   : > { %v6506_v8 = vpop.f32.mrb[56].mxu1 }
 0x37e   : > { %v6554_v29 = vadd.f32 %v6506_v8, %v6342_v57  ;;  %v11445_v45 = vpop.f32.mrb[57].mxu1 }
 0x37f   : > { %v6509_v41 = vpop.f32.mrb[58].mxu1 }
 0x380   : > { %v6555_v26 = vadd.f32 %v6509_v41, %v6343_v50  ;;  %v11446_v17 = vpop.f32.mrb[59].mxu1 }
 0x381   : > { %v6318_v62 = vpop.f32.mrb[68].mxu0 }
 0x382   : > { %v6348_v7 = vadd.f32 %v6318_v62, %v6121_v15  ;;  %v11413_v51 = vpop.f32.mrb[69].mxu0 }
 0x383   : > { %v6321_v58 = vpop.f32.mrb[70].mxu0 }
 0x384   : > { %v6349_v16 = vadd.f32 %v6321_v58, %v6122_v35  ;;  %v11414_v0 = vpop.f32.mrb[71].mxu0 }
 0x385   : > { %v6514_v1 = vpop.f32.mrb[60].mxu1 }
 0x386   : > { %v15152_v63 = vadd.f32 %v6514_v1, %v6344_v10  ;;  %v11449_v30 = vpop.f32.mrb[61].mxu1 }
 0x387   : > { %v6517_v55 = vpop.f32.mrb[62].mxu1 }
 0x388   : > { %v15154_v3 = vadd.f32 %v6517_v55, %v6345_v9  ;;  %v11450_v61 = vpop.f32.mrb[63].mxu1 }
 0x389   : > { %v6326_v14 = vpop.f32.mrb[72].mxu0 }
 0x38a   : > { %v6350_v18 = vadd.f32 %v6326_v14, %v6123_v54  ;;  %v11417_v37 = vpop.f32.mrb[73].mxu0 }
 0x38b   : > { %v6329_v49 = vpop.f32.mrb[74].mxu0 }
 0x38c   : > { %v6351_v42 = vadd.f32 %v6329_v49, %v6124_v40  ;;  %v11418_v13 = vpop.f32.mrb[75].mxu0 }
 0x38d   : > { %v6522_v19 = vpop.f32.mrb[64].mxu1 }
 0x38e   : > { %v15156_v15 = vadd.f32 %v6522_v19, %v6346_v44  ;;  %v11453_v59 = vpop.f32.mrb[65].mxu1 }
 0x38f   : > { %v6525_v35 = vpop.f32.mrb[66].mxu1 }
 0x390   : > { %v15158_v11 = vadd.f32 %v6525_v35, %v6347_v48  ;;  %v11454_v56 = vpop.f32.mrb[67].mxu1 }
 0x391   : > { %v6334_v21 = vpop.f32.mrb[76].mxu0 }
 0x392   : > { %v6352_v24 = vadd.f32 %v6334_v21, %v6125_v47  ;;  %v11421_v39 = vpop.f32.mrb[77].mxu0 }
 0x393   : > { %v6337_v57 = vpop.f32.mrb[78].mxu0 }
 0x394   : > { %v11422_v27 = vpop.f32.mrb[79].mxu0 }
 0x395   : > { %v6530_v23 = vpop.f32.mrb[68].mxu1 }
 0x396   : > { %v15160_v50 = vadd.f32 %v6530_v23, %v6348_v7  ;;  %v11457_v54 = vpop.f32.mrb[69].mxu1 }
 0x397   : > { %v6533_v60 = vpop.f32.mrb[70].mxu1 }
 0x398   : > { %v15162_v40 = vadd.f32 %v6533_v60, %v6349_v16  ;;  %v11458_v28 = vpop.f32.mrb[71].mxu1 }
 0x399   : > { %v6693_v22 = vpop.f32.mrb[80].mxu0 }
 0x39a   : > { %v6747_v5 = vadd.f32 %v6693_v22, %v6552_v38  ;;  %v11485_v53 = vpop.f32.mrb[81].mxu0 }
 0x39b   : > { %v6696_v47 = vpop.f32.mrb[82].mxu0 }
 0x39c   : > { %v6767_v10 = vadd.f32 %v15167_v25, %v6747_v5  ;;  %v6748_v52 = vadd.f32 %v6696_v47, %v6553_v4  ;;  %v11486_v2 = vpop.f32.mrb[83].mxu0 }
 0x39d   : > { %v6538_v9 = vpop.f32.mrb[72].mxu1 }
 0x39e   : > { %v6768_v43 = vadd.f32 %v15167_v25, %v6748_v52  ;;  %v15171_v33 = vadd.f32 %v6538_v9, %v6350_v18  ;;  %v11461_v36 = vpop.f32.mrb[73].mxu1  ;;  %v6780_v31 = vmax.f32 %v6767_v10, 0.0 }
 0x39f   : > { %v6541_v12 = vpop.f32.mrb[74].mxu1 }
 0x3a0   : > { %v6781_v34 = vmax.f32 %v6768_v43, 0.0  ;;  %v15173_v44 = vadd.f32 %v6541_v12, %v6351_v42  ;;  %v11462_v32 = vpop.f32.mrb[75].mxu1 }
 0x3a1   : > { %v6701_v46 = vpop.f32.mrb[84].mxu0  ;;  %v12229_v32 = vld [vmem:[%s15887_s5 + $0x108] sm:$0xff]  }
 0x3a2   : > { %v9867_v38 = vpack.c.bf16 %v6781_v34, %v6780_v31  ;;  %v6749_v48 = vadd.f32 %v6701_v46, %v6554_v29  ;;  %v11489_v20 = vpop.f32.mrb[85].mxu0 }
 0x3a3   : > { %v6704_v8 = vpop.f32.mrb[86].mxu0  ;;  %v12225_v20 = vld [vmem:[%s15887_s5 + $0x8] sm:$0xff]  }
 0x3a4   : > { %9868 = vst [vmem:[#allocation3] sm:$0xff] %v9867_v38   ;;  %v6769_v4 = vadd.f32 %v15167_v25, %v6749_v48  ;;  %v6750_v45 = vadd.f32 %v6704_v8, %v6555_v26  ;;  %v11490_v41 = vpop.f32.mrb[87].mxu0 }
 0x3a5   : > { %v6546_v17 = vpop.f32.mrb[76].mxu1 }
 0x3a6   : > { %v6770_v62 = vadd.f32 %v15167_v25, %v6750_v45  ;;  %v15177_v7 = vadd.f32 %v6546_v17, %v6352_v24  ;;  %v11465_v51 = vpop.f32.mrb[77].mxu1  ;;  %v6782_v16 = vmax.f32 %v6769_v4, 0.0 }
 0x3a7   : > { %v6549_v58 = vpop.f32.mrb[78].mxu1 }
 0x3a8   : > { %v6783_v0 = vmax.f32 %v6770_v62, 0.0  ;;  %v11466_v1 = vpop.f32.mrb[79].mxu1  ;;  %v12231_v58 = vld [vmem:[%s15887_s5 + $0x110] sm:$0xff]  }
 0x3a9   : > { %v6709_v30 = vpop.f32.mrb[88].mxu0 }
 0x3aa   : > { %v9872_v55 = vpack.c.bf16 %v6783_v0, %v6782_v16  ;;  %v6751_v29 = vadd.f32 %v6709_v30, %v15152_v63  ;;  %v11493_v61 = vpop.f32.mrb[89].mxu0  ;;  %v12228_v30 = vld [vmem:[%s15887_s5 + $0x10] sm:$0xff]  }
 0x3ab   : > { %v6712_v14 = vpop.f32.mrb[90].mxu0  ;;  %v6864_v18 = vld [vmem:[#allocation3] sm:$0xf]  ;;  %v6865_v37 = vld [vmem:[#allocation3 + $0x4] sm:$0xf] }
 0x3ac   : > { %9919 = vst [vmem:[#allocation3 + $0x8] sm:$0xff] %v9872_v55   ;;  %v6771_v26 = vadd.f32 %v15167_v25, %v6751_v29  ;;  %v6752_v49 = vadd.f32 %v6712_v14, %v15154_v3  ;;  %v11494_v42 = vpop.f32.mrb[91].mxu0  ;;  %v15182_v13 = vcombine.low %v6864_v18, %v6865_v37  ;;  %v7232_v59 = vld [vmem:[#allocation3] sm:$0xe]  ;;  %v12233_v18 = vld [vmem:[%s15887_s5 + $0x118] sm:$0xff]  }
 0x3ad   : > { %v9654_v24 = vcombine.low %v7232_v59, %v6865_v37  ;;  %v12232_v42 = vld [vmem:[%s15887_s5 + $0x18] sm:$0xff]  }
 0x3ae   : > { %v6772_v19 = vadd.f32 %v15167_v25, %v6752_v49  ;;  %v6939_v35 = vshll.u32 %v15182_v13, 16  ;;  %v6784_v56 = vmax.f32 %v6771_v26, 0.0  ;;  %v6937_v47 = vshrl.u32 %v15182_v13, 16 }
 0x3af   : > { %v7254_v5 = vrot.slane %v9654_v24, 1 }
 0x3b0   : > { %v6785_v21 = vmax.f32 %v6772_v19, 0.0  ;;  %v6941_v23 = vrot.slane %v6939_v35, 1 }
 0x3b1   : > { %v6717_v63 = vpop.f32.mrb[92].mxu0 }
 0x3b2   : > { %v9877_v39 = vpack.c.bf16 %v6785_v21, %v6784_v56  ;;  %v6753_v57 = vadd.f32 %v6717_v63, %v15156_v15  ;;  %v11497_v27 = vpop.f32.mrb[93].mxu0  ;;  %v12227_v15 = vld [vmem:[%s15887_s5 + $0x100] sm:$0xff]   ;;  %v6942_v9 = vor.u32 %v6941_v23, %v6937_v47 }
 0x3b3   : > { %v6720_v54 = vpop.f32.mrb[94].mxu0  ;;  %v15187_v60 = vld [vmem:[#allocation3 + $0x8] sm:$0xff]  }
 0x3b4   : > { %9920 = vst [vmem:[#allocation3 + $0x10] sm:$0xff] %v9877_v39   ;;  %v6773_v3 = vadd.f32 %v15167_v25, %v6753_v57  ;;  %v6754_v28 = vadd.f32 %v6720_v54, %v15158_v11  ;;  %v11498_v22 = vpop.f32.mrb[95].mxu0  ;;  %v7255_v53 = vrot.slane %v15187_v60, 1  ;;  %v6944_v10 = vshll.u32 %v15187_v60, 16  ;;  %v12224_v11 = vld [vmem:[%s15887_s5] sm:$0xff]  }
 0x3b5   : > { %v6948_v62 = vshrl.u32 %v15187_v60, 16  ;;  %v12236_v39 = vld [vmem:[%s15887_s5 + $0x120] sm:$0xff]  }
 0x3b6   : > { %v6774_v52 = vadd.f32 %v15167_v25, %v6754_v28  ;;  %v7256_v2 = vsel %vm7253_vm6, %v7254_v5, %v7255_v53  ;;  %v6946_v43 = vrot.slane %v6944_v10, 1  ;;  %v6786_v36 = vmax.f32 %v6773_v3, 0.0  ;;  %v12234_v54 = vld [vmem:[%s15887_s5 + $0x20] sm:$0xff]  }
 0x3b7   : > { %11600 = vmatmul.mubr.bf16.vlgmr.msra.gmra.mrb[108].mxu0 %v7256_v2 }
 0x3b8   : > { %v6787_v12 = vmax.f32 %v6774_v52, 0.0  ;;  %v6947_v34 = vsel %vm759_vm0, %v6942_v9, %v6946_v43  ;;  %11603 = vmatprep.mubr.msk.bf16.mxu0 %vm12321_vm3, %v12320_v6  ;;  %11656 = vmatpush3.bf16.msra.mxu0 %v12227_v15  ;;  %v6950_v0 = vor.u32 %v6948_v62, %v6946_v43  ;;  %v12237_v52 = vld [vmem:[%s15887_s5 + $0x28] sm:$0xff]   ;;  %v12243_v62 = vld [vmem:[%s15887_s5 + $0x38] sm:$0xff]  }
 0x3b9   : > { %v6725_v31 = vpop.f32.mrb[96].mxu0  ;;  %11528 = vmatmul.mubr.bf16.vlgmr.msra.gmra.mrb[80].mxu1 %v6947_v34  ;;  %11657 = vmatprep.subr.bf16.mxu0 %v12320_v6 }
 0x3ba   : > { %v9882_v46 = vpack.c.bf16 %v6787_v12, %v6786_v36  ;;  %v6755_v38 = vadd.f32 %v6725_v31, %v15160_v50  ;;  %v11501_v48 = vpop.f32.mrb[97].mxu0  ;;  %11548 = vmatpush3.bf16.msra.mxu1 %v12224_v11  ;;  %11531 = vmatprep.mubr.msk.bf16.mxu1 %vm12321_vm3, %v12320_v6  ;;  %v12241_v31 = vld [vmem:[%s15887_s5 + $0x130] sm:$0xff]  }
 0x3bb   : > { %v6728_v8 = vpop.f32.mrb[98].mxu0  ;;  %v15213_v4 = vld [vmem:[#allocation3 + $0x10] sm:$0xff]   ;;  %11549 = vmatprep.subr.bf16.mxu1 %v12320_v6 }
 0x3bc   : > { %9921 = vst [vmem:[#allocation3 + $0x18] sm:$0xff] %v9882_v46   ;;  %v6775_v45 = vadd.f32 %v15167_v25, %v6755_v38  ;;  %v6756_v50 = vadd.f32 %v6728_v8, %v15162_v40  ;;  %v11502_v41 = vpop.f32.mrb[99].mxu0  ;;  %v7257_v17 = vrot.slane %v15213_v4, 1  ;;  %v6952_v51 = vshll.u32 %v15213_v4, 16  ;;  %11658 = vmatpush3.bf16.msra.mxu0 %v12229_v32  ;;  %v6861_v32 = vld [vmem:[#allocation3 + $0x30] sm:$0x1] }
 0x3bd   : > { %11659 = vmatprep.subr.bf16.mxu0 %v12320_v6  ;;  %v6956_v63 = vshrl.u32 %v15213_v4, 16 }
 0x3be   : > { %v6776_v16 = vadd.f32 %v15167_v25, %v6756_v50  ;;  %11550 = vmatpush3.bf16.msra.mxu1 %v12225_v20  ;;  %v7258_v40 = vsel %vm7253_vm6, %v7255_v53, %v7257_v17  ;;  %v6954_v1 = vrot.slane %v6952_v51, 1  ;;  %v6788_v55 = vmax.f32 %v6775_v45, 0.0  ;;  %v12238_v53 = vld [vmem:[%s15887_s5 + $0x128] sm:$0xff]   ;;  %v12240_v20 = vld [vmem:[%s15887_s5 + $0x30] sm:$0xff]   ;;  %v12242_v50 = vld [vmem:[%s15887_s5 + $0x138] sm:$0xff]  }
 0x3bf   : > { %11604 = vmatmul.mubr.bf16.gmra.mrb[112].mxu0 %v7258_v40  ;;  %11551 = vmatprep.subr.bf16.mxu1 %v12320_v6  ;;  %v15314_v40 = vld [vmem:[#allocation3 + $0x8] sm:$0xf] }
 0x3c0   : > { %v6789_v29 = vmax.f32 %v6776_v16, 0.0  ;;  %v6955_v14 = vsel %vm759_vm0, %v6950_v0, %v6954_v1  ;;  %11607 = vmatprep.mubr.msk.bf16.mxu0 %vm12321_vm3, %v12320_v6  ;;  %11660 = vmatpush3.bf16.msra.mxu0 %v12231_v58  ;;  %v6958_v27 = vor.u32 %v6956_v63, %v6954_v1 }
 0x3c1   : > { %v6733_v61 = vpop.f32.mrb[100].mxu0  ;;  %11532 = vmatmul.mubr.bf16.gmra.mrb[84].mxu1 %v6955_v14  ;;  %11661 = vmatprep.subr.bf16.mxu0 %v12320_v6  ;;  %v7646_v14 = vld [vmem:[#allocation3 + $0x4] sm:$0xc] }
 0x3c2   : > { %v9887_v37 = vpack.c.bf16 %v6789_v29, %v6788_v55  ;;  %v6757_v26 = vadd.f32 %v6733_v61, %v15171_v33  ;;  %v11505_v49 = vpop.f32.mrb[101].mxu0  ;;  %11552 = vmatpush3.bf16.msra.mxu1 %v12228_v30  ;;  %11535 = vmatprep.mubr.msk.bf16.mxu1 %vm12321_vm3, %v12320_v6  ;;  %v15318_v55 = vld [vmem:[#allocation3 + $0xc] sm:$0xff]   ;;  %v8005_v29 = vld [vmem:[#allocation3 + $0x8] sm:$0x8] }
 0x3c3   : > { %v6736_v19 = vpop.f32.mrb[102].mxu0  ;;  %v15244_v59 = vld [vmem:[#allocation3 + $0x18] sm:$0xff]   ;;  %11553 = vmatprep.subr.bf16.mxu1 %v12320_v6  ;;  %v15320_v61 = vld [vmem:[#allocation3 + $0xc] sm:$0xf]  ;;  %v15331_v49 = vcombine.low %v7646_v14, %v15314_v40 }
 0x3c4   : > { %9922 = vst [vmem:[#allocation3 + $0x20] sm:$0xff] %v9887_v37   ;;  %v6777_v35 = vadd.f32 %v15167_v25, %v6757_v26  ;;  %v6758_v33 = vadd.f32 %v6736_v19, %v15173_v44  ;;  %v11506_v56 = vpop.f32.mrb[103].mxu0  ;;  %v7259_v21 = vrot.slane %v15244_v59, 1  ;;  %v6960_v24 = vshll.u32 %v15244_v59, 16  ;;  %11662 = vmatpush3.bf16.msra.mxu0 %v12233_v18  ;;  %v15323_v18 = vld [vmem:[#allocation3 + $0x10] sm:$0xf] }
 0x3c5   : > { %11663 = vmatprep.subr.bf16.mxu0 %v12320_v6  ;;  %v6964_v36 = vshrl.u32 %v15244_v59, 16  ;;  %v15325_v37 = vld [vmem:[#allocation3 + $0x14] sm:$0xf]  ;;  %v15336_v19 = vld [vmem:[#allocation3 + $0x18] sm:$0xf] }
 0x3c6   : > { %v6778_v57 = vadd.f32 %v15167_v25, %v6758_v33  ;;  %v7260_v44 = vsel %vm7253_vm6, %v7257_v17, %v7259_v21  ;;  %v6962_v23 = vrot.slane %v6960_v24, 1  ;;  %11554 = vmatpush3.bf16.msra.mxu1 %v12232_v42  ;;  %v6790_v3 = vmax.f32 %v6777_v35, 0.0  ;;  %v15338_v35 = vld [vmem:[#allocation3 + $0x1c] sm:$0xf] }
 0x3c7   : > { %11608 = vmatmul.mubr.bf16.gmra.mrb[116].mxu0 %v7260_v44  ;;  %11555 = vmatprep.subr.bf16.mxu1 %v12320_v6  ;;  %v15334_v42 = vcombine.low %v8005_v29, %v15320_v61  ;;  %v7668_v33 = vrot.slane %v15318_v55, 2  ;;  %v15345_v56 = vcombine.low %v15323_v18, %v15325_v37  ;;  %v12249_v44 = vld [vmem:[%s15887_s5 + $0x180] sm:$0xff]  }
 0x3c8   : > { %v6791_v28 = vmax.f32 %v6778_v57, 0.0  ;;  %v6963_v5 = vsel %vm759_vm0, %v6958_v27, %v6962_v23  ;;  %11611 = vmatprep.mubr.msk.bf16.mxu0 %vm12321_vm3, %v12320_v6  ;;  %11664 = vmatpush3.bf16.msra.mxu0 %v12236_v39  ;;  %v6966_v38 = vor.u32 %v6964_v36, %v6962_v23  ;;  %v7667_v57 = vrot.slane %v15331_v49, 2  ;;  %v15363_v23 = vld [vmem:[#allocation3 + $0x14] sm:$0xff]  }
 0x3c9   : > { %v6741_v22 = vpop.f32.mrb[104].mxu0  ;;  %11536 = vmatmul.mubr.bf16.gmra.mrb[88].mxu1 %v6963_v5  ;;  %11665 = vmatprep.subr.bf16.mxu0 %v12320_v6  ;;  %v15361_v27 = vcombine.low %v15336_v19, %v15338_v35  ;;  %v12246_v5 = vld [vmem:[%s15887_s5 + $0xc0] sm:$0xff]   ;;  %v7670_v36 = vrot.slane %v15363_v23, 2 }
 0x3ca   : > { %v9892_v47 = vpack.c.bf16 %v6791_v28, %v6790_v3  ;;  %v6759_v10 = vadd.f32 %v6741_v22, %v15177_v7  ;;  %v11509_v15 = vpop.f32.mrb[105].mxu0  ;;  %11556 = vmatpush3.bf16.msra.mxu1 %v12234_v54  ;;  %11539 = vmatprep.mubr.msk.bf16.mxu1 %vm12321_vm3, %v12320_v6  ;;  %v8232_v3 = vshrl.u32 %v15334_v42, 16  ;;  %v8235_v28 = vshll.u32 %v15334_v42, 16 }
 0x3cb   : > { %v6744_v2 = vpop.f32.mrb[106].mxu0  ;;  %v15275_v9 = vld [vmem:[#allocation3 + $0x20] sm:$0xff]   ;;  %11557 = vmatprep.subr.bf16.mxu1 %v12320_v6  ;;  %v7669_v22 = vsel %vm3263_vm2, %v7667_v57, %v7668_v33 }
 0x3cc   : > { %9923 = vst [vmem:[#allocation3 + $0x28] sm:$0xff] %v9892_v47   ;;  %v6779_v43 = vadd.f32 %v15167_v25, %v6759_v10  ;;  %v11510_v7 = vpop.f32.mrb[107].mxu0  ;;  %v7261_v11 = vrot.slane %v15275_v9, 1  ;;  %v6968_v12 = vshll.u32 %v15275_v9, 16  ;;  %11666 = vmatpush3.bf16.msra.mxu0 %v12238_v53  ;;  %v6972_v58 = vshrl.u32 %v15275_v9, 16  ;;  %v12251_v2 = vld [vmem:[%s15887_s5 + $0x188] sm:$0xff]  }
 0x3cd   : > { %11667 = vmatprep.subr.bf16.mxu0 %v12320_v6  ;;  %v15349_v63 = vld [vmem:[#allocation3 + $0x24] sm:$0xf]  ;;  %v8240_v47 = vshrl.u32 %v15345_v56, 16  ;;  %v8234_v10 = vrot.slane %v8232_v3, 3  ;;  %v8237_v15 = vrot.slane %v8235_v28, 4  ;;  %v8249_v7 = vshrl.u32 %v15361_v27, 16 }
 0x3ce   : > { %v6792_v34 = vmax.f32 %v6779_v43, 0.0  ;;  %v7262_v46 = vsel %vm7253_vm6, %v7259_v21, %v7261_v11  ;;  %v6970_v48 = vrot.slane %v6968_v12, 1  ;;  %11558 = vmatpush3.bf16.msra.mxu1 %v12237_v52  ;;  %v15347_v21 = vld [vmem:[#allocation3 + $0x20] sm:$0xf]  ;;  %v8243_v52 = vshll.u32 %v15345_v56, 16  ;;  %v12247_v25 = vld [vmem:[%s15887_s5 + $0xc8] sm:$0xff]  }
 0x3cf   : > { %11612 = vmatmul.mubr.bf16.gmra.mrb[120].mxu0 %v7262_v46  ;;  %11559 = vmatprep.subr.bf16.mxu1 %v12320_v6  ;;  %v15367_v54 = vcombine.low %v15347_v21, %v15349_v63  ;;  %v8242_v43 = vrot.slane %v8240_v47, 3  ;;  %v8251_v46 = vrot.slane %v8249_v7, 3  ;;  %v12256_v28 = vld [vmem:[%s15887_s5 + $0xe0] sm:$0xff]  }
 0x3d0   : > { %v9853_v8 = vpack.c.bf16 %v6792_v34, %v6792_v34  ;;  %v6971_v45 = vsel %vm759_vm0, %v6966_v38, %v6970_v48  ;;  %11615 = vmatprep.mubr.msk.bf16.mxu0 %vm12321_vm3, %v12320_v6  ;;  %11668 = vmatpush3.bf16.msra.mxu0 %v12241_v31  ;;  %v6974_v1 = vor.u32 %v6972_v58, %v6970_v48  ;;  %v8245_v12 = vrot.slane %v8243_v52, 4  ;;  %v7401_v7 = vld [vmem:[#allocation3 + $0x4] sm:$0xe] }
 0x3d1   : > { %11540 = vmatmul.mubr.bf16.gmra.mrb[92].mxu1 %v6971_v45  ;;  %11669 = vmatprep.subr.bf16.mxu0 %v12320_v6  ;;  %v8258_v31 = vshrl.u32 %v15367_v54, 16  ;;  %v8261_v34 = vshll.u32 %v15367_v54, 16 }
 0x3d2   : > { %v6862_v41 = vsel %vm15289_vm9, %v9853_v8, %v6861_v32  ;;  %11543 = vmatprep.mubr.msk.bf16.mxu1 %vm12321_vm3, %v12320_v6  ;;  %11560 = vmatpush3.bf16.msra.mxu1 %v12240_v20  ;;  %v8238_v32 = vor.u32 %v8237_v15, %v8234_v10  ;;  %v8246_v48 = vor.u32 %v8245_v12, %v8242_v43  ;;  %v12259_v10 = vld [vmem:[%s15887_s5 + $0xe8] sm:$0xff]   ;;  %v12263_v15 = vld [vmem:[%s15887_s5 + $0x1b0] sm:$0xff]   ;;  %v12264_v43 = vld [vmem:[%s15887_s5 + $0x1b8] sm:$0xff]  }
 0x3d3   : > { %6863 = vst [vmem:[#allocation3 + $0x30] sm:$0x1] %v6862_v41  ;;  %v12239_v17 = vld [vmem:[#allocation3 + $0x28] ss:$0 sps:$4 sm:$0x11]   ;;  %11561 = vmatprep.subr.bf16.mxu1 %v12320_v6  ;;  %v8260_v20 = vrot.slane %v8258_v31, 3  ;;  %v9679_v12 = vcombine.low %v7401_v7, %v15314_v40 }
 0x3d4   : > { %v7263_v51 = vrot.slane %v12239_v17, 1  ;;  %v6976_v16 = vshll.u32 %v12239_v17, 16  ;;  %11670 = vmatpush3.bf16.msra.mxu0 %v12242_v50  ;;  %v15351_v24 = vld [vmem:[#allocation3 + $0x28] sm:$0xf]  ;;  %v15353_v39 = vld [vmem:[#allocation3 + $0x2c] sm:$0xf] }
 0x3d5   : > { %11727 = vmatprep.subr.bf16.mxu0 %v12320_v6  ;;  %v15377_v53 = vcombine.low %v15351_v24, %v15353_v39  ;;  %v8263_v8 = vrot.slane %v8261_v34, 4  ;;  %v12253_v50 = vld [vmem:[%s15887_s5 + $0x190] sm:$0xff]   ;;  %v15471_v52 = vld [vmem:[#allocation3 + $0x2c] ss:$0 sps:$4 sm:$0x33]   ;;  %v7469_v31 = vshll.u32 %v15318_v55, 16 }
 0x3d6   : > { %v7264_v0 = vsel %vm7253_vm6, %v7261_v11, %v7263_v51  ;;  %v6978_v30 = vrot.slane %v6976_v16, 1  ;;  %11562 = vmatpush3.bf16.msra.mxu1 %v12243_v62  ;;  %v8252_v11 = vshll.u32 %v15361_v27, 16  ;;  %v15406_v62 = vsel %vm8230_vm10, %v8238_v32, %v8246_v48  ;;  %v15579_v7 = vld [vmem:[%s15887_s5 + $0x220] sm:$0xff]  }
 0x3d7   : > { %11616 = vmatmul.mubr.bf16.gmra.mrb[124].mxu0 %v7264_v0  ;;  %11619 = vmatprep.subr.bf16.mxu1 %v12320_v6  ;;  %v8267_v38 = vshrl.u32 %v15377_v53, 16  ;;  %v8270_v45 = vshll.u32 %v15377_v53, 16  ;;  %v8264_v51 = vor.u32 %v8263_v8, %v8260_v20  ;;  %v7671_v16 = vsel %vm3263_vm2, %v7668_v33, %v7670_v36  ;;  %v12250_v0 = vld [vmem:[%s15887_s5 + $0xd0] sm:$0xff]  }
 0x3d8   : > { %v6979_v26 = vsel %vm759_vm0, %v6974_v1, %v6978_v30  ;;  %11671 = vmatprep.mubr.msk.bf16.mxu0 %vm12321_vm3, %v12320_v6  ;;  %v15412_v1 = vld [vmem:[#allocation3 + $0x1c] sm:$0xff]   ;;  %v7461_v32 = vshll.u32 %v9679_v12, 16  ;;  %v8062_v20 = vrot.slane %v15334_v42, 3 }
 0x3d9   : > { %11544 = vmatmul.mubr.bf16.gmra.mrb[96].mxu1 %v6979_v26  ;;  %v8269_v17 = vrot.slane %v8267_v38, 3  ;;  %v8272_v58 = vrot.slane %v8270_v45, 4  ;;  %v12255_v26 = vld [vmem:[%s15887_s5 + $0x198] sm:$0xff]   ;;  %v7672_v57 = vrot.slane %v15412_v1, 2  ;;  %v15511_v45 = vld [vmem:[%s15887_s5 + $0x200] sm:$0xff]  }
 0x3da   : > { %11563 = vmatprep.mubr.msk.bf16.mxu1 %vm12321_vm3, %v12320_v6 }
 0x3db   : > { %v15421_v14 = vor.u32 %v8272_v58, %v8269_v17  ;;  %v7673_v3 = vsel %vm3263_vm2, %v7670_v36, %v7672_v57  ;;  %v12265_v36 = vld [vmem:[%s15887_s5 + $0xf8] sm:$0xff]   ;;  %v12270_v17 = vld [vmem:[%s15887_s5 + $0x140] sm:$0xff]  }
 0x3dd   : > { %v15432_v33 = vsel %vm8230_vm10, %v8264_v51, %v15421_v14 }
 0x3df   : > { %11672 = vmatmul.mubr.bf16.vlgmr.msra.gmra.mrb[128].mxu0 %v7669_v22  ;;  %v15449_v22 = vld [vmem:[#allocation3 + $0x24] sm:$0xff]  }
 0x3e0   : > { %11675 = vmatprep.mubr.msk.bf16.mxu0 %vm12321_vm3, %v12320_v6  ;;  %11728 = vmatpush3.bf16.msra.mxu0 %v12249_v44  ;;  %v12254_v44 = vld [vmem:[%s15887_s5 + $0xd8] sm:$0xff]   ;;  %v7674_v47 = vrot.slane %v15449_v22, 2 }
 0x3e1   : > { %11564 = vmatmul.mubr.bf16.vlgmr.msra.gmra.mrb[100].mxu1 %v15182_v13  ;;  %11729 = vmatprep.subr.bf16.mxu0 %v12320_v6  ;;  %v8254_v13 = vrot.slane %v8252_v11, 4  ;;  %v7676_v11 = vrot.slane %v15471_v52, 2 }
 0x3e2   : > { %11620 = vmatpush3.bf16.msra.mxu1 %v12246_v5  ;;  %11567 = vmatprep.mubr.msk.bf16.mxu1 %vm12321_vm3, %v12320_v6  ;;  %v12260_v5 = vld [vmem:[%s15887_s5 + $0x1a8] sm:$0xff]  }
 0x3e3   : > { %11621 = vmatprep.subr.bf16.mxu1 %v12320_v6  ;;  %v8255_v41 = vor.u32 %v8254_v13, %v8251_v46  ;;  %v7677_v34 = vsel %vm3263_vm2, %v7674_v47, %v7676_v11  ;;  %v7471_v46 = vrot.slane %v7469_v31, 2  ;;  %v8063_v13 = vrot.slane %v15345_v56, 3 }
 0x3e4   : > { %11730 = vmatpush3.bf16.msra.mxu0 %v12251_v2  ;;  %v12262_v2 = vld [vmem:[%s15887_s5 + $0xf0] sm:$0xff]   ;;  %v7493_v11 = vshrl.u32 %v15449_v22, 16 }
 0x3e5   : > { %11731 = vmatprep.subr.bf16.mxu0 %v12320_v6  ;;  %v15415_v30 = vsel %vm8230_vm10, %v8246_v48, %v8255_v41  ;;  %v15419_v29 = vsel %vm8230_vm10, %v8255_v41, %v8264_v51  ;;  %v7463_v48 = vrot.slane %v7461_v32, 2  ;;  %v8064_v56 = vsel %vm8061_vm11, %v8062_v20, %v8063_v13 }
 0x3e6   : > { %11622 = vmatpush3.bf16.msra.mxu1 %v12247_v25  ;;  %v7458_v25 = vshrl.u32 %v9679_v12, 16  ;;  %v12282_v12 = vld [vmem:[%s15887_s5 + $0x160] sm:$0xff]   ;;  %v7502_v20 = vshrl.u32 %v15471_v52, 16 }
 0x3e7   : > { %11676 = vmatmul.mubr.bf16.gmra.mrb[132].mxu0 %v7671_v16  ;;  %11623 = vmatprep.subr.bf16.mxu1 %v12320_v6  ;;  %v15530_v16 = vld [vmem:[%s15887_s5 + $0x208] sm:$0xff]  }
 0x3e8   : > { %11679 = vmatprep.mubr.msk.bf16.mxu0 %vm12321_vm3, %v12320_v6  ;;  %11732 = vmatpush3.bf16.msra.mxu0 %v12253_v50  ;;  %v7460_v38 = vrot.slane %v7458_v25, 1  ;;  %v7475_v50 = vshrl.u32 %v15363_v23, 16  ;;  %v7495_v25 = vrot.slane %v7493_v11, 1 }
 0x3e9   : > { %11568 = vmatmul.mubr.bf16.gmra.mrb[104].mxu1 %v15187_v60  ;;  %11733 = vmatprep.subr.bf16.mxu0 %v12320_v6  ;;  %v12258_v60 = vld [vmem:[%s15887_s5 + $0x1a0] sm:$0xff]  }
 0x3ea   : > { %11624 = vmatpush3.bf16.msra.mxu1 %v12250_v0  ;;  %11571 = vmatprep.mubr.msk.bf16.mxu1 %vm12321_vm3, %v12320_v6  ;;  %v7464_v41 = vor.u32 %v7463_v48, %v7460_v38  ;;  %v7477_v51 = vrot.slane %v7475_v50, 1  ;;  %v12271_v0 = vld [vmem:[%s15887_s5 + $0x148] sm:$0xff]   ;;  %v15614_v48 = vld [vmem:[%s15887_s5 + $0x230] sm:$0xff]  }
 0x3eb   : > { %11625 = vmatprep.subr.bf16.mxu1 %v12320_v6 }
 0x3ec   : > { %11734 = vmatpush3.bf16.msra.mxu0 %v12255_v26  ;;  %v8065_v26 = vrot.slane %v15361_v27, 3 }
 0x3ed   : > { %11735 = vmatprep.subr.bf16.mxu0 %v12320_v6 }
 0x3ee   : > { %11626 = vmatpush3.bf16.msra.mxu1 %v12254_v44  ;;  %v15544_v44 = vld [vmem:[%s15887_s5 + $0x210] sm:$0xff]   ;;  %v8066_v27 = vsel %vm8061_vm11, %v8063_v13, %v8065_v26  ;;  %v12286_v13 = vld [vmem:[%s15887_s5 + $0x168] sm:$0xff]  }
 0x3ef   : > { %11680 = vmatmul.mubr.bf16.gmra.mrb[136].mxu0 %v7673_v3  ;;  %11627 = vmatprep.subr.bf16.mxu1 %v12320_v6  ;;  %v7487_v3 = vshll.u32 %v15412_v1, 16 }
 0x3f0   : > { %11683 = vmatprep.mubr.msk.bf16.mxu0 %vm12321_vm3, %v12320_v6  ;;  %11736 = vmatpush3.bf16.msra.mxu0 %v12258_v60  ;;  %v7484_v60 = vshrl.u32 %v15412_v1, 16  ;;  %v12297_v1 = vld [vmem:[%s15887_s5 + $0x1e0] sm:$0xff]  }
 0x3f1   : > { %11572 = vmatmul.mubr.bf16.gmra.mrb[108].mxu1 %v15213_v4  ;;  %11737 = vmatprep.subr.bf16.mxu0 %v12320_v6  ;;  %v7675_v4 = vsel %vm3263_vm2, %v7672_v57, %v7674_v47 }
 0x3f2   : > { %11628 = vmatpush3.bf16.msra.mxu1 %v12256_v28  ;;  %11575 = vmatprep.mubr.msk.bf16.mxu1 %vm12321_vm3, %v12320_v6  ;;  %v12275_v28 = vld [vmem:[%s15887_s5 + $0x150] sm:$0xff]   ;;  %v7486_v47 = vrot.slane %v7484_v60, 1 }
 0x3f3   : > { %11629 = vmatprep.subr.bf16.mxu1 %v12320_v6 }
 0x3f4   : > { %11738 = vmatpush3.bf16.msra.mxu0 %v12260_v5 }
 0x3f5   : > { %11739 = vmatprep.subr.bf16.mxu0 %v12320_v6 }
 0x3f6   : > { %11630 = vmatpush3.bf16.msra.mxu1 %v12259_v10  ;;  %v7489_v10 = vrot.slane %v7487_v3, 2 }
 0x3f7   : > { %11684 = vmatmul.mubr.bf16.gmra.mrb[140].mxu0 %v7675_v4  ;;  %11631 = vmatprep.subr.bf16.mxu1 %v12320_v6  ;;  %v8067_v4 = vrot.slane %v15367_v54, 3  ;;  %v7496_v54 = vshll.u32 %v15449_v22, 16  ;;  %v12299_v22 = vld [vmem:[%s15887_s5 + $0x1f0] sm:$0xff]  }
 0x3f8   : > { %11687 = vmatprep.mubr.msk.bf16.mxu0 %vm12321_vm3, %v12320_v6  ;;  %11740 = vmatpush3.bf16.msra.mxu0 %v12263_v15  ;;  %v15565_v15 = vld [vmem:[%s15887_s5 + $0x218] sm:$0xff]  }
 0x3f9   : > { %11576 = vmatmul.mubr.bf16.gmra.mrb[112].mxu1 %v15244_v59  ;;  %11741 = vmatprep.subr.bf16.mxu0 %v12320_v6  ;;  %v7466_v59 = vshrl.u32 %v15318_v55, 16  ;;  %v7498_v32 = vrot.slane %v7496_v54, 2 }
 0x3fa   : > { %11579 = vmatprep.mubr.msk.bf16.mxu1 %vm12321_vm3, %v12320_v6  ;;  %11632 = vmatpush3.bf16.msra.mxu1 %v12262_v2  ;;  %v12280_v2 = vld [vmem:[%s15887_s5 + $0x158] sm:$0xff]  }
 0x3fb   : > { %11633 = vmatprep.subr.bf16.mxu1 %v12320_v6  ;;  %v7468_v40 = vrot.slane %v7466_v59, 1  ;;  %v7499_v38 = vor.u32 %v7498_v32, %v7495_v25  ;;  %v7853_v25 = vrot.slane %v7487_v3, 3  ;;  %v9816_v32 = vcombine.low %v15338_v35, %v15347_v21  ;;  %v12300_v35 = vld [vmem:[#allocation3 + $0x2c] ss:$0 sps:$4 sm:$0x77]  }
 0x3fc   : > { %11742 = vmatpush3.bf16.msra.mxu0 %v12264_v43  ;;  %v7490_v43 = vor.u32 %v7489_v10, %v7486_v47  ;;  %v7844_v47 = vrot.slane %v7466_v59, 2  ;;  %v7845_v10 = vrot.slane %v7469_v31, 3  ;;  %v7848_v59 = vrot.slane %v7475_v50, 2  ;;  %v12298_v21 = vld [vmem:[%s15887_s5 + $0x1e8] sm:$0xff]  }
 0x3fd   : > { %11799 = vmatprep.subr.bf16.mxu0 %v12320_v6  ;;  %v7472_v8 = vor.u32 %v7471_v46, %v7468_v40  ;;  %v15600_v40 = vld [vmem:[%s15887_s5 + $0x228] sm:$0xff]   ;;  %v8069_v46 = vrot.slane %v15377_v53, 3  ;;  %v7505_v53 = vshll.u32 %v15471_v52, 16  ;;  %v7504_v52 = vrot.slane %v7502_v20, 1 }
 0x3fe   : > { %11634 = vmatpush3.bf16.msra.mxu1 %v12265_v36  ;;  %v8068_v36 = vsel %vm8061_vm11, %v8065_v26, %v8067_v4  ;;  %v7856_v3 = vrot.slane %v7493_v11, 2  ;;  %v7864_v20 = vshll.u32 %v12300_v35, 16  ;;  %v9817_v11 = vcombine.low %v15349_v63, %v15351_v24  ;;  %v12301_v63 = vld [vmem:[%s15887_s5 + $0x1f8] sm:$0xff]  }
 0x3ff   : > { %11688 = vmatmul.mubr.bf16.gmra.mrb[144].mxu0 %v7677_v34  ;;  %11691 = vmatprep.subr.bf16.mxu1 %v12320_v6  ;;  %v7473_v42 = vsel %vm1479_vm1, %v7464_v41, %v7472_v8  ;;  %v12289_v41 = vld [vmem:[%s15887_s5 + $0x170] sm:$0xff]  }
 0x400   : > { %11743 = vmatprep.mubr.msk.bf16.mxu0 %vm12321_vm3, %v12320_v6 }
 0x401   : > { %11580 = vmatmul.mubr.bf16.gmra.mrb[116].mxu1 %v15275_v9  ;;  %v7478_v9 = vshll.u32 %v15363_v23, 16  ;;  %v12295_v23 = vld [vmem:[%s15887_s5 + $0x1d0] sm:$0xff]  }
 0x402   : > { %11635 = vmatprep.mubr.msk.bf16.mxu1 %vm12321_vm3, %v12320_v6 }
 0x403   : > { %v7480_v58 = vrot.slane %v7478_v9, 2  ;;  %v7849_v31 = vrot.slane %v7478_v9, 3  ;;  %v7852_v9 = vrot.slane %v7484_v60, 2 }
 0x405   : > { %v7481_v57 = vor.u32 %v7480_v58, %v7477_v51  ;;  %v15631_v51 = vld [vmem:[%s15887_s5 + $0x238] sm:$0xff]  }
 0x407   : > { %11744 = vmatmul.mubr.bf16.vlgmr.msra.gmra.mrb[148].mxu0 %v8064_v56  ;;  %v7482_v5 = vsel %vm1479_vm1, %v7472_v8, %v7481_v57  ;;  %v7491_v34 = vsel %vm1479_vm1, %v7481_v57, %v7490_v43  ;;  %v8070_v8 = vsel %vm8061_vm11, %v8067_v4, %v8069_v46  ;;  %v12288_v56 = vld [vmem:[#allocation3 + $0x30] ss:$0 sps:$4 sm:$0x77]  }
 0x408   : > { %11747 = vmatprep.mubr.msk.bf16.mxu0 %vm12321_vm3, %v12320_v6  ;;  %11800 = vmatpush3.bf16.msra.mxu0 %v15511_v45  ;;  %v8071_v58 = vrot.slane %v12288_v56, 3 }
 0x409   : > { %11636 = vmatmul.mubr.bf16.vlgmr.msra.gmra.mrb[120].mxu1 %v7473_v42  ;;  %11801 = vmatprep.subr.bf16.mxu0 %v12320_v6  ;;  %v7507_v42 = vrot.slane %v7505_v53, 2 }
 0x40a   : > { %11692 = vmatpush3.bf16.msra.mxu1 %v12270_v17  ;;  %11639 = vmatprep.mubr.msk.bf16.mxu1 %vm12321_vm3, %v12320_v6  ;;  %v7500_v17 = vsel %vm1479_vm1, %v7490_v43, %v7499_v38  ;;  %v8072_v57 = vsel %vm8061_vm11, %v8069_v46, %v8071_v58  ;;  %v9814_v43 = vcombine.low %v15320_v61, %v15323_v18  ;;  %v12294_v61 = vld [vmem:[%s15887_s5 + $0x1c8] sm:$0xff]   ;;  %v7857_v46 = vrot.slane %v7496_v54, 3 }
 0x40b   : > { %11693 = vmatprep.subr.bf16.mxu1 %v12320_v6  ;;  %v7508_v26 = vor.u32 %v7507_v42, %v7504_v52  ;;  %v7850_v18 = vor.u32 %v7849_v31, %v7848_v59 }
 0x40c   : > { %11802 = vmatpush3.bf16.msra.mxu0 %v15530_v16 }
 0x40d   : > { %11803 = vmatprep.subr.bf16.mxu0 %v12320_v6 }
 0x40e   : > { %11694 = vmatpush3.bf16.msra.mxu1 %v12271_v0  ;;  %v12292_v0 = vld [vmem:[%s15887_s5 + $0x178] sm:$0xff]  }
 0x40f   : > { %11748 = vmatmul.mubr.bf16.gmra.mrb[152].mxu0 %v8066_v27  ;;  %11695 = vmatprep.subr.bf16.mxu1 %v12320_v6  ;;  %v7837_v27 = vshrl.u32 %v15331_v49, 16 }
 0x410   : > { %11751 = vmatprep.mubr.msk.bf16.mxu0 %vm12321_vm3, %v12320_v6  ;;  %11804 = vmatpush3.bf16.msra.mxu0 %v15544_v44 }
 0x411   : > { %11640 = vmatmul.mubr.bf16.gmra.mrb[124].mxu1 %v7482_v5  ;;  %11805 = vmatprep.subr.bf16.mxu0 %v12320_v6  ;;  %v7509_v5 = vsel %vm1479_vm1, %v7499_v38, %v7508_v26  ;;  %v7839_v4 = vrot.slane %v7837_v27, 2  ;;  %v7861_v38 = vshrl.u32 %v12300_v35, 16 }
 0x412   : > { %11696 = vmatpush3.bf16.msra.mxu1 %v12275_v28  ;;  %11643 = vmatprep.mubr.msk.bf16.mxu1 %vm12321_vm3, %v12320_v6  ;;  %v7840_v28 = vshll.u32 %v15331_v49, 16 }
 0x413   : > { %11697 = vmatprep.subr.bf16.mxu1 %v12320_v6  ;;  %v7863_v53 = vrot.slane %v7861_v38, 2 }
 0x414   : > { %11806 = vmatpush3.bf16.msra.mxu0 %v15565_v15  ;;  %v7842_v49 = vrot.slane %v7840_v28, 3 }
 0x415   : > { %11807 = vmatprep.subr.bf16.mxu0 %v12320_v6 }
 0x416   : > { %11698 = vmatpush3.bf16.msra.mxu1 %v12280_v2  ;;  %v7846_v2 = vor.u32 %v7845_v10, %v7844_v47 }
 0x417   : > { %11752 = vmatmul.mubr.bf16.gmra.mrb[156].mxu0 %v8068_v36  ;;  %11699 = vmatprep.subr.bf16.mxu1 %v12320_v6  ;;  %v7843_v36 = vor.u32 %v7842_v49, %v7839_v4 }
 0x418   : > { %11755 = vmatprep.mubr.msk.bf16.mxu0 %vm12321_vm3, %v12320_v6  ;;  %11808 = vmatpush3.bf16.msra.mxu0 %v15579_v7  ;;  %v7851_v50 = vsel %vm7835_vm12, %v7846_v2, %v7850_v18 }
 0x419   : > { %11644 = vmatmul.mubr.bf16.gmra.mrb[128].mxu1 %v7491_v34  ;;  %11809 = vmatprep.subr.bf16.mxu0 %v12320_v6  ;;  %v7847_v55 = vsel %vm7835_vm12, %v7843_v36, %v7846_v2  ;;  %v9815_v34 = vcombine.low %v15325_v37, %v15336_v19  ;;  %v12296_v37 = vld [vmem:[%s15887_s5 + $0x1d8] sm:$0xff]   ;;  %v7854_v19 = vor.u32 %v7853_v25, %v7852_v9 }
 0x41a   : > { %11700 = vmatpush3.bf16.msra.mxu1 %v12282_v12  ;;  %11647 = vmatprep.mubr.msk.bf16.mxu1 %vm12321_vm3, %v12320_v6  ;;  %v12293_v12 = vld [vmem:[%s15887_s5 + $0x1c0] sm:$0xff]  }
 0x41b   : > { %11701 = vmatprep.subr.bf16.mxu1 %v12320_v6  ;;  %v7855_v60 = vsel %vm7835_vm12, %v7850_v18, %v7854_v19 }
 0x41c   : > { %11810 = vmatpush3.bf16.msra.mxu0 %v15600_v40 }
 0x41d   : > { %11811 = vmatprep.subr.bf16.mxu0 %v12320_v6 }
 0x41e   : > { %11702 = vmatpush3.bf16.msra.mxu1 %v12286_v13  ;;  %v7858_v13 = vor.u32 %v7857_v46, %v7856_v3 }
 0x41f   : > { %11756 = vmatmul.mubr.bf16.gmra.mrb[160].mxu0 %v8070_v8  ;;  %11703 = vmatprep.subr.bf16.mxu1 %v12320_v6  ;;  %v7866_v8 = vrot.slane %v7864_v20, 3 }
 0x420   : > { %11759 = vmatprep.mubr.msk.bf16.mxu0 %vm12321_vm3, %v12320_v6  ;;  %11812 = vmatpush3.bf16.msra.mxu0 %v15614_v48  ;;  %v7859_v54 = vsel %vm7835_vm12, %v7854_v19, %v7858_v13 }
 0x421   : > { %11648 = vmatmul.mubr.bf16.gmra.mrb[132].mxu1 %v7500_v17  ;;  %11813 = vmatprep.subr.bf16.mxu0 %v12320_v6  ;;  %v7867_v24 = vor.u32 %v7866_v8, %v7863_v53 }
 0x422   : > { %11651 = vmatprep.mubr.msk.bf16.mxu1 %vm12321_vm3, %v12320_v6  ;;  %11704 = vmatpush3.bf16.msra.mxu1 %v12289_v41 }
 0x423   : > { %11705 = vmatprep.subr.bf16.mxu1 %v12320_v6  ;;  %v7868_v56 = vsel %vm7835_vm12, %v7858_v13, %v7867_v24 }
 0x424   : > { %11814 = vmatpush3.bf16.msra.mxu0 %v15631_v51 }
 0x426   : > { %11706 = vmatpush3.bf16.msra.mxu1 %v12292_v0 }
 0x427   : > { %11760 = vmatmul.mubr.bf16.gmra.mrb[164].mxu0 %v8072_v57  ;;  %11763 = vmatprep.subr.bf16.mxu1 %v12320_v6 }
 0x428   : > { %11815 = vmatprep.mubr.msk.bf16.mxu0 %vm12321_vm3, %v12320_v6 }
 0x429   : > { %11652 = vmatmul.mubr.bf16.gmra.mrb[136].mxu1 %v7509_v5 }
 0x42a   : > { %11707 = vmatprep.mubr.msk.bf16.mxu1 %vm12321_vm3, %v12320_v6 }
 0x42f   : > { %11816 = vmatmul.mubr.bf16.vlgmr.msra.gmra.mrb[168].mxu0 %v9814_v43 }
 0x430   : > { %11819 = vmatprep.mubr.msk.bf16.mxu0 %vm12321_vm3, %v12320_v6 }
 0x431   : > { %11708 = vmatmul.mubr.bf16.vlgmr.msra.gmra.mrb[140].mxu1 %v7847_v55 }
 0x432   : > { %11764 = vmatpush3.bf16.msra.mxu1 %v12293_v12  ;;  %11711 = vmatprep.mubr.msk.bf16.mxu1 %vm12321_vm3, %v12320_v6 }
 0x433   : > { %11765 = vmatprep.subr.bf16.mxu1 %v12320_v6 }
 0x436   : > { %11766 = vmatpush3.bf16.msra.mxu1 %v12294_v61 }
 0x437   : > { %11820 = vmatmul.mubr.bf16.gmra.mrb[172].mxu0 %v9815_v34  ;;  %11767 = vmatprep.subr.bf16.mxu1 %v12320_v6 }
 0x438   : > { %11823 = vmatprep.mubr.msk.bf16.mxu0 %vm12321_vm3, %v12320_v6 }
 0x439   : > { %11712 = vmatmul.mubr.bf16.gmra.mrb[144].mxu1 %v7851_v50 }
 0x43a   : > { %11768 = vmatpush3.bf16.msra.mxu1 %v12295_v23  ;;  %11715 = vmatprep.mubr.msk.bf16.mxu1 %vm12321_vm3, %v12320_v6 }
 0x43b   : > { %11769 = vmatprep.subr.bf16.mxu1 %v12320_v6 }
 0x43e   : > { %11770 = vmatpush3.bf16.msra.mxu1 %v12296_v37 }
 0x43f   : > { %11824 = vmatmul.mubr.bf16.gmra.mrb[176].mxu0 %v9816_v32  ;;  %11771 = vmatprep.subr.bf16.mxu1 %v12320_v6 }
 0x440   : > { %11827 = vmatprep.mubr.msk.bf16.mxu0 %vm12321_vm3, %v12320_v6 }
 0x441   : > { %11716 = vmatmul.mubr.bf16.gmra.mrb[148].mxu1 %v7855_v60 }
 0x442   : > { %11772 = vmatpush3.bf16.msra.mxu1 %v12297_v1  ;;  %11719 = vmatprep.mubr.msk.bf16.mxu1 %vm12321_vm3, %v12320_v6 }
 0x443   : > { %11773 = vmatprep.subr.bf16.mxu1 %v12320_v6 }
 0x446   : > { %11774 = vmatpush3.bf16.msra.mxu1 %v12298_v21 }
 0x447   : > { %11828 = vmatmul.mubr.bf16.gmra.mrb[180].mxu0 %v9817_v11  ;;  %11775 = vmatprep.subr.bf16.mxu1 %v12320_v6 }
 0x449   : > { %11720 = vmatmul.mubr.bf16.gmra.mrb[152].mxu1 %v7859_v54 }
 0x44a   : > { %11723 = vmatprep.mubr.msk.bf16.mxu1 %vm12321_vm3, %v12320_v6  ;;  %11776 = vmatpush3.bf16.msra.mxu1 %v12299_v22 }
 0x44b   : > { %11777 = vmatprep.subr.bf16.mxu1 %v12320_v6 }
 0x44e   : > { %11778 = vmatpush3.bf16.msra.mxu1 %v12301_v63 }
 0x44f   : > { %11835 = vmatprep.subr.bf16.mxu1 %v12320_v6 }
 0x451   : > { %11724 = vmatmul.mubr.bf16.gmra.mrb[156].mxu1 %v7868_v56 }
 0x452   : > { %11779 = vmatprep.mubr.msk.bf16.mxu1 %vm12321_vm3, %v12320_v6 }
 0x459   : > { %11780 = vmatmul.mubr.bf16.vlgmr.msra.gmra.mrb[160].mxu1 %v15406_v62  ;;  %v8209_v62 = vld [vmem:[#allocation3 + $0x30] sm:$0xf] }
 0x45a   : > { %11843 = vmatpush3.bf16.msra.mxu1 %v15511_v45  ;;  %11783 = vmatprep.mubr.msk.bf16.mxu1 %vm12321_vm3, %v12320_v6  ;;  %v9789_v45 = vcombine.low %v8209_v62, %v8209_v62 }
 0x45b   : > { %11836 = vmatprep.subr.bf16.mxu1 %v12320_v6 }
 0x45e   : > { %11844 = vmatpush3.bf16.msra.mxu1 %v15530_v16  ;;  %v8279_v16 = vshll.u32 %v9789_v45, 16 }
 0x45f   : > { %11837 = vmatprep.subr.bf16.mxu1 %v12320_v6 }
 0x461   : > { %11784 = vmatmul.mubr.bf16.gmra.mrb[164].mxu1 %v15415_v30  ;;  %v8276_v30 = vshrl.u32 %v9789_v45, 16 }
 0x462   : > { %11845 = vmatpush3.bf16.msra.mxu1 %v15544_v44  ;;  %11787 = vmatprep.mubr.msk.bf16.mxu1 %vm12321_vm3, %v12320_v6 }
 0x463   : > { %11838 = vmatprep.subr.bf16.mxu1 %v12320_v6  ;;  %v8278_v44 = vrot.slane %v8276_v30, 3 }
 0x466   : > { %11846 = vmatpush3.bf16.msra.mxu1 %v15565_v15  ;;  %v8281_v15 = vrot.slane %v8279_v16, 4 }
 0x467   : > { %11839 = vmatprep.subr.bf16.mxu1 %v12320_v6 }
 0x469   : > { %11788 = vmatmul.mubr.bf16.gmra.mrb[168].mxu1 %v15419_v29  ;;  %v8282_v29 = vor.u32 %v8281_v15, %v8278_v44 }
 0x46a   : > { %11847 = vmatpush3.bf16.msra.mxu1 %v15579_v7  ;;  %11791 = vmatprep.mubr.msk.bf16.mxu1 %vm12321_vm3, %v12320_v6 }
 0x46b   : > { %11840 = vmatprep.subr.bf16.mxu1 %v12320_v6  ;;  %v8283_v7 = vsel %vm8230_vm10, %v15421_v14, %v8282_v29 }
 0x46e   : > { %11848 = vmatpush3.bf16.msra.mxu1 %v15600_v40  ;;  %v9818_v40 = vcombine.low %v15353_v39, %v8209_v62 }
 0x46f   : > { %11841 = vmatprep.subr.bf16.mxu1 %v12320_v6 }
 0x471   : > { %11792 = vmatmul.mubr.bf16.gmra.mrb[172].mxu1 %v15432_v33 }
 0x472   : > { %11795 = vmatprep.mubr.msk.bf16.mxu1 %vm12321_vm3, %v12320_v6  ;;  %11849 = vmatpush3.bf16.msra.mxu1 %v15614_v48 }
 0x473   : > { %11842 = vmatprep.subr.bf16.mxu1 %v12320_v6 }
 0x476   : > { %11850 = vmatpush3.bf16.msra.mxu1 %v15631_v51 }
 0x479   : > { %11796 = vmatmul.mubr.bf16.gmra.mrb[176].mxu1 %v8283_v7 }
 0x47a   : > { %11831 = vmatprep.mubr.msk.bf16.mxu1 %vm12321_vm3, %v12320_v6 }
 0x481   : > { %11832 = vmatmul.mubr.bf16.vlgmr.msra.gmra.mrb[180].mxu1 %v9818_v40 }
 0x48a   : > { %v7352_v33 = vpop.f32.mrb[108].mxu0 }
 0x48b   : > { %v11601_v41 = vpop.f32.mrb[109].mxu0 }
 0x48c   : > { %v7067_v17 = vpop.f32.mrb[80].mxu1  ;;  %v7355_v52 = vpop.f32.mrb[110].mxu0 }
 0x48d   : > { %v11529_v48 = vpop.f32.mrb[81].mxu1  ;;  %v11602_v42 = vpop.f32.mrb[111].mxu0 }
 0x48e   : > { %v7070_v58 = vpop.f32.mrb[82].mxu1 }
 0x48f   : > { %v11530_v0 = vpop.f32.mrb[83].mxu1 }
 0x492   : > { %v7360_v26 = vpop.f32.mrb[112].mxu0 }
 0x493   : > { %v11605_v51 = vpop.f32.mrb[113].mxu0 }
 0x494   : > { %v7075_v57 = vpop.f32.mrb[84].mxu1  ;;  %v7363_v27 = vpop.f32.mrb[114].mxu0 }
 0x495   : > { %v11533_v14 = vpop.f32.mrb[85].mxu1  ;;  %v11606_v28 = vpop.f32.mrb[115].mxu0 }
 0x496   : > { %v7078_v5 = vpop.f32.mrb[86].mxu1 }
 0x497   : > { %v11534_v47 = vpop.f32.mrb[87].mxu1 }
 0x49a   : > { %v7368_v6 = vpop.f32.mrb[116].mxu0 }
 0x49b   : > { %v11609_v10 = vpop.f32.mrb[117].mxu0 }
 0x49c   : > { %v7083_v39 = vpop.f32.mrb[88].mxu1  ;;  %v7371_v4 = vpop.f32.mrb[118].mxu0 }
 0x49d   : > { %v11537_v49 = vpop.f32.mrb[89].mxu1  ;;  %v11610_v2 = vpop.f32.mrb[119].mxu0 }
 0x49e   : > { %v7086_v43 = vpop.f32.mrb[90].mxu1 }
 0x49f   : > { %v11538_v36 = vpop.f32.mrb[91].mxu1 }
 0x4a2   : > { %v7376_v12 = vpop.f32.mrb[120].mxu0 }
 0x4a3   : > { %v11613_v55 = vpop.f32.mrb[121].mxu0 }
 0x4a4   : > { %v7091_v59 = vpop.f32.mrb[92].mxu1  ;;  %v7379_v31 = vpop.f32.mrb[122].mxu0 }
 0x4a5   : > { %v11541_v61 = vpop.f32.mrb[93].mxu1  ;;  %v11614_v18 = vpop.f32.mrb[123].mxu0 }
 0x4a6   : > { %v7094_v34 = vpop.f32.mrb[94].mxu1 }
 0x4a7   : > { %v11542_v23 = vpop.f32.mrb[95].mxu1 }
 0x4aa   : > { %v15759_v50 = vpop.f32.mrb[124].mxu0 }
 0x4ab   : > { %v11617_v9 = vpop.f32.mrb[125].mxu0 }
 0x4ac   : > { %v7099_v25 = vpop.f32.mrb[96].mxu1  ;;  %v15761_v37 = vpop.f32.mrb[126].mxu0 }
 0x4ad   : > { %v11545_v19 = vpop.f32.mrb[97].mxu1  ;;  %v11618_v32 = vpop.f32.mrb[127].mxu0 }
 0x4ae   : > { %v7102_v1 = vpop.f32.mrb[98].mxu1 }
 0x4af   : > { %v11546_v60 = vpop.f32.mrb[99].mxu1 }
 0x4b2   : > { %v15763_v3 = vpop.f32.mrb[128].mxu0 }
 0x4b3   : > { %v11673_v46 = vpop.f32.mrb[129].mxu0 }
 0x4b4   : > { %v7193_v35 = vpop.f32.mrb[100].mxu1  ;;  %v15765_v21 = vpop.f32.mrb[130].mxu0 }
 0x4b5   : > { %v7194_v13 = vadd.f32 %v7193_v35, %v7067_v17  ;;  %v11565_v38 = vpop.f32.mrb[101].mxu1  ;;  %v11674_v20 = vpop.f32.mrb[131].mxu0 }
 0x4b6   : > { %v7196_v11 = vpop.f32.mrb[102].mxu1 }
 0x4b7   : > { %v7197_v22 = vadd.f32 %v7196_v11, %v7070_v58  ;;  %v11566_v54 = vpop.f32.mrb[103].mxu1  ;;  %v7391_v53 = vadd.f32 %v7352_v33, %v7194_v13 }
 0x4b9   : > { %v7392_v8 = vadd.f32 %v7355_v52, %v7197_v22 }
 0x4ba   : > { %v15767_v63 = vpop.f32.mrb[132].mxu0 }
 0x4bb   : > { %v11677_v24 = vpop.f32.mrb[133].mxu0 }
 0x4bc   : > { %v7201_v56 = vpop.f32.mrb[104].mxu1  ;;  %v15769_v62 = vpop.f32.mrb[134].mxu0 }
 0x4bd   : > { %v7202_v45 = vadd.f32 %v7201_v56, %v7075_v57  ;;  %v11569_v30 = vpop.f32.mrb[105].mxu1  ;;  %v11678_v16 = vpop.f32.mrb[135].mxu0 }
 0x4be   : > { %v7204_v44 = vpop.f32.mrb[106].mxu1 }
 0x4bf   : > { %v7205_v15 = vadd.f32 %v7204_v44, %v7078_v5  ;;  %v11570_v29 = vpop.f32.mrb[107].mxu1  ;;  %v7393_v7 = vadd.f32 %v7360_v26, %v7202_v45 }
 0x4c1   : > { %v7394_v40 = vadd.f32 %v7363_v27, %v7205_v15 }
 0x4c2   : > { %v15771_v41 = vpop.f32.mrb[136].mxu0 }
 0x4c3   : > { %v11681_v17 = vpop.f32.mrb[137].mxu0 }
 0x4c4   : > { %v7209_v48 = vpop.f32.mrb[108].mxu1  ;;  %v15773_v33 = vpop.f32.mrb[138].mxu0 }
 0x4c5   : > { %v7210_v52 = vadd.f32 %v7209_v48, %v7083_v39  ;;  %v11573_v42 = vpop.f32.mrb[109].mxu1  ;;  %v11682_v58 = vpop.f32.mrb[139].mxu0 }
 0x4c6   : > { %v7212_v0 = vpop.f32.mrb[110].mxu1 }
 0x4c7   : > { %v7213_v51 = vadd.f32 %v7212_v0, %v7086_v43  ;;  %v11574_v14 = vpop.f32.mrb[111].mxu1  ;;  %v7395_v57 = vadd.f32 %v7368_v6, %v7210_v52 }
 0x4c9   : > { %v7396_v28 = vadd.f32 %v7371_v4, %v7213_v51 }
 0x4ca   : > { %v15775_v47 = vpop.f32.mrb[140].mxu0 }
 0x4cb   : > { %v11685_v5 = vpop.f32.mrb[141].mxu0 }
 0x4cc   : > { %v7217_v10 = vpop.f32.mrb[112].mxu1  ;;  %v15777_v26 = vpop.f32.mrb[142].mxu0 }
 0x4cd   : > { %v7218_v27 = vadd.f32 %v7217_v10, %v7091_v59  ;;  %v11577_v49 = vpop.f32.mrb[113].mxu1  ;;  %v11686_v2 = vpop.f32.mrb[143].mxu0 }
 0x4ce   : > { %v7220_v36 = vpop.f32.mrb[114].mxu1 }
 0x4cf   : > { %v7221_v55 = vadd.f32 %v7220_v36, %v7094_v34  ;;  %v11578_v61 = vpop.f32.mrb[115].mxu1  ;;  %v7397_v39 = vadd.f32 %v7376_v12, %v7218_v27 }
 0x4d1   : > { %v7398_v18 = vadd.f32 %v7379_v31, %v7221_v55 }
 0x4d2   : > { %v15779_v23 = vpop.f32.mrb[144].mxu0 }
 0x4d3   : > { %v11689_v43 = vpop.f32.mrb[145].mxu0 }
 0x4d4   : > { %v7225_v9 = vpop.f32.mrb[116].mxu1  ;;  %v15781_v6 = vpop.f32.mrb[146].mxu0 }
 0x4d5   : > { %v7226_v4 = vadd.f32 %v7225_v9, %v7099_v25  ;;  %v11581_v19 = vpop.f32.mrb[117].mxu1  ;;  %v11690_v32 = vpop.f32.mrb[147].mxu0 }
 0x4d6   : > { %v7228_v60 = vpop.f32.mrb[118].mxu1 }
 0x4d7   : > { %v7229_v46 = vadd.f32 %v7228_v60, %v7102_v1  ;;  %v11582_v35 = vpop.f32.mrb[119].mxu1  ;;  %v7399_v59 = vadd.f32 %v15759_v50, %v7226_v4 }
 0x4d9   : > { %v7400_v13 = vadd.f32 %v15761_v37, %v7229_v46 }
 0x4da   : > { %v15785_v34 = vpop.f32.mrb[148].mxu0 }
 0x4db   : > { %v11745_v12 = vpop.f32.mrb[149].mxu0 }
 0x4dc   : > { %v7597_v31 = vpop.f32.mrb[120].mxu1  ;;  %v15787_v38 = vpop.f32.mrb[150].mxu0 }
 0x4dd   : > { %v7636_v20 = vadd.f32 %v7597_v31, %v7391_v53  ;;  %v11637_v11 = vpop.f32.mrb[121].mxu1  ;;  %v11746_v22 = vpop.f32.mrb[151].mxu0 }
 0x4de   : > { %v7600_v54 = vpop.f32.mrb[122].mxu1 }
 0x4df   : > { %v7637_v25 = vadd.f32 %v7600_v54, %v7392_v8  ;;  %v11638_v24 = vpop.f32.mrb[123].mxu1  ;;  %v7804_v56 = vadd.f32 %v15763_v3, %v7636_v20 }
 0x4e1   : > { %v7805_v1 = vadd.f32 %v15765_v21, %v7637_v25 }
 0x4e2   : > { %v15791_v45 = vpop.f32.mrb[152].mxu0 }
 0x4e3   : > { %v11749_v50 = vpop.f32.mrb[153].mxu0 }
 0x4e4   : > { %v7605_v37 = vpop.f32.mrb[124].mxu1  ;;  %v15793_v30 = vpop.f32.mrb[154].mxu0 }
 0x4e5   : > { %v7638_v16 = vadd.f32 %v7605_v37, %v7393_v7  ;;  %v11641_v44 = vpop.f32.mrb[125].mxu1  ;;  %v11750_v15 = vpop.f32.mrb[155].mxu0 }
 0x4e6   : > { %v7608_v29 = vpop.f32.mrb[126].mxu1 }
 0x4e7   : > { %v7639_v53 = vadd.f32 %v7608_v29, %v7394_v40  ;;  %v11642_v17 = vpop.f32.mrb[127].mxu1  ;;  %v7806_v48 = vadd.f32 %v15767_v63, %v7638_v16 }
 0x4e9   : > { %v7807_v8 = vadd.f32 %v15769_v62, %v7639_v53 }
 0x4ea   : > { %v15797_v52 = vpop.f32.mrb[156].mxu0 }
 0x4eb   : > { %v11753_v3 = vpop.f32.mrb[157].mxu0 }
 0x4ec   : > { %v7613_v21 = vpop.f32.mrb[128].mxu1  ;;  %v15799_v42 = vpop.f32.mrb[158].mxu0 }
 0x4ed   : > { %v7640_v58 = vadd.f32 %v7613_v21, %v7395_v57  ;;  %v11645_v0 = vpop.f32.mrb[129].mxu1  ;;  %v11754_v51 = vpop.f32.mrb[159].mxu0 }
 0x4ee   : > { %v7616_v14 = vpop.f32.mrb[130].mxu1 }
 0x4ef   : > { %v7641_v7 = vadd.f32 %v7616_v14, %v7396_v28  ;;  %v11646_v5 = vpop.f32.mrb[131].mxu1  ;;  %v7808_v10 = vadd.f32 %v15771_v41, %v7640_v58 }
 0x4f1   : > { %v7809_v40 = vadd.f32 %v15773_v33, %v7641_v7 }
 0x4f2   : > { %v15803_v27 = vpop.f32.mrb[160].mxu0 }
 0x4f3   : > { %v11757_v63 = vpop.f32.mrb[161].mxu0 }
 0x4f4   : > { %v7621_v62 = vpop.f32.mrb[132].mxu1  ;;  %v15805_v49 = vpop.f32.mrb[162].mxu0 }
 0x4f5   : > { %v7642_v2 = vadd.f32 %v7621_v62, %v7397_v39  ;;  %v11649_v36 = vpop.f32.mrb[133].mxu1  ;;  %v11758_v55 = vpop.f32.mrb[163].mxu0 }
 0x4f6   : > { %v7624_v61 = vpop.f32.mrb[134].mxu1 }
 0x4f7   : > { %v7643_v57 = vadd.f32 %v7624_v61, %v7398_v18  ;;  %v11650_v43 = vpop.f32.mrb[135].mxu1  ;;  %v7810_v9 = vadd.f32 %v15775_v47, %v7642_v2 }
 0x4f9   : > { %v7811_v28 = vadd.f32 %v15777_v26, %v7643_v57 }
 0x4fa   : > { %v15809_v4 = vpop.f32.mrb[164].mxu0 }
 0x4fb   : > { %v11761_v41 = vpop.f32.mrb[165].mxu0 }
 0x4fc   : > { %v7629_v33 = vpop.f32.mrb[136].mxu1  ;;  %v15811_v19 = vpop.f32.mrb[166].mxu0 }
 0x4fd   : > { %v7644_v32 = vadd.f32 %v7629_v33, %v7399_v59  ;;  %v11653_v60 = vpop.f32.mrb[137].mxu1  ;;  %v11762_v46 = vpop.f32.mrb[167].mxu0 }
 0x4fe   : > { %v7632_v35 = vpop.f32.mrb[138].mxu1 }
 0x4ff   : > { %v7645_v39 = vadd.f32 %v7632_v35, %v7400_v13  ;;  %v11654_v12 = vpop.f32.mrb[139].mxu1  ;;  %v7812_v31 = vadd.f32 %v15779_v23, %v7644_v32 }
 0x501   : > { %v7813_v18 = vadd.f32 %v15781_v6, %v7645_v39 }
 0x502   : > { %v15815_v20 = vpop.f32.mrb[168].mxu0 }
 0x503   : > { %v11817_v47 = vpop.f32.mrb[169].mxu0 }
 0x504   : > { %v7956_v26 = vpop.f32.mrb[140].mxu1  ;;  %v15817_v11 = vpop.f32.mrb[170].mxu0 }
 0x505   : > { %v7995_v22 = vadd.f32 %v7956_v26, %v7804_v56  ;;  %v11709_v54 = vpop.f32.mrb[141].mxu1  ;;  %v11818_v25 = vpop.f32.mrb[171].mxu0 }
 0x506   : > { %v7959_v24 = vpop.f32.mrb[142].mxu1 }
 0x507   : > { %v7996_v59 = vadd.f32 %v7959_v24, %v7805_v1  ;;  %v11710_v50 = vpop.f32.mrb[143].mxu1  ;;  %v8199_v37 = vadd.f32 %v15785_v34, %v7995_v22 }
 0x509   : > { %v8200_v13 = vadd.f32 %v15787_v38, %v7996_v59 }
 0x50a   : > { %v15821_v16 = vpop.f32.mrb[172].mxu0 }
 0x50b   : > { %v11821_v23 = vpop.f32.mrb[173].mxu0 }
 0x50c   : > { %v7964_v6 = vpop.f32.mrb[144].mxu1  ;;  %v15823_v44 = vpop.f32.mrb[174].mxu0 }
 0x50d   : > { %v7997_v15 = vadd.f32 %v7964_v6, %v7806_v48  ;;  %v11713_v29 = vpop.f32.mrb[145].mxu1  ;;  %v11822_v53 = vpop.f32.mrb[175].mxu0 }
 0x50e   : > { %v7967_v17 = vpop.f32.mrb[146].mxu1 }
 0x50f   : > { %v7998_v56 = vadd.f32 %v7967_v17, %v7807_v8  ;;  %v11714_v3 = vpop.f32.mrb[147].mxu1  ;;  %v8201_v21 = vadd.f32 %v15791_v45, %v7997_v15 }
 0x511   : > { %v8202_v1 = vadd.f32 %v15793_v30, %v7998_v56 }
 0x512   : > { %v15827_v58 = vpop.f32.mrb[176].mxu0 }
 0x513   : > { %v11825_v34 = vpop.f32.mrb[177].mxu0 }
 0x514   : > { %v7972_v38 = vpop.f32.mrb[148].mxu1  ;;  %v15829_v0 = vpop.f32.mrb[178].mxu0 }
 0x515   : > { %v7999_v51 = vadd.f32 %v7972_v38, %v7808_v10  ;;  %v11717_v14 = vpop.f32.mrb[149].mxu1  ;;  %v11826_v7 = vpop.f32.mrb[179].mxu0 }
 0x516   : > { %v7975_v5 = vpop.f32.mrb[150].mxu1 }
 0x517   : > { %v8000_v48 = vadd.f32 %v7975_v5, %v7809_v40  ;;  %v11718_v63 = vpop.f32.mrb[151].mxu1  ;;  %v8203_v62 = vadd.f32 %v15797_v52, %v7999_v51 }
 0x519   : > { %v8204_v8 = vadd.f32 %v15799_v42, %v8000_v48 }
 0x51a   : > { %v15833_v2 = vpop.f32.mrb[180].mxu0 }
 0x51b   : > { %v11829_v45 = vpop.f32.mrb[181].mxu0 }
 0x51c   : > { %v7980_v30 = vpop.f32.mrb[152].mxu1  ;;  %v15835_v36 = vpop.f32.mrb[182].mxu0 }
 0x51d   : > { %v8001_v55 = vadd.f32 %v7980_v30, %v7810_v9  ;;  %v11721_v61 = vpop.f32.mrb[153].mxu1  ;;  %v11830_v57 = vpop.f32.mrb[183].mxu0 }
 0x51e   : > { %v7983_v10 = vpop.f32.mrb[154].mxu1 }
 0x51f   : > { %v8002_v43 = vadd.f32 %v7983_v10, %v7811_v28  ;;  %v11722_v41 = vpop.f32.mrb[155].mxu1  ;;  %v8205_v40 = vadd.f32 %v15803_v27, %v8001_v55  ;;  %v15848_v27 = vld [vmem:[%s15888_s6] ss:$0 sm:$0xff] }
 0x521   : > { %v8206_v33 = vadd.f32 %v15805_v49, %v8002_v43 }
 0x524   : > { %v7988_v52 = vpop.f32.mrb[156].mxu1 }
 0x525   : > { %v8003_v32 = vadd.f32 %v7988_v52, %v7812_v31  ;;  %v11725_v42 = vpop.f32.mrb[157].mxu1 }
 0x526   : > { %v7991_v60 = vpop.f32.mrb[158].mxu1 }
 0x527   : > { %v8004_v46 = vadd.f32 %v7991_v60, %v7813_v18  ;;  %v11726_v35 = vpop.f32.mrb[159].mxu1  ;;  %v8207_v39 = vadd.f32 %v15809_v4, %v8003_v32 }
 0x529   : > { %v15843_v9 = vadd.f32 %v15811_v19, %v8004_v46 }
 0x52c   : > { %v8371_v28 = vpop.f32.mrb[160].mxu1 }
 0x52d   : > { %v8410_v12 = vadd.f32 %v8371_v28, %v8199_v37  ;;  %v11781_v47 = vpop.f32.mrb[161].mxu1 }
 0x52e   : > { %v8374_v49 = vpop.f32.mrb[162].mxu1 }
 0x52f   : > { %v8568_v31 = vadd.f32 %v15815_v20, %v8410_v12  ;;  %v8411_v18 = vadd.f32 %v8374_v49, %v8200_v13  ;;  %v11782_v26 = vpop.f32.mrb[163].mxu1 }
 0x531   : > { %v8585_v4 = vadd.f32 %v15848_v27, %v8568_v31  ;;  %v8569_v19 = vadd.f32 %v15817_v11, %v8411_v18 }
 0x533   : > { %v8586_v22 = vadd.f32 %v15848_v27, %v8569_v19  ;;  %v8595_v25 = vmax.f32 %v8585_v4, 0.0 }
 0x534   : > { %v8379_v54 = vpop.f32.mrb[164].mxu1 }
 0x535   : > { %v8596_v24 = vmax.f32 %v8586_v22, 0.0  ;;  %v8412_v59 = vadd.f32 %v8379_v54, %v8201_v21  ;;  %v11785_v50 = vpop.f32.mrb[165].mxu1 }
 0x536   : > { %v8382_v20 = vpop.f32.mrb[166].mxu1 }
 0x537   : > { %v9897_v37 = vpack.c.bf16 %v8596_v24, %v8595_v25  ;;  %v8570_v13 = vadd.f32 %v15821_v16, %v8412_v59  ;;  %v8413_v23 = vadd.f32 %v8382_v20, %v8202_v1  ;;  %v11786_v11 = vpop.f32.mrb[167].mxu1 }
 0x539   : > { %9898 = vst [vmem:[%s15857_s9] sm:$0xff] %v9897_v37   ;;  %v8587_v6 = vadd.f32 %v15848_v27, %v8570_v13  ;;  %v8571_v15 = vadd.f32 %v15823_v44, %v8413_v23 }
 0x53b   : > { %v8588_v29 = vadd.f32 %v15848_v27, %v8571_v15  ;;  %v8597_v17 = vmax.f32 %v8587_v6, 0.0 }
 0x53c   : > { %v8387_v53 = vpop.f32.mrb[168].mxu1 }
 0x53d   : > { %v8598_v56 = vmax.f32 %v8588_v29, 0.0  ;;  %v8414_v3 = vadd.f32 %v8387_v53, %v8203_v62  ;;  %v11789_v21 = vpop.f32.mrb[169].mxu1 }
 0x53e   : > { %v8390_v34 = vpop.f32.mrb[170].mxu1 }
 0x53f   : > { %v9902_v38 = vpack.c.bf16 %v8598_v56, %v8597_v17  ;;  %v8572_v51 = vadd.f32 %v15827_v58, %v8414_v3  ;;  %v8415_v16 = vadd.f32 %v8390_v34, %v8204_v8  ;;  %v11790_v1 = vpop.f32.mrb[171].mxu1 }
 0x541   : > { %9924 = vst [vmem:[%s15857_s9 + $0x8] sm:$0xff] %v9902_v38   ;;  %v8589_v14 = vadd.f32 %v15848_v27, %v8572_v51  ;;  %v8573_v7 = vadd.f32 %v15829_v0, %v8415_v16 }
 0x543   : > { %v8590_v44 = vadd.f32 %v15848_v27, %v8573_v7  ;;  %v8599_v48 = vmax.f32 %v8589_v14, 0.0 }
 0x544   : > { %v8395_v5 = vpop.f32.mrb[172].mxu1 }
 0x545   : > { %v8600_v63 = vmax.f32 %v8590_v44, 0.0  ;;  %v8416_v45 = vadd.f32 %v8395_v5, %v8205_v40  ;;  %v11793_v62 = vpop.f32.mrb[173].mxu1 }
 0x546   : > { %v8398_v30 = vpop.f32.mrb[174].mxu1 }
 0x547   : > { %v9907_v55 = vpack.c.bf16 %v8600_v63, %v8599_v48  ;;  %v8574_v61 = vadd.f32 %v15833_v2, %v8416_v45  ;;  %v8417_v58 = vadd.f32 %v8398_v30, %v8206_v33  ;;  %v11794_v8 = vpop.f32.mrb[175].mxu1 }
 0x549   : > { %9925 = vst [vmem:[%s15857_s9 + $0x10] sm:$0xff] %v9907_v55   ;;  %v8591_v57 = vadd.f32 %v15848_v27, %v8574_v61  ;;  %v8575_v10 = vadd.f32 %v15835_v36, %v8417_v58 }
 0x54b   : > { %v8592_v0 = vadd.f32 %v15848_v27, %v8575_v10  ;;  %v8601_v41 = vmax.f32 %v8591_v57, 0.0 }
 0x54c   : > { %v8403_v43 = vpop.f32.mrb[176].mxu1 }
 0x54d   : > { %v8602_v52 = vmax.f32 %v8592_v0, 0.0  ;;  %v8418_v32 = vadd.f32 %v8403_v43, %v8207_v39  ;;  %v11797_v40 = vpop.f32.mrb[177].mxu1 }
 0x54e   : > { %v8406_v42 = vpop.f32.mrb[178].mxu1 }
 0x54f   : > { %v9912_v60 = vpack.c.bf16 %v8602_v52, %v8601_v41  ;;  %v8419_v2 = vadd.f32 %v8406_v42, %v15843_v9  ;;  %v11798_v46 = vpop.f32.mrb[179].mxu1 }
 0x551   : > { %9926 = vst [vmem:[%s15857_s9 + $0x18] sm:$0xff] %v9912_v60  }
 0x554   : > { %v8561_v33 = vpop.f32.mrb[180].mxu1 }
 0x555   : > { %v8576_v35 = vadd.f32 %v8561_v33, %v8418_v32  ;;  %v11833_v28 = vpop.f32.mrb[181].mxu1 }
 0x556   : > { %v8564_v12 = vpop.f32.mrb[182].mxu1 }
 0x557   : > { %v8593_v36 = vadd.f32 %v15848_v27, %v8576_v35  ;;  %v8577_v47 = vadd.f32 %v8564_v12, %v8419_v2  ;;  %v11834_v49 = vpop.f32.mrb[183].mxu1 }
 0x559   : > { %v8594_v31 = vadd.f32 %v15848_v27, %v8577_v47  ;;  %v8603_v18 = vmax.f32 %v8593_v36, 0.0 }
 0x55b   : > { %v8604_v39 = vmax.f32 %v8594_v31, 0.0 }
 0x55d   : > { %v9917_v26 = vpack.c.bf16 %v8604_v39, %v8603_v18 }
 0x55f   : > { %9927 = vst [vmem:[%s15857_s9 + $0x20] sm:$0xff] %v9917_v26  }
 0x560 PF: > { %s17_s24 = sadd.s32 1, %s12318_s24  }
 0x561   : > { %p14_p5 = scmp.ge.s32.totalorder %s17_s24, 4  }
 0x563   :  { %16 = sbr.rel (!%p14_p5) target bundleno = 1 (0x1), region = 112 }

// kernel: neural_network_forward.3
= control target key start
LH: loop header
LB: loop body
LE: loop exit
PB: predicated region body
PF: predicated region fallthrough
CT: control target
= control target key end

     0   :  { %vm4898_vm0 = vcmask 523264   ;;  %s11187_s1 = inlined_call_operand.vmem [shape: bf16[3136,512], index: 1, kind: input, shape index: {}]   ;;  %s11188_s0 = inlined_call_operand.vmem [shape: bf16[16,3136], index: 0, kind: input, shape index: {}]   ;;  %s11189_s3 = inlined_call_operand.vmem [shape: bf16[512,128], index: 3, kind: input, shape index: {}]   ;;  %s11190_s2 = inlined_call_operand.vmem [shape: f32[1,512], index: 2, kind: input, shape index: {}]   ;;  %s11191_s4 = inlined_call_operand.vmem [shape: f32[1,128], index: 4, kind: input, shape index: {}]   ;;  %s11192_s5 = inlined_call_operand.vmem [shape: f32[16,128], index: 5, kind: output, shape index: {}]  }
   0x1   :  { %v7376_v0 = vld [vmem:[%s11187_s1 + $0x4] ss:$16 sps:$4 sm:$0xff]   ;;  %v7378_v1 = vld [vmem:[%s11187_s1 + $0xc] ss:$16 sps:$4 sm:$0xff]   ;;  %v7380_v2 = vld [vmem:[%s11187_s1] ss:$16 sps:$4 sm:$0xff]  }
   0x2   :  { %4902 = vmatprep.subr.bf16.mxu0 %v7376_v0  ;;  %v7381_v3 = vld [vmem:[%s11187_s1 + $0x8] ss:$16 sps:$4 sm:$0xff]   ;;  %5461 = vmatprep.subr.bf16.mxu1 %v7378_v1  ;;  %v7382_v4 = vld [vmem:[%s11187_s1 + $0x24] ss:$16 sps:$4 sm:$0xff]   ;;  %v7384_v5 = vld [vmem:[%s11187_s1 + $0x2c] ss:$16 sps:$4 sm:$0xff]  }
   0x3   :  { %4903 = vmatpush1.bf16.msra.mxu0 %v7380_v2  ;;  %5462 = vmatpush1.bf16.msra.mxu1 %v7381_v3  ;;  %v7386_v6 = vld [vmem:[%s11187_s1 + $0x20] ss:$16 sps:$4 sm:$0xff]   ;;  %v7387_v7 = vld [vmem:[%s11187_s1 + $0x28] ss:$16 sps:$4 sm:$0xff]   ;;  %v7388_v8 = vld [vmem:[%s11187_s1 + $0x44] ss:$16 sps:$4 sm:$0xff]  }
   0x4   :  { %4904 = vmatprep.subr.bf16.mxu0 %v7382_v4  ;;  %5463 = vmatprep.subr.bf16.mxu1 %v7384_v5  ;;  %v7390_v9 = vld [vmem:[%s11187_s1 + $0x4c] ss:$16 sps:$4 sm:$0xff]   ;;  %v7392_v10 = vld [vmem:[%s11187_s1 + $0x40] ss:$16 sps:$4 sm:$0xff]   ;;  %v7393_v11 = vld [vmem:[%s11187_s1 + $0x48] ss:$16 sps:$4 sm:$0xff]  }
   0x5   :  { %v7394_v12 = vld [vmem:[%s11187_s1 + $0x64] ss:$16 sps:$4 sm:$0xff]   ;;  %v7396_v13 = vld [vmem:[%s11187_s1 + $0x6c] ss:$16 sps:$4 sm:$0xff]   ;;  %v7398_v14 = vld [vmem:[%s11187_s1 + $0x60] ss:$16 sps:$4 sm:$0xff]  }
   0x6   :  { %v7399_v15 = vld [vmem:[%s11187_s1 + $0x68] ss:$16 sps:$4 sm:$0xff]   ;;  %v7400_v16 = vld [vmem:[%s11187_s1 + $0x84] ss:$16 sps:$4 sm:$0xff]   ;;  %v7402_v17 = vld [vmem:[%s11187_s1 + $0x8c] ss:$16 sps:$4 sm:$0xff]  }
   0x7   :  { %4905 = vmatpush1.bf16.msra.mxu0 %v7386_v6  ;;  %5464 = vmatpush1.bf16.msra.mxu1 %v7387_v7  ;;  %v7404_v18 = vld [vmem:[%s11187_s1 + $0x80] ss:$16 sps:$4 sm:$0xff]   ;;  %v7405_v19 = vld [vmem:[%s11187_s1 + $0x88] ss:$16 sps:$4 sm:$0xff]   ;;  %v7406_v20 = vld [vmem:[%s11187_s1 + $0xa4] ss:$16 sps:$4 sm:$0xff]  }
   0x8   :  { %4906 = vmatprep.subr.bf16.mxu0 %v7388_v8  ;;  %5465 = vmatprep.subr.bf16.mxu1 %v7390_v9  ;;  %v7408_v21 = vld [vmem:[%s11187_s1 + $0xac] ss:$16 sps:$4 sm:$0xff]   ;;  %v7410_v22 = vld [vmem:[%s11187_s1 + $0xa0] ss:$16 sps:$4 sm:$0xff]   ;;  %v7411_v23 = vld [vmem:[%s11187_s1 + $0xa8] ss:$16 sps:$4 sm:$0xff]  }
   0x9   :  { %v7412_v24 = vld [vmem:[%s11187_s1 + $0xc4] ss:$16 sps:$4 sm:$0xff]   ;;  %v7414_v25 = vld [vmem:[%s11187_s1 + $0xcc] ss:$16 sps:$4 sm:$0xff]   ;;  %v7416_v26 = vld [vmem:[%s11187_s1 + $0xc0] ss:$16 sps:$4 sm:$0xff]  }
   0xa   :  { %v7417_v27 = vld [vmem:[%s11187_s1 + $0xc8] ss:$16 sps:$4 sm:$0xff]   ;;  %v7418_v28 = vld [vmem:[%s11187_s1 + $0xe4] ss:$16 sps:$4 sm:$0xff]   ;;  %v7420_v29 = vld [vmem:[%s11187_s1 + $0xec] ss:$16 sps:$4 sm:$0xff]  }
   0xb   :  { %4907 = vmatpush1.bf16.msra.mxu0 %v7392_v10  ;;  %5466 = vmatpush1.bf16.msra.mxu1 %v7393_v11  ;;  %v7422_v30 = vld [vmem:[%s11187_s1 + $0xe0] ss:$16 sps:$4 sm:$0xff]   ;;  %v7423_v31 = vld [vmem:[%s11187_s1 + $0xe8] ss:$16 sps:$4 sm:$0xff]   ;;  %v7424_v32 = vld [vmem:[%s11187_s1 + $0x104] ss:$16 sps:$4 sm:$0xff]  }
   0xc   :  { %4908 = vmatprep.subr.bf16.mxu0 %v7394_v12  ;;  %5467 = vmatprep.subr.bf16.mxu1 %v7396_v13  ;;  %v7426_v33 = vld [vmem:[%s11187_s1 + $0x10c] ss:$16 sps:$4 sm:$0xff]   ;;  %v7428_v34 = vld [vmem:[%s11187_s1 + $0x100] ss:$16 sps:$4 sm:$0xff]   ;;  %v7429_v35 = vld [vmem:[%s11187_s1 + $0x108] ss:$16 sps:$4 sm:$0xff]  }
   0xd   :  { %v7430_v36 = vld [vmem:[%s11187_s1 + $0x124] ss:$16 sps:$4 sm:$0xff]   ;;  %v7432_v37 = vld [vmem:[%s11187_s1 + $0x12c] ss:$16 sps:$4 sm:$0xff]   ;;  %v7434_v38 = vld [vmem:[%s11187_s1 + $0x120] ss:$16 sps:$4 sm:$0xff]  }
   0xe   :  { %v7435_v39 = vld [vmem:[%s11187_s1 + $0x128] ss:$16 sps:$4 sm:$0xff]   ;;  %v7436_v40 = vld [vmem:[%s11187_s1 + $0x144] ss:$16 sps:$4 sm:$0xff]   ;;  %v7438_v41 = vld [vmem:[%s11187_s1 + $0x14c] ss:$16 sps:$4 sm:$0xff]  }
   0xf   :  { %4909 = vmatpush1.bf16.msra.mxu0 %v7398_v14  ;;  %5468 = vmatpush1.bf16.msra.mxu1 %v7399_v15  ;;  %v7440_v42 = vld [vmem:[%s11187_s1 + $0x140] ss:$16 sps:$4 sm:$0xff]   ;;  %v7441_v43 = vld [vmem:[%s11187_s1 + $0x148] ss:$16 sps:$4 sm:$0xff]   ;;  %v7442_v44 = vld [vmem:[%s11187_s1 + $0x164] ss:$16 sps:$4 sm:$0xff]  }
  0x10   :  { %4910 = vmatprep.subr.bf16.mxu0 %v7400_v16  ;;  %5469 = vmatprep.subr.bf16.mxu1 %v7402_v17  ;;  %v7444_v45 = vld [vmem:[%s11187_s1 + $0x16c] ss:$16 sps:$4 sm:$0xff]   ;;  %v7446_v46 = vld [vmem:[%s11187_s1 + $0x160] ss:$16 sps:$4 sm:$0xff]   ;;  %v7447_v47 = vld [vmem:[%s11187_s1 + $0x168] ss:$16 sps:$4 sm:$0xff]  }
  0x11   :  { %v7474_v48 = vld [vmem:[%s11188_s0 + $0x4] ss:$100 sps:$4 sm:$0xff]   ;;  %v7450_v50 = vld [vmem:[%s11187_s1 + $0x18c] ss:$16 sps:$4 sm:$0xff]   ;;  %v7452_v51 = vld [vmem:[%s11187_s1 + $0x180] ss:$16 sps:$4 sm:$0xff]  }
  0x12   :  { %v7448_v49 = vld [vmem:[%s11187_s1 + $0x184] ss:$16 sps:$4 sm:$0xff]   ;;  %4934 = vmatprep.mubr.bf16.mxu0 %v7474_v48  ;;  %5493 = vmatprep.mubr.bf16.mxu1 %v7474_v48  ;;  %v7453_v52 = vld [vmem:[%s11187_s1 + $0x188] ss:$16 sps:$4 sm:$0xff]   ;;  %v7456_v54 = vld [vmem:[%s11187_s1 + $0x1ac] ss:$16 sps:$4 sm:$0xff]  }
  0x13   :  { %4911 = vmatpush1.bf16.msra.mxu0 %v7404_v18  ;;  %5470 = vmatpush1.bf16.msra.mxu1 %v7405_v19  ;;  %v7454_v53 = vld [vmem:[%s11187_s1 + $0x1a4] ss:$16 sps:$4 sm:$0xff]   ;;  %v7458_v55 = vld [vmem:[%s11187_s1 + $0x1a0] ss:$16 sps:$4 sm:$0xff]   ;;  %v7459_v56 = vld [vmem:[%s11187_s1 + $0x1a8] ss:$16 sps:$4 sm:$0xff]  }
  0x14   :  { %4912 = vmatprep.subr.bf16.mxu0 %v7406_v20  ;;  %5471 = vmatprep.subr.bf16.mxu1 %v7408_v21  ;;  %v7460_v57 = vld [vmem:[%s11187_s1 + $0x1c4] ss:$16 sps:$4 sm:$0xff]   ;;  %v7462_v58 = vld [vmem:[%s11187_s1 + $0x1cc] ss:$16 sps:$4 sm:$0xff]   ;;  %v7464_v59 = vld [vmem:[%s11187_s1 + $0x1c0] ss:$16 sps:$4 sm:$0xff]  }
  0x15   :  { %v7465_v60 = vld [vmem:[%s11187_s1 + $0x1c8] ss:$16 sps:$4 sm:$0xff]   ;;  %v7466_v61 = vld [vmem:[%s11187_s1 + $0x1e4] ss:$16 sps:$4 sm:$0xff]   ;;  %v7468_v62 = vld [vmem:[%s11187_s1 + $0x1ec] ss:$16 sps:$4 sm:$0xff]  }
  0x16   :  { %v7470_v63 = vld [vmem:[%s11187_s1 + $0x1e0] ss:$16 sps:$4 sm:$0xff]   ;;  %v7471_v0 = vld [vmem:[%s11187_s1 + $0x1e8] ss:$16 sps:$4 sm:$0xff]   ;;  %v7477_v1 = vld [vmem:[%s11187_s1 + $0x204] ss:$16 sps:$4 sm:$0xff]  }
  0x17   :  { %4913 = vmatpush1.bf16.msra.mxu0 %v7410_v22  ;;  %5472 = vmatpush1.bf16.msra.mxu1 %v7411_v23  ;;  %v7480_v2 = vld [vmem:[%s11187_s1 + $0x20c] ss:$16 sps:$4 sm:$0xff]   ;;  %v7472_v3 = vld [vmem:[%s11188_s0] ss:$100 sps:$4 sm:$0xff]   ;;  %v7478_v5 = vld [vmem:[%s11187_s1 + $0x208] ss:$16 sps:$4 sm:$0xff]  }
  0x18   :  { %4914 = vmatprep.subr.bf16.mxu0 %v7412_v24  ;;  %5473 = vmatprep.subr.bf16.mxu1 %v7414_v25  ;;  %v7475_v4 = vld [vmem:[%s11187_s1 + $0x200] ss:$16 sps:$4 sm:$0xff]   ;;  %v7483_v6 = vld [vmem:[%s11187_s1 + $0x224] ss:$16 sps:$4 sm:$0xff]   ;;  %v7486_v7 = vld [vmem:[%s11187_s1 + $0x22c] ss:$16 sps:$4 sm:$0xff]  }
  0x19   :  { %v7481_v8 = vld [vmem:[%s11187_s1 + $0x220] ss:$16 sps:$4 sm:$0xff]   ;;  %v7484_v9 = vld [vmem:[%s11187_s1 + $0x228] ss:$16 sps:$4 sm:$0xff]   ;;  %v7489_v10 = vld [vmem:[%s11187_s1 + $0x244] ss:$16 sps:$4 sm:$0xff]  }
  0x1a   :  { %v7492_v11 = vld [vmem:[%s11187_s1 + $0x24c] ss:$16 sps:$4 sm:$0xff]   ;;  %v7487_v12 = vld [vmem:[%s11187_s1 + $0x240] ss:$16 sps:$4 sm:$0xff]   ;;  %v7490_v13 = vld [vmem:[%s11187_s1 + $0x248] ss:$16 sps:$4 sm:$0xff]  }
  0x1b   :  { %4915 = vmatpush1.bf16.msra.mxu0 %v7416_v26  ;;  %5474 = vmatpush1.bf16.msra.mxu1 %v7417_v27  ;;  %v7495_v14 = vld [vmem:[%s11187_s1 + $0x264] ss:$16 sps:$4 sm:$0xff]   ;;  %v7498_v15 = vld [vmem:[%s11187_s1 + $0x26c] ss:$16 sps:$4 sm:$0xff]   ;;  %v7493_v16 = vld [vmem:[%s11187_s1 + $0x260] ss:$16 sps:$4 sm:$0xff]  }
  0x1c   :  { %4916 = vmatprep.subr.bf16.mxu0 %v7418_v28  ;;  %5475 = vmatprep.subr.bf16.mxu1 %v7420_v29  ;;  %v7496_v17 = vld [vmem:[%s11187_s1 + $0x268] ss:$16 sps:$4 sm:$0xff]   ;;  %v7501_v18 = vld [vmem:[%s11187_s1 + $0x284] ss:$16 sps:$4 sm:$0xff]   ;;  %v7504_v19 = vld [vmem:[%s11187_s1 + $0x28c] ss:$16 sps:$4 sm:$0xff]  }
  0x1d   :  { %v7499_v20 = vld [vmem:[%s11187_s1 + $0x280] ss:$16 sps:$4 sm:$0xff]   ;;  %v7502_v21 = vld [vmem:[%s11187_s1 + $0x288] ss:$16 sps:$4 sm:$0xff]   ;;  %v7507_v22 = vld [vmem:[%s11187_s1 + $0x2a4] ss:$16 sps:$4 sm:$0xff]  }
  0x1e   :  { %v7510_v23 = vld [vmem:[%s11187_s1 + $0x2ac] ss:$16 sps:$4 sm:$0xff]   ;;  %v7505_v24 = vld [vmem:[%s11187_s1 + $0x2a0] ss:$16 sps:$4 sm:$0xff]   ;;  %v7508_v25 = vld [vmem:[%s11187_s1 + $0x2a8] ss:$16 sps:$4 sm:$0xff]  }
  0x1f   :  { %4917 = vmatpush1.bf16.msra.mxu0 %v7422_v30  ;;  %5476 = vmatpush1.bf16.msra.mxu1 %v7423_v31  ;;  %v7513_v26 = vld [vmem:[%s11187_s1 + $0x2c4] ss:$16 sps:$4 sm:$0xff]   ;;  %v7516_v27 = vld [vmem:[%s11187_s1 + $0x2cc] ss:$16 sps:$4 sm:$0xff]   ;;  %v7511_v28 = vld [vmem:[%s11187_s1 + $0x2c0] ss:$16 sps:$4 sm:$0xff]  }
  0x20   :  { %4918 = vmatprep.subr.bf16.mxu0 %v7424_v32  ;;  %5477 = vmatprep.subr.bf16.mxu1 %v7426_v33  ;;  %v7514_v29 = vld [vmem:[%s11187_s1 + $0x2c8] ss:$16 sps:$4 sm:$0xff]   ;;  %v7573_v30 = vld [vmem:[%s11188_s0 + $0xc] ss:$100 sps:$4 sm:$0xff]   ;;  %v7519_v31 = vld [vmem:[%s11187_s1 + $0x2e4] ss:$16 sps:$4 sm:$0xff]  }
  0x21   :  { %v7522_v32 = vld [vmem:[%s11187_s1 + $0x2ec] ss:$16 sps:$4 sm:$0xff]   ;;  %v7517_v33 = vld [vmem:[%s11187_s1 + $0x2e0] ss:$16 sps:$4 sm:$0xff]  }
  0x22   :  { %v7546_v48 = vld [vmem:[%s11187_s1 + $0x36c] ss:$16 sps:$4 sm:$0xff]  }
  0x23   :  { %4919 = vmatpush1.bf16.msra.mxu0 %v7428_v34  ;;  %5478 = vmatpush1.bf16.msra.mxu1 %v7429_v35  ;;  %v7520_v34 = vld [vmem:[%s11187_s1 + $0x2e8] ss:$16 sps:$4 sm:$0xff]   ;;  %v7525_v35 = vld [vmem:[%s11187_s1 + $0x304] ss:$16 sps:$4 sm:$0xff]  }
  0x24   :  { %4920 = vmatprep.subr.bf16.mxu0 %v7430_v36  ;;  %5479 = vmatprep.subr.bf16.mxu1 %v7432_v37  ;;  %v7528_v36 = vld [vmem:[%s11187_s1 + $0x30c] ss:$16 sps:$4 sm:$0xff]   ;;  %v7523_v37 = vld [vmem:[%s11187_s1 + $0x300] ss:$16 sps:$4 sm:$0xff]  }
  0x27   :  { %4921 = vmatpush1.bf16.msra.mxu0 %v7434_v38  ;;  %5480 = vmatpush1.bf16.msra.mxu1 %v7435_v39  ;;  %v7526_v38 = vld [vmem:[%s11187_s1 + $0x308] ss:$16 sps:$4 sm:$0xff]   ;;  %v7531_v39 = vld [vmem:[%s11187_s1 + $0x324] ss:$16 sps:$4 sm:$0xff]  }
  0x28   :  { %4922 = vmatprep.subr.bf16.mxu0 %v7436_v40  ;;  %5481 = vmatprep.subr.bf16.mxu1 %v7438_v41  ;;  %v7534_v40 = vld [vmem:[%s11187_s1 + $0x32c] ss:$16 sps:$4 sm:$0xff]   ;;  %v7529_v41 = vld [vmem:[%s11187_s1 + $0x320] ss:$16 sps:$4 sm:$0xff]  }
  0x2b   :  { %4923 = vmatpush1.bf16.msra.mxu0 %v7440_v42  ;;  %5482 = vmatpush1.bf16.msra.mxu1 %v7441_v43  ;;  %v7532_v42 = vld [vmem:[%s11187_s1 + $0x328] ss:$16 sps:$4 sm:$0xff]   ;;  %v7537_v43 = vld [vmem:[%s11187_s1 + $0x344] ss:$16 sps:$4 sm:$0xff]  }
  0x2c   :  { %4924 = vmatprep.subr.bf16.mxu0 %v7442_v44  ;;  %5483 = vmatprep.subr.bf16.mxu1 %v7444_v45  ;;  %v7540_v44 = vld [vmem:[%s11187_s1 + $0x34c] ss:$16 sps:$4 sm:$0xff]   ;;  %v7535_v45 = vld [vmem:[%s11187_s1 + $0x340] ss:$16 sps:$4 sm:$0xff]  }
  0x2f   :  { %4925 = vmatpush1.bf16.msra.mxu0 %v7446_v46  ;;  %5484 = vmatpush1.bf16.msra.mxu1 %v7447_v47  ;;  %v7538_v46 = vld [vmem:[%s11187_s1 + $0x348] ss:$16 sps:$4 sm:$0xff]   ;;  %v7543_v47 = vld [vmem:[%s11187_s1 + $0x364] ss:$16 sps:$4 sm:$0xff]  }
  0x30   :  { %4926 = vmatprep.subr.bf16.mxu0 %v7448_v49  ;;  %5485 = vmatprep.subr.bf16.mxu1 %v7450_v50  ;;  %v7541_v49 = vld [vmem:[%s11187_s1 + $0x360] ss:$16 sps:$4 sm:$0xff]   ;;  %v7544_v50 = vld [vmem:[%s11187_s1 + $0x368] ss:$16 sps:$4 sm:$0xff]  }
  0x33   :  { %4927 = vmatpush1.bf16.msra.mxu0 %v7452_v51  ;;  %5486 = vmatpush1.bf16.msra.mxu1 %v7453_v52  ;;  %v7549_v51 = vld [vmem:[%s11187_s1 + $0x384] ss:$16 sps:$4 sm:$0xff]   ;;  %v7552_v52 = vld [vmem:[%s11187_s1 + $0x38c] ss:$16 sps:$4 sm:$0xff]  }
  0x34   :  { %4928 = vmatprep.subr.bf16.mxu0 %v7454_v53  ;;  %5487 = vmatprep.subr.bf16.mxu1 %v7456_v54  ;;  %v7547_v53 = vld [vmem:[%s11187_s1 + $0x380] ss:$16 sps:$4 sm:$0xff]   ;;  %v7550_v54 = vld [vmem:[%s11187_s1 + $0x388] ss:$16 sps:$4 sm:$0xff]  }
  0x37   :  { %4929 = vmatpush1.bf16.msra.mxu0 %v7458_v55  ;;  %5488 = vmatpush1.bf16.msra.mxu1 %v7459_v56  ;;  %v7555_v55 = vld [vmem:[%s11187_s1 + $0x3a4] ss:$16 sps:$4 sm:$0xff]   ;;  %v7558_v56 = vld [vmem:[%s11187_s1 + $0x3ac] ss:$16 sps:$4 sm:$0xff]  }
  0x38   :  { %4930 = vmatprep.subr.bf16.mxu0 %v7460_v57  ;;  %5489 = vmatprep.subr.bf16.mxu1 %v7462_v58  ;;  %v7553_v57 = vld [vmem:[%s11187_s1 + $0x3a0] ss:$16 sps:$4 sm:$0xff]   ;;  %v7556_v58 = vld [vmem:[%s11187_s1 + $0x3a8] ss:$16 sps:$4 sm:$0xff]  }
  0x3b   :  { %4931 = vmatpush1.bf16.msra.mxu0 %v7464_v59  ;;  %5490 = vmatpush1.bf16.msra.mxu1 %v7465_v60  ;;  %v7561_v59 = vld [vmem:[%s11187_s1 + $0x3c4] ss:$16 sps:$4 sm:$0xff]   ;;  %v7564_v60 = vld [vmem:[%s11187_s1 + $0x3cc] ss:$16 sps:$4 sm:$0xff]  }
  0x3c   :  { %4932 = vmatprep.subr.bf16.mxu0 %v7466_v61  ;;  %5491 = vmatprep.subr.bf16.mxu1 %v7468_v62  ;;  %v7559_v61 = vld [vmem:[%s11187_s1 + $0x3c0] ss:$16 sps:$4 sm:$0xff]   ;;  %v7562_v62 = vld [vmem:[%s11187_s1 + $0x3c8] ss:$16 sps:$4 sm:$0xff]  }
  0x3f   :  { %4933 = vmatpush1.bf16.msra.mxu0 %v7470_v63  ;;  %5492 = vmatpush1.bf16.msra.mxu1 %v7471_v0  ;;  %v7567_v63 = vld [vmem:[%s11187_s1 + $0x3e4] ss:$16 sps:$4 sm:$0xff]   ;;  %v7570_v0 = vld [vmem:[%s11187_s1 + $0x3ec] ss:$16 sps:$4 sm:$0xff]  }
  0x40   :  { %4945 = vmatprep.subr.bf16.mxu0 %v7477_v1  ;;  %5504 = vmatprep.subr.bf16.mxu1 %v7480_v2  ;;  %v7565_v1 = vld [vmem:[%s11187_s1 + $0x3e0] ss:$16 sps:$4 sm:$0xff]   ;;  %v7568_v2 = vld [vmem:[%s11187_s1 + $0x3e8] ss:$16 sps:$4 sm:$0xff]  }
  0x42   :  { %4935 = vmatmul.mubr.bf16.vlgmr.msra.gmra.mrb[0].mxu0 %v7472_v3  ;;  %5494 = vmatmul.mubr.bf16.vlgmr.msra.gmra.mrb[0].mxu1 %v7472_v3  ;;  %v7576_v3 = vld [vmem:[%s11187_s1 + $0x404] ss:$16 sps:$4 sm:$0xff]  }
  0x43   :  { %4946 = vmatpush1.bf16.msra.mxu0 %v7475_v4  ;;  %5505 = vmatpush1.bf16.msra.mxu1 %v7478_v5  ;;  %v7579_v4 = vld [vmem:[%s11187_s1 + $0x40c] ss:$16 sps:$4 sm:$0xff]  }
  0x44   :  { %4947 = vmatprep.subr.bf16.mxu0 %v7483_v6  ;;  %5506 = vmatprep.subr.bf16.mxu1 %v7486_v7  ;;  %v7571_v5 = vld [vmem:[%s11188_s0 + $0x8] ss:$100 sps:$4 sm:$0xff]   ;;  %v7574_v6 = vld [vmem:[%s11187_s1 + $0x400] ss:$16 sps:$4 sm:$0xff]  }
  0x45   :  { %4977 = vmatprep.mubr.bf16.mxu0 %v7573_v30  ;;  %5536 = vmatprep.mubr.bf16.mxu1 %v7573_v30  ;;  %v7577_v7 = vld [vmem:[%s11187_s1 + $0x408] ss:$16 sps:$4 sm:$0xff]   ;;  %v7615_v30 = vld [vmem:[%s11187_s1 + $0x4cc] ss:$16 sps:$4 sm:$0xff]  }
  0x47   :  { %4948 = vmatpush1.bf16.msra.mxu0 %v7481_v8  ;;  %5507 = vmatpush1.bf16.msra.mxu1 %v7484_v9  ;;  %v7582_v8 = vld [vmem:[%s11187_s1 + $0x424] ss:$16 sps:$4 sm:$0xff]   ;;  %v7585_v9 = vld [vmem:[%s11187_s1 + $0x42c] ss:$16 sps:$4 sm:$0xff]  }
  0x48   :  { %4949 = vmatprep.subr.bf16.mxu0 %v7489_v10  ;;  %5508 = vmatprep.subr.bf16.mxu1 %v7492_v11  ;;  %v7580_v10 = vld [vmem:[%s11187_s1 + $0x420] ss:$16 sps:$4 sm:$0xff]   ;;  %v7583_v11 = vld [vmem:[%s11187_s1 + $0x428] ss:$16 sps:$4 sm:$0xff]  }
  0x4b   :  { %4950 = vmatpush1.bf16.msra.mxu0 %v7487_v12  ;;  %5509 = vmatpush1.bf16.msra.mxu1 %v7490_v13  ;;  %v7672_v12 = vld [vmem:[%s11188_s0 + $0x14] ss:$100 sps:$4 sm:$0xff]  }
  0x4c   :  { %4951 = vmatprep.subr.bf16.mxu0 %v7495_v14  ;;  %5510 = vmatprep.subr.bf16.mxu1 %v7498_v15  ;;  %v7588_v13 = vld [vmem:[%s11187_s1 + $0x444] ss:$16 sps:$4 sm:$0xff]   ;;  %v7591_v14 = vld [vmem:[%s11187_s1 + $0x44c] ss:$16 sps:$4 sm:$0xff]   ;;  %v7586_v15 = vld [vmem:[%s11187_s1 + $0x440] ss:$16 sps:$4 sm:$0xff]  }
  0x4f   :  { %4952 = vmatpush1.bf16.msra.mxu0 %v7493_v16  ;;  %5511 = vmatpush1.bf16.msra.mxu1 %v7496_v17  ;;  %v7589_v16 = vld [vmem:[%s11187_s1 + $0x448] ss:$16 sps:$4 sm:$0xff]   ;;  %v7594_v17 = vld [vmem:[%s11187_s1 + $0x464] ss:$16 sps:$4 sm:$0xff]  }
  0x50   :  { %4953 = vmatprep.subr.bf16.mxu0 %v7501_v18  ;;  %5512 = vmatprep.subr.bf16.mxu1 %v7504_v19  ;;  %v7597_v18 = vld [vmem:[%s11187_s1 + $0x46c] ss:$16 sps:$4 sm:$0xff]   ;;  %v7592_v19 = vld [vmem:[%s11187_s1 + $0x460] ss:$16 sps:$4 sm:$0xff]  }
  0x53   :  { %4954 = vmatpush1.bf16.msra.mxu0 %v7499_v20  ;;  %5513 = vmatpush1.bf16.msra.mxu1 %v7502_v21  ;;  %v7595_v20 = vld [vmem:[%s11187_s1 + $0x468] ss:$16 sps:$4 sm:$0xff]   ;;  %v7600_v21 = vld [vmem:[%s11187_s1 + $0x484] ss:$16 sps:$4 sm:$0xff]  }
  0x54   :  { %4955 = vmatprep.subr.bf16.mxu0 %v7507_v22  ;;  %5514 = vmatprep.subr.bf16.mxu1 %v7510_v23  ;;  %v7603_v22 = vld [vmem:[%s11187_s1 + $0x48c] ss:$16 sps:$4 sm:$0xff]   ;;  %v7598_v23 = vld [vmem:[%s11187_s1 + $0x480] ss:$16 sps:$4 sm:$0xff]  }
  0x57   :  { %4956 = vmatpush1.bf16.msra.mxu0 %v7505_v24  ;;  %5515 = vmatpush1.bf16.msra.mxu1 %v7508_v25  ;;  %v7601_v24 = vld [vmem:[%s11187_s1 + $0x488] ss:$16 sps:$4 sm:$0xff]   ;;  %v7606_v25 = vld [vmem:[%s11187_s1 + $0x4a4] ss:$16 sps:$4 sm:$0xff]  }
  0x58   :  { %4957 = vmatprep.subr.bf16.mxu0 %v7513_v26  ;;  %5516 = vmatprep.subr.bf16.mxu1 %v7516_v27  ;;  %v7609_v26 = vld [vmem:[%s11187_s1 + $0x4ac] ss:$16 sps:$4 sm:$0xff]   ;;  %v7604_v27 = vld [vmem:[%s11187_s1 + $0x4a0] ss:$16 sps:$4 sm:$0xff]  }
  0x5b   :  { %4958 = vmatpush1.bf16.msra.mxu0 %v7511_v28  ;;  %5517 = vmatpush1.bf16.msra.mxu1 %v7514_v29  ;;  %v7607_v28 = vld [vmem:[%s11187_s1 + $0x4a8] ss:$16 sps:$4 sm:$0xff]   ;;  %v7612_v29 = vld [vmem:[%s11187_s1 + $0x4c4] ss:$16 sps:$4 sm:$0xff]  }
  0x5c   :  { %4959 = vmatprep.subr.bf16.mxu0 %v7519_v31  ;;  %5518 = vmatprep.subr.bf16.mxu1 %v7522_v32  ;;  %v7610_v31 = vld [vmem:[%s11187_s1 + $0x4c0] ss:$16 sps:$4 sm:$0xff]   ;;  %v7613_v32 = vld [vmem:[%s11187_s1 + $0x4c8] ss:$16 sps:$4 sm:$0xff]  }
  0x5f   :  { %4960 = vmatpush1.bf16.msra.mxu0 %v7517_v33  ;;  %5519 = vmatpush1.bf16.msra.mxu1 %v7520_v34  ;;  %v7618_v33 = vld [vmem:[%s11187_s1 + $0x4e4] ss:$16 sps:$4 sm:$0xff]   ;;  %v7621_v34 = vld [vmem:[%s11187_s1 + $0x4ec] ss:$16 sps:$4 sm:$0xff]  }
  0x60   :  { %4961 = vmatprep.subr.bf16.mxu0 %v7525_v35  ;;  %5520 = vmatprep.subr.bf16.mxu1 %v7528_v36  ;;  %v7616_v35 = vld [vmem:[%s11187_s1 + $0x4e0] ss:$16 sps:$4 sm:$0xff]   ;;  %v7619_v36 = vld [vmem:[%s11187_s1 + $0x4e8] ss:$16 sps:$4 sm:$0xff]  }
  0x63   :  { %4962 = vmatpush1.bf16.msra.mxu0 %v7523_v37  ;;  %5521 = vmatpush1.bf16.msra.mxu1 %v7526_v38  ;;  %v7624_v37 = vld [vmem:[%s11187_s1 + $0x504] ss:$16 sps:$4 sm:$0xff]   ;;  %v7627_v38 = vld [vmem:[%s11187_s1 + $0x50c] ss:$16 sps:$4 sm:$0xff]  }
  0x64   :  { %4963 = vmatprep.subr.bf16.mxu0 %v7531_v39  ;;  %5522 = vmatprep.subr.bf16.mxu1 %v7534_v40  ;;  %v7622_v39 = vld [vmem:[%s11187_s1 + $0x500] ss:$16 sps:$4 sm:$0xff]   ;;  %v7625_v40 = vld [vmem:[%s11187_s1 + $0x508] ss:$16 sps:$4 sm:$0xff]  }
  0x67   :  { %4964 = vmatpush1.bf16.msra.mxu0 %v7529_v41  ;;  %5523 = vmatpush1.bf16.msra.mxu1 %v7532_v42  ;;  %v7630_v41 = vld [vmem:[%s11187_s1 + $0x524] ss:$16 sps:$4 sm:$0xff]   ;;  %v7633_v42 = vld [vmem:[%s11187_s1 + $0x52c] ss:$16 sps:$4 sm:$0xff]  }
  0x68   :  { %4965 = vmatprep.subr.bf16.mxu0 %v7537_v43  ;;  %5524 = vmatprep.subr.bf16.mxu1 %v7540_v44  ;;  %v7628_v43 = vld [vmem:[%s11187_s1 + $0x520] ss:$16 sps:$4 sm:$0xff]   ;;  %v7631_v44 = vld [vmem:[%s11187_s1 + $0x528] ss:$16 sps:$4 sm:$0xff]  }
  0x6b   :  { %4966 = vmatpush1.bf16.msra.mxu0 %v7535_v45  ;;  %5525 = vmatpush1.bf16.msra.mxu1 %v7538_v46  ;;  %v7636_v45 = vld [vmem:[%s11187_s1 + $0x544] ss:$16 sps:$4 sm:$0xff]   ;;  %v7639_v46 = vld [vmem:[%s11187_s1 + $0x54c] ss:$16 sps:$4 sm:$0xff]  }
  0x6c   :  { %4967 = vmatprep.subr.bf16.mxu0 %v7543_v47  ;;  %5526 = vmatprep.subr.bf16.mxu1 %v7546_v48  ;;  %v7634_v47 = vld [vmem:[%s11187_s1 + $0x540] ss:$16 sps:$4 sm:$0xff]   ;;  %v7637_v48 = vld [vmem:[%s11187_s1 + $0x548] ss:$16 sps:$4 sm:$0xff]  }
  0x6f   :  { %4968 = vmatpush1.bf16.msra.mxu0 %v7541_v49  ;;  %5527 = vmatpush1.bf16.msra.mxu1 %v7544_v50  ;;  %v7642_v49 = vld [vmem:[%s11187_s1 + $0x564] ss:$16 sps:$4 sm:$0xff]   ;;  %v7645_v50 = vld [vmem:[%s11187_s1 + $0x56c] ss:$16 sps:$4 sm:$0xff]  }
  0x70   :  { %4969 = vmatprep.subr.bf16.mxu0 %v7549_v51  ;;  %5528 = vmatprep.subr.bf16.mxu1 %v7552_v52  ;;  %v7640_v51 = vld [vmem:[%s11187_s1 + $0x560] ss:$16 sps:$4 sm:$0xff]   ;;  %v7643_v52 = vld [vmem:[%s11187_s1 + $0x568] ss:$16 sps:$4 sm:$0xff]  }
  0x73   :  { %4970 = vmatpush1.bf16.msra.mxu0 %v7547_v53  ;;  %5529 = vmatpush1.bf16.msra.mxu1 %v7550_v54  ;;  %v7648_v53 = vld [vmem:[%s11187_s1 + $0x584] ss:$16 sps:$4 sm:$0xff]   ;;  %v7651_v54 = vld [vmem:[%s11187_s1 + $0x58c] ss:$16 sps:$4 sm:$0xff]  }
  0x74   :  { %4971 = vmatprep.subr.bf16.mxu0 %v7555_v55  ;;  %5530 = vmatprep.subr.bf16.mxu1 %v7558_v56  ;;  %v7646_v55 = vld [vmem:[%s11187_s1 + $0x580] ss:$16 sps:$4 sm:$0xff]   ;;  %v7649_v56 = vld [vmem:[%s11187_s1 + $0x588] ss:$16 sps:$4 sm:$0xff]  }
  0x77   :  { %4972 = vmatpush1.bf16.msra.mxu0 %v7553_v57  ;;  %5531 = vmatpush1.bf16.msra.mxu1 %v7556_v58  ;;  %v7654_v57 = vld [vmem:[%s11187_s1 + $0x5a4] ss:$16 sps:$4 sm:$0xff]   ;;  %v7657_v58 = vld [vmem:[%s11187_s1 + $0x5ac] ss:$16 sps:$4 sm:$0xff]  }
  0x78   :  { %4973 = vmatprep.subr.bf16.mxu0 %v7561_v59  ;;  %5532 = vmatprep.subr.bf16.mxu1 %v7564_v60  ;;  %v7652_v59 = vld [vmem:[%s11187_s1 + $0x5a0] ss:$16 sps:$4 sm:$0xff]   ;;  %v7655_v60 = vld [vmem:[%s11187_s1 + $0x5a8] ss:$16 sps:$4 sm:$0xff]  }
  0x7b   :  { %4974 = vmatpush1.bf16.msra.mxu0 %v7559_v61  ;;  %5533 = vmatpush1.bf16.msra.mxu1 %v7562_v62  ;;  %v7660_v61 = vld [vmem:[%s11187_s1 + $0x5c4] ss:$16 sps:$4 sm:$0xff]   ;;  %v7663_v62 = vld [vmem:[%s11187_s1 + $0x5cc] ss:$16 sps:$4 sm:$0xff]  }
  0x7c   :  { %4975 = vmatprep.subr.bf16.mxu0 %v7567_v63  ;;  %5534 = vmatprep.subr.bf16.mxu1 %v7570_v0  ;;  %v7658_v63 = vld [vmem:[%s11187_s1 + $0x5c0] ss:$16 sps:$4 sm:$0xff]   ;;  %v7661_v0 = vld [vmem:[%s11187_s1 + $0x5c8] ss:$16 sps:$4 sm:$0xff]  }
  0x7f   :  { %4976 = vmatpush1.bf16.msra.mxu0 %v7565_v1  ;;  %5535 = vmatpush1.bf16.msra.mxu1 %v7568_v2  ;;  %v7666_v1 = vld [vmem:[%s11187_s1 + $0x5e4] ss:$16 sps:$4 sm:$0xff]   ;;  %v7669_v2 = vld [vmem:[%s11187_s1 + $0x5ec] ss:$16 sps:$4 sm:$0xff]  }
  0x80   :  { %4988 = vmatprep.subr.bf16.mxu0 %v7576_v3  ;;  %5547 = vmatprep.subr.bf16.mxu1 %v7579_v4  ;;  %v7664_v3 = vld [vmem:[%s11187_s1 + $0x5e0] ss:$16 sps:$4 sm:$0xff]   ;;  %v7667_v4 = vld [vmem:[%s11187_s1 + $0x5e8] ss:$16 sps:$4 sm:$0xff]  }
  0x82   :  { %4978 = vmatmul.mubr.bf16.vlgmr.msra.gmra.mrb[0].mxu0 %v7571_v5  ;;  %5537 = vmatmul.mubr.bf16.vlgmr.msra.gmra.mrb[0].mxu1 %v7571_v5  ;;  %v7675_v5 = vld [vmem:[%s11187_s1 + $0x604] ss:$16 sps:$4 sm:$0xff]  }
  0x83   :  { %4989 = vmatpush1.bf16.msra.mxu0 %v7574_v6  ;;  %5548 = vmatpush1.bf16.msra.mxu1 %v7577_v7  ;;  %v7678_v6 = vld [vmem:[%s11187_s1 + $0x60c] ss:$16 sps:$4 sm:$0xff]   ;;  %v7670_v7 = vld [vmem:[%s11188_s0 + $0x10] ss:$100 sps:$4 sm:$0xff]  }
  0x84   :  { %4990 = vmatprep.subr.bf16.mxu0 %v7582_v8  ;;  %5549 = vmatprep.subr.bf16.mxu1 %v7585_v9  ;;  %v7673_v8 = vld [vmem:[%s11187_s1 + $0x600] ss:$16 sps:$4 sm:$0xff]   ;;  %v7676_v9 = vld [vmem:[%s11187_s1 + $0x608] ss:$16 sps:$4 sm:$0xff]  }
  0x85   :  { %5020 = vmatprep.mubr.bf16.mxu0 %v7672_v12  ;;  %5579 = vmatprep.mubr.bf16.mxu1 %v7672_v12  ;;  %v7771_v12 = vld [vmem:[%s11188_s0 + $0x1c] ss:$100 sps:$4 sm:$0xff]  }
  0x87   :  { %4991 = vmatpush1.bf16.msra.mxu0 %v7580_v10  ;;  %5550 = vmatpush1.bf16.msra.mxu1 %v7583_v11  ;;  %v7681_v10 = vld [vmem:[%s11187_s1 + $0x624] ss:$16 sps:$4 sm:$0xff]   ;;  %v7684_v11 = vld [vmem:[%s11187_s1 + $0x62c] ss:$16 sps:$4 sm:$0xff]  }
  0x88   :  { %4992 = vmatprep.subr.bf16.mxu0 %v7588_v13  ;;  %5551 = vmatprep.subr.bf16.mxu1 %v7591_v14  ;;  %v7679_v13 = vld [vmem:[%s11187_s1 + $0x620] ss:$16 sps:$4 sm:$0xff]   ;;  %v7682_v14 = vld [vmem:[%s11187_s1 + $0x628] ss:$16 sps:$4 sm:$0xff]  }
  0x8b   :  { %4993 = vmatpush1.bf16.msra.mxu0 %v7586_v15  ;;  %5552 = vmatpush1.bf16.msra.mxu1 %v7589_v16  ;;  %v7687_v15 = vld [vmem:[%s11187_s1 + $0x644] ss:$16 sps:$4 sm:$0xff]   ;;  %v7690_v16 = vld [vmem:[%s11187_s1 + $0x64c] ss:$16 sps:$4 sm:$0xff]  }
  0x8c   :  { %4994 = vmatprep.subr.bf16.mxu0 %v7594_v17  ;;  %5553 = vmatprep.subr.bf16.mxu1 %v7597_v18  ;;  %v7685_v17 = vld [vmem:[%s11187_s1 + $0x640] ss:$16 sps:$4 sm:$0xff]   ;;  %v7688_v18 = vld [vmem:[%s11187_s1 + $0x648] ss:$16 sps:$4 sm:$0xff]  }
  0x8f   :  { %4995 = vmatpush1.bf16.msra.mxu0 %v7592_v19  ;;  %5554 = vmatpush1.bf16.msra.mxu1 %v7595_v20  ;;  %v7693_v19 = vld [vmem:[%s11187_s1 + $0x664] ss:$16 sps:$4 sm:$0xff]   ;;  %v7696_v20 = vld [vmem:[%s11187_s1 + $0x66c] ss:$16 sps:$4 sm:$0xff]  }
  0x90   :  { %4996 = vmatprep.subr.bf16.mxu0 %v7600_v21  ;;  %5555 = vmatprep.subr.bf16.mxu1 %v7603_v22  ;;  %v7691_v21 = vld [vmem:[%s11187_s1 + $0x660] ss:$16 sps:$4 sm:$0xff]   ;;  %v7694_v22 = vld [vmem:[%s11187_s1 + $0x668] ss:$16 sps:$4 sm:$0xff]  }
  0x93   :  { %4997 = vmatpush1.bf16.msra.mxu0 %v7598_v23  ;;  %5556 = vmatpush1.bf16.msra.mxu1 %v7601_v24  ;;  %v7699_v23 = vld [vmem:[%s11187_s1 + $0x684] ss:$16 sps:$4 sm:$0xff]   ;;  %v7702_v24 = vld [vmem:[%s11187_s1 + $0x68c] ss:$16 sps:$4 sm:$0xff]  }
  0x94   :  { %4998 = vmatprep.subr.bf16.mxu0 %v7606_v25  ;;  %5557 = vmatprep.subr.bf16.mxu1 %v7609_v26  ;;  %v7697_v25 = vld [vmem:[%s11187_s1 + $0x680] ss:$16 sps:$4 sm:$0xff]   ;;  %v7700_v26 = vld [vmem:[%s11187_s1 + $0x688] ss:$16 sps:$4 sm:$0xff]  }
  0x97   :  { %4999 = vmatpush1.bf16.msra.mxu0 %v7604_v27  ;;  %5558 = vmatpush1.bf16.msra.mxu1 %v7607_v28  ;;  %v7705_v27 = vld [vmem:[%s11187_s1 + $0x6a4] ss:$16 sps:$4 sm:$0xff]   ;;  %v7708_v28 = vld [vmem:[%s11187_s1 + $0x6ac] ss:$16 sps:$4 sm:$0xff]  }
  0x98   :  { %5000 = vmatprep.subr.bf16.mxu0 %v7612_v29  ;;  %5559 = vmatprep.subr.bf16.mxu1 %v7615_v30  ;;  %v7703_v29 = vld [vmem:[%s11187_s1 + $0x6a0] ss:$16 sps:$4 sm:$0xff]   ;;  %v7706_v30 = vld [vmem:[%s11187_s1 + $0x6a8] ss:$16 sps:$4 sm:$0xff]  }
  0x9b   :  { %5001 = vmatpush1.bf16.msra.mxu0 %v7610_v31  ;;  %5560 = vmatpush1.bf16.msra.mxu1 %v7613_v32  ;;  %v7711_v31 = vld [vmem:[%s11187_s1 + $0x6c4] ss:$16 sps:$4 sm:$0xff]   ;;  %v7714_v32 = vld [vmem:[%s11187_s1 + $0x6cc] ss:$16 sps:$4 sm:$0xff]  }
  0x9c   :  { %5002 = vmatprep.subr.bf16.mxu0 %v7618_v33  ;;  %5561 = vmatprep.subr.bf16.mxu1 %v7621_v34  ;;  %v7709_v33 = vld [vmem:[%s11187_s1 + $0x6c0] ss:$16 sps:$4 sm:$0xff]   ;;  %v7712_v34 = vld [vmem:[%s11187_s1 + $0x6c8] ss:$16 sps:$4 sm:$0xff]  }
  0x9f   :  { %5003 = vmatpush1.bf16.msra.mxu0 %v7616_v35  ;;  %5562 = vmatpush1.bf16.msra.mxu1 %v7619_v36  ;;  %v7717_v35 = vld [vmem:[%s11187_s1 + $0x6e4] ss:$16 sps:$4 sm:$0xff]   ;;  %v7720_v36 = vld [vmem:[%s11187_s1 + $0x6ec] ss:$16 sps:$4 sm:$0xff]  }
  0xa0   :  { %5004 = vmatprep.subr.bf16.mxu0 %v7624_v37  ;;  %5563 = vmatprep.subr.bf16.mxu1 %v7627_v38  ;;  %v7715_v37 = vld [vmem:[%s11187_s1 + $0x6e0] ss:$16 sps:$4 sm:$0xff]   ;;  %v7718_v38 = vld [vmem:[%s11187_s1 + $0x6e8] ss:$16 sps:$4 sm:$0xff]  }
  0xa3   :  { %5005 = vmatpush1.bf16.msra.mxu0 %v7622_v39  ;;  %5564 = vmatpush1.bf16.msra.mxu1 %v7625_v40  ;;  %v7723_v39 = vld [vmem:[%s11187_s1 + $0x704] ss:$16 sps:$4 sm:$0xff]   ;;  %v7726_v40 = vld [vmem:[%s11187_s1 + $0x70c] ss:$16 sps:$4 sm:$0xff]  }
  0xa4   :  { %5006 = vmatprep.subr.bf16.mxu0 %v7630_v41  ;;  %5565 = vmatprep.subr.bf16.mxu1 %v7633_v42  ;;  %v7721_v41 = vld [vmem:[%s11187_s1 + $0x700] ss:$16 sps:$4 sm:$0xff]   ;;  %v7724_v42 = vld [vmem:[%s11187_s1 + $0x708] ss:$16 sps:$4 sm:$0xff]  }
  0xa7   :  { %5007 = vmatpush1.bf16.msra.mxu0 %v7628_v43  ;;  %5566 = vmatpush1.bf16.msra.mxu1 %v7631_v44  ;;  %v7729_v43 = vld [vmem:[%s11187_s1 + $0x724] ss:$16 sps:$4 sm:$0xff]   ;;  %v7732_v44 = vld [vmem:[%s11187_s1 + $0x72c] ss:$16 sps:$4 sm:$0xff]  }
  0xa8   :  { %5008 = vmatprep.subr.bf16.mxu0 %v7636_v45  ;;  %5567 = vmatprep.subr.bf16.mxu1 %v7639_v46  ;;  %v7727_v45 = vld [vmem:[%s11187_s1 + $0x720] ss:$16 sps:$4 sm:$0xff]   ;;  %v7730_v46 = vld [vmem:[%s11187_s1 + $0x728] ss:$16 sps:$4 sm:$0xff]  }
  0xab   :  { %5009 = vmatpush1.bf16.msra.mxu0 %v7634_v47  ;;  %5568 = vmatpush1.bf16.msra.mxu1 %v7637_v48  ;;  %v7735_v47 = vld [vmem:[%s11187_s1 + $0x744] ss:$16 sps:$4 sm:$0xff]   ;;  %v7738_v48 = vld [vmem:[%s11187_s1 + $0x74c] ss:$16 sps:$4 sm:$0xff]  }
  0xac   :  { %5010 = vmatprep.subr.bf16.mxu0 %v7642_v49  ;;  %5569 = vmatprep.subr.bf16.mxu1 %v7645_v50  ;;  %v7733_v49 = vld [vmem:[%s11187_s1 + $0x740] ss:$16 sps:$4 sm:$0xff]   ;;  %v7736_v50 = vld [vmem:[%s11187_s1 + $0x748] ss:$16 sps:$4 sm:$0xff]  }
  0xaf   :  { %5011 = vmatpush1.bf16.msra.mxu0 %v7640_v51  ;;  %5570 = vmatpush1.bf16.msra.mxu1 %v7643_v52  ;;  %v7741_v51 = vld [vmem:[%s11187_s1 + $0x764] ss:$16 sps:$4 sm:$0xff]   ;;  %v7744_v52 = vld [vmem:[%s11187_s1 + $0x76c] ss:$16 sps:$4 sm:$0xff]  }
  0xb0   :  { %5012 = vmatprep.subr.bf16.mxu0 %v7648_v53  ;;  %5571 = vmatprep.subr.bf16.mxu1 %v7651_v54  ;;  %v7739_v53 = vld [vmem:[%s11187_s1 + $0x760] ss:$16 sps:$4 sm:$0xff]   ;;  %v7742_v54 = vld [vmem:[%s11187_s1 + $0x768] ss:$16 sps:$4 sm:$0xff]  }
  0xb3   :  { %5013 = vmatpush1.bf16.msra.mxu0 %v7646_v55  ;;  %5572 = vmatpush1.bf16.msra.mxu1 %v7649_v56  ;;  %v7747_v55 = vld [vmem:[%s11187_s1 + $0x784] ss:$16 sps:$4 sm:$0xff]   ;;  %v7750_v56 = vld [vmem:[%s11187_s1 + $0x78c] ss:$16 sps:$4 sm:$0xff]  }
  0xb4   :  { %5014 = vmatprep.subr.bf16.mxu0 %v7654_v57  ;;  %5573 = vmatprep.subr.bf16.mxu1 %v7657_v58  ;;  %v7745_v57 = vld [vmem:[%s11187_s1 + $0x780] ss:$16 sps:$4 sm:$0xff]   ;;  %v7748_v58 = vld [vmem:[%s11187_s1 + $0x788] ss:$16 sps:$4 sm:$0xff]  }
  0xb7   :  { %5015 = vmatpush1.bf16.msra.mxu0 %v7652_v59  ;;  %5574 = vmatpush1.bf16.msra.mxu1 %v7655_v60  ;;  %v7753_v59 = vld [vmem:[%s11187_s1 + $0x7a4] ss:$16 sps:$4 sm:$0xff]   ;;  %v7756_v60 = vld [vmem:[%s11187_s1 + $0x7ac] ss:$16 sps:$4 sm:$0xff]  }
  0xb8   :  { %5016 = vmatprep.subr.bf16.mxu0 %v7660_v61  ;;  %5575 = vmatprep.subr.bf16.mxu1 %v7663_v62  ;;  %v7751_v61 = vld [vmem:[%s11187_s1 + $0x7a0] ss:$16 sps:$4 sm:$0xff]   ;;  %v7754_v62 = vld [vmem:[%s11187_s1 + $0x7a8] ss:$16 sps:$4 sm:$0xff]  }
  0xbb   :  { %5017 = vmatpush1.bf16.msra.mxu0 %v7658_v63  ;;  %5576 = vmatpush1.bf16.msra.mxu1 %v7661_v0  ;;  %v7759_v63 = vld [vmem:[%s11187_s1 + $0x7c4] ss:$16 sps:$4 sm:$0xff]   ;;  %v7762_v0 = vld [vmem:[%s11187_s1 + $0x7cc] ss:$16 sps:$4 sm:$0xff]  }
  0xbc   :  { %5018 = vmatprep.subr.bf16.mxu0 %v7666_v1  ;;  %5577 = vmatprep.subr.bf16.mxu1 %v7669_v2  ;;  %v7757_v1 = vld [vmem:[%s11187_s1 + $0x7c0] ss:$16 sps:$4 sm:$0xff]   ;;  %v7760_v2 = vld [vmem:[%s11187_s1 + $0x7c8] ss:$16 sps:$4 sm:$0xff]  }
  0xbf   :  { %5019 = vmatpush1.bf16.msra.mxu0 %v7664_v3  ;;  %5578 = vmatpush1.bf16.msra.mxu1 %v7667_v4  ;;  %v7765_v3 = vld [vmem:[%s11187_s1 + $0x7e4] ss:$16 sps:$4 sm:$0xff]   ;;  %v7768_v4 = vld [vmem:[%s11187_s1 + $0x7ec] ss:$16 sps:$4 sm:$0xff]  }
  0xc0   :  { %5031 = vmatprep.subr.bf16.mxu0 %v7675_v5  ;;  %5590 = vmatprep.subr.bf16.mxu1 %v7678_v6  ;;  %v7763_v5 = vld [vmem:[%s11187_s1 + $0x7e0] ss:$16 sps:$4 sm:$0xff]   ;;  %v7766_v6 = vld [vmem:[%s11187_s1 + $0x7e8] ss:$16 sps:$4 sm:$0xff]  }
  0xc2   :  { %5021 = vmatmul.mubr.bf16.vlgmr.msra.gmra.mrb[0].mxu0 %v7670_v7  ;;  %5580 = vmatmul.mubr.bf16.vlgmr.msra.gmra.mrb[0].mxu1 %v7670_v7  ;;  %v7774_v7 = vld [vmem:[%s11187_s1 + $0x804] ss:$16 sps:$4 sm:$0xff]  }
  0xc3   :  { %5032 = vmatpush1.bf16.msra.mxu0 %v7673_v8  ;;  %5591 = vmatpush1.bf16.msra.mxu1 %v7676_v9  ;;  %v7777_v8 = vld [vmem:[%s11187_s1 + $0x80c] ss:$16 sps:$4 sm:$0xff]  }
  0xc4   :  { %5033 = vmatprep.subr.bf16.mxu0 %v7681_v10  ;;  %5592 = vmatprep.subr.bf16.mxu1 %v7684_v11  ;;  %v7769_v9 = vld [vmem:[%s11188_s0 + $0x18] ss:$100 sps:$4 sm:$0xff]   ;;  %v7772_v10 = vld [vmem:[%s11187_s1 + $0x800] ss:$16 sps:$4 sm:$0xff]  }
  0xc5   :  { %5063 = vmatprep.mubr.bf16.mxu0 %v7771_v12  ;;  %5622 = vmatprep.mubr.bf16.mxu1 %v7771_v12  ;;  %v7775_v11 = vld [vmem:[%s11187_s1 + $0x808] ss:$16 sps:$4 sm:$0xff]   ;;  %v7780_v12 = vld [vmem:[%s11187_s1 + $0x824] ss:$16 sps:$4 sm:$0xff]  }
  0xc7   :  { %5034 = vmatpush1.bf16.msra.mxu0 %v7679_v13  ;;  %5593 = vmatpush1.bf16.msra.mxu1 %v7682_v14  ;;  %v7783_v13 = vld [vmem:[%s11187_s1 + $0x82c] ss:$16 sps:$4 sm:$0xff]   ;;  %v7870_v14 = vld [vmem:[%s11188_s0 + $0x24] ss:$100 sps:$4 sm:$0xff]  }
  0xc8   :  { %5035 = vmatprep.subr.bf16.mxu0 %v7687_v15  ;;  %5594 = vmatprep.subr.bf16.mxu1 %v7690_v16  ;;  %v7778_v15 = vld [vmem:[%s11187_s1 + $0x820] ss:$16 sps:$4 sm:$0xff]   ;;  %v7781_v16 = vld [vmem:[%s11187_s1 + $0x828] ss:$16 sps:$4 sm:$0xff]  }
  0xcb   :  { %5036 = vmatpush1.bf16.msra.mxu0 %v7685_v17  ;;  %5595 = vmatpush1.bf16.msra.mxu1 %v7688_v18  ;;  %v7786_v17 = vld [vmem:[%s11187_s1 + $0x844] ss:$16 sps:$4 sm:$0xff]   ;;  %v7789_v18 = vld [vmem:[%s11187_s1 + $0x84c] ss:$16 sps:$4 sm:$0xff]  }
  0xcc   :  { %5037 = vmatprep.subr.bf16.mxu0 %v7693_v19  ;;  %5596 = vmatprep.subr.bf16.mxu1 %v7696_v20  ;;  %v7784_v19 = vld [vmem:[%s11187_s1 + $0x840] ss:$16 sps:$4 sm:$0xff]   ;;  %v7787_v20 = vld [vmem:[%s11187_s1 + $0x848] ss:$16 sps:$4 sm:$0xff]  }
  0xcf   :  { %5038 = vmatpush1.bf16.msra.mxu0 %v7691_v21  ;;  %5597 = vmatpush1.bf16.msra.mxu1 %v7694_v22  ;;  %v7792_v21 = vld [vmem:[%s11187_s1 + $0x864] ss:$16 sps:$4 sm:$0xff]   ;;  %v7795_v22 = vld [vmem:[%s11187_s1 + $0x86c] ss:$16 sps:$4 sm:$0xff]  }
  0xd0   :  { %5039 = vmatprep.subr.bf16.mxu0 %v7699_v23  ;;  %5598 = vmatprep.subr.bf16.mxu1 %v7702_v24  ;;  %v7790_v23 = vld [vmem:[%s11187_s1 + $0x860] ss:$16 sps:$4 sm:$0xff]   ;;  %v7793_v24 = vld [vmem:[%s11187_s1 + $0x868] ss:$16 sps:$4 sm:$0xff]  }
  0xd3   :  { %5040 = vmatpush1.bf16.msra.mxu0 %v7697_v25  ;;  %5599 = vmatpush1.bf16.msra.mxu1 %v7700_v26  ;;  %v7798_v25 = vld [vmem:[%s11187_s1 + $0x884] ss:$16 sps:$4 sm:$0xff]   ;;  %v7801_v26 = vld [vmem:[%s11187_s1 + $0x88c] ss:$16 sps:$4 sm:$0xff]  }
  0xd4   :  { %5041 = vmatprep.subr.bf16.mxu0 %v7705_v27  ;;  %5600 = vmatprep.subr.bf16.mxu1 %v7708_v28  ;;  %v7796_v27 = vld [vmem:[%s11187_s1 + $0x880] ss:$16 sps:$4 sm:$0xff]   ;;  %v7799_v28 = vld [vmem:[%s11187_s1 + $0x888] ss:$16 sps:$4 sm:$0xff]  }
  0xd7   :  { %5042 = vmatpush1.bf16.msra.mxu0 %v7703_v29  ;;  %5601 = vmatpush1.bf16.msra.mxu1 %v7706_v30  ;;  %v7804_v29 = vld [vmem:[%s11187_s1 + $0x8a4] ss:$16 sps:$4 sm:$0xff]   ;;  %v7807_v30 = vld [vmem:[%s11187_s1 + $0x8ac] ss:$16 sps:$4 sm:$0xff]  }
  0xd8   :  { %5043 = vmatprep.subr.bf16.mxu0 %v7711_v31  ;;  %5602 = vmatprep.subr.bf16.mxu1 %v7714_v32  ;;  %v7802_v31 = vld [vmem:[%s11187_s1 + $0x8a0] ss:$16 sps:$4 sm:$0xff]   ;;  %v7805_v32 = vld [vmem:[%s11187_s1 + $0x8a8] ss:$16 sps:$4 sm:$0xff]  }
  0xdb   :  { %5044 = vmatpush1.bf16.msra.mxu0 %v7709_v33  ;;  %5603 = vmatpush1.bf16.msra.mxu1 %v7712_v34  ;;  %v7810_v33 = vld [vmem:[%s11187_s1 + $0x8c4] ss:$16 sps:$4 sm:$0xff]   ;;  %v7813_v34 = vld [vmem:[%s11187_s1 + $0x8cc] ss:$16 sps:$4 sm:$0xff]  }
  0xdc   :  { %5045 = vmatprep.subr.bf16.mxu0 %v7717_v35  ;;  %5604 = vmatprep.subr.bf16.mxu1 %v7720_v36  ;;  %v7808_v35 = vld [vmem:[%s11187_s1 + $0x8c0] ss:$16 sps:$4 sm:$0xff]   ;;  %v7811_v36 = vld [vmem:[%s11187_s1 + $0x8c8] ss:$16 sps:$4 sm:$0xff]  }
  0xdf   :  { %5046 = vmatpush1.bf16.msra.mxu0 %v7715_v37  ;;  %5605 = vmatpush1.bf16.msra.mxu1 %v7718_v38  ;;  %v7816_v37 = vld [vmem:[%s11187_s1 + $0x8e4] ss:$16 sps:$4 sm:$0xff]   ;;  %v7819_v38 = vld [vmem:[%s11187_s1 + $0x8ec] ss:$16 sps:$4 sm:$0xff]  }
  0xe0   :  { %5047 = vmatprep.subr.bf16.mxu0 %v7723_v39  ;;  %5606 = vmatprep.subr.bf16.mxu1 %v7726_v40  ;;  %v7814_v39 = vld [vmem:[%s11187_s1 + $0x8e0] ss:$16 sps:$4 sm:$0xff]   ;;  %v7817_v40 = vld [vmem:[%s11187_s1 + $0x8e8] ss:$16 sps:$4 sm:$0xff]  }
  0xe3   :  { %5048 = vmatpush1.bf16.msra.mxu0 %v7721_v41  ;;  %5607 = vmatpush1.bf16.msra.mxu1 %v7724_v42  ;;  %v7822_v41 = vld [vmem:[%s11187_s1 + $0x904] ss:$16 sps:$4 sm:$0xff]   ;;  %v7825_v42 = vld [vmem:[%s11187_s1 + $0x90c] ss:$16 sps:$4 sm:$0xff]  }
  0xe4   :  { %5049 = vmatprep.subr.bf16.mxu0 %v7729_v43  ;;  %5608 = vmatprep.subr.bf16.mxu1 %v7732_v44  ;;  %v7820_v43 = vld [vmem:[%s11187_s1 + $0x900] ss:$16 sps:$4 sm:$0xff]   ;;  %v7823_v44 = vld [vmem:[%s11187_s1 + $0x908] ss:$16 sps:$4 sm:$0xff]  }
  0xe7   :  { %5050 = vmatpush1.bf16.msra.mxu0 %v7727_v45  ;;  %5609 = vmatpush1.bf16.msra.mxu1 %v7730_v46  ;;  %v7828_v45 = vld [vmem:[%s11187_s1 + $0x924] ss:$16 sps:$4 sm:$0xff]   ;;  %v7831_v46 = vld [vmem:[%s11187_s1 + $0x92c] ss:$16 sps:$4 sm:$0xff]  }
  0xe8   :  { %5051 = vmatprep.subr.bf16.mxu0 %v7735_v47  ;;  %5610 = vmatprep.subr.bf16.mxu1 %v7738_v48  ;;  %v7826_v47 = vld [vmem:[%s11187_s1 + $0x920] ss:$16 sps:$4 sm:$0xff]   ;;  %v7829_v48 = vld [vmem:[%s11187_s1 + $0x928] ss:$16 sps:$4 sm:$0xff]  }
  0xeb   :  { %5052 = vmatpush1.bf16.msra.mxu0 %v7733_v49  ;;  %5611 = vmatpush1.bf16.msra.mxu1 %v7736_v50  ;;  %v7834_v49 = vld [vmem:[%s11187_s1 + $0x944] ss:$16 sps:$4 sm:$0xff]   ;;  %v7837_v50 = vld [vmem:[%s11187_s1 + $0x94c] ss:$16 sps:$4 sm:$0xff]  }
  0xec   :  { %5053 = vmatprep.subr.bf16.mxu0 %v7741_v51  ;;  %5612 = vmatprep.subr.bf16.mxu1 %v7744_v52  ;;  %v7832_v51 = vld [vmem:[%s11187_s1 + $0x940] ss:$16 sps:$4 sm:$0xff]   ;;  %v7835_v52 = vld [vmem:[%s11187_s1 + $0x948] ss:$16 sps:$4 sm:$0xff]  }
  0xef   :  { %5054 = vmatpush1.bf16.msra.mxu0 %v7739_v53  ;;  %5613 = vmatpush1.bf16.msra.mxu1 %v7742_v54  ;;  %v7840_v53 = vld [vmem:[%s11187_s1 + $0x964] ss:$16 sps:$4 sm:$0xff]   ;;  %v7843_v54 = vld [vmem:[%s11187_s1 + $0x96c] ss:$16 sps:$4 sm:$0xff]  }
  0xf0   :  { %5055 = vmatprep.subr.bf16.mxu0 %v7747_v55  ;;  %5614 = vmatprep.subr.bf16.mxu1 %v7750_v56  ;;  %v7838_v55 = vld [vmem:[%s11187_s1 + $0x960] ss:$16 sps:$4 sm:$0xff]   ;;  %v7841_v56 = vld [vmem:[%s11187_s1 + $0x968] ss:$16 sps:$4 sm:$0xff]  }
  0xf3   :  { %5056 = vmatpush1.bf16.msra.mxu0 %v7745_v57  ;;  %5615 = vmatpush1.bf16.msra.mxu1 %v7748_v58  ;;  %v7846_v57 = vld [vmem:[%s11187_s1 + $0x984] ss:$16 sps:$4 sm:$0xff]   ;;  %v7849_v58 = vld [vmem:[%s11187_s1 + $0x98c] ss:$16 sps:$4 sm:$0xff]  }
  0xf4   :  { %5057 = vmatprep.subr.bf16.mxu0 %v7753_v59  ;;  %5616 = vmatprep.subr.bf16.mxu1 %v7756_v60  ;;  %v7844_v59 = vld [vmem:[%s11187_s1 + $0x980] ss:$16 sps:$4 sm:$0xff]   ;;  %v7847_v60 = vld [vmem:[%s11187_s1 + $0x988] ss:$16 sps:$4 sm:$0xff]  }
  0xf7   :  { %5058 = vmatpush1.bf16.msra.mxu0 %v7751_v61  ;;  %5617 = vmatpush1.bf16.msra.mxu1 %v7754_v62  ;;  %v7852_v61 = vld [vmem:[%s11187_s1 + $0x9a4] ss:$16 sps:$4 sm:$0xff]   ;;  %v7855_v62 = vld [vmem:[%s11187_s1 + $0x9ac] ss:$16 sps:$4 sm:$0xff]  }
  0xf8   :  { %5059 = vmatprep.subr.bf16.mxu0 %v7759_v63  ;;  %5618 = vmatprep.subr.bf16.mxu1 %v7762_v0  ;;  %v7850_v63 = vld [vmem:[%s11187_s1 + $0x9a0] ss:$16 sps:$4 sm:$0xff]   ;;  %v7853_v0 = vld [vmem:[%s11187_s1 + $0x9a8] ss:$16 sps:$4 sm:$0xff]  }
  0xfb   :  { %5060 = vmatpush1.bf16.msra.mxu0 %v7757_v1  ;;  %5619 = vmatpush1.bf16.msra.mxu1 %v7760_v2  ;;  %v7858_v1 = vld [vmem:[%s11187_s1 + $0x9c4] ss:$16 sps:$4 sm:$0xff]   ;;  %v7861_v2 = vld [vmem:[%s11187_s1 + $0x9cc] ss:$16 sps:$4 sm:$0xff]  }
  0xfc   :  { %5061 = vmatprep.subr.bf16.mxu0 %v7765_v3  ;;  %5620 = vmatprep.subr.bf16.mxu1 %v7768_v4  ;;  %v7856_v3 = vld [vmem:[%s11187_s1 + $0x9c0] ss:$16 sps:$4 sm:$0xff]   ;;  %v7859_v4 = vld [vmem:[%s11187_s1 + $0x9c8] ss:$16 sps:$4 sm:$0xff]  }
  0xff   :  { %5062 = vmatpush1.bf16.msra.mxu0 %v7763_v5  ;;  %5621 = vmatpush1.bf16.msra.mxu1 %v7766_v6  ;;  %v7864_v5 = vld [vmem:[%s11187_s1 + $0x9e4] ss:$16 sps:$4 sm:$0xff]   ;;  %v7867_v6 = vld [vmem:[%s11187_s1 + $0x9ec] ss:$16 sps:$4 sm:$0xff]  }
 0x100   :  { %5074 = vmatprep.subr.bf16.mxu0 %v7774_v7  ;;  %5633 = vmatprep.subr.bf16.mxu1 %v7777_v8  ;;  %v7862_v7 = vld [vmem:[%s11187_s1 + $0x9e0] ss:$16 sps:$4 sm:$0xff]   ;;  %v7865_v8 = vld [vmem:[%s11187_s1 + $0x9e8] ss:$16 sps:$4 sm:$0xff]  }
 0x102   :  { %5064 = vmatmul.mubr.bf16.vlgmr.msra.gmra.mrb[0].mxu0 %v7769_v9  ;;  %5623 = vmatmul.mubr.bf16.vlgmr.msra.gmra.mrb[0].mxu1 %v7769_v9  ;;  %v7868_v9 = vld [vmem:[%s11188_s0 + $0x20] ss:$100 sps:$4 sm:$0xff]  }
 0x103   :  { %5075 = vmatpush1.bf16.msra.mxu0 %v7772_v10  ;;  %5634 = vmatpush1.bf16.msra.mxu1 %v7775_v11  ;;  %v7873_v10 = vld [vmem:[%s11187_s1 + $0xa04] ss:$16 sps:$4 sm:$0xff]   ;;  %v7876_v11 = vld [vmem:[%s11187_s1 + $0xa0c] ss:$16 sps:$4 sm:$0xff]  }
 0x104   :  { %5076 = vmatprep.subr.bf16.mxu0 %v7780_v12  ;;  %5635 = vmatprep.subr.bf16.mxu1 %v7783_v13  ;;  %v7871_v12 = vld [vmem:[%s11187_s1 + $0xa00] ss:$16 sps:$4 sm:$0xff]   ;;  %v7874_v13 = vld [vmem:[%s11187_s1 + $0xa08] ss:$16 sps:$4 sm:$0xff]  }
 0x105   :  { %5106 = vmatprep.mubr.bf16.mxu0 %v7870_v14  ;;  %5665 = vmatprep.mubr.bf16.mxu1 %v7870_v14  ;;  %v7879_v14 = vld [vmem:[%s11187_s1 + $0xa24] ss:$16 sps:$4 sm:$0xff]  }
 0x107   :  { %5077 = vmatpush1.bf16.msra.mxu0 %v7778_v15  ;;  %5636 = vmatpush1.bf16.msra.mxu1 %v7781_v16  ;;  %v7882_v15 = vld [vmem:[%s11187_s1 + $0xa2c] ss:$16 sps:$4 sm:$0xff]  }
 0x108   :  { %5078 = vmatprep.subr.bf16.mxu0 %v7786_v17  ;;  %5637 = vmatprep.subr.bf16.mxu1 %v7789_v18  ;;  %v7969_v16 = vld [vmem:[%s11188_s0 + $0x2c] ss:$100 sps:$4 sm:$0xff]   ;;  %v7880_v18 = vld [vmem:[%s11187_s1 + $0xa28] ss:$16 sps:$4 sm:$0xff]  }
 0x109   :  { %v7877_v17 = vld [vmem:[%s11187_s1 + $0xa20] ss:$16 sps:$4 sm:$0xff]  }
 0x10b   :  { %5079 = vmatpush1.bf16.msra.mxu0 %v7784_v19  ;;  %5638 = vmatpush1.bf16.msra.mxu1 %v7787_v20  ;;  %v7885_v19 = vld [vmem:[%s11187_s1 + $0xa44] ss:$16 sps:$4 sm:$0xff]   ;;  %v7888_v20 = vld [vmem:[%s11187_s1 + $0xa4c] ss:$16 sps:$4 sm:$0xff]  }
 0x10c   :  { %5080 = vmatprep.subr.bf16.mxu0 %v7792_v21  ;;  %5639 = vmatprep.subr.bf16.mxu1 %v7795_v22  ;;  %v7883_v21 = vld [vmem:[%s11187_s1 + $0xa40] ss:$16 sps:$4 sm:$0xff]   ;;  %v7886_v22 = vld [vmem:[%s11187_s1 + $0xa48] ss:$16 sps:$4 sm:$0xff]  }
 0x10f   :  { %5081 = vmatpush1.bf16.msra.mxu0 %v7790_v23  ;;  %5640 = vmatpush1.bf16.msra.mxu1 %v7793_v24  ;;  %v7891_v23 = vld [vmem:[%s11187_s1 + $0xa64] ss:$16 sps:$4 sm:$0xff]   ;;  %v7894_v24 = vld [vmem:[%s11187_s1 + $0xa6c] ss:$16 sps:$4 sm:$0xff]  }
 0x110   :  { %5082 = vmatprep.subr.bf16.mxu0 %v7798_v25  ;;  %5641 = vmatprep.subr.bf16.mxu1 %v7801_v26  ;;  %v7889_v25 = vld [vmem:[%s11187_s1 + $0xa60] ss:$16 sps:$4 sm:$0xff]   ;;  %v7892_v26 = vld [vmem:[%s11187_s1 + $0xa68] ss:$16 sps:$4 sm:$0xff]  }
 0x113   :  { %5083 = vmatpush1.bf16.msra.mxu0 %v7796_v27  ;;  %5642 = vmatpush1.bf16.msra.mxu1 %v7799_v28  ;;  %v7897_v27 = vld [vmem:[%s11187_s1 + $0xa84] ss:$16 sps:$4 sm:$0xff]   ;;  %v7900_v28 = vld [vmem:[%s11187_s1 + $0xa8c] ss:$16 sps:$4 sm:$0xff]  }
 0x114   :  { %5084 = vmatprep.subr.bf16.mxu0 %v7804_v29  ;;  %5643 = vmatprep.subr.bf16.mxu1 %v7807_v30  ;;  %v7895_v29 = vld [vmem:[%s11187_s1 + $0xa80] ss:$16 sps:$4 sm:$0xff]   ;;  %v7898_v30 = vld [vmem:[%s11187_s1 + $0xa88] ss:$16 sps:$4 sm:$0xff]  }
 0x117   :  { %5085 = vmatpush1.bf16.msra.mxu0 %v7802_v31  ;;  %5644 = vmatpush1.bf16.msra.mxu1 %v7805_v32  ;;  %v7903_v31 = vld [vmem:[%s11187_s1 + $0xaa4] ss:$16 sps:$4 sm:$0xff]   ;;  %v7906_v32 = vld [vmem:[%s11187_s1 + $0xaac] ss:$16 sps:$4 sm:$0xff]  }
 0x118   :  { %5086 = vmatprep.subr.bf16.mxu0 %v7810_v33  ;;  %5645 = vmatprep.subr.bf16.mxu1 %v7813_v34  ;;  %v7901_v33 = vld [vmem:[%s11187_s1 + $0xaa0] ss:$16 sps:$4 sm:$0xff]   ;;  %v7904_v34 = vld [vmem:[%s11187_s1 + $0xaa8] ss:$16 sps:$4 sm:$0xff]  }
 0x11b   :  { %5087 = vmatpush1.bf16.msra.mxu0 %v7808_v35  ;;  %5646 = vmatpush1.bf16.msra.mxu1 %v7811_v36  ;;  %v7909_v35 = vld [vmem:[%s11187_s1 + $0xac4] ss:$16 sps:$4 sm:$0xff]   ;;  %v7912_v36 = vld [vmem:[%s11187_s1 + $0xacc] ss:$16 sps:$4 sm:$0xff]  }
 0x11c   :  { %5088 = vmatprep.subr.bf16.mxu0 %v7816_v37  ;;  %5647 = vmatprep.subr.bf16.mxu1 %v7819_v38  ;;  %v7907_v37 = vld [vmem:[%s11187_s1 + $0xac0] ss:$16 sps:$4 sm:$0xff]   ;;  %v7910_v38 = vld [vmem:[%s11187_s1 + $0xac8] ss:$16 sps:$4 sm:$0xff]  }
 0x11f   :  { %5089 = vmatpush1.bf16.msra.mxu0 %v7814_v39  ;;  %5648 = vmatpush1.bf16.msra.mxu1 %v7817_v40  ;;  %v7915_v39 = vld [vmem:[%s11187_s1 + $0xae4] ss:$16 sps:$4 sm:$0xff]   ;;  %v7918_v40 = vld [vmem:[%s11187_s1 + $0xaec] ss:$16 sps:$4 sm:$0xff]  }
 0x120   :  { %5090 = vmatprep.subr.bf16.mxu0 %v7822_v41  ;;  %5649 = vmatprep.subr.bf16.mxu1 %v7825_v42  ;;  %v7913_v41 = vld [vmem:[%s11187_s1 + $0xae0] ss:$16 sps:$4 sm:$0xff]   ;;  %v7916_v42 = vld [vmem:[%s11187_s1 + $0xae8] ss:$16 sps:$4 sm:$0xff]  }
 0x123   :  { %5091 = vmatpush1.bf16.msra.mxu0 %v7820_v43  ;;  %5650 = vmatpush1.bf16.msra.mxu1 %v7823_v44  ;;  %v7921_v43 = vld [vmem:[%s11187_s1 + $0xb04] ss:$16 sps:$4 sm:$0xff]   ;;  %v7924_v44 = vld [vmem:[%s11187_s1 + $0xb0c] ss:$16 sps:$4 sm:$0xff]  }
 0x124   :  { %5092 = vmatprep.subr.bf16.mxu0 %v7828_v45  ;;  %5651 = vmatprep.subr.bf16.mxu1 %v7831_v46  ;;  %v7919_v45 = vld [vmem:[%s11187_s1 + $0xb00] ss:$16 sps:$4 sm:$0xff]   ;;  %v7922_v46 = vld [vmem:[%s11187_s1 + $0xb08] ss:$16 sps:$4 sm:$0xff]  }
 0x127   :  { %5093 = vmatpush1.bf16.msra.mxu0 %v7826_v47  ;;  %5652 = vmatpush1.bf16.msra.mxu1 %v7829_v48  ;;  %v7927_v47 = vld [vmem:[%s11187_s1 + $0xb24] ss:$16 sps:$4 sm:$0xff]   ;;  %v7930_v48 = vld [vmem:[%s11187_s1 + $0xb2c] ss:$16 sps:$4 sm:$0xff]  }
 0x128   :  { %5094 = vmatprep.subr.bf16.mxu0 %v7834_v49  ;;  %5653 = vmatprep.subr.bf16.mxu1 %v7837_v50  ;;  %v7925_v49 = vld [vmem:[%s11187_s1 + $0xb20] ss:$16 sps:$4 sm:$0xff]   ;;  %v7928_v50 = vld [vmem:[%s11187_s1 + $0xb28] ss:$16 sps:$4 sm:$0xff]  }
 0x12b   :  { %5095 = vmatpush1.bf16.msra.mxu0 %v7832_v51  ;;  %5654 = vmatpush1.bf16.msra.mxu1 %v7835_v52  ;;  %v7933_v51 = vld [vmem:[%s11187_s1 + $0xb44] ss:$16 sps:$4 sm:$0xff]   ;;  %v7936_v52 = vld [vmem:[%s11187_s1 + $0xb4c] ss:$16 sps:$4 sm:$0xff]  }
 0x12c   :  { %5096 = vmatprep.subr.bf16.mxu0 %v7840_v53  ;;  %5655 = vmatprep.subr.bf16.mxu1 %v7843_v54  ;;  %v7931_v53 = vld [vmem:[%s11187_s1 + $0xb40] ss:$16 sps:$4 sm:$0xff]   ;;  %v7934_v54 = vld [vmem:[%s11187_s1 + $0xb48] ss:$16 sps:$4 sm:$0xff]  }
 0x12f   :  { %5097 = vmatpush1.bf16.msra.mxu0 %v7838_v55  ;;  %5656 = vmatpush1.bf16.msra.mxu1 %v7841_v56  ;;  %v7939_v55 = vld [vmem:[%s11187_s1 + $0xb64] ss:$16 sps:$4 sm:$0xff]   ;;  %v7942_v56 = vld [vmem:[%s11187_s1 + $0xb6c] ss:$16 sps:$4 sm:$0xff]  }
 0x130   :  { %5098 = vmatprep.subr.bf16.mxu0 %v7846_v57  ;;  %5657 = vmatprep.subr.bf16.mxu1 %v7849_v58  ;;  %v7937_v57 = vld [vmem:[%s11187_s1 + $0xb60] ss:$16 sps:$4 sm:$0xff]   ;;  %v7940_v58 = vld [vmem:[%s11187_s1 + $0xb68] ss:$16 sps:$4 sm:$0xff]  }
 0x133   :  { %5099 = vmatpush1.bf16.msra.mxu0 %v7844_v59  ;;  %5658 = vmatpush1.bf16.msra.mxu1 %v7847_v60  ;;  %v7945_v59 = vld [vmem:[%s11187_s1 + $0xb84] ss:$16 sps:$4 sm:$0xff]   ;;  %v7948_v60 = vld [vmem:[%s11187_s1 + $0xb8c] ss:$16 sps:$4 sm:$0xff]  }
 0x134   :  { %5100 = vmatprep.subr.bf16.mxu0 %v7852_v61  ;;  %5659 = vmatprep.subr.bf16.mxu1 %v7855_v62  ;;  %v7943_v61 = vld [vmem:[%s11187_s1 + $0xb80] ss:$16 sps:$4 sm:$0xff]   ;;  %v7946_v62 = vld [vmem:[%s11187_s1 + $0xb88] ss:$16 sps:$4 sm:$0xff]  }
 0x137   :  { %5101 = vmatpush1.bf16.msra.mxu0 %v7850_v63  ;;  %5660 = vmatpush1.bf16.msra.mxu1 %v7853_v0  ;;  %v7951_v63 = vld [vmem:[%s11187_s1 + $0xba4] ss:$16 sps:$4 sm:$0xff]   ;;  %v7954_v0 = vld [vmem:[%s11187_s1 + $0xbac] ss:$16 sps:$4 sm:$0xff]  }
 0x138   :  { %5102 = vmatprep.subr.bf16.mxu0 %v7858_v1  ;;  %5661 = vmatprep.subr.bf16.mxu1 %v7861_v2  ;;  %v7949_v1 = vld [vmem:[%s11187_s1 + $0xba0] ss:$16 sps:$4 sm:$0xff]   ;;  %v7952_v2 = vld [vmem:[%s11187_s1 + $0xba8] ss:$16 sps:$4 sm:$0xff]  }
 0x13b   :  { %5103 = vmatpush1.bf16.msra.mxu0 %v7856_v3  ;;  %5662 = vmatpush1.bf16.msra.mxu1 %v7859_v4  ;;  %v7957_v3 = vld [vmem:[%s11187_s1 + $0xbc4] ss:$16 sps:$4 sm:$0xff]   ;;  %v7960_v4 = vld [vmem:[%s11187_s1 + $0xbcc] ss:$16 sps:$4 sm:$0xff]  }
 0x13c   :  { %5104 = vmatprep.subr.bf16.mxu0 %v7864_v5  ;;  %5663 = vmatprep.subr.bf16.mxu1 %v7867_v6  ;;  %v7955_v5 = vld [vmem:[%s11187_s1 + $0xbc0] ss:$16 sps:$4 sm:$0xff]   ;;  %v7958_v6 = vld [vmem:[%s11187_s1 + $0xbc8] ss:$16 sps:$4 sm:$0xff]  }
 0x13f   :  { %5105 = vmatpush1.bf16.msra.mxu0 %v7862_v7  ;;  %5664 = vmatpush1.bf16.msra.mxu1 %v7865_v8  ;;  %v7963_v7 = vld [vmem:[%s11187_s1 + $0xbe4] ss:$16 sps:$4 sm:$0xff]   ;;  %v7966_v8 = vld [vmem:[%s11187_s1 + $0xbec] ss:$16 sps:$4 sm:$0xff]  }
 0x140   :  { %5117 = vmatprep.subr.bf16.mxu0 %v7873_v10  ;;  %5676 = vmatprep.subr.bf16.mxu1 %v7876_v11  ;;  %v7964_v10 = vld [vmem:[%s11187_s1 + $0xbe8] ss:$16 sps:$4 sm:$0xff]  }
 0x141   :  { %v7967_v11 = vld [vmem:[%s11188_s0 + $0x28] ss:$100 sps:$4 sm:$0xff]  }
 0x142   :  { %5107 = vmatmul.mubr.bf16.vlgmr.msra.gmra.mrb[0].mxu0 %v7868_v9  ;;  %5666 = vmatmul.mubr.bf16.vlgmr.msra.gmra.mrb[0].mxu1 %v7868_v9  ;;  %v7961_v9 = vld [vmem:[%s11187_s1 + $0xbe0] ss:$16 sps:$4 sm:$0xff]  }
 0x143   :  { %5118 = vmatpush1.bf16.msra.mxu0 %v7871_v12  ;;  %5677 = vmatpush1.bf16.msra.mxu1 %v7874_v13  ;;  %v7972_v12 = vld [vmem:[%s11187_s1 + $0xc04] ss:$16 sps:$4 sm:$0xff]   ;;  %v7975_v13 = vld [vmem:[%s11187_s1 + $0xc0c] ss:$16 sps:$4 sm:$0xff]  }
 0x144   :  { %5119 = vmatprep.subr.bf16.mxu0 %v7879_v14  ;;  %5678 = vmatprep.subr.bf16.mxu1 %v7882_v15  ;;  %v7970_v14 = vld [vmem:[%s11187_s1 + $0xc00] ss:$16 sps:$4 sm:$0xff]   ;;  %v7973_v15 = vld [vmem:[%s11187_s1 + $0xc08] ss:$16 sps:$4 sm:$0xff]  }
 0x145   :  { %5149 = vmatprep.mubr.bf16.mxu0 %v7969_v16  ;;  %5708 = vmatprep.mubr.bf16.mxu1 %v7969_v16  ;;  %v7978_v16 = vld [vmem:[%s11187_s1 + $0xc24] ss:$16 sps:$4 sm:$0xff]  }
 0x147   :  { %5120 = vmatpush1.bf16.msra.mxu0 %v7877_v17  ;;  %5679 = vmatpush1.bf16.msra.mxu1 %v7880_v18  ;;  %v7981_v17 = vld [vmem:[%s11187_s1 + $0xc2c] ss:$16 sps:$4 sm:$0xff]   ;;  %v8068_v18 = vld [vmem:[%s11188_s0 + $0x34] ss:$100 sps:$4 sm:$0xff]  }
 0x148   :  { %5121 = vmatprep.subr.bf16.mxu0 %v7885_v19  ;;  %5680 = vmatprep.subr.bf16.mxu1 %v7888_v20  ;;  %v7976_v19 = vld [vmem:[%s11187_s1 + $0xc20] ss:$16 sps:$4 sm:$0xff]   ;;  %v7979_v20 = vld [vmem:[%s11187_s1 + $0xc28] ss:$16 sps:$4 sm:$0xff]  }
 0x14b   :  { %5122 = vmatpush1.bf16.msra.mxu0 %v7883_v21  ;;  %5681 = vmatpush1.bf16.msra.mxu1 %v7886_v22  ;;  %v7984_v21 = vld [vmem:[%s11187_s1 + $0xc44] ss:$16 sps:$4 sm:$0xff]   ;;  %v7987_v22 = vld [vmem:[%s11187_s1 + $0xc4c] ss:$16 sps:$4 sm:$0xff]  }
 0x14c   :  { %5123 = vmatprep.subr.bf16.mxu0 %v7891_v23  ;;  %5682 = vmatprep.subr.bf16.mxu1 %v7894_v24  ;;  %v7982_v23 = vld [vmem:[%s11187_s1 + $0xc40] ss:$16 sps:$4 sm:$0xff]   ;;  %v7985_v24 = vld [vmem:[%s11187_s1 + $0xc48] ss:$16 sps:$4 sm:$0xff]  }
 0x14f   :  { %5124 = vmatpush1.bf16.msra.mxu0 %v7889_v25  ;;  %5683 = vmatpush1.bf16.msra.mxu1 %v7892_v26  ;;  %v7990_v25 = vld [vmem:[%s11187_s1 + $0xc64] ss:$16 sps:$4 sm:$0xff]   ;;  %v7993_v26 = vld [vmem:[%s11187_s1 + $0xc6c] ss:$16 sps:$4 sm:$0xff]  }
 0x150   :  { %5125 = vmatprep.subr.bf16.mxu0 %v7897_v27  ;;  %5684 = vmatprep.subr.bf16.mxu1 %v7900_v28  ;;  %v7988_v27 = vld [vmem:[%s11187_s1 + $0xc60] ss:$16 sps:$4 sm:$0xff]   ;;  %v7991_v28 = vld [vmem:[%s11187_s1 + $0xc68] ss:$16 sps:$4 sm:$0xff]  }
 0x153   :  { %5126 = vmatpush1.bf16.msra.mxu0 %v7895_v29  ;;  %5685 = vmatpush1.bf16.msra.mxu1 %v7898_v30  ;;  %v7996_v29 = vld [vmem:[%s11187_s1 + $0xc84] ss:$16 sps:$4 sm:$0xff]   ;;  %v7999_v30 = vld [vmem:[%s11187_s1 + $0xc8c] ss:$16 sps:$4 sm:$0xff]  }
 0x154   :  { %5127 = vmatprep.subr.bf16.mxu0 %v7903_v31  ;;  %5686 = vmatprep.subr.bf16.mxu1 %v7906_v32  ;;  %v7994_v31 = vld [vmem:[%s11187_s1 + $0xc80] ss:$16 sps:$4 sm:$0xff]   ;;  %v7997_v32 = vld [vmem:[%s11187_s1 + $0xc88] ss:$16 sps:$4 sm:$0xff]  }
 0x157   :  { %5128 = vmatpush1.bf16.msra.mxu0 %v7901_v33  ;;  %5687 = vmatpush1.bf16.msra.mxu1 %v7904_v34  ;;  %v8002_v33 = vld [vmem:[%s11187_s1 + $0xca4] ss:$16 sps:$4 sm:$0xff]   ;;  %v8005_v34 = vld [vmem:[%s11187_s1 + $0xcac] ss:$16 sps:$4 sm:$0xff]  }
 0x158   :  { %5129 = vmatprep.subr.bf16.mxu0 %v7909_v35  ;;  %5688 = vmatprep.subr.bf16.mxu1 %v7912_v36  ;;  %v8000_v35 = vld [vmem:[%s11187_s1 + $0xca0] ss:$16 sps:$4 sm:$0xff]   ;;  %v8003_v36 = vld [vmem:[%s11187_s1 + $0xca8] ss:$16 sps:$4 sm:$0xff]  }
 0x15b   :  { %5130 = vmatpush1.bf16.msra.mxu0 %v7907_v37  ;;  %5689 = vmatpush1.bf16.msra.mxu1 %v7910_v38  ;;  %v8008_v37 = vld [vmem:[%s11187_s1 + $0xcc4] ss:$16 sps:$4 sm:$0xff]   ;;  %v8011_v38 = vld [vmem:[%s11187_s1 + $0xccc] ss:$16 sps:$4 sm:$0xff]  }
 0x15c   :  { %5131 = vmatprep.subr.bf16.mxu0 %v7915_v39  ;;  %5690 = vmatprep.subr.bf16.mxu1 %v7918_v40  ;;  %v8006_v39 = vld [vmem:[%s11187_s1 + $0xcc0] ss:$16 sps:$4 sm:$0xff]   ;;  %v8009_v40 = vld [vmem:[%s11187_s1 + $0xcc8] ss:$16 sps:$4 sm:$0xff]  }
 0x15f   :  { %5132 = vmatpush1.bf16.msra.mxu0 %v7913_v41  ;;  %5691 = vmatpush1.bf16.msra.mxu1 %v7916_v42  ;;  %v8014_v41 = vld [vmem:[%s11187_s1 + $0xce4] ss:$16 sps:$4 sm:$0xff]   ;;  %v8017_v42 = vld [vmem:[%s11187_s1 + $0xcec] ss:$16 sps:$4 sm:$0xff]  }
 0x160   :  { %5133 = vmatprep.subr.bf16.mxu0 %v7921_v43  ;;  %5692 = vmatprep.subr.bf16.mxu1 %v7924_v44  ;;  %v8012_v43 = vld [vmem:[%s11187_s1 + $0xce0] ss:$16 sps:$4 sm:$0xff]   ;;  %v8015_v44 = vld [vmem:[%s11187_s1 + $0xce8] ss:$16 sps:$4 sm:$0xff]  }
 0x163   :  { %5134 = vmatpush1.bf16.msra.mxu0 %v7919_v45  ;;  %5693 = vmatpush1.bf16.msra.mxu1 %v7922_v46  ;;  %v8020_v45 = vld [vmem:[%s11187_s1 + $0xd04] ss:$16 sps:$4 sm:$0xff]   ;;  %v8023_v46 = vld [vmem:[%s11187_s1 + $0xd0c] ss:$16 sps:$4 sm:$0xff]  }
 0x164   :  { %5135 = vmatprep.subr.bf16.mxu0 %v7927_v47  ;;  %5694 = vmatprep.subr.bf16.mxu1 %v7930_v48  ;;  %v8018_v47 = vld [vmem:[%s11187_s1 + $0xd00] ss:$16 sps:$4 sm:$0xff]   ;;  %v8021_v48 = vld [vmem:[%s11187_s1 + $0xd08] ss:$16 sps:$4 sm:$0xff]  }
 0x167   :  { %5136 = vmatpush1.bf16.msra.mxu0 %v7925_v49  ;;  %5695 = vmatpush1.bf16.msra.mxu1 %v7928_v50  ;;  %v8026_v49 = vld [vmem:[%s11187_s1 + $0xd24] ss:$16 sps:$4 sm:$0xff]   ;;  %v8029_v50 = vld [vmem:[%s11187_s1 + $0xd2c] ss:$16 sps:$4 sm:$0xff]  }
 0x168   :  { %5137 = vmatprep.subr.bf16.mxu0 %v7933_v51  ;;  %5696 = vmatprep.subr.bf16.mxu1 %v7936_v52  ;;  %v8024_v51 = vld [vmem:[%s11187_s1 + $0xd20] ss:$16 sps:$4 sm:$0xff]   ;;  %v8027_v52 = vld [vmem:[%s11187_s1 + $0xd28] ss:$16 sps:$4 sm:$0xff]  }
 0x16b   :  { %5138 = vmatpush1.bf16.msra.mxu0 %v7931_v53  ;;  %5697 = vmatpush1.bf16.msra.mxu1 %v7934_v54  ;;  %v8032_v53 = vld [vmem:[%s11187_s1 + $0xd44] ss:$16 sps:$4 sm:$0xff]   ;;  %v8035_v54 = vld [vmem:[%s11187_s1 + $0xd4c] ss:$16 sps:$4 sm:$0xff]  }
 0x16c   :  { %5139 = vmatprep.subr.bf16.mxu0 %v7939_v55  ;;  %5698 = vmatprep.subr.bf16.mxu1 %v7942_v56  ;;  %v8030_v55 = vld [vmem:[%s11187_s1 + $0xd40] ss:$16 sps:$4 sm:$0xff]   ;;  %v8033_v56 = vld [vmem:[%s11187_s1 + $0xd48] ss:$16 sps:$4 sm:$0xff]  }
 0x16f   :  { %5140 = vmatpush1.bf16.msra.mxu0 %v7937_v57  ;;  %5699 = vmatpush1.bf16.msra.mxu1 %v7940_v58  ;;  %v8038_v57 = vld [vmem:[%s11187_s1 + $0xd64] ss:$16 sps:$4 sm:$0xff]   ;;  %v8041_v58 = vld [vmem:[%s11187_s1 + $0xd6c] ss:$16 sps:$4 sm:$0xff]  }
 0x170   :  { %5141 = vmatprep.subr.bf16.mxu0 %v7945_v59  ;;  %5700 = vmatprep.subr.bf16.mxu1 %v7948_v60  ;;  %v8036_v59 = vld [vmem:[%s11187_s1 + $0xd60] ss:$16 sps:$4 sm:$0xff]   ;;  %v8039_v60 = vld [vmem:[%s11187_s1 + $0xd68] ss:$16 sps:$4 sm:$0xff]  }
 0x173   :  { %5142 = vmatpush1.bf16.msra.mxu0 %v7943_v61  ;;  %5701 = vmatpush1.bf16.msra.mxu1 %v7946_v62  ;;  %v8044_v61 = vld [vmem:[%s11187_s1 + $0xd84] ss:$16 sps:$4 sm:$0xff]   ;;  %v8047_v62 = vld [vmem:[%s11187_s1 + $0xd8c] ss:$16 sps:$4 sm:$0xff]  }
 0x174   :  { %5143 = vmatprep.subr.bf16.mxu0 %v7951_v63  ;;  %5702 = vmatprep.subr.bf16.mxu1 %v7954_v0  ;;  %v8042_v63 = vld [vmem:[%s11187_s1 + $0xd80] ss:$16 sps:$4 sm:$0xff]   ;;  %v8045_v0 = vld [vmem:[%s11187_s1 + $0xd88] ss:$16 sps:$4 sm:$0xff]  }
 0x177   :  { %5144 = vmatpush1.bf16.msra.mxu0 %v7949_v1  ;;  %5703 = vmatpush1.bf16.msra.mxu1 %v7952_v2  ;;  %v8050_v1 = vld [vmem:[%s11187_s1 + $0xda4] ss:$16 sps:$4 sm:$0xff]   ;;  %v8053_v2 = vld [vmem:[%s11187_s1 + $0xdac] ss:$16 sps:$4 sm:$0xff]  }
 0x178   :  { %5145 = vmatprep.subr.bf16.mxu0 %v7957_v3  ;;  %5704 = vmatprep.subr.bf16.mxu1 %v7960_v4  ;;  %v8048_v3 = vld [vmem:[%s11187_s1 + $0xda0] ss:$16 sps:$4 sm:$0xff]   ;;  %v8051_v4 = vld [vmem:[%s11187_s1 + $0xda8] ss:$16 sps:$4 sm:$0xff]  }
 0x17b   :  { %5146 = vmatpush1.bf16.msra.mxu0 %v7955_v5  ;;  %5705 = vmatpush1.bf16.msra.mxu1 %v7958_v6  ;;  %v8056_v5 = vld [vmem:[%s11187_s1 + $0xdc4] ss:$16 sps:$4 sm:$0xff]   ;;  %v8059_v6 = vld [vmem:[%s11187_s1 + $0xdcc] ss:$16 sps:$4 sm:$0xff]  }
 0x17c   :  { %5147 = vmatprep.subr.bf16.mxu0 %v7963_v7  ;;  %5706 = vmatprep.subr.bf16.mxu1 %v7966_v8  ;;  %v8054_v7 = vld [vmem:[%s11187_s1 + $0xdc0] ss:$16 sps:$4 sm:$0xff]   ;;  %v8057_v8 = vld [vmem:[%s11187_s1 + $0xdc8] ss:$16 sps:$4 sm:$0xff]  }
 0x17f   :  { %5148 = vmatpush1.bf16.msra.mxu0 %v7961_v9  ;;  %5707 = vmatpush1.bf16.msra.mxu1 %v7964_v10  ;;  %v8062_v9 = vld [vmem:[%s11187_s1 + $0xde4] ss:$16 sps:$4 sm:$0xff]   ;;  %v8065_v10 = vld [vmem:[%s11187_s1 + $0xdec] ss:$16 sps:$4 sm:$0xff]  }
 0x180   :  { %5160 = vmatprep.subr.bf16.mxu0 %v7972_v12  ;;  %5719 = vmatprep.subr.bf16.mxu1 %v7975_v13  ;;  %v8063_v12 = vld [vmem:[%s11187_s1 + $0xde8] ss:$16 sps:$4 sm:$0xff]   ;;  %v8066_v13 = vld [vmem:[%s11188_s0 + $0x30] ss:$100 sps:$4 sm:$0xff]  }
 0x182   :  { %5150 = vmatmul.mubr.bf16.vlgmr.msra.gmra.mrb[0].mxu0 %v7967_v11  ;;  %5709 = vmatmul.mubr.bf16.vlgmr.msra.gmra.mrb[0].mxu1 %v7967_v11  ;;  %v8060_v11 = vld [vmem:[%s11187_s1 + $0xde0] ss:$16 sps:$4 sm:$0xff]  }
 0x183   :  { %5161 = vmatpush1.bf16.msra.mxu0 %v7970_v14  ;;  %5720 = vmatpush1.bf16.msra.mxu1 %v7973_v15  ;;  %v8071_v14 = vld [vmem:[%s11187_s1 + $0xe04] ss:$16 sps:$4 sm:$0xff]   ;;  %v8074_v15 = vld [vmem:[%s11187_s1 + $0xe0c] ss:$16 sps:$4 sm:$0xff]  }
 0x184   :  { %5162 = vmatprep.subr.bf16.mxu0 %v7978_v16  ;;  %5721 = vmatprep.subr.bf16.mxu1 %v7981_v17  ;;  %v8069_v16 = vld [vmem:[%s11187_s1 + $0xe00] ss:$16 sps:$4 sm:$0xff]   ;;  %v8072_v17 = vld [vmem:[%s11187_s1 + $0xe08] ss:$16 sps:$4 sm:$0xff]  }
 0x185   :  { %5192 = vmatprep.mubr.bf16.mxu0 %v8068_v18  ;;  %5751 = vmatprep.mubr.bf16.mxu1 %v8068_v18  ;;  %v8077_v18 = vld [vmem:[%s11187_s1 + $0xe24] ss:$16 sps:$4 sm:$0xff]  }
 0x187   :  { %5163 = vmatpush1.bf16.msra.mxu0 %v7976_v19  ;;  %5722 = vmatpush1.bf16.msra.mxu1 %v7979_v20  ;;  %v8080_v19 = vld [vmem:[%s11187_s1 + $0xe2c] ss:$16 sps:$4 sm:$0xff]  }
 0x188   :  { %5164 = vmatprep.subr.bf16.mxu0 %v7984_v21  ;;  %5723 = vmatprep.subr.bf16.mxu1 %v7987_v22  ;;  %v8167_v20 = vld [vmem:[%s11188_s0 + $0x3c] ss:$100 sps:$4 sm:$0xff]   ;;  %v8078_v22 = vld [vmem:[%s11187_s1 + $0xe28] ss:$16 sps:$4 sm:$0xff]  }
 0x189   :  { %v8075_v21 = vld [vmem:[%s11187_s1 + $0xe20] ss:$16 sps:$4 sm:$0xff]  }
 0x18b   :  { %5165 = vmatpush1.bf16.msra.mxu0 %v7982_v23  ;;  %5724 = vmatpush1.bf16.msra.mxu1 %v7985_v24  ;;  %v8083_v23 = vld [vmem:[%s11187_s1 + $0xe44] ss:$16 sps:$4 sm:$0xff]   ;;  %v8086_v24 = vld [vmem:[%s11187_s1 + $0xe4c] ss:$16 sps:$4 sm:$0xff]  }
 0x18c   :  { %5166 = vmatprep.subr.bf16.mxu0 %v7990_v25  ;;  %5725 = vmatprep.subr.bf16.mxu1 %v7993_v26  ;;  %v8081_v25 = vld [vmem:[%s11187_s1 + $0xe40] ss:$16 sps:$4 sm:$0xff]   ;;  %v8084_v26 = vld [vmem:[%s11187_s1 + $0xe48] ss:$16 sps:$4 sm:$0xff]  }
 0x18f   :  { %5167 = vmatpush1.bf16.msra.mxu0 %v7988_v27  ;;  %5726 = vmatpush1.bf16.msra.mxu1 %v7991_v28  ;;  %v8089_v27 = vld [vmem:[%s11187_s1 + $0xe64] ss:$16 sps:$4 sm:$0xff]   ;;  %v8092_v28 = vld [vmem:[%s11187_s1 + $0xe6c] ss:$16 sps:$4 sm:$0xff]  }
 0x190   :  { %5168 = vmatprep.subr.bf16.mxu0 %v7996_v29  ;;  %5727 = vmatprep.subr.bf16.mxu1 %v7999_v30  ;;  %v8087_v29 = vld [vmem:[%s11187_s1 + $0xe60] ss:$16 sps:$4 sm:$0xff]   ;;  %v8090_v30 = vld [vmem:[%s11187_s1 + $0xe68] ss:$16 sps:$4 sm:$0xff]  }
 0x193   :  { %5169 = vmatpush1.bf16.msra.mxu0 %v7994_v31  ;;  %5728 = vmatpush1.bf16.msra.mxu1 %v7997_v32  ;;  %v8095_v31 = vld [vmem:[%s11187_s1 + $0xe84] ss:$16 sps:$4 sm:$0xff]   ;;  %v8098_v32 = vld [vmem:[%s11187_s1 + $0xe8c] ss:$16 sps:$4 sm:$0xff]  }
 0x194   :  { %5170 = vmatprep.subr.bf16.mxu0 %v8002_v33  ;;  %5729 = vmatprep.subr.bf16.mxu1 %v8005_v34  ;;  %v8093_v33 = vld [vmem:[%s11187_s1 + $0xe80] ss:$16 sps:$4 sm:$0xff]   ;;  %v8096_v34 = vld [vmem:[%s11187_s1 + $0xe88] ss:$16 sps:$4 sm:$0xff]  }
 0x197   :  { %5171 = vmatpush1.bf16.msra.mxu0 %v8000_v35  ;;  %5730 = vmatpush1.bf16.msra.mxu1 %v8003_v36  ;;  %v8101_v35 = vld [vmem:[%s11187_s1 + $0xea4] ss:$16 sps:$4 sm:$0xff]   ;;  %v8104_v36 = vld [vmem:[%s11187_s1 + $0xeac] ss:$16 sps:$4 sm:$0xff]  }
 0x198   :  { %5172 = vmatprep.subr.bf16.mxu0 %v8008_v37  ;;  %5731 = vmatprep.subr.bf16.mxu1 %v8011_v38  ;;  %v8099_v37 = vld [vmem:[%s11187_s1 + $0xea0] ss:$16 sps:$4 sm:$0xff]   ;;  %v8102_v38 = vld [vmem:[%s11187_s1 + $0xea8] ss:$16 sps:$4 sm:$0xff]  }
 0x19b   :  { %5173 = vmatpush1.bf16.msra.mxu0 %v8006_v39  ;;  %5732 = vmatpush1.bf16.msra.mxu1 %v8009_v40  ;;  %v8107_v39 = vld [vmem:[%s11187_s1 + $0xec4] ss:$16 sps:$4 sm:$0xff]   ;;  %v8110_v40 = vld [vmem:[%s11187_s1 + $0xecc] ss:$16 sps:$4 sm:$0xff]  }
 0x19c   :  { %5174 = vmatprep.subr.bf16.mxu0 %v8014_v41  ;;  %5733 = vmatprep.subr.bf16.mxu1 %v8017_v42  ;;  %v8105_v41 = vld [vmem:[%s11187_s1 + $0xec0] ss:$16 sps:$4 sm:$0xff]   ;;  %v8108_v42 = vld [vmem:[%s11187_s1 + $0xec8] ss:$16 sps:$4 sm:$0xff]  }
 0x19f   :  { %5175 = vmatpush1.bf16.msra.mxu0 %v8012_v43  ;;  %5734 = vmatpush1.bf16.msra.mxu1 %v8015_v44  ;;  %v8113_v43 = vld [vmem:[%s11187_s1 + $0xee4] ss:$16 sps:$4 sm:$0xff]   ;;  %v8116_v44 = vld [vmem:[%s11187_s1 + $0xeec] ss:$16 sps:$4 sm:$0xff]  }
 0x1a0   :  { %5176 = vmatprep.subr.bf16.mxu0 %v8020_v45  ;;  %5735 = vmatprep.subr.bf16.mxu1 %v8023_v46  ;;  %v8111_v45 = vld [vmem:[%s11187_s1 + $0xee0] ss:$16 sps:$4 sm:$0xff]   ;;  %v8114_v46 = vld [vmem:[%s11187_s1 + $0xee8] ss:$16 sps:$4 sm:$0xff]  }
 0x1a3   :  { %5177 = vmatpush1.bf16.msra.mxu0 %v8018_v47  ;;  %5736 = vmatpush1.bf16.msra.mxu1 %v8021_v48  ;;  %v8119_v47 = vld [vmem:[%s11187_s1 + $0xf04] ss:$16 sps:$4 sm:$0xff]   ;;  %v8122_v48 = vld [vmem:[%s11187_s1 + $0xf0c] ss:$16 sps:$4 sm:$0xff]  }
 0x1a4   :  { %5178 = vmatprep.subr.bf16.mxu0 %v8026_v49  ;;  %5737 = vmatprep.subr.bf16.mxu1 %v8029_v50  ;;  %v8117_v49 = vld [vmem:[%s11187_s1 + $0xf00] ss:$16 sps:$4 sm:$0xff]   ;;  %v8120_v50 = vld [vmem:[%s11187_s1 + $0xf08] ss:$16 sps:$4 sm:$0xff]  }
 0x1a7   :  { %5179 = vmatpush1.bf16.msra.mxu0 %v8024_v51  ;;  %5738 = vmatpush1.bf16.msra.mxu1 %v8027_v52  ;;  %v8125_v51 = vld [vmem:[%s11187_s1 + $0xf24] ss:$16 sps:$4 sm:$0xff]   ;;  %v8128_v52 = vld [vmem:[%s11187_s1 + $0xf2c] ss:$16 sps:$4 sm:$0xff]  }
 0x1a8   :  { %5180 = vmatprep.subr.bf16.mxu0 %v8032_v53  ;;  %5739 = vmatprep.subr.bf16.mxu1 %v8035_v54  ;;  %v8123_v53 = vld [vmem:[%s11187_s1 + $0xf20] ss:$16 sps:$4 sm:$0xff]   ;;  %v8126_v54 = vld [vmem:[%s11187_s1 + $0xf28] ss:$16 sps:$4 sm:$0xff]  }
 0x1ab   :  { %5181 = vmatpush1.bf16.msra.mxu0 %v8030_v55  ;;  %5740 = vmatpush1.bf16.msra.mxu1 %v8033_v56  ;;  %v8131_v55 = vld [vmem:[%s11187_s1 + $0xf44] ss:$16 sps:$4 sm:$0xff]   ;;  %v8134_v56 = vld [vmem:[%s11187_s1 + $0xf4c] ss:$16 sps:$4 sm:$0xff]  }
 0x1ac   :  { %5182 = vmatprep.subr.bf16.mxu0 %v8038_v57  ;;  %5741 = vmatprep.subr.bf16.mxu1 %v8041_v58  ;;  %v8129_v57 = vld [vmem:[%s11187_s1 + $0xf40] ss:$16 sps:$4 sm:$0xff]   ;;  %v8132_v58 = vld [vmem:[%s11187_s1 + $0xf48] ss:$16 sps:$4 sm:$0xff]  }
 0x1af   :  { %5183 = vmatpush1.bf16.msra.mxu0 %v8036_v59  ;;  %5742 = vmatpush1.bf16.msra.mxu1 %v8039_v60  ;;  %v8137_v59 = vld [vmem:[%s11187_s1 + $0xf64] ss:$16 sps:$4 sm:$0xff]   ;;  %v8140_v60 = vld [vmem:[%s11187_s1 + $0xf6c] ss:$16 sps:$4 sm:$0xff]  }
 0x1b0   :  { %5184 = vmatprep.subr.bf16.mxu0 %v8044_v61  ;;  %5743 = vmatprep.subr.bf16.mxu1 %v8047_v62  ;;  %v8135_v61 = vld [vmem:[%s11187_s1 + $0xf60] ss:$16 sps:$4 sm:$0xff]   ;;  %v8138_v62 = vld [vmem:[%s11187_s1 + $0xf68] ss:$16 sps:$4 sm:$0xff]  }
 0x1b3   :  { %5185 = vmatpush1.bf16.msra.mxu0 %v8042_v63  ;;  %5744 = vmatpush1.bf16.msra.mxu1 %v8045_v0  ;;  %v8143_v63 = vld [vmem:[%s11187_s1 + $0xf84] ss:$16 sps:$4 sm:$0xff]   ;;  %v8146_v0 = vld [vmem:[%s11187_s1 + $0xf8c] ss:$16 sps:$4 sm:$0xff]  }
 0x1b4   :  { %5186 = vmatprep.subr.bf16.mxu0 %v8050_v1  ;;  %5745 = vmatprep.subr.bf16.mxu1 %v8053_v2  ;;  %v8141_v1 = vld [vmem:[%s11187_s1 + $0xf80] ss:$16 sps:$4 sm:$0xff]   ;;  %v8144_v2 = vld [vmem:[%s11187_s1 + $0xf88] ss:$16 sps:$4 sm:$0xff]  }
 0x1b7   :  { %5187 = vmatpush1.bf16.msra.mxu0 %v8048_v3  ;;  %5746 = vmatpush1.bf16.msra.mxu1 %v8051_v4  ;;  %v8149_v3 = vld [vmem:[%s11187_s1 + $0xfa4] ss:$16 sps:$4 sm:$0xff]   ;;  %v8152_v4 = vld [vmem:[%s11187_s1 + $0xfac] ss:$16 sps:$4 sm:$0xff]  }
 0x1b8   :  { %5188 = vmatprep.subr.bf16.mxu0 %v8056_v5  ;;  %5747 = vmatprep.subr.bf16.mxu1 %v8059_v6  ;;  %v8147_v5 = vld [vmem:[%s11187_s1 + $0xfa0] ss:$16 sps:$4 sm:$0xff]   ;;  %v8150_v6 = vld [vmem:[%s11187_s1 + $0xfa8] ss:$16 sps:$4 sm:$0xff]  }
 0x1bb   :  { %5189 = vmatpush1.bf16.msra.mxu0 %v8054_v7  ;;  %5748 = vmatpush1.bf16.msra.mxu1 %v8057_v8  ;;  %v8155_v7 = vld [vmem:[%s11187_s1 + $0xfc4] ss:$16 sps:$4 sm:$0xff]   ;;  %v8158_v8 = vld [vmem:[%s11187_s1 + $0xfcc] ss:$16 sps:$4 sm:$0xff]  }
 0x1bc   :  { %5190 = vmatprep.subr.bf16.mxu0 %v8062_v9  ;;  %5749 = vmatprep.subr.bf16.mxu1 %v8065_v10  ;;  %v8153_v9 = vld [vmem:[%s11187_s1 + $0xfc0] ss:$16 sps:$4 sm:$0xff]   ;;  %v8156_v10 = vld [vmem:[%s11187_s1 + $0xfc8] ss:$16 sps:$4 sm:$0xff]  }
 0x1bf   :  { %5191 = vmatpush1.bf16.msra.mxu0 %v8060_v11  ;;  %5750 = vmatpush1.bf16.msra.mxu1 %v8063_v12  ;;  %v8161_v11 = vld [vmem:[%s11187_s1 + $0xfe4] ss:$16 sps:$4 sm:$0xff]   ;;  %v8164_v12 = vld [vmem:[%s11187_s1 + $0xfec] ss:$16 sps:$4 sm:$0xff]  }
 0x1c0   :  { %5203 = vmatprep.subr.bf16.mxu0 %v8071_v14  ;;  %5762 = vmatprep.subr.bf16.mxu1 %v8074_v15  ;;  %v8162_v14 = vld [vmem:[%s11187_s1 + $0xfe8] ss:$16 sps:$4 sm:$0xff]   ;;  %v8170_v15 = vld [vmem:[%s11187_s1 + $0x1004] ss:$16 sps:$4 sm:$0xff]  }
 0x1c2   :  { %5193 = vmatmul.mubr.bf16.vlgmr.msra.gmra.mrb[0].mxu0 %v8066_v13  ;;  %5752 = vmatmul.mubr.bf16.vlgmr.msra.gmra.mrb[0].mxu1 %v8066_v13  ;;  %v8159_v13 = vld [vmem:[%s11187_s1 + $0xfe0] ss:$16 sps:$4 sm:$0xff]  }
 0x1c3   :  { %5204 = vmatpush1.bf16.msra.mxu0 %v8069_v16  ;;  %5763 = vmatpush1.bf16.msra.mxu1 %v8072_v17  ;;  %v8173_v16 = vld [vmem:[%s11187_s1 + $0x100c] ss:$16 sps:$4 sm:$0xff]  }
 0x1c4   :  { %5205 = vmatprep.subr.bf16.mxu0 %v8077_v18  ;;  %5764 = vmatprep.subr.bf16.mxu1 %v8080_v19  ;;  %v8165_v17 = vld [vmem:[%s11188_s0 + $0x38] ss:$100 sps:$4 sm:$0xff]   ;;  %v8168_v18 = vld [vmem:[%s11187_s1 + $0x1000] ss:$16 sps:$4 sm:$0xff]  }
 0x1c5   :  { %5235 = vmatprep.mubr.bf16.mxu0 %v8167_v20  ;;  %5794 = vmatprep.mubr.bf16.mxu1 %v8167_v20  ;;  %v8171_v19 = vld [vmem:[%s11187_s1 + $0x1008] ss:$16 sps:$4 sm:$0xff]   ;;  %v8176_v20 = vld [vmem:[%s11187_s1 + $0x1024] ss:$16 sps:$4 sm:$0xff]  }
 0x1c7   :  { %5206 = vmatpush1.bf16.msra.mxu0 %v8075_v21  ;;  %5765 = vmatpush1.bf16.msra.mxu1 %v8078_v22  ;;  %v8179_v21 = vld [vmem:[%s11187_s1 + $0x102c] ss:$16 sps:$4 sm:$0xff]   ;;  %v8266_v22 = vld [vmem:[%s11188_s0 + $0x44] ss:$100 sps:$4 sm:$0xff]  }
 0x1c8   :  { %5207 = vmatprep.subr.bf16.mxu0 %v8083_v23  ;;  %5766 = vmatprep.subr.bf16.mxu1 %v8086_v24  ;;  %v8174_v23 = vld [vmem:[%s11187_s1 + $0x1020] ss:$16 sps:$4 sm:$0xff]   ;;  %v8177_v24 = vld [vmem:[%s11187_s1 + $0x1028] ss:$16 sps:$4 sm:$0xff]  }
 0x1cb   :  { %5208 = vmatpush1.bf16.msra.mxu0 %v8081_v25  ;;  %5767 = vmatpush1.bf16.msra.mxu1 %v8084_v26  ;;  %v8182_v25 = vld [vmem:[%s11187_s1 + $0x1044] ss:$16 sps:$4 sm:$0xff]   ;;  %v8185_v26 = vld [vmem:[%s11187_s1 + $0x104c] ss:$16 sps:$4 sm:$0xff]  }
 0x1cc   :  { %5209 = vmatprep.subr.bf16.mxu0 %v8089_v27  ;;  %5768 = vmatprep.subr.bf16.mxu1 %v8092_v28  ;;  %v8180_v27 = vld [vmem:[%s11187_s1 + $0x1040] ss:$16 sps:$4 sm:$0xff]   ;;  %v8183_v28 = vld [vmem:[%s11187_s1 + $0x1048] ss:$16 sps:$4 sm:$0xff]  }
 0x1cf   :  { %5210 = vmatpush1.bf16.msra.mxu0 %v8087_v29  ;;  %5769 = vmatpush1.bf16.msra.mxu1 %v8090_v30  ;;  %v8188_v29 = vld [vmem:[%s11187_s1 + $0x1064] ss:$16 sps:$4 sm:$0xff]   ;;  %v8191_v30 = vld [vmem:[%s11187_s1 + $0x106c] ss:$16 sps:$4 sm:$0xff]  }
 0x1d0   :  { %5211 = vmatprep.subr.bf16.mxu0 %v8095_v31  ;;  %5770 = vmatprep.subr.bf16.mxu1 %v8098_v32  ;;  %v8186_v31 = vld [vmem:[%s11187_s1 + $0x1060] ss:$16 sps:$4 sm:$0xff]   ;;  %v8189_v32 = vld [vmem:[%s11187_s1 + $0x1068] ss:$16 sps:$4 sm:$0xff]  }
 0x1d3   :  { %5212 = vmatpush1.bf16.msra.mxu0 %v8093_v33  ;;  %5771 = vmatpush1.bf16.msra.mxu1 %v8096_v34  ;;  %v8194_v33 = vld [vmem:[%s11187_s1 + $0x1084] ss:$16 sps:$4 sm:$0xff]   ;;  %v8197_v34 = vld [vmem:[%s11187_s1 + $0x108c] ss:$16 sps:$4 sm:$0xff]  }
 0x1d4   :  { %5213 = vmatprep.subr.bf16.mxu0 %v8101_v35  ;;  %5772 = vmatprep.subr.bf16.mxu1 %v8104_v36  ;;  %v8192_v35 = vld [vmem:[%s11187_s1 + $0x1080] ss:$16 sps:$4 sm:$0xff]   ;;  %v8195_v36 = vld [vmem:[%s11187_s1 + $0x1088] ss:$16 sps:$4 sm:$0xff]  }
 0x1d7   :  { %5214 = vmatpush1.bf16.msra.mxu0 %v8099_v37  ;;  %5773 = vmatpush1.bf16.msra.mxu1 %v8102_v38  ;;  %v8200_v37 = vld [vmem:[%s11187_s1 + $0x10a4] ss:$16 sps:$4 sm:$0xff]   ;;  %v8203_v38 = vld [vmem:[%s11187_s1 + $0x10ac] ss:$16 sps:$4 sm:$0xff]  }
 0x1d8   :  { %5215 = vmatprep.subr.bf16.mxu0 %v8107_v39  ;;  %5774 = vmatprep.subr.bf16.mxu1 %v8110_v40  ;;  %v8198_v39 = vld [vmem:[%s11187_s1 + $0x10a0] ss:$16 sps:$4 sm:$0xff]   ;;  %v8201_v40 = vld [vmem:[%s11187_s1 + $0x10a8] ss:$16 sps:$4 sm:$0xff]  }
 0x1db   :  { %5216 = vmatpush1.bf16.msra.mxu0 %v8105_v41  ;;  %5775 = vmatpush1.bf16.msra.mxu1 %v8108_v42  ;;  %v8206_v41 = vld [vmem:[%s11187_s1 + $0x10c4] ss:$16 sps:$4 sm:$0xff]   ;;  %v8209_v42 = vld [vmem:[%s11187_s1 + $0x10cc] ss:$16 sps:$4 sm:$0xff]  }
 0x1dc   :  { %5217 = vmatprep.subr.bf16.mxu0 %v8113_v43  ;;  %5776 = vmatprep.subr.bf16.mxu1 %v8116_v44  ;;  %v8204_v43 = vld [vmem:[%s11187_s1 + $0x10c0] ss:$16 sps:$4 sm:$0xff]   ;;  %v8207_v44 = vld [vmem:[%s11187_s1 + $0x10c8] ss:$16 sps:$4 sm:$0xff]  }
 0x1df   :  { %5218 = vmatpush1.bf16.msra.mxu0 %v8111_v45  ;;  %5777 = vmatpush1.bf16.msra.mxu1 %v8114_v46  ;;  %v8212_v45 = vld [vmem:[%s11187_s1 + $0x10e4] ss:$16 sps:$4 sm:$0xff]   ;;  %v8215_v46 = vld [vmem:[%s11187_s1 + $0x10ec] ss:$16 sps:$4 sm:$0xff]  }
 0x1e0   :  { %5219 = vmatprep.subr.bf16.mxu0 %v8119_v47  ;;  %5778 = vmatprep.subr.bf16.mxu1 %v8122_v48  ;;  %v8210_v47 = vld [vmem:[%s11187_s1 + $0x10e0] ss:$16 sps:$4 sm:$0xff]   ;;  %v8213_v48 = vld [vmem:[%s11187_s1 + $0x10e8] ss:$16 sps:$4 sm:$0xff]  }
 0x1e3   :  { %5220 = vmatpush1.bf16.msra.mxu0 %v8117_v49  ;;  %5779 = vmatpush1.bf16.msra.mxu1 %v8120_v50  ;;  %v8218_v49 = vld [vmem:[%s11187_s1 + $0x1104] ss:$16 sps:$4 sm:$0xff]   ;;  %v8221_v50 = vld [vmem:[%s11187_s1 + $0x110c] ss:$16 sps:$4 sm:$0xff]  }
 0x1e4   :  { %5221 = vmatprep.subr.bf16.mxu0 %v8125_v51  ;;  %5780 = vmatprep.subr.bf16.mxu1 %v8128_v52  ;;  %v8216_v51 = vld [vmem:[%s11187_s1 + $0x1100] ss:$16 sps:$4 sm:$0xff]   ;;  %v8219_v52 = vld [vmem:[%s11187_s1 + $0x1108] ss:$16 sps:$4 sm:$0xff]  }
 0x1e7   :  { %5222 = vmatpush1.bf16.msra.mxu0 %v8123_v53  ;;  %5781 = vmatpush1.bf16.msra.mxu1 %v8126_v54  ;;  %v8224_v53 = vld [vmem:[%s11187_s1 + $0x1124] ss:$16 sps:$4 sm:$0xff]   ;;  %v8227_v54 = vld [vmem:[%s11187_s1 + $0x112c] ss:$16 sps:$4 sm:$0xff]  }
 0x1e8   :  { %5223 = vmatprep.subr.bf16.mxu0 %v8131_v55  ;;  %5782 = vmatprep.subr.bf16.mxu1 %v8134_v56  ;;  %v8222_v55 = vld [vmem:[%s11187_s1 + $0x1120] ss:$16 sps:$4 sm:$0xff]   ;;  %v8225_v56 = vld [vmem:[%s11187_s1 + $0x1128] ss:$16 sps:$4 sm:$0xff]  }
 0x1eb   :  { %5224 = vmatpush1.bf16.msra.mxu0 %v8129_v57  ;;  %5783 = vmatpush1.bf16.msra.mxu1 %v8132_v58  ;;  %v8230_v57 = vld [vmem:[%s11187_s1 + $0x1144] ss:$16 sps:$4 sm:$0xff]   ;;  %v8233_v58 = vld [vmem:[%s11187_s1 + $0x114c] ss:$16 sps:$4 sm:$0xff]  }
 0x1ec   :  { %5225 = vmatprep.subr.bf16.mxu0 %v8137_v59  ;;  %5784 = vmatprep.subr.bf16.mxu1 %v8140_v60  ;;  %v8228_v59 = vld [vmem:[%s11187_s1 + $0x1140] ss:$16 sps:$4 sm:$0xff]   ;;  %v8231_v60 = vld [vmem:[%s11187_s1 + $0x1148] ss:$16 sps:$4 sm:$0xff]  }
 0x1ef   :  { %5226 = vmatpush1.bf16.msra.mxu0 %v8135_v61  ;;  %5785 = vmatpush1.bf16.msra.mxu1 %v8138_v62  ;;  %v8236_v61 = vld [vmem:[%s11187_s1 + $0x1164] ss:$16 sps:$4 sm:$0xff]   ;;  %v8239_v62 = vld [vmem:[%s11187_s1 + $0x116c] ss:$16 sps:$4 sm:$0xff]  }
 0x1f0   :  { %5227 = vmatprep.subr.bf16.mxu0 %v8143_v63  ;;  %5786 = vmatprep.subr.bf16.mxu1 %v8146_v0  ;;  %v8234_v63 = vld [vmem:[%s11187_s1 + $0x1160] ss:$16 sps:$4 sm:$0xff]   ;;  %v8237_v0 = vld [vmem:[%s11187_s1 + $0x1168] ss:$16 sps:$4 sm:$0xff]  }
 0x1f3   :  { %5228 = vmatpush1.bf16.msra.mxu0 %v8141_v1  ;;  %5787 = vmatpush1.bf16.msra.mxu1 %v8144_v2  ;;  %v8242_v1 = vld [vmem:[%s11187_s1 + $0x1184] ss:$16 sps:$4 sm:$0xff]   ;;  %v8245_v2 = vld [vmem:[%s11187_s1 + $0x118c] ss:$16 sps:$4 sm:$0xff]  }
 0x1f4   :  { %5229 = vmatprep.subr.bf16.mxu0 %v8149_v3  ;;  %5788 = vmatprep.subr.bf16.mxu1 %v8152_v4  ;;  %v8240_v3 = vld [vmem:[%s11187_s1 + $0x1180] ss:$16 sps:$4 sm:$0xff]   ;;  %v8243_v4 = vld [vmem:[%s11187_s1 + $0x1188] ss:$16 sps:$4 sm:$0xff]  }
 0x1f7   :  { %5230 = vmatpush1.bf16.msra.mxu0 %v8147_v5  ;;  %5789 = vmatpush1.bf16.msra.mxu1 %v8150_v6  ;;  %v8248_v5 = vld [vmem:[%s11187_s1 + $0x11a4] ss:$16 sps:$4 sm:$0xff]   ;;  %v8251_v6 = vld [vmem:[%s11187_s1 + $0x11ac] ss:$16 sps:$4 sm:$0xff]  }
 0x1f8   :  { %5231 = vmatprep.subr.bf16.mxu0 %v8155_v7  ;;  %5790 = vmatprep.subr.bf16.mxu1 %v8158_v8  ;;  %v8246_v7 = vld [vmem:[%s11187_s1 + $0x11a0] ss:$16 sps:$4 sm:$0xff]   ;;  %v8249_v8 = vld [vmem:[%s11187_s1 + $0x11a8] ss:$16 sps:$4 sm:$0xff]  }
 0x1fb   :  { %5232 = vmatpush1.bf16.msra.mxu0 %v8153_v9  ;;  %5791 = vmatpush1.bf16.msra.mxu1 %v8156_v10  ;;  %v8254_v9 = vld [vmem:[%s11187_s1 + $0x11c4] ss:$16 sps:$4 sm:$0xff]   ;;  %v8257_v10 = vld [vmem:[%s11187_s1 + $0x11cc] ss:$16 sps:$4 sm:$0xff]  }
 0x1fc   :  { %5233 = vmatprep.subr.bf16.mxu0 %v8161_v11  ;;  %5792 = vmatprep.subr.bf16.mxu1 %v8164_v12  ;;  %v8252_v11 = vld [vmem:[%s11187_s1 + $0x11c0] ss:$16 sps:$4 sm:$0xff]   ;;  %v8255_v12 = vld [vmem:[%s11187_s1 + $0x11c8] ss:$16 sps:$4 sm:$0xff]  }
 0x1ff   :  { %5234 = vmatpush1.bf16.msra.mxu0 %v8159_v13  ;;  %5793 = vmatpush1.bf16.msra.mxu1 %v8162_v14  ;;  %v8260_v13 = vld [vmem:[%s11187_s1 + $0x11e4] ss:$16 sps:$4 sm:$0xff]   ;;  %v8263_v14 = vld [vmem:[%s11187_s1 + $0x11ec] ss:$16 sps:$4 sm:$0xff]  }
 0x200   :  { %5246 = vmatprep.subr.bf16.mxu0 %v8170_v15  ;;  %5805 = vmatprep.subr.bf16.mxu1 %v8173_v16  ;;  %v8258_v15 = vld [vmem:[%s11187_s1 + $0x11e0] ss:$16 sps:$4 sm:$0xff]   ;;  %v8261_v16 = vld [vmem:[%s11187_s1 + $0x11e8] ss:$16 sps:$4 sm:$0xff]  }
 0x202   :  { %5236 = vmatmul.mubr.bf16.vlgmr.msra.gmra.mrb[0].mxu0 %v8165_v17  ;;  %5795 = vmatmul.mubr.bf16.vlgmr.msra.gmra.mrb[0].mxu1 %v8165_v17  ;;  %v8269_v17 = vld [vmem:[%s11187_s1 + $0x1204] ss:$16 sps:$4 sm:$0xff]  }
 0x203   :  { %5247 = vmatpush1.bf16.msra.mxu0 %v8168_v18  ;;  %5806 = vmatpush1.bf16.msra.mxu1 %v8171_v19  ;;  %v8272_v18 = vld [vmem:[%s11187_s1 + $0x120c] ss:$16 sps:$4 sm:$0xff]   ;;  %v8264_v19 = vld [vmem:[%s11188_s0 + $0x40] ss:$100 sps:$4 sm:$0xff]  }
 0x204   :  { %5248 = vmatprep.subr.bf16.mxu0 %v8176_v20  ;;  %5807 = vmatprep.subr.bf16.mxu1 %v8179_v21  ;;  %v8267_v20 = vld [vmem:[%s11187_s1 + $0x1200] ss:$16 sps:$4 sm:$0xff]   ;;  %v8270_v21 = vld [vmem:[%s11187_s1 + $0x1208] ss:$16 sps:$4 sm:$0xff]  }
 0x205   :  { %5278 = vmatprep.mubr.bf16.mxu0 %v8266_v22  ;;  %5837 = vmatprep.mubr.bf16.mxu1 %v8266_v22  ;;  %v8275_v22 = vld [vmem:[%s11187_s1 + $0x1224] ss:$16 sps:$4 sm:$0xff]  }
 0x207   :  { %5249 = vmatpush1.bf16.msra.mxu0 %v8174_v23  ;;  %5808 = vmatpush1.bf16.msra.mxu1 %v8177_v24  ;;  %v8278_v23 = vld [vmem:[%s11187_s1 + $0x122c] ss:$16 sps:$4 sm:$0xff]  }
 0x208   :  { %5250 = vmatprep.subr.bf16.mxu0 %v8182_v25  ;;  %5809 = vmatprep.subr.bf16.mxu1 %v8185_v26  ;;  %v8365_v24 = vld [vmem:[%s11188_s0 + $0x4c] ss:$100 sps:$4 sm:$0xff]   ;;  %v8276_v26 = vld [vmem:[%s11187_s1 + $0x1228] ss:$16 sps:$4 sm:$0xff]  }
 0x209   :  { %v8273_v25 = vld [vmem:[%s11187_s1 + $0x1220] ss:$16 sps:$4 sm:$0xff]  }
 0x20b   :  { %5251 = vmatpush1.bf16.msra.mxu0 %v8180_v27  ;;  %5810 = vmatpush1.bf16.msra.mxu1 %v8183_v28  ;;  %v8281_v27 = vld [vmem:[%s11187_s1 + $0x1244] ss:$16 sps:$4 sm:$0xff]   ;;  %v8284_v28 = vld [vmem:[%s11187_s1 + $0x124c] ss:$16 sps:$4 sm:$0xff]  }
 0x20c   :  { %5252 = vmatprep.subr.bf16.mxu0 %v8188_v29  ;;  %5811 = vmatprep.subr.bf16.mxu1 %v8191_v30  ;;  %v8279_v29 = vld [vmem:[%s11187_s1 + $0x1240] ss:$16 sps:$4 sm:$0xff]   ;;  %v8282_v30 = vld [vmem:[%s11187_s1 + $0x1248] ss:$16 sps:$4 sm:$0xff]  }
 0x20f   :  { %5253 = vmatpush1.bf16.msra.mxu0 %v8186_v31  ;;  %5812 = vmatpush1.bf16.msra.mxu1 %v8189_v32  ;;  %v8287_v31 = vld [vmem:[%s11187_s1 + $0x1264] ss:$16 sps:$4 sm:$0xff]   ;;  %v8290_v32 = vld [vmem:[%s11187_s1 + $0x126c] ss:$16 sps:$4 sm:$0xff]  }
 0x210   :  { %5254 = vmatprep.subr.bf16.mxu0 %v8194_v33  ;;  %5813 = vmatprep.subr.bf16.mxu1 %v8197_v34  ;;  %v8285_v33 = vld [vmem:[%s11187_s1 + $0x1260] ss:$16 sps:$4 sm:$0xff]   ;;  %v8288_v34 = vld [vmem:[%s11187_s1 + $0x1268] ss:$16 sps:$4 sm:$0xff]  }
 0x213   :  { %5255 = vmatpush1.bf16.msra.mxu0 %v8192_v35  ;;  %5814 = vmatpush1.bf16.msra.mxu1 %v8195_v36  ;;  %v8293_v35 = vld [vmem:[%s11187_s1 + $0x1284] ss:$16 sps:$4 sm:$0xff]   ;;  %v8296_v36 = vld [vmem:[%s11187_s1 + $0x128c] ss:$16 sps:$4 sm:$0xff]  }
 0x214   :  { %5256 = vmatprep.subr.bf16.mxu0 %v8200_v37  ;;  %5815 = vmatprep.subr.bf16.mxu1 %v8203_v38  ;;  %v8291_v37 = vld [vmem:[%s11187_s1 + $0x1280] ss:$16 sps:$4 sm:$0xff]   ;;  %v8294_v38 = vld [vmem:[%s11187_s1 + $0x1288] ss:$16 sps:$4 sm:$0xff]  }
 0x217   :  { %5257 = vmatpush1.bf16.msra.mxu0 %v8198_v39  ;;  %5816 = vmatpush1.bf16.msra.mxu1 %v8201_v40  ;;  %v8299_v39 = vld [vmem:[%s11187_s1 + $0x12a4] ss:$16 sps:$4 sm:$0xff]   ;;  %v8302_v40 = vld [vmem:[%s11187_s1 + $0x12ac] ss:$16 sps:$4 sm:$0xff]  }
 0x218   :  { %5258 = vmatprep.subr.bf16.mxu0 %v8206_v41  ;;  %5817 = vmatprep.subr.bf16.mxu1 %v8209_v42  ;;  %v8297_v41 = vld [vmem:[%s11187_s1 + $0x12a0] ss:$16 sps:$4 sm:$0xff]   ;;  %v8300_v42 = vld [vmem:[%s11187_s1 + $0x12a8] ss:$16 sps:$4 sm:$0xff]  }
 0x21b   :  { %5259 = vmatpush1.bf16.msra.mxu0 %v8204_v43  ;;  %5818 = vmatpush1.bf16.msra.mxu1 %v8207_v44  ;;  %v8305_v43 = vld [vmem:[%s11187_s1 + $0x12c4] ss:$16 sps:$4 sm:$0xff]   ;;  %v8308_v44 = vld [vmem:[%s11187_s1 + $0x12cc] ss:$16 sps:$4 sm:$0xff]  }
 0x21c   :  { %5260 = vmatprep.subr.bf16.mxu0 %v8212_v45  ;;  %5819 = vmatprep.subr.bf16.mxu1 %v8215_v46  ;;  %v8303_v45 = vld [vmem:[%s11187_s1 + $0x12c0] ss:$16 sps:$4 sm:$0xff]   ;;  %v8306_v46 = vld [vmem:[%s11187_s1 + $0x12c8] ss:$16 sps:$4 sm:$0xff]  }
 0x21f   :  { %5261 = vmatpush1.bf16.msra.mxu0 %v8210_v47  ;;  %5820 = vmatpush1.bf16.msra.mxu1 %v8213_v48  ;;  %v8311_v47 = vld [vmem:[%s11187_s1 + $0x12e4] ss:$16 sps:$4 sm:$0xff]   ;;  %v8314_v48 = vld [vmem:[%s11187_s1 + $0x12ec] ss:$16 sps:$4 sm:$0xff]  }
 0x220   :  { %5262 = vmatprep.subr.bf16.mxu0 %v8218_v49  ;;  %5821 = vmatprep.subr.bf16.mxu1 %v8221_v50  ;;  %v8309_v49 = vld [vmem:[%s11187_s1 + $0x12e0] ss:$16 sps:$4 sm:$0xff]   ;;  %v8312_v50 = vld [vmem:[%s11187_s1 + $0x12e8] ss:$16 sps:$4 sm:$0xff]  }
 0x223   :  { %5263 = vmatpush1.bf16.msra.mxu0 %v8216_v51  ;;  %5822 = vmatpush1.bf16.msra.mxu1 %v8219_v52  ;;  %v8317_v51 = vld [vmem:[%s11187_s1 + $0x1304] ss:$16 sps:$4 sm:$0xff]   ;;  %v8320_v52 = vld [vmem:[%s11187_s1 + $0x130c] ss:$16 sps:$4 sm:$0xff]  }
 0x224   :  { %5264 = vmatprep.subr.bf16.mxu0 %v8224_v53  ;;  %5823 = vmatprep.subr.bf16.mxu1 %v8227_v54  ;;  %v8315_v53 = vld [vmem:[%s11187_s1 + $0x1300] ss:$16 sps:$4 sm:$0xff]   ;;  %v8318_v54 = vld [vmem:[%s11187_s1 + $0x1308] ss:$16 sps:$4 sm:$0xff]  }
 0x227   :  { %5265 = vmatpush1.bf16.msra.mxu0 %v8222_v55  ;;  %5824 = vmatpush1.bf16.msra.mxu1 %v8225_v56  ;;  %v8323_v55 = vld [vmem:[%s11187_s1 + $0x1324] ss:$16 sps:$4 sm:$0xff]   ;;  %v8326_v56 = vld [vmem:[%s11187_s1 + $0x132c] ss:$16 sps:$4 sm:$0xff]  }
 0x228   :  { %5266 = vmatprep.subr.bf16.mxu0 %v8230_v57  ;;  %5825 = vmatprep.subr.bf16.mxu1 %v8233_v58  ;;  %v8321_v57 = vld [vmem:[%s11187_s1 + $0x1320] ss:$16 sps:$4 sm:$0xff]   ;;  %v8324_v58 = vld [vmem:[%s11187_s1 + $0x1328] ss:$16 sps:$4 sm:$0xff]  }
 0x22b   :  { %5267 = vmatpush1.bf16.msra.mxu0 %v8228_v59  ;;  %5826 = vmatpush1.bf16.msra.mxu1 %v8231_v60  ;;  %v8329_v59 = vld [vmem:[%s11187_s1 + $0x1344] ss:$16 sps:$4 sm:$0xff]   ;;  %v8332_v60 = vld [vmem:[%s11187_s1 + $0x134c] ss:$16 sps:$4 sm:$0xff]  }
 0x22c   :  { %5268 = vmatprep.subr.bf16.mxu0 %v8236_v61  ;;  %5827 = vmatprep.subr.bf16.mxu1 %v8239_v62  ;;  %v8327_v61 = vld [vmem:[%s11187_s1 + $0x1340] ss:$16 sps:$4 sm:$0xff]   ;;  %v8330_v62 = vld [vmem:[%s11187_s1 + $0x1348] ss:$16 sps:$4 sm:$0xff]  }
 0x22f   :  { %5269 = vmatpush1.bf16.msra.mxu0 %v8234_v63  ;;  %5828 = vmatpush1.bf16.msra.mxu1 %v8237_v0  ;;  %v8335_v63 = vld [vmem:[%s11187_s1 + $0x1364] ss:$16 sps:$4 sm:$0xff]   ;;  %v8338_v0 = vld [vmem:[%s11187_s1 + $0x136c] ss:$16 sps:$4 sm:$0xff]  }
 0x230   :  { %5270 = vmatprep.subr.bf16.mxu0 %v8242_v1  ;;  %5829 = vmatprep.subr.bf16.mxu1 %v8245_v2  ;;  %v8333_v1 = vld [vmem:[%s11187_s1 + $0x1360] ss:$16 sps:$4 sm:$0xff]   ;;  %v8336_v2 = vld [vmem:[%s11187_s1 + $0x1368] ss:$16 sps:$4 sm:$0xff]  }
 0x233   :  { %5271 = vmatpush1.bf16.msra.mxu0 %v8240_v3  ;;  %5830 = vmatpush1.bf16.msra.mxu1 %v8243_v4  ;;  %v8341_v3 = vld [vmem:[%s11187_s1 + $0x1384] ss:$16 sps:$4 sm:$0xff]   ;;  %v8344_v4 = vld [vmem:[%s11187_s1 + $0x138c] ss:$16 sps:$4 sm:$0xff]  }
 0x234   :  { %5272 = vmatprep.subr.bf16.mxu0 %v8248_v5  ;;  %5831 = vmatprep.subr.bf16.mxu1 %v8251_v6  ;;  %v8339_v5 = vld [vmem:[%s11187_s1 + $0x1380] ss:$16 sps:$4 sm:$0xff]   ;;  %v8342_v6 = vld [vmem:[%s11187_s1 + $0x1388] ss:$16 sps:$4 sm:$0xff]  }
 0x237   :  { %5273 = vmatpush1.bf16.msra.mxu0 %v8246_v7  ;;  %5832 = vmatpush1.bf16.msra.mxu1 %v8249_v8  ;;  %v8347_v7 = vld [vmem:[%s11187_s1 + $0x13a4] ss:$16 sps:$4 sm:$0xff]   ;;  %v8350_v8 = vld [vmem:[%s11187_s1 + $0x13ac] ss:$16 sps:$4 sm:$0xff]  }
 0x238   :  { %5274 = vmatprep.subr.bf16.mxu0 %v8254_v9  ;;  %5833 = vmatprep.subr.bf16.mxu1 %v8257_v10  ;;  %v8345_v9 = vld [vmem:[%s11187_s1 + $0x13a0] ss:$16 sps:$4 sm:$0xff]   ;;  %v8348_v10 = vld [vmem:[%s11187_s1 + $0x13a8] ss:$16 sps:$4 sm:$0xff]  }
 0x23b   :  { %5275 = vmatpush1.bf16.msra.mxu0 %v8252_v11  ;;  %5834 = vmatpush1.bf16.msra.mxu1 %v8255_v12  ;;  %v8353_v11 = vld [vmem:[%s11187_s1 + $0x13c4] ss:$16 sps:$4 sm:$0xff]   ;;  %v8356_v12 = vld [vmem:[%s11187_s1 + $0x13cc] ss:$16 sps:$4 sm:$0xff]  }
 0x23c   :  { %5276 = vmatprep.subr.bf16.mxu0 %v8260_v13  ;;  %5835 = vmatprep.subr.bf16.mxu1 %v8263_v14  ;;  %v8351_v13 = vld [vmem:[%s11187_s1 + $0x13c0] ss:$16 sps:$4 sm:$0xff]   ;;  %v8354_v14 = vld [vmem:[%s11187_s1 + $0x13c8] ss:$16 sps:$4 sm:$0xff]  }
 0x23f   :  { %5277 = vmatpush1.bf16.msra.mxu0 %v8258_v15  ;;  %5836 = vmatpush1.bf16.msra.mxu1 %v8261_v16  ;;  %v8359_v15 = vld [vmem:[%s11187_s1 + $0x13e4] ss:$16 sps:$4 sm:$0xff]   ;;  %v8362_v16 = vld [vmem:[%s11187_s1 + $0x13ec] ss:$16 sps:$4 sm:$0xff]  }
 0x240   :  { %5289 = vmatprep.subr.bf16.mxu0 %v8269_v17  ;;  %5848 = vmatprep.subr.bf16.mxu1 %v8272_v18  ;;  %v8357_v17 = vld [vmem:[%s11187_s1 + $0x13e0] ss:$16 sps:$4 sm:$0xff]   ;;  %v8360_v18 = vld [vmem:[%s11187_s1 + $0x13e8] ss:$16 sps:$4 sm:$0xff]  }
 0x242   :  { %5279 = vmatmul.mubr.bf16.vlgmr.msra.gmra.mrb[0].mxu0 %v8264_v19  ;;  %5838 = vmatmul.mubr.bf16.vlgmr.msra.gmra.mrb[0].mxu1 %v8264_v19  ;;  %v8368_v19 = vld [vmem:[%s11187_s1 + $0x1404] ss:$16 sps:$4 sm:$0xff]  }
 0x243   :  { %5290 = vmatpush1.bf16.msra.mxu0 %v8267_v20  ;;  %5849 = vmatpush1.bf16.msra.mxu1 %v8270_v21  ;;  %v8371_v20 = vld [vmem:[%s11187_s1 + $0x140c] ss:$16 sps:$4 sm:$0xff]  }
 0x244   :  { %5291 = vmatprep.subr.bf16.mxu0 %v8275_v22  ;;  %5850 = vmatprep.subr.bf16.mxu1 %v8278_v23  ;;  %v8363_v21 = vld [vmem:[%s11188_s0 + $0x48] ss:$100 sps:$4 sm:$0xff]   ;;  %v8366_v22 = vld [vmem:[%s11187_s1 + $0x1400] ss:$16 sps:$4 sm:$0xff]  }
 0x245   :  { %5321 = vmatprep.mubr.bf16.mxu0 %v8365_v24  ;;  %5880 = vmatprep.mubr.bf16.mxu1 %v8365_v24  ;;  %v8369_v23 = vld [vmem:[%s11187_s1 + $0x1408] ss:$16 sps:$4 sm:$0xff]   ;;  %v8374_v24 = vld [vmem:[%s11187_s1 + $0x1424] ss:$16 sps:$4 sm:$0xff]  }
 0x247   :  { %5292 = vmatpush1.bf16.msra.mxu0 %v8273_v25  ;;  %5851 = vmatpush1.bf16.msra.mxu1 %v8276_v26  ;;  %v8377_v25 = vld [vmem:[%s11187_s1 + $0x142c] ss:$16 sps:$4 sm:$0xff]   ;;  %v8464_v26 = vld [vmem:[%s11188_s0 + $0x54] ss:$100 sps:$4 sm:$0xff]  }
 0x248   :  { %5293 = vmatprep.subr.bf16.mxu0 %v8281_v27  ;;  %5852 = vmatprep.subr.bf16.mxu1 %v8284_v28  ;;  %v8372_v27 = vld [vmem:[%s11187_s1 + $0x1420] ss:$16 sps:$4 sm:$0xff]   ;;  %v8375_v28 = vld [vmem:[%s11187_s1 + $0x1428] ss:$16 sps:$4 sm:$0xff]  }
 0x24b   :  { %5294 = vmatpush1.bf16.msra.mxu0 %v8279_v29  ;;  %5853 = vmatpush1.bf16.msra.mxu1 %v8282_v30  ;;  %v8380_v29 = vld [vmem:[%s11187_s1 + $0x1444] ss:$16 sps:$4 sm:$0xff]   ;;  %v8383_v30 = vld [vmem:[%s11187_s1 + $0x144c] ss:$16 sps:$4 sm:$0xff]  }
 0x24c   :  { %5295 = vmatprep.subr.bf16.mxu0 %v8287_v31  ;;  %5854 = vmatprep.subr.bf16.mxu1 %v8290_v32  ;;  %v8378_v31 = vld [vmem:[%s11187_s1 + $0x1440] ss:$16 sps:$4 sm:$0xff]   ;;  %v8381_v32 = vld [vmem:[%s11187_s1 + $0x1448] ss:$16 sps:$4 sm:$0xff]  }
 0x24f   :  { %5296 = vmatpush1.bf16.msra.mxu0 %v8285_v33  ;;  %5855 = vmatpush1.bf16.msra.mxu1 %v8288_v34  ;;  %v8386_v33 = vld [vmem:[%s11187_s1 + $0x1464] ss:$16 sps:$4 sm:$0xff]   ;;  %v8389_v34 = vld [vmem:[%s11187_s1 + $0x146c] ss:$16 sps:$4 sm:$0xff]  }
 0x250   :  { %5297 = vmatprep.subr.bf16.mxu0 %v8293_v35  ;;  %5856 = vmatprep.subr.bf16.mxu1 %v8296_v36  ;;  %v8384_v35 = vld [vmem:[%s11187_s1 + $0x1460] ss:$16 sps:$4 sm:$0xff]   ;;  %v8387_v36 = vld [vmem:[%s11187_s1 + $0x1468] ss:$16 sps:$4 sm:$0xff]  }
 0x253   :  { %5298 = vmatpush1.bf16.msra.mxu0 %v8291_v37  ;;  %5857 = vmatpush1.bf16.msra.mxu1 %v8294_v38  ;;  %v8392_v37 = vld [vmem:[%s11187_s1 + $0x1484] ss:$16 sps:$4 sm:$0xff]   ;;  %v8395_v38 = vld [vmem:[%s11187_s1 + $0x148c] ss:$16 sps:$4 sm:$0xff]  }
 0x254   :  { %5299 = vmatprep.subr.bf16.mxu0 %v8299_v39  ;;  %5858 = vmatprep.subr.bf16.mxu1 %v8302_v40  ;;  %v8390_v39 = vld [vmem:[%s11187_s1 + $0x1480] ss:$16 sps:$4 sm:$0xff]   ;;  %v8393_v40 = vld [vmem:[%s11187_s1 + $0x1488] ss:$16 sps:$4 sm:$0xff]  }
 0x257   :  { %5300 = vmatpush1.bf16.msra.mxu0 %v8297_v41  ;;  %5859 = vmatpush1.bf16.msra.mxu1 %v8300_v42  ;;  %v8398_v41 = vld [vmem:[%s11187_s1 + $0x14a4] ss:$16 sps:$4 sm:$0xff]   ;;  %v8401_v42 = vld [vmem:[%s11187_s1 + $0x14ac] ss:$16 sps:$4 sm:$0xff]  }
 0x258   :  { %5301 = vmatprep.subr.bf16.mxu0 %v8305_v43  ;;  %5860 = vmatprep.subr.bf16.mxu1 %v8308_v44  ;;  %v8396_v43 = vld [vmem:[%s11187_s1 + $0x14a0] ss:$16 sps:$4 sm:$0xff]   ;;  %v8399_v44 = vld [vmem:[%s11187_s1 + $0x14a8] ss:$16 sps:$4 sm:$0xff]  }
 0x25b   :  { %5302 = vmatpush1.bf16.msra.mxu0 %v8303_v45  ;;  %5861 = vmatpush1.bf16.msra.mxu1 %v8306_v46  ;;  %v8404_v45 = vld [vmem:[%s11187_s1 + $0x14c4] ss:$16 sps:$4 sm:$0xff]   ;;  %v8407_v46 = vld [vmem:[%s11187_s1 + $0x14cc] ss:$16 sps:$4 sm:$0xff]  }
 0x25c   :  { %5303 = vmatprep.subr.bf16.mxu0 %v8311_v47  ;;  %5862 = vmatprep.subr.bf16.mxu1 %v8314_v48  ;;  %v8402_v47 = vld [vmem:[%s11187_s1 + $0x14c0] ss:$16 sps:$4 sm:$0xff]   ;;  %v8405_v48 = vld [vmem:[%s11187_s1 + $0x14c8] ss:$16 sps:$4 sm:$0xff]  }
 0x25f   :  { %5304 = vmatpush1.bf16.msra.mxu0 %v8309_v49  ;;  %5863 = vmatpush1.bf16.msra.mxu1 %v8312_v50  ;;  %v8410_v49 = vld [vmem:[%s11187_s1 + $0x14e4] ss:$16 sps:$4 sm:$0xff]   ;;  %v8413_v50 = vld [vmem:[%s11187_s1 + $0x14ec] ss:$16 sps:$4 sm:$0xff]  }
 0x260   :  { %5305 = vmatprep.subr.bf16.mxu0 %v8317_v51  ;;  %5864 = vmatprep.subr.bf16.mxu1 %v8320_v52  ;;  %v8408_v51 = vld [vmem:[%s11187_s1 + $0x14e0] ss:$16 sps:$4 sm:$0xff]   ;;  %v8411_v52 = vld [vmem:[%s11187_s1 + $0x14e8] ss:$16 sps:$4 sm:$0xff]  }
 0x263   :  { %5306 = vmatpush1.bf16.msra.mxu0 %v8315_v53  ;;  %5865 = vmatpush1.bf16.msra.mxu1 %v8318_v54  ;;  %v8416_v53 = vld [vmem:[%s11187_s1 + $0x1504] ss:$16 sps:$4 sm:$0xff]   ;;  %v8419_v54 = vld [vmem:[%s11187_s1 + $0x150c] ss:$16 sps:$4 sm:$0xff]  }
 0x264   :  { %5307 = vmatprep.subr.bf16.mxu0 %v8323_v55  ;;  %5866 = vmatprep.subr.bf16.mxu1 %v8326_v56  ;;  %v8414_v55 = vld [vmem:[%s11187_s1 + $0x1500] ss:$16 sps:$4 sm:$0xff]   ;;  %v8417_v56 = vld [vmem:[%s11187_s1 + $0x1508] ss:$16 sps:$4 sm:$0xff]  }
 0x267   :  { %5308 = vmatpush1.bf16.msra.mxu0 %v8321_v57  ;;  %5867 = vmatpush1.bf16.msra.mxu1 %v8324_v58  ;;  %v8422_v57 = vld [vmem:[%s11187_s1 + $0x1524] ss:$16 sps:$4 sm:$0xff]   ;;  %v8425_v58 = vld [vmem:[%s11187_s1 + $0x152c] ss:$16 sps:$4 sm:$0xff]  }
 0x268   :  { %5309 = vmatprep.subr.bf16.mxu0 %v8329_v59  ;;  %5868 = vmatprep.subr.bf16.mxu1 %v8332_v60  ;;  %v8420_v59 = vld [vmem:[%s11187_s1 + $0x1520] ss:$16 sps:$4 sm:$0xff]   ;;  %v8423_v60 = vld [vmem:[%s11187_s1 + $0x1528] ss:$16 sps:$4 sm:$0xff]  }
 0x26b   :  { %5310 = vmatpush1.bf16.msra.mxu0 %v8327_v61  ;;  %5869 = vmatpush1.bf16.msra.mxu1 %v8330_v62  ;;  %v8428_v61 = vld [vmem:[%s11187_s1 + $0x1544] ss:$16 sps:$4 sm:$0xff]   ;;  %v8431_v62 = vld [vmem:[%s11187_s1 + $0x154c] ss:$16 sps:$4 sm:$0xff]  }
 0x26c   :  { %5311 = vmatprep.subr.bf16.mxu0 %v8335_v63  ;;  %5870 = vmatprep.subr.bf16.mxu1 %v8338_v0  ;;  %v8426_v63 = vld [vmem:[%s11187_s1 + $0x1540] ss:$16 sps:$4 sm:$0xff]   ;;  %v8429_v0 = vld [vmem:[%s11187_s1 + $0x1548] ss:$16 sps:$4 sm:$0xff]  }
 0x26f   :  { %5312 = vmatpush1.bf16.msra.mxu0 %v8333_v1  ;;  %5871 = vmatpush1.bf16.msra.mxu1 %v8336_v2  ;;  %v8434_v1 = vld [vmem:[%s11187_s1 + $0x1564] ss:$16 sps:$4 sm:$0xff]   ;;  %v8437_v2 = vld [vmem:[%s11187_s1 + $0x156c] ss:$16 sps:$4 sm:$0xff]  }
 0x270   :  { %5313 = vmatprep.subr.bf16.mxu0 %v8341_v3  ;;  %5872 = vmatprep.subr.bf16.mxu1 %v8344_v4  ;;  %v8432_v3 = vld [vmem:[%s11187_s1 + $0x1560] ss:$16 sps:$4 sm:$0xff]   ;;  %v8435_v4 = vld [vmem:[%s11187_s1 + $0x1568] ss:$16 sps:$4 sm:$0xff]  }
 0x273   :  { %5314 = vmatpush1.bf16.msra.mxu0 %v8339_v5  ;;  %5873 = vmatpush1.bf16.msra.mxu1 %v8342_v6  ;;  %v8440_v5 = vld [vmem:[%s11187_s1 + $0x1584] ss:$16 sps:$4 sm:$0xff]   ;;  %v8443_v6 = vld [vmem:[%s11187_s1 + $0x158c] ss:$16 sps:$4 sm:$0xff]  }
 0x274   :  { %5315 = vmatprep.subr.bf16.mxu0 %v8347_v7  ;;  %5874 = vmatprep.subr.bf16.mxu1 %v8350_v8  ;;  %v8438_v7 = vld [vmem:[%s11187_s1 + $0x1580] ss:$16 sps:$4 sm:$0xff]   ;;  %v8441_v8 = vld [vmem:[%s11187_s1 + $0x1588] ss:$16 sps:$4 sm:$0xff]  }
 0x277   :  { %5316 = vmatpush1.bf16.msra.mxu0 %v8345_v9  ;;  %5875 = vmatpush1.bf16.msra.mxu1 %v8348_v10  ;;  %v8446_v9 = vld [vmem:[%s11187_s1 + $0x15a4] ss:$16 sps:$4 sm:$0xff]   ;;  %v8449_v10 = vld [vmem:[%s11187_s1 + $0x15ac] ss:$16 sps:$4 sm:$0xff]  }
 0x278   :  { %5317 = vmatprep.subr.bf16.mxu0 %v8353_v11  ;;  %5876 = vmatprep.subr.bf16.mxu1 %v8356_v12  ;;  %v8444_v11 = vld [vmem:[%s11187_s1 + $0x15a0] ss:$16 sps:$4 sm:$0xff]   ;;  %v8447_v12 = vld [vmem:[%s11187_s1 + $0x15a8] ss:$16 sps:$4 sm:$0xff]  }
 0x27b   :  { %5318 = vmatpush1.bf16.msra.mxu0 %v8351_v13  ;;  %5877 = vmatpush1.bf16.msra.mxu1 %v8354_v14  ;;  %v8452_v13 = vld [vmem:[%s11187_s1 + $0x15c4] ss:$16 sps:$4 sm:$0xff]   ;;  %v8455_v14 = vld [vmem:[%s11187_s1 + $0x15cc] ss:$16 sps:$4 sm:$0xff]  }
 0x27c   :  { %5319 = vmatprep.subr.bf16.mxu0 %v8359_v15  ;;  %5878 = vmatprep.subr.bf16.mxu1 %v8362_v16  ;;  %v8450_v15 = vld [vmem:[%s11187_s1 + $0x15c0] ss:$16 sps:$4 sm:$0xff]   ;;  %v8453_v16 = vld [vmem:[%s11187_s1 + $0x15c8] ss:$16 sps:$4 sm:$0xff]  }
 0x27f   :  { %5320 = vmatpush1.bf16.msra.mxu0 %v8357_v17  ;;  %5879 = vmatpush1.bf16.msra.mxu1 %v8360_v18  ;;  %v8458_v17 = vld [vmem:[%s11187_s1 + $0x15e4] ss:$16 sps:$4 sm:$0xff]   ;;  %v8461_v18 = vld [vmem:[%s11187_s1 + $0x15ec] ss:$16 sps:$4 sm:$0xff]  }
 0x280   :  { %5332 = vmatprep.subr.bf16.mxu0 %v8368_v19  ;;  %5891 = vmatprep.subr.bf16.mxu1 %v8371_v20  ;;  %v8456_v19 = vld [vmem:[%s11187_s1 + $0x15e0] ss:$16 sps:$4 sm:$0xff]   ;;  %v8459_v20 = vld [vmem:[%s11187_s1 + $0x15e8] ss:$16 sps:$4 sm:$0xff]  }
 0x282   :  { %5322 = vmatmul.mubr.bf16.vlgmr.msra.gmra.mrb[0].mxu0 %v8363_v21  ;;  %5881 = vmatmul.mubr.bf16.vlgmr.msra.gmra.mrb[0].mxu1 %v8363_v21  ;;  %v8467_v21 = vld [vmem:[%s11187_s1 + $0x1604] ss:$16 sps:$4 sm:$0xff]  }
 0x283   :  { %5333 = vmatpush1.bf16.msra.mxu0 %v8366_v22  ;;  %5892 = vmatpush1.bf16.msra.mxu1 %v8369_v23  ;;  %v8470_v22 = vld [vmem:[%s11187_s1 + $0x160c] ss:$16 sps:$4 sm:$0xff]   ;;  %v8462_v23 = vld [vmem:[%s11188_s0 + $0x50] ss:$100 sps:$4 sm:$0xff]  }
 0x284   :  { %5334 = vmatprep.subr.bf16.mxu0 %v8374_v24  ;;  %5893 = vmatprep.subr.bf16.mxu1 %v8377_v25  ;;  %v8465_v24 = vld [vmem:[%s11187_s1 + $0x1600] ss:$16 sps:$4 sm:$0xff]   ;;  %v8468_v25 = vld [vmem:[%s11187_s1 + $0x1608] ss:$16 sps:$4 sm:$0xff]  }
 0x285   :  { %5364 = vmatprep.mubr.bf16.mxu0 %v8464_v26  ;;  %5923 = vmatprep.mubr.bf16.mxu1 %v8464_v26  ;;  %v8473_v26 = vld [vmem:[%s11187_s1 + $0x1624] ss:$16 sps:$4 sm:$0xff]  }
 0x287   :  { %5335 = vmatpush1.bf16.msra.mxu0 %v8372_v27  ;;  %5894 = vmatpush1.bf16.msra.mxu1 %v8375_v28  ;;  %v8476_v27 = vld [vmem:[%s11187_s1 + $0x162c] ss:$16 sps:$4 sm:$0xff]  }
 0x288   :  { %5336 = vmatprep.subr.bf16.mxu0 %v8380_v29  ;;  %5895 = vmatprep.subr.bf16.mxu1 %v8383_v30  ;;  %v8563_v28 = vld [vmem:[%s11188_s0 + $0x5c] ss:$100 sps:$4 sm:$0xff]   ;;  %v8474_v30 = vld [vmem:[%s11187_s1 + $0x1628] ss:$16 sps:$4 sm:$0xff]  }
 0x289   :  { %v8471_v29 = vld [vmem:[%s11187_s1 + $0x1620] ss:$16 sps:$4 sm:$0xff]  }
 0x28b   :  { %5337 = vmatpush1.bf16.msra.mxu0 %v8378_v31  ;;  %5896 = vmatpush1.bf16.msra.mxu1 %v8381_v32  ;;  %v8479_v31 = vld [vmem:[%s11187_s1 + $0x1644] ss:$16 sps:$4 sm:$0xff]   ;;  %v8482_v32 = vld [vmem:[%s11187_s1 + $0x164c] ss:$16 sps:$4 sm:$0xff]  }
 0x28c   :  { %5338 = vmatprep.subr.bf16.mxu0 %v8386_v33  ;;  %5897 = vmatprep.subr.bf16.mxu1 %v8389_v34  ;;  %v8477_v33 = vld [vmem:[%s11187_s1 + $0x1640] ss:$16 sps:$4 sm:$0xff]   ;;  %v8480_v34 = vld [vmem:[%s11187_s1 + $0x1648] ss:$16 sps:$4 sm:$0xff]  }
 0x28f   :  { %5339 = vmatpush1.bf16.msra.mxu0 %v8384_v35  ;;  %5898 = vmatpush1.bf16.msra.mxu1 %v8387_v36  ;;  %v8485_v35 = vld [vmem:[%s11187_s1 + $0x1664] ss:$16 sps:$4 sm:$0xff]   ;;  %v8488_v36 = vld [vmem:[%s11187_s1 + $0x166c] ss:$16 sps:$4 sm:$0xff]  }
 0x290   :  { %5340 = vmatprep.subr.bf16.mxu0 %v8392_v37  ;;  %5899 = vmatprep.subr.bf16.mxu1 %v8395_v38  ;;  %v8483_v37 = vld [vmem:[%s11187_s1 + $0x1660] ss:$16 sps:$4 sm:$0xff]   ;;  %v8486_v38 = vld [vmem:[%s11187_s1 + $0x1668] ss:$16 sps:$4 sm:$0xff]  }
 0x293   :  { %5341 = vmatpush1.bf16.msra.mxu0 %v8390_v39  ;;  %5900 = vmatpush1.bf16.msra.mxu1 %v8393_v40  ;;  %v8491_v39 = vld [vmem:[%s11187_s1 + $0x1684] ss:$16 sps:$4 sm:$0xff]   ;;  %v8494_v40 = vld [vmem:[%s11187_s1 + $0x168c] ss:$16 sps:$4 sm:$0xff]  }
 0x294   :  { %5342 = vmatprep.subr.bf16.mxu0 %v8398_v41  ;;  %5901 = vmatprep.subr.bf16.mxu1 %v8401_v42  ;;  %v8489_v41 = vld [vmem:[%s11187_s1 + $0x1680] ss:$16 sps:$4 sm:$0xff]   ;;  %v8492_v42 = vld [vmem:[%s11187_s1 + $0x1688] ss:$16 sps:$4 sm:$0xff]  }
 0x297   :  { %5343 = vmatpush1.bf16.msra.mxu0 %v8396_v43  ;;  %5902 = vmatpush1.bf16.msra.mxu1 %v8399_v44  ;;  %v8497_v43 = vld [vmem:[%s11187_s1 + $0x16a4] ss:$16 sps:$4 sm:$0xff]   ;;  %v8500_v44 = vld [vmem:[%s11187_s1 + $0x16ac] ss:$16 sps:$4 sm:$0xff]  }
 0x298   :  { %5344 = vmatprep.subr.bf16.mxu0 %v8404_v45  ;;  %5903 = vmatprep.subr.bf16.mxu1 %v8407_v46  ;;  %v8495_v45 = vld [vmem:[%s11187_s1 + $0x16a0] ss:$16 sps:$4 sm:$0xff]   ;;  %v8498_v46 = vld [vmem:[%s11187_s1 + $0x16a8] ss:$16 sps:$4 sm:$0xff]  }
 0x29b   :  { %5345 = vmatpush1.bf16.msra.mxu0 %v8402_v47  ;;  %5904 = vmatpush1.bf16.msra.mxu1 %v8405_v48  ;;  %v8503_v47 = vld [vmem:[%s11187_s1 + $0x16c4] ss:$16 sps:$4 sm:$0xff]   ;;  %v8506_v48 = vld [vmem:[%s11187_s1 + $0x16cc] ss:$16 sps:$4 sm:$0xff]  }
 0x29c   :  { %5346 = vmatprep.subr.bf16.mxu0 %v8410_v49  ;;  %5905 = vmatprep.subr.bf16.mxu1 %v8413_v50  ;;  %v8501_v49 = vld [vmem:[%s11187_s1 + $0x16c0] ss:$16 sps:$4 sm:$0xff]   ;;  %v8504_v50 = vld [vmem:[%s11187_s1 + $0x16c8] ss:$16 sps:$4 sm:$0xff]  }
 0x29f   :  { %5347 = vmatpush1.bf16.msra.mxu0 %v8408_v51  ;;  %5906 = vmatpush1.bf16.msra.mxu1 %v8411_v52  ;;  %v8509_v51 = vld [vmem:[%s11187_s1 + $0x16e4] ss:$16 sps:$4 sm:$0xff]   ;;  %v8512_v52 = vld [vmem:[%s11187_s1 + $0x16ec] ss:$16 sps:$4 sm:$0xff]  }
 0x2a0   :  { %5348 = vmatprep.subr.bf16.mxu0 %v8416_v53  ;;  %5907 = vmatprep.subr.bf16.mxu1 %v8419_v54  ;;  %v8507_v53 = vld [vmem:[%s11187_s1 + $0x16e0] ss:$16 sps:$4 sm:$0xff]   ;;  %v8510_v54 = vld [vmem:[%s11187_s1 + $0x16e8] ss:$16 sps:$4 sm:$0xff]  }
 0x2a3   :  { %5349 = vmatpush1.bf16.msra.mxu0 %v8414_v55  ;;  %5908 = vmatpush1.bf16.msra.mxu1 %v8417_v56  ;;  %v8515_v55 = vld [vmem:[%s11187_s1 + $0x1704] ss:$16 sps:$4 sm:$0xff]   ;;  %v8518_v56 = vld [vmem:[%s11187_s1 + $0x170c] ss:$16 sps:$4 sm:$0xff]  }
 0x2a4   :  { %5350 = vmatprep.subr.bf16.mxu0 %v8422_v57  ;;  %5909 = vmatprep.subr.bf16.mxu1 %v8425_v58  ;;  %v8513_v57 = vld [vmem:[%s11187_s1 + $0x1700] ss:$16 sps:$4 sm:$0xff]   ;;  %v8516_v58 = vld [vmem:[%s11187_s1 + $0x1708] ss:$16 sps:$4 sm:$0xff]  }
 0x2a7   :  { %5351 = vmatpush1.bf16.msra.mxu0 %v8420_v59  ;;  %5910 = vmatpush1.bf16.msra.mxu1 %v8423_v60  ;;  %v8521_v59 = vld [vmem:[%s11187_s1 + $0x1724] ss:$16 sps:$4 sm:$0xff]   ;;  %v8524_v60 = vld [vmem:[%s11187_s1 + $0x172c] ss:$16 sps:$4 sm:$0xff]  }
 0x2a8   :  { %5352 = vmatprep.subr.bf16.mxu0 %v8428_v61  ;;  %5911 = vmatprep.subr.bf16.mxu1 %v8431_v62  ;;  %v8519_v61 = vld [vmem:[%s11187_s1 + $0x1720] ss:$16 sps:$4 sm:$0xff]   ;;  %v8522_v62 = vld [vmem:[%s11187_s1 + $0x1728] ss:$16 sps:$4 sm:$0xff]  }
 0x2ab   :  { %5353 = vmatpush1.bf16.msra.mxu0 %v8426_v63  ;;  %5912 = vmatpush1.bf16.msra.mxu1 %v8429_v0  ;;  %v8527_v63 = vld [vmem:[%s11187_s1 + $0x1744] ss:$16 sps:$4 sm:$0xff]   ;;  %v8530_v0 = vld [vmem:[%s11187_s1 + $0x174c] ss:$16 sps:$4 sm:$0xff]  }
 0x2ac   :  { %5354 = vmatprep.subr.bf16.mxu0 %v8434_v1  ;;  %5913 = vmatprep.subr.bf16.mxu1 %v8437_v2  ;;  %v8525_v1 = vld [vmem:[%s11187_s1 + $0x1740] ss:$16 sps:$4 sm:$0xff]   ;;  %v8528_v2 = vld [vmem:[%s11187_s1 + $0x1748] ss:$16 sps:$4 sm:$0xff]  }
 0x2af   :  { %5355 = vmatpush1.bf16.msra.mxu0 %v8432_v3  ;;  %5914 = vmatpush1.bf16.msra.mxu1 %v8435_v4  ;;  %v8533_v3 = vld [vmem:[%s11187_s1 + $0x1764] ss:$16 sps:$4 sm:$0xff]   ;;  %v8536_v4 = vld [vmem:[%s11187_s1 + $0x176c] ss:$16 sps:$4 sm:$0xff]  }
 0x2b0   :  { %5356 = vmatprep.subr.bf16.mxu0 %v8440_v5  ;;  %5915 = vmatprep.subr.bf16.mxu1 %v8443_v6  ;;  %v8531_v5 = vld [vmem:[%s11187_s1 + $0x1760] ss:$16 sps:$4 sm:$0xff]   ;;  %v8534_v6 = vld [vmem:[%s11187_s1 + $0x1768] ss:$16 sps:$4 sm:$0xff]  }
 0x2b3   :  { %5357 = vmatpush1.bf16.msra.mxu0 %v8438_v7  ;;  %5916 = vmatpush1.bf16.msra.mxu1 %v8441_v8  ;;  %v8539_v7 = vld [vmem:[%s11187_s1 + $0x1784] ss:$16 sps:$4 sm:$0xff]   ;;  %v8542_v8 = vld [vmem:[%s11187_s1 + $0x178c] ss:$16 sps:$4 sm:$0xff]  }
 0x2b4   :  { %5358 = vmatprep.subr.bf16.mxu0 %v8446_v9  ;;  %5917 = vmatprep.subr.bf16.mxu1 %v8449_v10  ;;  %v8537_v9 = vld [vmem:[%s11187_s1 + $0x1780] ss:$16 sps:$4 sm:$0xff]   ;;  %v8540_v10 = vld [vmem:[%s11187_s1 + $0x1788] ss:$16 sps:$4 sm:$0xff]  }
 0x2b7   :  { %5359 = vmatpush1.bf16.msra.mxu0 %v8444_v11  ;;  %5918 = vmatpush1.bf16.msra.mxu1 %v8447_v12  ;;  %v8545_v11 = vld [vmem:[%s11187_s1 + $0x17a4] ss:$16 sps:$4 sm:$0xff]   ;;  %v8548_v12 = vld [vmem:[%s11187_s1 + $0x17ac] ss:$16 sps:$4 sm:$0xff]  }
 0x2b8   :  { %5360 = vmatprep.subr.bf16.mxu0 %v8452_v13  ;;  %5919 = vmatprep.subr.bf16.mxu1 %v8455_v14  ;;  %v8543_v13 = vld [vmem:[%s11187_s1 + $0x17a0] ss:$16 sps:$4 sm:$0xff]   ;;  %v8546_v14 = vld [vmem:[%s11187_s1 + $0x17a8] ss:$16 sps:$4 sm:$0xff]  }
 0x2bb   :  { %5361 = vmatpush1.bf16.msra.mxu0 %v8450_v15  ;;  %5920 = vmatpush1.bf16.msra.mxu1 %v8453_v16  ;;  %v8551_v15 = vld [vmem:[%s11187_s1 + $0x17c4] ss:$16 sps:$4 sm:$0xff]   ;;  %v8554_v16 = vld [vmem:[%s11187_s1 + $0x17cc] ss:$16 sps:$4 sm:$0xff]  }
 0x2bc   :  { %5362 = vmatprep.subr.bf16.mxu0 %v8458_v17  ;;  %5921 = vmatprep.subr.bf16.mxu1 %v8461_v18  ;;  %v8549_v17 = vld [vmem:[%s11187_s1 + $0x17c0] ss:$16 sps:$4 sm:$0xff]   ;;  %v8552_v18 = vld [vmem:[%s11187_s1 + $0x17c8] ss:$16 sps:$4 sm:$0xff]  }
 0x2bf   :  { %5363 = vmatpush1.bf16.msra.mxu0 %v8456_v19  ;;  %5922 = vmatpush1.bf16.msra.mxu1 %v8459_v20  ;;  %v8557_v19 = vld [vmem:[%s11187_s1 + $0x17e4] ss:$16 sps:$4 sm:$0xff]   ;;  %v8560_v20 = vld [vmem:[%s11187_s1 + $0x17ec] ss:$16 sps:$4 sm:$0xff]  }
 0x2c0   :  { %5375 = vmatprep.subr.bf16.mxu0 %v8467_v21  ;;  %5934 = vmatprep.subr.bf16.mxu1 %v8470_v22  ;;  %v8555_v21 = vld [vmem:[%s11187_s1 + $0x17e0] ss:$16 sps:$4 sm:$0xff]   ;;  %v8558_v22 = vld [vmem:[%s11187_s1 + $0x17e8] ss:$16 sps:$4 sm:$0xff]  }
 0x2c2   :  { %5365 = vmatmul.mubr.bf16.vlgmr.msra.gmra.mrb[0].mxu0 %v8462_v23  ;;  %5924 = vmatmul.mubr.bf16.vlgmr.msra.gmra.mrb[0].mxu1 %v8462_v23  ;;  %v8566_v23 = vld [vmem:[%s11187_s1 + $0x1804] ss:$16 sps:$4 sm:$0xff]  }
 0x2c3   :  { %5376 = vmatpush1.bf16.msra.mxu0 %v8465_v24  ;;  %5935 = vmatpush1.bf16.msra.mxu1 %v8468_v25  ;;  %v8569_v24 = vld [vmem:[%s11187_s1 + $0x180c] ss:$16 sps:$4 sm:$0xff]  }
 0x2c4   :  { %5377 = vmatprep.subr.bf16.mxu0 %v8473_v26  ;;  %5936 = vmatprep.subr.bf16.mxu1 %v8476_v27  ;;  %v8561_v25 = vld [vmem:[%s11188_s0 + $0x58] ss:$100 sps:$4 sm:$0xff]   ;;  %v8564_v26 = vld [vmem:[%s11187_s1 + $0x1800] ss:$16 sps:$4 sm:$0xff]  }
 0x2c5   :  { %5407 = vmatprep.mubr.bf16.mxu0 %v8563_v28  ;;  %5966 = vmatprep.mubr.bf16.mxu1 %v8563_v28  ;;  %v8567_v27 = vld [vmem:[%s11187_s1 + $0x1808] ss:$16 sps:$4 sm:$0xff]   ;;  %v8572_v28 = vld [vmem:[%s11187_s1 + $0x1824] ss:$16 sps:$4 sm:$0xff]  }
 0x2c7   :  { %5378 = vmatpush1.bf16.msra.mxu0 %v8471_v29  ;;  %5937 = vmatpush1.bf16.msra.mxu1 %v8474_v30  ;;  %v8575_v29 = vld [vmem:[%s11187_s1 + $0x182c] ss:$16 sps:$4 sm:$0xff]   ;;  %v8570_v30 = vld [vmem:[%s11187_s1 + $0x1820] ss:$16 sps:$4 sm:$0xff]  }
 0x2c8   :  { %5379 = vmatprep.subr.bf16.mxu0 %v8479_v31  ;;  %5938 = vmatprep.subr.bf16.mxu1 %v8482_v32  ;;  %v8573_v31 = vld [vmem:[%s11187_s1 + $0x1828] ss:$16 sps:$4 sm:$0xff]   ;;  %v8578_v32 = vld [vmem:[%s11187_s1 + $0x1844] ss:$16 sps:$4 sm:$0xff]  }
 0x2cb   :  { %5380 = vmatpush1.bf16.msra.mxu0 %v8477_v33  ;;  %5939 = vmatpush1.bf16.msra.mxu1 %v8480_v34  ;;  %v8581_v33 = vld [vmem:[%s11187_s1 + $0x184c] ss:$16 sps:$4 sm:$0xff]   ;;  %v8621_v34 = vmov 0  }
 0x2cc   :  { %5381 = vmatprep.subr.bf16.mxu0 %v8485_v35  ;;  %5940 = vmatprep.subr.bf16.mxu1 %v8488_v36  ;;  %v8576_v35 = vld [vmem:[%s11187_s1 + $0x1840] ss:$16 sps:$4 sm:$0xff]   ;;  %v8579_v36 = vld [vmem:[%s11187_s1 + $0x1848] ss:$16 sps:$4 sm:$0xff]  }
 0x2cf   :  { %5382 = vmatpush1.bf16.msra.mxu0 %v8483_v37  ;;  %5941 = vmatpush1.bf16.msra.mxu1 %v8486_v38  ;;  %v8584_v37 = vld [vmem:[%s11187_s1 + $0x1864] ss:$16 sps:$4 sm:$0xff]   ;;  %v8587_v38 = vld [vmem:[%s11187_s1 + $0x186c] ss:$16 sps:$4 sm:$0xff]  }
 0x2d0   :  { %5383 = vmatprep.subr.bf16.mxu0 %v8491_v39  ;;  %5942 = vmatprep.subr.bf16.mxu1 %v8494_v40  ;;  %v8582_v39 = vld [vmem:[%s11187_s1 + $0x1860] ss:$16 sps:$4 sm:$0xff]   ;;  %v8585_v40 = vld [vmem:[%s11187_s1 + $0x1868] ss:$16 sps:$4 sm:$0xff]  }
 0x2d3   :  { %5384 = vmatpush1.bf16.msra.mxu0 %v8489_v41  ;;  %5943 = vmatpush1.bf16.msra.mxu1 %v8492_v42  ;;  %v8589_v41 = vld [vmem:[%s11189_s3 + $0x40] sm:$0xff]  }
 0x2d4   :  { %5385 = vmatprep.subr.bf16.mxu0 %v8497_v43  ;;  %5944 = vmatprep.subr.bf16.mxu1 %v8500_v44  ;;  %v8590_v42 = vld [vmem:[%s11189_s3 + $0xc0] sm:$0xff]  }
 0x2d5   :  { %v8588_v43 = vld [vmem:[%s11188_s0 + $0x60] ss:$100 sps:$4 sm:$0xff]  }
 0x2d6   :  { %v8591_v44 = vld [vmem:[%s11189_s3] sm:$0xff]  }
 0x2d7   :  { %5386 = vmatpush1.bf16.msra.mxu0 %v8495_v45  ;;  %5945 = vmatpush1.bf16.msra.mxu1 %v8498_v46  ;;  %v8592_v45 = vld [vmem:[%s11189_s3 + $0x80] sm:$0xff]   ;;  %v8593_v46 = vld [vmem:[%s11189_s3 + $0x48] sm:$0xff]  }
 0x2d8   :  { %5387 = vmatprep.subr.bf16.mxu0 %v8503_v47  ;;  %5946 = vmatprep.subr.bf16.mxu1 %v8506_v48  ;;  %v8594_v47 = vld [vmem:[%s11189_s3 + $0xc8] sm:$0xff]  }
 0x2d9   :  { %v8595_v48 = vld [vmem:[%s11189_s3 + $0x8] sm:$0xff]  }
 0x2db   :  { %5388 = vmatpush1.bf16.msra.mxu0 %v8501_v49  ;;  %5947 = vmatpush1.bf16.msra.mxu1 %v8504_v50  ;;  %v8596_v49 = vld [vmem:[%s11189_s3 + $0x88] sm:$0xff]   ;;  %v8597_v50 = vld [vmem:[%s11189_s3 + $0x50] sm:$0xff]  }
 0x2dc   :  { %5389 = vmatprep.subr.bf16.mxu0 %v8509_v51  ;;  %5948 = vmatprep.subr.bf16.mxu1 %v8512_v52  ;;  %v8598_v51 = vld [vmem:[%s11189_s3 + $0xd0] sm:$0xff]  }
 0x2dd   :  { %v8599_v52 = vld [vmem:[%s11189_s3 + $0x10] sm:$0xff]  }
 0x2df   :  { %5390 = vmatpush1.bf16.msra.mxu0 %v8507_v53  ;;  %5949 = vmatpush1.bf16.msra.mxu1 %v8510_v54  ;;  %v8600_v53 = vld [vmem:[%s11189_s3 + $0x90] sm:$0xff]   ;;  %v8601_v54 = vld [vmem:[%s11189_s3 + $0x58] sm:$0xff]  }
 0x2e0   :  { %5391 = vmatprep.subr.bf16.mxu0 %v8515_v55  ;;  %5950 = vmatprep.subr.bf16.mxu1 %v8518_v56  ;;  %v8602_v55 = vld [vmem:[%s11189_s3 + $0xd8] sm:$0xff]  }
 0x2e1   :  { %v8603_v56 = vld [vmem:[%s11189_s3 + $0x18] sm:$0xff]  }
 0x2e3   :  { %5392 = vmatpush1.bf16.msra.mxu0 %v8513_v57  ;;  %5951 = vmatpush1.bf16.msra.mxu1 %v8516_v58  ;;  %v8604_v57 = vld [vmem:[%s11189_s3 + $0x98] sm:$0xff]   ;;  %v8605_v58 = vld [vmem:[%s11189_s3 + $0x60] sm:$0xff]  }
 0x2e4   :  { %5393 = vmatprep.subr.bf16.mxu0 %v8521_v59  ;;  %5952 = vmatprep.subr.bf16.mxu1 %v8524_v60  ;;  %v8606_v59 = vld [vmem:[%s11189_s3 + $0xe0] sm:$0xff]  }
 0x2e5   :  { %v8607_v60 = vld [vmem:[%s11189_s3 + $0x20] sm:$0xff]  }
 0x2e7   :  { %5394 = vmatpush1.bf16.msra.mxu0 %v8519_v61  ;;  %5953 = vmatpush1.bf16.msra.mxu1 %v8522_v62  ;;  %v8608_v61 = vld [vmem:[%s11189_s3 + $0xa0] sm:$0xff]   ;;  %v8609_v62 = vld [vmem:[%s11189_s3 + $0x68] sm:$0xff]  }
 0x2e8   :  { %5395 = vmatprep.subr.bf16.mxu0 %v8527_v63  ;;  %5954 = vmatprep.subr.bf16.mxu1 %v8530_v0  ;;  %v8610_v63 = vld [vmem:[%s11189_s3 + $0xe8] sm:$0xff]  }
 0x2e9   :  { %v8611_v0 = vld [vmem:[%s11189_s3 + $0x28] sm:$0xff]  }
 0x2eb   :  { %5396 = vmatpush1.bf16.msra.mxu0 %v8525_v1  ;;  %5955 = vmatpush1.bf16.msra.mxu1 %v8528_v2  ;;  %v8612_v1 = vld [vmem:[%s11189_s3 + $0xa8] sm:$0xff]   ;;  %v8613_v2 = vld [vmem:[%s11189_s3 + $0x70] sm:$0xff]  }
 0x2ec   :  { %5397 = vmatprep.subr.bf16.mxu0 %v8533_v3  ;;  %5956 = vmatprep.subr.bf16.mxu1 %v8536_v4  ;;  %v8614_v3 = vld [vmem:[%s11189_s3 + $0xf0] sm:$0xff]  }
 0x2ed   :  { %v8615_v4 = vld [vmem:[%s11189_s3 + $0x30] sm:$0xff]  }
 0x2ef   :  { %5398 = vmatpush1.bf16.msra.mxu0 %v8531_v5  ;;  %5957 = vmatpush1.bf16.msra.mxu1 %v8534_v6  ;;  %v8616_v5 = vld [vmem:[%s11189_s3 + $0xb0] sm:$0xff]   ;;  %v8617_v6 = vld [vmem:[%s11189_s3 + $0x78] sm:$0xff]  }
 0x2f0   :  { %5399 = vmatprep.subr.bf16.mxu0 %v8539_v7  ;;  %5958 = vmatprep.subr.bf16.mxu1 %v8542_v8  ;;  %v8618_v7 = vld [vmem:[%s11189_s3 + $0xf8] sm:$0xff]  }
 0x2f1   :  { %v8619_v8 = vld [vmem:[%s11189_s3 + $0x38] sm:$0xff]  }
 0x2f3   :  { %5400 = vmatpush1.bf16.msra.mxu0 %v8537_v9  ;;  %5959 = vmatpush1.bf16.msra.mxu1 %v8540_v10  ;;  %v8620_v9 = vld [vmem:[%s11189_s3 + $0xb8] sm:$0xff]   ;;  %v833_v10 = vlaneseq }
 0x2f4   :  { %5401 = vmatprep.subr.bf16.mxu0 %v8545_v11  ;;  %5960 = vmatprep.subr.bf16.mxu1 %v8548_v12 }
 0x2f5   :  { %v834_v11 = vshrl.u32 %v833_v10, 7 }
 0x2f7   :  { %5402 = vmatpush1.bf16.msra.mxu0 %v8543_v13  ;;  %5961 = vmatpush1.bf16.msra.mxu1 %v8546_v14  ;;  %v835_v12 = vsub.s32 0, %v834_v11  ;;  %v843_v13 = vsub.s32 2, %v834_v11  ;;  %v831_v14 = vld [vmem:[%s11190_s2] sm:$0xf] }
 0x2f8   :  { %5403 = vmatprep.subr.bf16.mxu0 %v8551_v15  ;;  %5962 = vmatprep.subr.bf16.mxu1 %v8554_v16  ;;  %v839_v15 = vsub.s32 1, %v834_v11  ;;  %v847_v16 = vsub.s32 3, %v834_v11 }
 0x2fb   :  { %5404 = vmatpush1.bf16.msra.mxu0 %v8549_v17  ;;  %5963 = vmatpush1.bf16.msra.mxu1 %v8552_v18  ;;  %v836_v17 = vrot.slane %v831_v14, %v835_v12  ;;  %v844_v18 = vrot.slane %v831_v14, %v843_v13 }
 0x2fc   :  { %5405 = vmatprep.subr.bf16.mxu0 %v8557_v19  ;;  %5964 = vmatprep.subr.bf16.mxu1 %v8560_v20  ;;  %v840_v19 = vrot.slane %v831_v14, %v839_v15  ;;  %v848_v20 = vrot.slane %v831_v14, %v847_v16 }
 0x2ff   :  { %5406 = vmatpush1.bf16.msra.mxu0 %v8555_v21  ;;  %5965 = vmatpush1.bf16.msra.mxu1 %v8558_v22 }
 0x300   :  { %5418 = vmatprep.subr.bf16.mxu0 %v8566_v23  ;;  %5977 = vmatprep.subr.bf16.mxu1 %v8569_v24 }
 0x302   :  { %5408 = vmatmul.mubr.bf16.vlgmr.msra.gmra.mrb[0].mxu0 %v8561_v25  ;;  %5967 = vmatmul.mubr.bf16.vlgmr.msra.gmra.mrb[0].mxu1 %v8561_v25 }
 0x303   :  { %5419 = vmatpush1.bf16.msra.mxu0 %v8564_v26  ;;  %5978 = vmatpush1.bf16.msra.mxu1 %v8567_v27 }
 0x304   :  { %5420 = vmatprep.subr.bf16.mxu0 %v8572_v28  ;;  %5979 = vmatprep.subr.bf16.mxu1 %v8575_v29 }
 0x305   :  { %5450 = vmatprep.mubr.bf16.mxu0 %v8621_v34  ;;  %6009 = vmatprep.mubr.bf16.mxu1 %v8621_v34 }
 0x307   :  { %5421 = vmatpush1.bf16.msra.mxu0 %v8570_v30  ;;  %5980 = vmatpush1.bf16.msra.mxu1 %v8573_v31 }
 0x308   :  { %5422 = vmatprep.subr.bf16.mxu0 %v8578_v32  ;;  %5981 = vmatprep.subr.bf16.mxu1 %v8581_v33 }
 0x30b   :  { %5423 = vmatpush1.bf16.msra.mxu0 %v8576_v35  ;;  %5982 = vmatpush1.bf16.msra.mxu1 %v8579_v36 }
 0x30c   :  { %5424 = vmatprep.subr.bf16.mxu0 %v8584_v37  ;;  %5983 = vmatprep.subr.bf16.mxu1 %v8587_v38 }
 0x30f   :  { %5425 = vmatpush1.bf16.msra.mxu0 %v8582_v39  ;;  %5984 = vmatpush1.bf16.msra.mxu1 %v8585_v40 }
 0x310   :  { %7227 = vmatprep.subr.bf16.mxu0 %v8589_v41  ;;  %7249 = vmatprep.subr.bf16.mxu1 %v8590_v42 }
 0x312   :  { %7192 = vmatmul.mubr.msk.bf16.vlgmr.msra.gmra.mrb[0].mxu0 %vm4898_vm0, %v8588_v43  ;;  %7193 = vmatmul.mubr.msk.bf16.vlgmr.msra.gmra.mrb[0].mxu1 %vm4898_vm0, %v8588_v43 }
 0x313   :  { %7228 = vmatpush3.bf16.msra.mxu0 %v8591_v44  ;;  %7250 = vmatpush3.bf16.msra.mxu1 %v8592_v45 }
 0x314   :  { %7229 = vmatprep.subr.bf16.mxu0 %v8593_v46  ;;  %7251 = vmatprep.subr.bf16.mxu1 %v8594_v47 }
 0x317   :  { %7230 = vmatpush3.bf16.msra.mxu0 %v8595_v48  ;;  %7252 = vmatpush3.bf16.msra.mxu1 %v8596_v49 }
 0x318   :  { %7231 = vmatprep.subr.bf16.mxu0 %v8597_v50  ;;  %7253 = vmatprep.subr.bf16.mxu1 %v8598_v51  ;;  %v7194_v51 = vld [vmem:[%s11191_s4] ss:$0 sm:$0xff] }
 0x31b   :  { %7232 = vmatpush3.bf16.msra.mxu0 %v8599_v52  ;;  %7254 = vmatpush3.bf16.msra.mxu1 %v8600_v53 }
 0x31c   :  { %7233 = vmatprep.subr.bf16.mxu0 %v8601_v54  ;;  %7255 = vmatprep.subr.bf16.mxu1 %v8602_v55 }
 0x31f   :  { %7234 = vmatpush3.bf16.msra.mxu0 %v8603_v56  ;;  %7256 = vmatpush3.bf16.msra.mxu1 %v8604_v57 }
 0x320   :  { %7235 = vmatprep.subr.bf16.mxu0 %v8605_v58  ;;  %7257 = vmatprep.subr.bf16.mxu1 %v8606_v59 }
 0x323   :  { %7236 = vmatpush3.bf16.msra.mxu0 %v8607_v60  ;;  %7258 = vmatpush3.bf16.msra.mxu1 %v8608_v61 }
 0x324   :  { %7237 = vmatprep.subr.bf16.mxu0 %v8609_v62  ;;  %7259 = vmatprep.subr.bf16.mxu1 %v8610_v63 }
 0x327   :  { %7238 = vmatpush3.bf16.msra.mxu0 %v8611_v0  ;;  %7260 = vmatpush3.bf16.msra.mxu1 %v8612_v1 }
 0x328   :  { %7239 = vmatprep.subr.bf16.mxu0 %v8613_v2  ;;  %7261 = vmatprep.subr.bf16.mxu1 %v8614_v3 }
 0x32b   :  { %7240 = vmatpush3.bf16.msra.mxu0 %v8615_v4  ;;  %7262 = vmatpush3.bf16.msra.mxu1 %v8616_v5 }
 0x32c   :  { %7241 = vmatprep.subr.bf16.mxu0 %v8617_v6  ;;  %7263 = vmatprep.subr.bf16.mxu1 %v8618_v7 }
 0x32f   :  { %7242 = vmatpush3.bf16.msra.mxu0 %v8619_v8  ;;  %7264 = vmatpush3.bf16.msra.mxu1 %v8620_v9 }
 0x3e5   :  { %v5452_v21 = vpop.f32.mrb[0].mxu0  ;;  %v6011_v22 = vpop.f32.mrb[0].mxu1 }
 0x3e6   :  { %v7271_v23 = vadd.f32 %v5452_v21, %v836_v17  ;;  %v7275_v24 = vadd.f32 %v6011_v22, %v844_v18  ;;  %v5454_v25 = vpop.f32.mrb[1].mxu0  ;;  %v6013_v26 = vpop.f32.mrb[1].mxu1 }
 0x3e7   :  { %v7272_v27 = vadd.f32 %v5454_v25, %v840_v19  ;;  %v7276_v28 = vadd.f32 %v6013_v26, %v848_v20  ;;  %v5456_v29 = vpop.f32.mrb[2].mxu0  ;;  %v6015_v30 = vpop.f32.mrb[2].mxu1 }
 0x3e8   :  { %v7273_v31 = vadd.f32 %v5456_v29, %v836_v17  ;;  %v7277_v32 = vadd.f32 %v6015_v30, %v844_v18  ;;  %v5458_v33 = vpop.f32.mrb[3].mxu0  ;;  %v6017_v34 = vpop.f32.mrb[3].mxu1  ;;  %v6020_v37 = vmax.f32 %v7271_v23, 0.0  ;;  %v6022_v38 = vmax.f32 %v7275_v24, 0.0 }
 0x3e9   :  { %v7274_v35 = vadd.f32 %v5458_v33, %v840_v19  ;;  %v7278_v36 = vadd.f32 %v6017_v34, %v848_v20  ;;  %v6021_v41 = vmax.f32 %v7272_v27, 0.0  ;;  %v6023_v42 = vmax.f32 %v7276_v28, 0.0 }
 0x3ea   :  { %v6024_v39 = vmax.f32 %v7273_v31, 0.0  ;;  %v6026_v40 = vmax.f32 %v7277_v32, 0.0 }
 0x3eb   :  { %v6025_v43 = vmax.f32 %v7274_v35, 0.0  ;;  %v6027_v44 = vmax.f32 %v7278_v36, 0.0 }
 0x3ec   :  { %v6028_v45 = vpack.c.bf16 %v6024_v39, %v6020_v37  ;;  %v6030_v46 = vpack.c.bf16 %v6026_v40, %v6022_v38 }
 0x3ed   :  { %v6029_v47 = vpack.c.bf16 %v6025_v43, %v6021_v41  ;;  %v6031_v48 = vpack.c.bf16 %v6027_v44, %v6023_v42 }
 0x3ef   :  { %6327 = vmatprep.mubr.bf16.mxu0 %v6029_v47  ;;  %6368 = vmatprep.mubr.bf16.mxu1 %v6031_v48 }
 0x3f0   :  { %6328 = vmatmul.mubr.bf16.vlgmr.msra.gmra.mrb[4].mxu0 %v6028_v45  ;;  %6369 = vmatmul.mubr.bf16.vlgmr.msra.gmra.mrb[4].mxu1 %v6030_v46 }
 0x4c3   :  { %v7243_v49 = vpop.f32.mrb[4].mxu0  ;;  %v7265_v50 = vpop.f32.mrb[4].mxu1 }
 0x4c4   :  { %v7244_v52 = vpop.f32.mrb[5].mxu0  ;;  %v7266_v53 = vpop.f32.mrb[5].mxu1 }
 0x4c5   :  { %v7245_v54 = vadd.f32 %v7244_v52, %v7243_v49  ;;  %v7267_v55 = vadd.f32 %v7266_v53, %v7265_v50  ;;  %v7246_v56 = vpop.f32.mrb[6].mxu0  ;;  %v7268_v57 = vpop.f32.mrb[6].mxu1 }
 0x4c6   :  { %v7247_v58 = vpop.f32.mrb[7].mxu0  ;;  %v7269_v59 = vpop.f32.mrb[7].mxu1 }
 0x4c7   :  { %v6330_v60 = vadd.f32 %v7245_v54, %v7194_v51  ;;  %v7248_v61 = vadd.f32 %v7247_v58, %v7246_v56  ;;  %v7270_v62 = vadd.f32 %v7269_v59, %v7268_v57 }
 0x4c9   :  { %v6371_v63 = vadd.f32 %v7267_v55, %v6330_v60  ;;  %v6333_v0 = vadd.f32 %v7248_v61, %v7194_v51 }
 0x4cb   :  { %6377 = vst [vmem:[%s11192_s5] sm:$0xff] %v6371_v63  ;;  %v6374_v1 = vadd.f32 %v7270_v62, %v6333_v0 }
 0x4cd   :  { %6378 = vst [vmem:[%s11192_s5 + $0x8] sm:$0xff] %v6374_v1 }

</bundles_post_ra>
